<compile_context>
chip_gen: v7x
topology: tpu7x:2x2x1
jax: 0.10.0
libtpu: 0.0.40
codegen_flags: <defaults>
</compile_context>

<pallas_src>
import functools

import jax
import jax.numpy as jnp
from jax.experimental import pallas as pl
from jax.experimental.pallas import tpu as pltpu


CPAD = 128  # lane-dense channel padding used for every activation / conv OUTPUT


# ----------------------------------------------------------------------------
# Pallas kernels
# ----------------------------------------------------------------------------
def _conv_bn_kernel(p_ref, w_ref, shift_ref, o_ref, *, do_relu):
    """(tm, K) x (K, 128) matmul; BN scale is pre-folded into W, so epilogue = +shift (+ReLU)."""
    acc = jnp.dot(p_ref[...], w_ref[...], preferred_element_type=jnp.float32)
    y = acc + shift_ref[...]
    if do_relu:
        y = jnp.maximum(y, 0.0)
    o_ref[...] = y.astype(o_ref.dtype)


def _conv_bn_res_kernel(p_ref, w_ref, shift_ref, res_ref, o_ref):
    """Same as above but fuses residual add + ReLU (BasicBlock tail)."""
    acc = jnp.dot(p_ref[...], w_ref[...], preferred_element_type=jnp.float32)
    y = acc + shift_ref[...] + res_ref[...].astype(jnp.float32)
    o_ref[...] = jnp.maximum(y, 0.0).astype(o_ref.dtype)


def _maxpool_kernel(p_ref, o_ref):
    # p_ref: (9, tm, C) shifted windows; reduce max over the (major) window axis.
    o_ref[...] = jnp.max(p_ref[...], axis=0)


def _avgpool_kernel(x_ref, o_ref):
    # x_ref: (N, 16, C) bf16 -> f32 mean over the 4x4 spatial window.
    o_ref[...] = jnp.mean(x_ref[...].astype(jnp.float32), axis=1)


# ----------------------------------------------------------------------------
# Tiling / glue helpers
# ----------------------------------------------------------------------------
def _pick_tm(m):
    """Row-tile size.

    * m <= 512: single resident tile (grid=1) — cheapest on 1-TC v5e/v6e, and the
      work is too small to matter on v7x.
    * larger m: aim for >= 8 grid steps (>= 4 per TensorCore on dual-TC v7x) so the
      input DMA pipelines, with tm a multiple of 16 sublanes (bf16 stores), cap 1024.
    """
    if m <= 512:
        return m
    tm = 1024
    while tm > 16 and (m % tm != 0 or m // tm < 8):
        tm //= 2
    return tm


def _im2col(x, cin, kh, kw, stride, padding, hout, wout):
    """Plain-JAX glue: (N,H,W,Cpad) -> (N*Hout*Wout, kh*kw*cin) bf16 patches.

    Only the `cin` REAL channels enter the contraction (padding lanes are dropped),
    and the taps are folded into K so each conv is a single matmul per M-tile.
    """
    n = x.shape[0]
    x = x[..., :cin]
    if padding:
        x = jnp.pad(x, ((0, 0), (padding, padding), (padding, padding), (0, 0)))
    cols = []
    for i in range(kh):
        for j in range(kw):
            sl = x[:,
                   i:i + (hout - 1) * stride + 1:stride,
                   j:j + (wout - 1) * stride + 1:stride, :]
            cols.append(sl)
    pat = cols[0] if len(cols) == 1 else jnp.concatenate(cols, axis=-1)
    return pat.reshape(n * hout * wout, kh * kw * cin)


# ----------------------------------------------------------------------------
# Conv + folded BN (+ residual) (+ ReLU)
# ----------------------------------------------------------------------------
def conv_bn(x, wmat, shift, *, kh, kw, stride, padding, do_relu, residual=None):
    """Conv2d (no bias) + folded BatchNorm [+ residual] [+ ReLU].

    x: (N,H,W,C*) bf16 NHWC (C* may be lane-padded); wmat: (kh*kw*cin_real, CPAD) bf16
    with BN scale folded in; shift: (1, CPAD) f32.  Output: (N,Hout,Wout,CPAD) bf16.
    """
    n, h, w, _ = x.shape
    cout = wmat.shape[1]                      # == CPAD
    cin = wmat.shape[0] // (kh * kw)          # real input channels
    hout = (h + 2 * padding - kh) // stride + 1
    wout = (w + 2 * padding - kw) // stride + 1
    m = n * hout * wout
    k = kh * kw * cin
    assert wmat.shape[0] == k, (wmat.shape, k)

    patches = _im2col(x, cin, kh, kw, stride, padding, hout, wout)

    tm = _pick_tm(m)
    grid = (pl.cdiv(m, tm),)

    in_specs = [
        pl.BlockSpec((tm, k), lambda i: (i, 0)),       # patch rows (bf16)
        pl.BlockSpec((k, cout), lambda i: (0, 0)),     # whole weight, resident
        pl.BlockSpec((1, cout), lambda i: (0, 0)),     # BN shift (f32)
    ]
    args = [patches, wmat, shift]

    if residual is not None:
        res2 = residual.reshape(m, cout)               # bf16
        in_specs.append(pl.BlockSpec((tm, cout), lambda i: (i, 0)))
        args.append(res2)
        kernel = _conv_bn_res_kernel
    else:
        kernel = functools.partial(_conv_bn_kernel, do_relu=do_relu)

    out = pl.pallas_call(
        kernel,
        out_shape=jax.ShapeDtypeStruct((m, cout), jnp.bfloat16),
        grid=grid,
        in_specs=in_specs,
        out_specs=pl.BlockSpec((tm, cout), lambda i: (i, 0)),
        compiler_params=pltpu.CompilerParams(
            dimension_semantics=("parallel",)),
    )(*args)
    return out.reshape(n, hout, wout, cout)


# ----------------------------------------------------------------------------
# Pooling
# ----------------------------------------------------------------------------
def maxpool_3x3_s2_p1(x):
    """MaxPool2d(kernel=3, stride=2, padding=1), NHWC bf16, tiled over M."""
    # TODO(synk): fuse into the stem conv epilogue / use in-kernel halo tiling to
    #             avoid the (9, M, C) window stack in HBM.
    n, h, w, c = x.shape
    hout = (h + 2 - 3) // 2 + 1
    wout = (w + 2 - 3) // 2 + 1
    xp = jnp.pad(x, ((0, 0), (1, 1), (1, 1), (0, 0)), constant_values=-jnp.inf)
    wins = []
    for i in range(3):
        for j in range(3):
            sl = xp[:,
                    i:i + (hout - 1) * 2 + 1:2,
                    j:j + (wout - 1) * 2 + 1:2, :]
            wins.append(sl.reshape(n * hout * wout, c))
    patches = jnp.stack(wins, axis=0)                     # (9, M, C) bf16
    m = n * hout * wout
    tm = _pick_tm(m)
    out = pl.pallas_call(
        _maxpool_kernel,
        out_shape=jax.ShapeDtypeStruct((m, c), jnp.bfloat16),
        grid=(pl.cdiv(m, tm),),
        in_specs=[pl.BlockSpec((9, tm, c), lambda i: (0, i, 0))],
        out_specs=pl.BlockSpec((tm, c), lambda i: (i, 0)),
        compiler_params=pltpu.CompilerParams(
            dimension_semantics=("parallel",)),
    )(patches)
    return out.reshape(n, hout, wout, c)


def avgpool_4(x):
    """avg_pool2d(out, 4) for the final 4x4 feature map (global average), f32 out."""
    n, h, w, c = x.shape
    assert h == 4 and w == 4, "final feature map must be 4x4 for avg_pool2d(., 4)"
    xr = x.reshape(n, h * w, c)
    return pl.pallas_call(
        _avgpool_kernel,
        out_shape=jax.ShapeDtypeStruct((n, c), jnp.float32),
        grid=(1,),
        in_specs=[pl.BlockSpec((n, h * w, c), lambda i: (0, 0, 0))],
        out_specs=pl.BlockSpec((n, c), lambda i: (0, 0)),
    )(xr)


# ----------------------------------------------------------------------------
# Deterministic parameter construction (shapes follow nn.Module.__init__)
# ----------------------------------------------------------------------------
class _KeyGen:
    def __init__(self, key):
        self._key = key

    def __call__(self):
        self._key, sub = jax.random.split(self._key)
        return sub


def _bn_fold(kg, c, eps=1e-5):
    """Eval-mode BatchNorm folded to (scale, shift)."""
    gamma = 1.0 + 0.1 * jax.random.normal(kg(), (c,), jnp.float32)
    beta = 0.05 * jax.random.normal(kg(), (c,), jnp.float32)
    mean = 0.05 * jax.random.normal(kg(), (c,), jnp.float32)
    var = jax.random.uniform(kg(), (c,), jnp.float32, 0.5, 1.5)
    scale = gamma / jnp.sqrt(var + eps)
    shift = beta - mean * scale
    return scale, shift


def _prep_conv_bn(kg, kh, kw, cin, cout):
    """Conv weight with BN scale folded in -> ((kh*kw*cin, CPAD) bf16, (1, CPAD) f32 shift).

    Only the REAL cin enters K; output columns are zero-padded to CPAD lanes and the
    shift is zero in the pad region, so padding channels stay exactly zero everywhere.
    """
    w = 0.05 * jax.random.normal(kg(), (kh, kw, cin, cout), jnp.float32)
    scale, shift = _bn_fold(kg, cout)
    wf = w * scale.reshape(1, 1, 1, cout)
    wp = jnp.zeros((kh, kw, cin, CPAD), jnp.float32).at[..., :cout].set(wf)
    wmat = wp.reshape(kh * kw * cin, CPAD).astype(jnp.bfloat16)
    shift_p = jnp.zeros((1, CPAD), jnp.float32).at[0, :cout].set(shift)
    return wmat, shift_p


def init_params(key, *, nf=8, num_blocks=(2, 2, 2, 2), input_channels=3):
    """Returns (params, config): params = arrays only (jit pytree), config = static ints/bools."""
    kg = _KeyGen(key)
    params = {}
    params["conv1_w"], params["conv1_shift"] = _prep_conv_bn(
        kg, 7, 7, input_channels, nf)

    layer_params = []
    layer_cfg = []
    in_planes = nf
    for layer_idx, (planes_mult, first_stride) in enumerate(
            zip((1, 2, 4, 8), (1, 2, 2, 2))):
        planes = nf * planes_mult
        strides = [first_stride] + [1] * (num_blocks[layer_idx] - 1)
        blocks_p, blocks_c = [], []
        for stride in strides:
            blk = {}
            blk["conv1_w"], blk["conv1_shift"] = _prep_conv_bn(
                kg, 3, 3, in_planes, planes)
            blk["conv2_w"], blk["conv2_shift"] = _prep_conv_bn(
                kg, 3, 3, planes, planes)
            has_sc = (stride != 1 or in_planes != planes)   # BasicBlock.expansion == 1
            if has_sc:
                blk["sc_w"], blk["sc_shift"] = _prep_conv_bn(
                    kg, 1, 1, in_planes, planes)
            blocks_p.append(blk)
            blocks_c.append({"stride": stride, "has_sc": has_sc})
            in_planes = planes
        layer_params.append(blocks_p)
        layer_cfg.append(blocks_c)
    params["layers"] = layer_params
    config = {"blocks": layer_cfg, "feat_dim": in_planes}
    # TODO(synk): nn.Linear(dim_in, num_classes) exists in __init__ but forward()
    # returns features only, so the linear head is intentionally not implemented.
    return params, config


# ----------------------------------------------------------------------------
# Forward pass (== ImageNet_ResNet.forward -> features)
# ----------------------------------------------------------------------------
def resnet_features(config, params, x_nchw):
    x = jnp.transpose(x_nchw, (0, 2, 3, 1)).astype(jnp.bfloat16)   # NCHW -> NHWC bf16

    # relu(bn1(conv1(x)))  then maxpool
    x = conv_bn(x, params["conv1_w"], params["conv1_shift"],
                kh=7, kw=7, stride=2, padding=3, do_relu=True)
    x = maxpool_3x3_s2_p1(x)

    # layer1..layer4 (BasicBlock)
    for blocks_cfg, blocks_p in zip(config["blocks"], params["layers"]):
        for blk_cfg, blk in zip(blocks_cfg, blocks_p):
            stride = blk_cfg["stride"]           # static Python int (not traced)
            if blk_cfg["has_sc"]:
                sc = conv_bn(x, blk["sc_w"], blk["sc_shift"],
                             kh=1, kw=1, stride=stride, padding=0, do_relu=False)
            else:
                sc = x
            h = conv_bn(x, blk["conv1_w"], blk["conv1_shift"],
                        kh=3, kw=3, stride=stride, padding=1, do_relu=True)
            x = conv_bn(h, blk["conv2_w"], blk["conv2_shift"],
                        kh=3, kw=3, stride=1, padding=1, do_relu=False, residual=sc)

    x = avgpool_4(x)                              # (N, CPAD) f32
    return x[:, :config["feat_dim"]]              # drop padding channels -> out.view(N, -1)


# ----------------------------------------------------------------------------
# Main
# ----------------------------------------------------------------------------
if __name__ == "__main__":
    key = jax.random.PRNGKey(0)
    pkey, xkey = jax.random.split(key)

    # Small config: ResNet-18 topology, nf=8, input 2x3x128x128 so the final
    # feature map is 4x4 (required by avg_pool2d(out, 4)); feat_dim == nf*8 == 64.
    params, config = init_params(pkey, nf=8, num_blocks=(2, 2, 2, 2),
                                 input_channels=3)
    x = jax.random.normal(xkey, (2, 3, 128, 128), jnp.float32)

    fwd = jax.jit(functools.partial(resnet_features, config))
    feats = jax.block_until_ready(fwd(params, x))

    assert feats.shape == (2, 64), feats.shape
    assert bool(jnp.all(jnp.isfinite(feats)))
    print("KERNEL_OK")
</pallas_src>

<mosaic_0001>
module attributes {stable_mosaic.version = 11 : i64} {
  func.func @_conv_bn_kernel(%arg0: i32, %arg1: memref<1024x147xbf16, #tpu.memory_space<vmem>>, %arg2: memref<147x128xbf16, #tpu.memory_space<vmem>>, %arg3: memref<1x128xf32, #tpu.memory_space<vmem>>, %arg4: memref<1024x128xbf16, #tpu.memory_space<vmem>>) attributes {dimension_semantics = [#tpu.dimension_semantics<parallel>], iteration_bounds = array<i64: 8>, scalar_prefetch = 0 : i64, scratch_operands = 0 : i64, tpu.core_type = #tpu.core_type<tc>, window_params = [{transform_indices = @transform_0, window_bounds = array<i64: 1024, 147>}, {pipeline_mode = #tpu.pipeline_mode<synchronous>, transform_indices = @transform_1, window_bounds = array<i64: 147, 128>}, {pipeline_mode = #tpu.pipeline_mode<synchronous>, transform_indices = @transform_2, window_bounds = array<i64: 1, 128>}, {transform_indices = @transform_3, window_bounds = array<i64: 1024, 128>}]} {
    %c0 = arith.constant 0 : index
    %c0_0 = arith.constant 0 : index
    %0 = vector.load %arg1[%c0, %c0_0] : memref<1024x147xbf16, #tpu.memory_space<vmem>>, vector<1024x147xbf16>
    %c0_1 = arith.constant 0 : index
    %c0_2 = arith.constant 0 : index
    %1 = vector.load %arg2[%c0_1, %c0_2] : memref<147x128xbf16, #tpu.memory_space<vmem>>, vector<147x128xbf16>
    %cst = arith.constant dense<0.000000e+00> : vector<1024x128xf32>
    %2 = tpu.matmul %0, %1, %cst {dimension_numbers = #tpu.dot_dimension_numbers<[1], [0], [0], [1], [0, 0, 1, 1], [], []>} : vector<1024x147xbf16>, vector<147x128xbf16>, vector<1024x128xf32> -> vector<1024x128xf32>
    %c0_3 = arith.constant 0 : index
    %c0_4 = arith.constant 0 : index
    %3 = vector.load %arg3[%c0_3, %c0_4] : memref<1x128xf32, #tpu.memory_space<vmem>>, vector<1x128xf32>
    %4 = vector.broadcast %3 : vector<1x128xf32> to vector<1024x128xf32>
    %5 = arith.addf %2, %4 : vector<1024x128xf32>
    %cst_5 = arith.constant 0.000000e+00 : f32
    %6 = vector.broadcast %cst_5 : f32 to vector<1024x128xf32>
    %7 = arith.maximumf %5, %6 : vector<1024x128xf32>
    %8 = arith.truncf %7 : vector<1024x128xf32> to vector<1024x128xbf16>
    %c0_6 = arith.constant 0 : index
    %c0_7 = arith.constant 0 : index
    %9 = vector.load %arg4[%c0_6, %c0_7] : memref<1024x128xbf16, #tpu.memory_space<vmem>>, vector<1024x128xbf16>
    tpu.vector_store %arg4[%c0_6, %c0_7], %8 {strides = array<i32>} : memref<1024x128xbf16, #tpu.memory_space<vmem>>, vector<1024x128xbf16>,
    return
  }
  func.func @transform_0(%arg0: i32) -> (i32, i32) {
    %c0_i32 = arith.constant 0 : i32
    %c0_i32_0 = arith.constant 0 : i32
    return %arg0, %c0_i32 : i32, i32
  }
  func.func @transform_1(%arg0: i32) -> (i32, i32) {
    %c0_i32 = arith.constant 0 : i32
    %c0_i32_0 = arith.constant 0 : i32
    %c0_i32_1 = arith.constant 0 : i32
    return %c0_i32, %c0_i32_0 : i32, i32
  }
  func.func @transform_2(%arg0: i32) -> (i32, i32) {
    %c0_i32 = arith.constant 0 : i32
    %c0_i32_0 = arith.constant 0 : i32
    %c0_i32_1 = arith.constant 0 : i32
    return %c0_i32, %c0_i32_0 : i32, i32
  }
  func.func @transform_3(%arg0: i32) -> (i32, i32) {
    %c0_i32 = arith.constant 0 : i32
    %c0_i32_0 = arith.constant 0 : i32
    return %arg0, %c0_i32 : i32, i32
  }
}

module attributes {stable_mosaic.version = 11 : i64} {
  func.func @_maxpool_kernel(%arg0: i32, %arg1: memref<9x256x128xbf16, #tpu.memory_space<vmem>>, %arg2: memref<256x128xbf16, #tpu.memory_space<vmem>>) attributes {dimension_semantics = [#tpu.dimension_semantics<parallel>], iteration_bounds = array<i64: 8>, scalar_prefetch = 0 : i64, scratch_operands = 0 : i64, tpu.core_type = #tpu.core_type<tc>, window_params = [{transform_indices = @transform_0, window_bounds = array<i64: 9, 256, 128>}, {transform_indices = @transform_1, window_bounds = array<i64: 256, 128>}]} {
    %c0 = arith.constant 0 : index
    %c0_0 = arith.constant 0 : index
    %c0_1 = arith.constant 0 : index
    %0 = vector.load %arg1[%c0, %c0_0, %c0_1] : memref<9x256x128xbf16, #tpu.memory_space<vmem>>, vector<9x256x128xbf16>
    %cst = arith.constant dense<0xFF80> : vector<256x128xbf16>
    %1 = vector.multi_reduction <maximumf>, %0, %cst [0] : vector<9x256x128xbf16> to vector<256x128xbf16>
    %c0_2 = arith.constant 0 : index
    %c0_3 = arith.constant 0 : index
    %2 = vector.load %arg2[%c0_2, %c0_3] : memref<256x128xbf16, #tpu.memory_space<vmem>>, vector<256x128xbf16>
    tpu.vector_store %arg2[%c0_2, %c0_3], %1 {strides = array<i32>} : memref<256x128xbf16, #tpu.memory_space<vmem>>, vector<256x128xbf16>,
    return
  }
  func.func @transform_0(%arg0: i32) -> (i32, i32, i32) {
    %c0_i32 = arith.constant 0 : i32
    %c0_i32_0 = arith.constant 0 : i32
    %c0_i32_1 = arith.constant 0 : i32
    return %c0_i32, %arg0, %c0_i32_0 : i32, i32, i32
  }
  func.func @transform_1(%arg0: i32) -> (i32, i32) {
    %c0_i32 = arith.constant 0 : i32
    %c0_i32_0 = arith.constant 0 : i32
    return %arg0, %c0_i32 : i32, i32
  }
}

module attributes {stable_mosaic.version = 11 : i64} {
  func.func @_conv_bn_kernel(%arg0: i32, %arg1: memref<256x72xbf16, #tpu.memory_space<vmem>>, %arg2: memref<72x128xbf16, #tpu.memory_space<vmem>>, %arg3: memref<1x128xf32, #tpu.memory_space<vmem>>, %arg4: memref<256x128xbf16, #tpu.memory_space<vmem>>) attributes {dimension_semantics = [#tpu.dimension_semantics<parallel>], iteration_bounds = array<i64: 8>, scalar_prefetch = 0 : i64, scratch_operands = 0 : i64, tpu.core_type = #tpu.core_type<tc>, window_params = [{transform_indices = @transform_0, window_bounds = array<i64: 256, 72>}, {pipeline_mode = #tpu.pipeline_mode<synchronous>, transform_indices = @transform_1, window_bounds = array<i64: 72, 128>}, {pipeline_mode = #tpu.pipeline_mode<synchronous>, transform_indices = @transform_2, window_bounds = array<i64: 1, 128>}, {transform_indices = @transform_3, window_bounds = array<i64: 256, 128>}]} {
    %c0 = arith.constant 0 : index
    %c0_0 = arith.constant 0 : index
    %0 = vector.load %arg1[%c0, %c0_0] : memref<256x72xbf16, #tpu.memory_space<vmem>>, vector<256x72xbf16>
    %c0_1 = arith.constant 0 : index
    %c0_2 = arith.constant 0 : index
    %1 = vector.load %arg2[%c0_1, %c0_2] : memref<72x128xbf16, #tpu.memory_space<vmem>>, vector<72x128xbf16>
    %cst = arith.constant dense<0.000000e+00> : vector<256x128xf32>
    %2 = tpu.matmul %0, %1, %cst {dimension_numbers = #tpu.dot_dimension_numbers<[1], [0], [0], [1], [0, 0, 1, 1], [], []>} : vector<256x72xbf16>, vector<72x128xbf16>, vector<256x128xf32> -> vector<256x128xf32>
    %c0_3 = arith.constant 0 : index
    %c0_4 = arith.constant 0 : index
    %3 = vector.load %arg3[%c0_3, %c0_4] : memref<1x128xf32, #tpu.memory_space<vmem>>, vector<1x128xf32>
    %4 = vector.broadcast %3 : vector<1x128xf32> to vector<256x128xf32>
    %5 = arith.addf %2, %4 : vector<256x128xf32>
    %cst_5 = arith.constant 0.000000e+00 : f32
    %6 = vector.broadcast %cst_5 : f32 to vector<256x128xf32>
    %7 = arith.maximumf %5, %6 : vector<256x128xf32>
    %8 = arith.truncf %7 : vector<256x128xf32> to vector<256x128xbf16>
    %c0_6 = arith.constant 0 : index
    %c0_7 = arith.constant 0 : index
    %9 = vector.load %arg4[%c0_6, %c0_7] : memref<256x128xbf16, #tpu.memory_space<vmem>>, vector<256x128xbf16>
    tpu.vector_store %arg4[%c0_6, %c0_7], %8 {strides = array<i32>} : memref<256x128xbf16, #tpu.memory_space<vmem>>, vector<256x128xbf16>,
    return
  }
  func.func @transform_0(%arg0: i32) -> (i32, i32) {
    %c0_i32 = arith.constant 0 : i32
    %c0_i32_0 = arith.constant 0 : i32
    return %arg0, %c0_i32 : i32, i32
  }
  func.func @transform_1(%arg0: i32) -> (i32, i32) {
    %c0_i32 = arith.constant 0 : i32
    %c0_i32_0 = arith.constant 0 : i32
    %c0_i32_1 = arith.constant 0 : i32
    return %c0_i32, %c0_i32_0 : i32, i32
  }
  func.func @transform_2(%arg0: i32) -> (i32, i32) {
    %c0_i32 = arith.constant 0 : i32
    %c0_i32_0 = arith.constant 0 : i32
    %c0_i32_1 = arith.constant 0 : i32
    return %c0_i32, %c0_i32_0 : i32, i32
  }
  func.func @transform_3(%arg0: i32) -> (i32, i32) {
    %c0_i32 = arith.constant 0 : i32
    %c0_i32_0 = arith.constant 0 : i32
    return %arg0, %c0_i32 : i32, i32
  }
}

module attributes {stable_mosaic.version = 11 : i64} {
  func.func @_conv_bn_res_kernel(%arg0: i32, %arg1: memref<256x72xbf16, #tpu.memory_space<vmem>>, %arg2: memref<72x128xbf16, #tpu.memory_space<vmem>>, %arg3: memref<1x128xf32, #tpu.memory_space<vmem>>, %arg4: memref<256x128xbf16, #tpu.memory_space<vmem>>, %arg5: memref<256x128xbf16, #tpu.memory_space<vmem>>) attributes {dimension_semantics = [#tpu.dimension_semantics<parallel>], iteration_bounds = array<i64: 8>, scalar_prefetch = 0 : i64, scratch_operands = 0 : i64, tpu.core_type = #tpu.core_type<tc>, window_params = [{transform_indices = @transform_0, window_bounds = array<i64: 256, 72>}, {pipeline_mode = #tpu.pipeline_mode<synchronous>, transform_indices = @transform_1, window_bounds = array<i64: 72, 128>}, {pipeline_mode = #tpu.pipeline_mode<synchronous>, transform_indices = @transform_2, window_bounds = array<i64: 1, 128>}, {transform_indices = @transform_3, window_bounds = array<i64: 256, 128>}, {transform_indices = @transform_4, window_bounds = array<i64: 256, 128>}]} {
    %c0 = arith.constant 0 : index
    %c0_0 = arith.constant 0 : index
    %0 = vector.load %arg1[%c0, %c0_0] : memref<256x72xbf16, #tpu.memory_space<vmem>>, vector<256x72xbf16>
    %c0_1 = arith.constant 0 : index
    %c0_2 = arith.constant 0 : index
    %1 = vector.load %arg2[%c0_1, %c0_2] : memref<72x128xbf16, #tpu.memory_space<vmem>>, vector<72x128xbf16>
    %cst = arith.constant dense<0.000000e+00> : vector<256x128xf32>
    %2 = tpu.matmul %0, %1, %cst {dimension_numbers = #tpu.dot_dimension_numbers<[1], [0], [0], [1], [0, 0, 1, 1], [], []>} : vector<256x72xbf16>, vector<72x128xbf16>, vector<256x128xf32> -> vector<256x128xf32>
    %c0_3 = arith.constant 0 : index
    %c0_4 = arith.constant 0 : index
    %3 = vector.load %arg3[%c0_3, %c0_4] : memref<1x128xf32, #tpu.memory_space<vmem>>, vector<1x128xf32>
    %4 = vector.broadcast %3 : vector<1x128xf32> to vector<256x128xf32>
    %5 = arith.addf %2, %4 : vector<256x128xf32>
    %c0_5 = arith.constant 0 : index
    %c0_6 = arith.constant 0 : index
    %6 = vector.load %arg4[%c0_5, %c0_6] : memref<256x128xbf16, #tpu.memory_space<vmem>>, vector<256x128xbf16>
    %7 = arith.extf %6 : vector<256x128xbf16> to vector<256x128xf32>
    %8 = arith.addf %5, %7 : vector<256x128xf32>
    %cst_7 = arith.constant 0.000000e+00 : f32
    %9 = vector.broadcast %cst_7 : f32 to vector<256x128xf32>
    %10 = arith.maximumf %8, %9 : vector<256x128xf32>
    %11 = arith.truncf %10 : vector<256x128xf32> to vector<256x128xbf16>
    %c0_8 = arith.constant 0 : index
    %c0_9 = arith.constant 0 : index
    %12 = vector.load %arg5[%c0_8, %c0_9] : memref<256x128xbf16, #tpu.memory_space<vmem>>, vector<256x128xbf16>
    tpu.vector_store %arg5[%c0_8, %c0_9], %11 {strides = array<i32>} : memref<256x128xbf16, #tpu.memory_space<vmem>>, vector<256x128xbf16>,
    return
  }
  func.func @transform_0(%arg0: i32) -> (i32, i32) {
    %c0_i32 = arith.constant 0 : i32
    %c0_i32_0 = arith.constant 0 : i32
    return %arg0, %c0_i32 : i32, i32
  }
  func.func @transform_1(%arg0: i32) -> (i32, i32) {
    %c0_i32 = arith.constant 0 : i32
    %c0_i32_0 = arith.constant 0 : i32
    %c0_i32_1 = arith.constant 0 : i32
    return %c0_i32, %c0_i32_0 : i32, i32
  }
  func.func @transform_2(%arg0: i32) -> (i32, i32) {
    %c0_i32 = arith.constant 0 : i32
    %c0_i32_0 = arith.constant 0 : i32
    %c0_i32_1 = arith.constant 0 : i32
    return %c0_i32, %c0_i32_0 : i32, i32
  }
  func.func @transform_3(%arg0: i32) -> (i32, i32) {
    %c0_i32 = arith.constant 0 : i32
    %c0_i32_0 = arith.constant 0 : i32
    return %arg0, %c0_i32 : i32, i32
  }
  func.func @transform_4(%arg0: i32) -> (i32, i32) {
    %c0_i32 = arith.constant 0 : i32
    %c0_i32_0 = arith.constant 0 : i32
    return %arg0, %c0_i32 : i32, i32
  }
}

module attributes {stable_mosaic.version = 11 : i64} {
  func.func @_conv_bn_kernel(%arg0: i32, %arg1: memref<512x72xbf16, #tpu.memory_space<vmem>>, %arg2: memref<72x128xbf16, #tpu.memory_space<vmem>>, %arg3: memref<1x128xf32, #tpu.memory_space<vmem>>, %arg4: memref<512x128xbf16, #tpu.memory_space<vmem>>) attributes {dimension_semantics = [#tpu.dimension_semantics<parallel>], iteration_bounds = array<i64: 1>, scalar_prefetch = 0 : i64, scratch_operands = 0 : i64, tpu.core_type = #tpu.core_type<tc>, window_params = [{transform_indices = @transform_0, window_bounds = array<i64: 512, 72>}, {pipeline_mode = #tpu.pipeline_mode<synchronous>, transform_indices = @transform_1, window_bounds = array<i64: 72, 128>}, {pipeline_mode = #tpu.pipeline_mode<synchronous>, transform_indices = @transform_2, window_bounds = array<i64: 1, 128>}, {transform_indices = @transform_3, window_bounds = array<i64: 512, 128>}]} {
    %c0 = arith.constant 0 : index
    %c0_0 = arith.constant 0 : index
    %0 = vector.load %arg1[%c0, %c0_0] : memref<512x72xbf16, #tpu.memory_space<vmem>>, vector<512x72xbf16>
    %c0_1 = arith.constant 0 : index
    %c0_2 = arith.constant 0 : index
    %1 = vector.load %arg2[%c0_1, %c0_2] : memref<72x128xbf16, #tpu.memory_space<vmem>>, vector<72x128xbf16>
    %cst = arith.constant dense<0.000000e+00> : vector<512x128xf32>
    %2 = tpu.matmul %0, %1, %cst {dimension_numbers = #tpu.dot_dimension_numbers<[1], [0], [0], [1], [0, 0, 1, 1], [], []>} : vector<512x72xbf16>, vector<72x128xbf16>, vector<512x128xf32> -> vector<512x128xf32>
    %c0_3 = arith.constant 0 : index
    %c0_4 = arith.constant 0 : index
    %3 = vector.load %arg3[%c0_3, %c0_4] : memref<1x128xf32, #tpu.memory_space<vmem>>, vector<1x128xf32>
    %4 = vector.broadcast %3 : vector<1x128xf32> to vector<512x128xf32>
    %5 = arith.addf %2, %4 : vector<512x128xf32>
    %cst_5 = arith.constant 0.000000e+00 : f32
    %6 = vector.broadcast %cst_5 : f32 to vector<512x128xf32>
    %7 = arith.maximumf %5, %6 : vector<512x128xf32>
    %8 = arith.truncf %7 : vector<512x128xf32> to vector<512x128xbf16>
    %c0_6 = arith.constant 0 : index
    %c0_7 = arith.constant 0 : index
    %9 = vector.load %arg4[%c0_6, %c0_7] : memref<512x128xbf16, #tpu.memory_space<vmem>>, vector<512x128xbf16>
    tpu.vector_store %arg4[%c0_6, %c0_7], %8 {strides = array<i32>} : memref<512x128xbf16, #tpu.memory_space<vmem>>, vector<512x128xbf16>,
    return
  }
  func.func @transform_0(%arg0: i32) -> (i32, i32) {
    %c0_i32 = arith.constant 0 : i32
    %c0_i32_0 = arith.constant 0 : i32
    return %arg0, %c0_i32 : i32, i32
  }
  func.func @transform_1(%arg0: i32) -> (i32, i32) {
    %c0_i32 = arith.constant 0 : i32
    %c0_i32_0 = arith.constant 0 : i32
    %c0_i32_1 = arith.constant 0 : i32
    return %c0_i32, %c0_i32_0 : i32, i32
  }
  func.func @transform_2(%arg0: i32) -> (i32, i32) {
    %c0_i32 = arith.constant 0 : i32
    %c0_i32_0 = arith.constant 0 : i32
    %c0_i32_1 = arith.constant 0 : i32
    return %c0_i32, %c0_i32_0 : i32, i32
  }
  func.func @transform_3(%arg0: i32) -> (i32, i32) {
    %c0_i32 = arith.constant 0 : i32
    %c0_i32_0 = arith.constant 0 : i32
    return %arg0, %c0_i32 : i32, i32
  }
}

module attributes {stable_mosaic.version = 11 : i64} {
  func.func @_conv_bn_kernel(%arg0: i32, %arg1: memref<512x8xbf16, #tpu.memory_space<vmem>>, %arg2: memref<8x128xbf16, #tpu.memory_space<vmem>>, %arg3: memref<1x128xf32, #tpu.memory_space<vmem>>, %arg4: memref<512x128xbf16, #tpu.memory_space<vmem>>) attributes {dimension_semantics = [#tpu.dimension_semantics<parallel>], iteration_bounds = array<i64: 1>, scalar_prefetch = 0 : i64, scratch_operands = 0 : i64, tpu.core_type = #tpu.core_type<tc>, window_params = [{transform_indices = @transform_0, window_bounds = array<i64: 512, 8>}, {pipeline_mode = #tpu.pipeline_mode<synchronous>, transform_indices = @transform_1, window_bounds = array<i64: 8, 128>}, {pipeline_mode = #tpu.pipeline_mode<synchronous>, transform_indices = @transform_2, window_bounds = array<i64: 1, 128>}, {transform_indices = @transform_3, window_bounds = array<i64: 512, 128>}]} {
    %c0 = arith.constant 0 : index
    %c0_0 = arith.constant 0 : index
    %0 = vector.load %arg1[%c0, %c0_0] : memref<512x8xbf16, #tpu.memory_space<vmem>>, vector<512x8xbf16>
    %c0_1 = arith.constant 0 : index
    %c0_2 = arith.constant 0 : index
    %1 = vector.load %arg2[%c0_1, %c0_2] : memref<8x128xbf16, #tpu.memory_space<vmem>>, vector<8x128xbf16>
    %cst = arith.constant dense<0.000000e+00> : vector<512x128xf32>
    %2 = tpu.matmul %0, %1, %cst {dimension_numbers = #tpu.dot_dimension_numbers<[1], [0], [0], [1], [0, 0, 1, 1], [], []>} : vector<512x8xbf16>, vector<8x128xbf16>, vector<512x128xf32> -> vector<512x128xf32>
    %c0_3 = arith.constant 0 : index
    %c0_4 = arith.constant 0 : index
    %3 = vector.load %arg3[%c0_3, %c0_4] : memref<1x128xf32, #tpu.memory_space<vmem>>, vector<1x128xf32>
    %4 = vector.broadcast %3 : vector<1x128xf32> to vector<512x128xf32>
    %5 = arith.addf %2, %4 : vector<512x128xf32>
    %6 = arith.truncf %5 : vector<512x128xf32> to vector<512x128xbf16>
    %c0_5 = arith.constant 0 : index
    %c0_6 = arith.constant 0 : index
    %7 = vector.load %arg4[%c0_5, %c0_6] : memref<512x128xbf16, #tpu.memory_space<vmem>>, vector<512x128xbf16>
    tpu.vector_store %arg4[%c0_5, %c0_6], %6 {strides = array<i32>} : memref<512x128xbf16, #tpu.memory_space<vmem>>, vector<512x128xbf16>,
    return
  }
  func.func @transform_0(%arg0: i32) -> (i32, i32) {
    %c0_i32 = arith.constant 0 : i32
    %c0_i32_0 = arith.constant 0 : i32
    return %arg0, %c0_i32 : i32, i32
  }
  func.func @transform_1(%arg0: i32) -> (i32, i32) {
    %c0_i32 = arith.constant 0 : i32
    %c0_i32_0 = arith.constant 0 : i32
    %c0_i32_1 = arith.constant 0 : i32
    return %c0_i32, %c0_i32_0 : i32, i32
  }
  func.func @transform_2(%arg0: i32) -> (i32, i32) {
    %c0_i32 = arith.constant 0 : i32
    %c0_i32_0 = arith.constant 0 : i32
    %c0_i32_1 = arith.constant 0 : i32
    return %c0_i32, %c0_i32_0 : i32, i32
  }
  func.func @transform_3(%arg0: i32) -> (i32, i32) {
    %c0_i32 = arith.constant 0 : i32
    %c0_i32_0 = arith.constant 0 : i32
    return %arg0, %c0_i32 : i32, i32
  }
}

module attributes {stable_mosaic.version = 11 : i64} {
  func.func @_conv_bn_res_kernel(%arg0: i32, %arg1: memref<512x144xbf16, #tpu.memory_space<vmem>>, %arg2: memref<144x128xbf16, #tpu.memory_space<vmem>>, %arg3: memref<1x128xf32, #tpu.memory_space<vmem>>, %arg4: memref<512x128xbf16, #tpu.memory_space<vmem>>, %arg5: memref<512x128xbf16, #tpu.memory_space<vmem>>) attributes {dimension_semantics = [#tpu.dimension_semantics<parallel>], iteration_bounds = array<i64: 1>, scalar_prefetch = 0 : i64, scratch_operands = 0 : i64, tpu.core_type = #tpu.core_type<tc>, window_params = [{transform_indices = @transform_0, window_bounds = array<i64: 512, 144>}, {pipeline_mode = #tpu.pipeline_mode<synchronous>, transform_indices = @transform_1, window_bounds = array<i64: 144, 128>}, {pipeline_mode = #tpu.pipeline_mode<synchronous>, transform_indices = @transform_2, window_bounds = array<i64: 1, 128>}, {transform_indices = @transform_3, window_bounds = array<i64: 512, 128>}, {transform_indices = @transform_4, window_bounds = array<i64: 512, 128>}]} {
    %c0 = arith.constant 0 : index
    %c0_0 = arith.constant 0 : index
    %0 = vector.load %arg1[%c0, %c0_0] : memref<512x144xbf16, #tpu.memory_space<vmem>>, vector<512x144xbf16>
    %c0_1 = arith.constant 0 : index
    %c0_2 = arith.constant 0 : index
    %1 = vector.load %arg2[%c0_1, %c0_2] : memref<144x128xbf16, #tpu.memory_space<vmem>>, vector<144x128xbf16>
    %cst = arith.constant dense<0.000000e+00> : vector<512x128xf32>
    %2 = tpu.matmul %0, %1, %cst {dimension_numbers = #tpu.dot_dimension_numbers<[1], [0], [0], [1], [0, 0, 1, 1], [], []>} : vector<512x144xbf16>, vector<144x128xbf16>, vector<512x128xf32> -> vector<512x128xf32>
    %c0_3 = arith.constant 0 : index
    %c0_4 = arith.constant 0 : index
    %3 = vector.load %arg3[%c0_3, %c0_4] : memref<1x128xf32, #tpu.memory_space<vmem>>, vector<1x128xf32>
    %4 = vector.broadcast %3 : vector<1x128xf32> to vector<512x128xf32>
    %5 = arith.addf %2, %4 : vector<512x128xf32>
    %c0_5 = arith.constant 0 : index
    %c0_6 = arith.constant 0 : index
    %6 = vector.load %arg4[%c0_5, %c0_6] : memref<512x128xbf16, #tpu.memory_space<vmem>>, vector<512x128xbf16>
    %7 = arith.extf %6 : vector<512x128xbf16> to vector<512x128xf32>
    %8 = arith.addf %5, %7 : vector<512x128xf32>
    %cst_7 = arith.constant 0.000000e+00 : f32
    %9 = vector.broadcast %cst_7 : f32 to vector<512x128xf32>
    %10 = arith.maximumf %8, %9 : vector<512x128xf32>
    %11 = arith.truncf %10 : vector<512x128xf32> to vector<512x128xbf16>
    %c0_8 = arith.constant 0 : index
    %c0_9 = arith.constant 0 : index
    %12 = vector.load %arg5[%c0_8, %c0_9] : memref<512x128xbf16, #tpu.memory_space<vmem>>, vector<512x128xbf16>
    tpu.vector_store %arg5[%c0_8, %c0_9], %11 {strides = array<i32>} : memref<512x128xbf16, #tpu.memory_space<vmem>>, vector<512x128xbf16>,
    return
  }
  func.func @transform_0(%arg0: i32) -> (i32, i32) {
    %c0_i32 = arith.constant 0 : i32
    %c0_i32_0 = arith.constant 0 : i32
    return %arg0, %c0_i32 : i32, i32
  }
  func.func @transform_1(%arg0: i32) -> (i32, i32) {
    %c0_i32 = arith.constant 0 : i32
    %c0_i32_0 = arith.constant 0 : i32
    %c0_i32_1 = arith.constant 0 : i32
    return %c0_i32, %c0_i32_0 : i32, i32
  }
  func.func @transform_2(%arg0: i32) -> (i32, i32) {
    %c0_i32 = arith.constant 0 : i32
    %c0_i32_0 = arith.constant 0 : i32
    %c0_i32_1 = arith.constant 0 : i32
    return %c0_i32, %c0_i32_0 : i32, i32
  }
  func.func @transform_3(%arg0: i32) -> (i32, i32) {
    %c0_i32 = arith.constant 0 : i32
    %c0_i32_0 = arith.constant 0 : i32
    return %arg0, %c0_i32 : i32, i32
  }
  func.func @transform_4(%arg0: i32) -> (i32, i32) {
    %c0_i32 = arith.constant 0 : i32
    %c0_i32_0 = arith.constant 0 : i32
    return %arg0, %c0_i32 : i32, i32
  }
}

module attributes {stable_mosaic.version = 11 : i64} {
  func.func @_conv_bn_kernel(%arg0: i32, %arg1: memref<512x144xbf16, #tpu.memory_space<vmem>>, %arg2: memref<144x128xbf16, #tpu.memory_space<vmem>>, %arg3: memref<1x128xf32, #tpu.memory_space<vmem>>, %arg4: memref<512x128xbf16, #tpu.memory_space<vmem>>) attributes {dimension_semantics = [#tpu.dimension_semantics<parallel>], iteration_bounds = array<i64: 1>, scalar_prefetch = 0 : i64, scratch_operands = 0 : i64, tpu.core_type = #tpu.core_type<tc>, window_params = [{transform_indices = @transform_0, window_bounds = array<i64: 512, 144>}, {pipeline_mode = #tpu.pipeline_mode<synchronous>, transform_indices = @transform_1, window_bounds = array<i64: 144, 128>}, {pipeline_mode = #tpu.pipeline_mode<synchronous>, transform_indices = @transform_2, window_bounds = array<i64: 1, 128>}, {transform_indices = @transform_3, window_bounds = array<i64: 512, 128>}]} {
    %c0 = arith.constant 0 : index
    %c0_0 = arith.constant 0 : index
    %0 = vector.load %arg1[%c0, %c0_0] : memref<512x144xbf16, #tpu.memory_space<vmem>>, vector<512x144xbf16>
    %c0_1 = arith.constant 0 : index
    %c0_2 = arith.constant 0 : index
    %1 = vector.load %arg2[%c0_1, %c0_2] : memref<144x128xbf16, #tpu.memory_space<vmem>>, vector<144x128xbf16>
    %cst = arith.constant dense<0.000000e+00> : vector<512x128xf32>
    %2 = tpu.matmul %0, %1, %cst {dimension_numbers = #tpu.dot_dimension_numbers<[1], [0], [0], [1], [0, 0, 1, 1], [], []>} : vector<512x144xbf16>, vector<144x128xbf16>, vector<512x128xf32> -> vector<512x128xf32>
    %c0_3 = arith.constant 0 : index
    %c0_4 = arith.constant 0 : index
    %3 = vector.load %arg3[%c0_3, %c0_4] : memref<1x128xf32, #tpu.memory_space<vmem>>, vector<1x128xf32>
    %4 = vector.broadcast %3 : vector<1x128xf32> to vector<512x128xf32>
    %5 = arith.addf %2, %4 : vector<512x128xf32>
    %cst_5 = arith.constant 0.000000e+00 : f32
    %6 = vector.broadcast %cst_5 : f32 to vector<512x128xf32>
    %7 = arith.maximumf %5, %6 : vector<512x128xf32>
    %8 = arith.truncf %7 : vector<512x128xf32> to vector<512x128xbf16>
    %c0_6 = arith.constant 0 : index
    %c0_7 = arith.constant 0 : index
    %9 = vector.load %arg4[%c0_6, %c0_7] : memref<512x128xbf16, #tpu.memory_space<vmem>>, vector<512x128xbf16>
    tpu.vector_store %arg4[%c0_6, %c0_7], %8 {strides = array<i32>} : memref<512x128xbf16, #tpu.memory_space<vmem>>, vector<512x128xbf16>,
    return
  }
  func.func @transform_0(%arg0: i32) -> (i32, i32) {
    %c0_i32 = arith.constant 0 : i32
    %c0_i32_0 = arith.constant 0 : i32
    return %arg0, %c0_i32 : i32, i32
  }
  func.func @transform_1(%arg0: i32) -> (i32, i32) {
    %c0_i32 = arith.constant 0 : i32
    %c0_i32_0 = arith.constant 0 : i32
    %c0_i32_1 = arith.constant 0 : i32
    return %c0_i32, %c0_i32_0 : i32, i32
  }
  func.func @transform_2(%arg0: i32) -> (i32, i32) {
    %c0_i32 = arith.constant 0 : i32
    %c0_i32_0 = arith.constant 0 : i32
    %c0_i32_1 = arith.constant 0 : i32
    return %c0_i32, %c0_i32_0 : i32, i32
  }
  func.func @transform_3(%arg0: i32) -> (i32, i32) {
    %c0_i32 = arith.constant 0 : i32
    %c0_i32_0 = arith.constant 0 : i32
    return %arg0, %c0_i32 : i32, i32
  }
}

module attributes {stable_mosaic.version = 11 : i64} {
  func.func @_conv_bn_kernel(%arg0: i32, %arg1: memref<128x144xbf16, #tpu.memory_space<vmem>>, %arg2: memref<144x128xbf16, #tpu.memory_space<vmem>>, %arg3: memref<1x128xf32, #tpu.memory_space<vmem>>, %arg4: memref<128x128xbf16, #tpu.memory_space<vmem>>) attributes {dimension_semantics = [#tpu.dimension_semantics<parallel>], iteration_bounds = array<i64: 1>, scalar_prefetch = 0 : i64, scratch_operands = 0 : i64, tpu.core_type = #tpu.core_type<tc>, window_params = [{transform_indices = @transform_0, window_bounds = array<i64: 128, 144>}, {pipeline_mode = #tpu.pipeline_mode<synchronous>, transform_indices = @transform_1, window_bounds = array<i64: 144, 128>}, {pipeline_mode = #tpu.pipeline_mode<synchronous>, transform_indices = @transform_2, window_bounds = array<i64: 1, 128>}, {transform_indices = @transform_3, window_bounds = array<i64: 128, 128>}]} {
    %c0 = arith.constant 0 : index
    %c0_0 = arith.constant 0 : index
    %0 = vector.load %arg1[%c0, %c0_0] : memref<128x144xbf16, #tpu.memory_space<vmem>>, vector<128x144xbf16>
    %c0_1 = arith.constant 0 : index
    %c0_2 = arith.constant 0 : index
    %1 = vector.load %arg2[%c0_1, %c0_2] : memref<144x128xbf16, #tpu.memory_space<vmem>>, vector<144x128xbf16>
    %cst = arith.constant dense<0.000000e+00> : vector<128x128xf32>
    %2 = tpu.matmul %0, %1, %cst {dimension_numbers = #tpu.dot_dimension_numbers<[1], [0], [0], [1], [0, 0, 1, 1], [], []>} : vector<128x144xbf16>, vector<144x128xbf16>, vector<128x128xf32> -> vector<128x128xf32>
    %c0_3 = arith.constant 0 : index
    %c0_4 = arith.constant 0 : index
    %3 = vector.load %arg3[%c0_3, %c0_4] : memref<1x128xf32, #tpu.memory_space<vmem>>, vector<1x128xf32>
    %4 = vector.broadcast %3 : vector<1x128xf32> to vector<128x128xf32>
    %5 = arith.addf %2, %4 : vector<128x128xf32>
    %cst_5 = arith.constant 0.000000e+00 : f32
    %6 = vector.broadcast %cst_5 : f32 to vector<128x128xf32>
    %7 = arith.maximumf %5, %6 : vector<128x128xf32>
    %8 = arith.truncf %7 : vector<128x128xf32> to vector<128x128xbf16>
    %c0_6 = arith.constant 0 : index
    %c0_7 = arith.constant 0 : index
    %9 = vector.load %arg4[%c0_6, %c0_7] : memref<128x128xbf16, #tpu.memory_space<vmem>>, vector<128x128xbf16>
    tpu.vector_store %arg4[%c0_6, %c0_7], %8 {strides = array<i32>} : memref<128x128xbf16, #tpu.memory_space<vmem>>, vector<128x128xbf16>,
    return
  }
  func.func @transform_0(%arg0: i32) -> (i32, i32) {
    %c0_i32 = arith.constant 0 : i32
    %c0_i32_0 = arith.constant 0 : i32
    return %arg0, %c0_i32 : i32, i32
  }
  func.func @transform_1(%arg0: i32) -> (i32, i32) {
    %c0_i32 = arith.constant 0 : i32
    %c0_i32_0 = arith.constant 0 : i32
    %c0_i32_1 = arith.constant 0 : i32
    return %c0_i32, %c0_i32_0 : i32, i32
  }
  func.func @transform_2(%arg0: i32) -> (i32, i32) {
    %c0_i32 = arith.constant 0 : i32
    %c0_i32_0 = arith.constant 0 : i32
    %c0_i32_1 = arith.constant 0 : i32
    return %c0_i32, %c0_i32_0 : i32, i32
  }
  func.func @transform_3(%arg0: i32) -> (i32, i32) {
    %c0_i32 = arith.constant 0 : i32
    %c0_i32_0 = arith.constant 0 : i32
    return %arg0, %c0_i32 : i32, i32
  }
}

module attributes {stable_mosaic.version = 11 : i64} {
  func.func @_conv_bn_kernel(%arg0: i32, %arg1: memref<128x16xbf16, #tpu.memory_space<vmem>>, %arg2: memref<16x128xbf16, #tpu.memory_space<vmem>>, %arg3: memref<1x128xf32, #tpu.memory_space<vmem>>, %arg4: memref<128x128xbf16, #tpu.memory_space<vmem>>) attributes {dimension_semantics = [#tpu.dimension_semantics<parallel>], iteration_bounds = array<i64: 1>, scalar_prefetch = 0 : i64, scratch_operands = 0 : i64, tpu.core_type = #tpu.core_type<tc>, window_params = [{transform_indices = @transform_0, window_bounds = array<i64: 128, 16>}, {pipeline_mode = #tpu.pipeline_mode<synchronous>, transform_indices = @transform_1, window_bounds = array<i64: 16, 128>}, {pipeline_mode = #tpu.pipeline_mode<synchronous>, transform_indices = @transform_2, window_bounds = array<i64: 1, 128>}, {transform_indices = @transform_3, window_bounds = array<i64: 128, 128>}]} {
    %c0 = arith.constant 0 : index
    %c0_0 = arith.constant 0 : index
    %0 = vector.load %arg1[%c0, %c0_0] : memref<128x16xbf16, #tpu.memory_space<vmem>>, vector<128x16xbf16>
    %c0_1 = arith.constant 0 : index
    %c0_2 = arith.constant 0 : index
    %1 = vector.load %arg2[%c0_1, %c0_2] : memref<16x128xbf16, #tpu.memory_space<vmem>>, vector<16x128xbf16>
    %cst = arith.constant dense<0.000000e+00> : vector<128x128xf32>
    %2 = tpu.matmul %0, %1, %cst {dimension_numbers = #tpu.dot_dimension_numbers<[1], [0], [0], [1], [0, 0, 1, 1], [], []>} : vector<128x16xbf16>, vector<16x128xbf16>, vector<128x128xf32> -> vector<128x128xf32>
    %c0_3 = arith.constant 0 : index
    %c0_4 = arith.constant 0 : index
    %3 = vector.load %arg3[%c0_3, %c0_4] : memref<1x128xf32, #tpu.memory_space<vmem>>, vector<1x128xf32>
    %4 = vector.broadcast %3 : vector<1x128xf32> to vector<128x128xf32>
    %5 = arith.addf %2, %4 : vector<128x128xf32>
    %6 = arith.truncf %5 : vector<128x128xf32> to vector<128x128xbf16>
    %c0_5 = arith.constant 0 : index
    %c0_6 = arith.constant 0 : index
    %7 = vector.load %arg4[%c0_5, %c0_6] : memref<128x128xbf16, #tpu.memory_space<vmem>>, vector<128x128xbf16>
    tpu.vector_store %arg4[%c0_5, %c0_6], %6 {strides = array<i32>} : memref<128x128xbf16, #tpu.memory_space<vmem>>, vector<128x128xbf16>,
    return
  }
  func.func @transform_0(%arg0: i32) -> (i32, i32) {
    %c0_i32 = arith.constant 0 : i32
    %c0_i32_0 = arith.constant 0 : i32
    return %arg0, %c0_i32 : i32, i32
  }
  func.func @transform_1(%arg0: i32) -> (i32, i32) {
    %c0_i32 = arith.constant 0 : i32
    %c0_i32_0 = arith.constant 0 : i32
    %c0_i32_1 = arith.constant 0 : i32
    return %c0_i32, %c0_i32_0 : i32, i32
  }
  func.func @transform_2(%arg0: i32) -> (i32, i32) {
    %c0_i32 = arith.constant 0 : i32
    %c0_i32_0 = arith.constant 0 : i32
    %c0_i32_1 = arith.constant 0 : i32
    return %c0_i32, %c0_i32_0 : i32, i32
  }
  func.func @transform_3(%arg0: i32) -> (i32, i32) {
    %c0_i32 = arith.constant 0 : i32
    %c0_i32_0 = arith.constant 0 : i32
    return %arg0, %c0_i32 : i32, i32
  }
}

module attributes {stable_mosaic.version = 11 : i64} {
  func.func @_conv_bn_res_kernel(%arg0: i32, %arg1: memref<128x288xbf16, #tpu.memory_space<vmem>>, %arg2: memref<288x128xbf16, #tpu.memory_space<vmem>>, %arg3: memref<1x128xf32, #tpu.memory_space<vmem>>, %arg4: memref<128x128xbf16, #tpu.memory_space<vmem>>, %arg5: memref<128x128xbf16, #tpu.memory_space<vmem>>) attributes {dimension_semantics = [#tpu.dimension_semantics<parallel>], iteration_bounds = array<i64: 1>, scalar_prefetch = 0 : i64, scratch_operands = 0 : i64, tpu.core_type = #tpu.core_type<tc>, window_params = [{transform_indices = @transform_0, window_bounds = array<i64: 128, 288>}, {pipeline_mode = #tpu.pipeline_mode<synchronous>, transform_indices = @transform_1, window_bounds = array<i64: 288, 128>}, {pipeline_mode = #tpu.pipeline_mode<synchronous>, transform_indices = @transform_2, window_bounds = array<i64: 1, 128>}, {transform_indices = @transform_3, window_bounds = array<i64: 128, 128>}, {transform_indices = @transform_4, window_bounds = array<i64: 128, 128>}]} {
    %c0 = arith.constant 0 : index
    %c0_0 = arith.constant 0 : index
    %0 = vector.load %arg1[%c0, %c0_0] : memref<128x288xbf16, #tpu.memory_space<vmem>>, vector<128x288xbf16>
    %c0_1 = arith.constant 0 : index
    %c0_2 = arith.constant 0 : index
    %1 = vector.load %arg2[%c0_1, %c0_2] : memref<288x128xbf16, #tpu.memory_space<vmem>>, vector<288x128xbf16>
    %cst = arith.constant dense<0.000000e+00> : vector<128x128xf32>
    %2 = tpu.matmul %0, %1, %cst {dimension_numbers = #tpu.dot_dimension_numbers<[1], [0], [0], [1], [0, 0, 1, 1], [], []>} : vector<128x288xbf16>, vector<288x128xbf16>, vector<128x128xf32> -> vector<128x128xf32>
    %c0_3 = arith.constant 0 : index
    %c0_4 = arith.constant 0 : index
    %3 = vector.load %arg3[%c0_3, %c0_4] : memref<1x128xf32, #tpu.memory_space<vmem>>, vector<1x128xf32>
    %4 = vector.broadcast %3 : vector<1x128xf32> to vector<128x128xf32>
    %5 = arith.addf %2, %4 : vector<128x128xf32>
    %c0_5 = arith.constant 0 : index
    %c0_6 = arith.constant 0 : index
    %6 = vector.load %arg4[%c0_5, %c0_6] : memref<128x128xbf16, #tpu.memory_space<vmem>>, vector<128x128xbf16>
    %7 = arith.extf %6 : vector<128x128xbf16> to vector<128x128xf32>
    %8 = arith.addf %5, %7 : vector<128x128xf32>
    %cst_7 = arith.constant 0.000000e+00 : f32
    %9 = vector.broadcast %cst_7 : f32 to vector<128x128xf32>
    %10 = arith.maximumf %8, %9 : vector<128x128xf32>
    %11 = arith.truncf %10 : vector<128x128xf32> to vector<128x128xbf16>
    %c0_8 = arith.constant 0 : index
    %c0_9 = arith.constant 0 : index
    %12 = vector.load %arg5[%c0_8, %c0_9] : memref<128x128xbf16, #tpu.memory_space<vmem>>, vector<128x128xbf16>
    tpu.vector_store %arg5[%c0_8, %c0_9], %11 {strides = array<i32>} : memref<128x128xbf16, #tpu.memory_space<vmem>>, vector<128x128xbf16>,
    return
  }
  func.func @transform_0(%arg0: i32) -> (i32, i32) {
    %c0_i32 = arith.constant 0 : i32
    %c0_i32_0 = arith.constant 0 : i32
    return %arg0, %c0_i32 : i32, i32
  }
  func.func @transform_1(%arg0: i32) -> (i32, i32) {
    %c0_i32 = arith.constant 0 : i32
    %c0_i32_0 = arith.constant 0 : i32
    %c0_i32_1 = arith.constant 0 : i32
    return %c0_i32, %c0_i32_0 : i32, i32
  }
  func.func @transform_2(%arg0: i32) -> (i32, i32) {
    %c0_i32 = arith.constant 0 : i32
    %c0_i32_0 = arith.constant 0 : i32
    %c0_i32_1 = arith.constant 0 : i32
    return %c0_i32, %c0_i32_0 : i32, i32
  }
  func.func @transform_3(%arg0: i32) -> (i32, i32) {
    %c0_i32 = arith.constant 0 : i32
    %c0_i32_0 = arith.constant 0 : i32
    return %arg0, %c0_i32 : i32, i32
  }
  func.func @transform_4(%arg0: i32) -> (i32, i32) {
    %c0_i32 = arith.constant 0 : i32
    %c0_i32_0 = arith.constant 0 : i32
    return %arg0, %c0_i32 : i32, i32
  }
}

module attributes {stable_mosaic.version = 11 : i64} {
  func.func @_conv_bn_kernel(%arg0: i32, %arg1: memref<128x288xbf16, #tpu.memory_space<vmem>>, %arg2: memref<288x128xbf16, #tpu.memory_space<vmem>>, %arg3: memref<1x128xf32, #tpu.memory_space<vmem>>, %arg4: memref<128x128xbf16, #tpu.memory_space<vmem>>) attributes {dimension_semantics = [#tpu.dimension_semantics<parallel>], iteration_bounds = array<i64: 1>, scalar_prefetch = 0 : i64, scratch_operands = 0 : i64, tpu.core_type = #tpu.core_type<tc>, window_params = [{transform_indices = @transform_0, window_bounds = array<i64: 128, 288>}, {pipeline_mode = #tpu.pipeline_mode<synchronous>, transform_indices = @transform_1, window_bounds = array<i64: 288, 128>}, {pipeline_mode = #tpu.pipeline_mode<synchronous>, transform_indices = @transform_2, window_bounds = array<i64: 1, 128>}, {transform_indices = @transform_3, window_bounds = array<i64: 128, 128>}]} {
    %c0 = arith.constant 0 : index
    %c0_0 = arith.constant 0 : index
    %0 = vector.load %arg1[%c0, %c0_0] : memref<128x288xbf16, #tpu.memory_space<vmem>>, vector<128x288xbf16>
    %c0_1 = arith.constant 0 : index
    %c0_2 = arith.constant 0 : index
    %1 = vector.load %arg2[%c0_1, %c0_2] : memref<288x128xbf16, #tpu.memory_space<vmem>>, vector<288x128xbf16>
    %cst = arith.constant dense<0.000000e+00> : vector<128x128xf32>
    %2 = tpu.matmul %0, %1, %cst {dimension_numbers = #tpu.dot_dimension_numbers<[1], [0], [0], [1], [0, 0, 1, 1], [], []>} : vector<128x288xbf16>, vector<288x128xbf16>, vector<128x128xf32> -> vector<128x128xf32>
    %c0_3 = arith.constant 0 : index
    %c0_4 = arith.constant 0 : index
    %3 = vector.load %arg3[%c0_3, %c0_4] : memref<1x128xf32, #tpu.memory_space<vmem>>, vector<1x128xf32>
    %4 = vector.broadcast %3 : vector<1x128xf32> to vector<128x128xf32>
    %5 = arith.addf %2, %4 : vector<128x128xf32>
    %cst_5 = arith.constant 0.000000e+00 : f32
    %6 = vector.broadcast %cst_5 : f32 to vector<128x128xf32>
    %7 = arith.maximumf %5, %6 : vector<128x128xf32>
    %8 = arith.truncf %7 : vector<128x128xf32> to vector<128x128xbf16>
    %c0_6 = arith.constant 0 : index
    %c0_7 = arith.constant 0 : index
    %9 = vector.load %arg4[%c0_6, %c0_7] : memref<128x128xbf16, #tpu.memory_space<vmem>>, vector<128x128xbf16>
    tpu.vector_store %arg4[%c0_6, %c0_7], %8 {strides = array<i32>} : memref<128x128xbf16, #tpu.memory_space<vmem>>, vector<128x128xbf16>,
    return
  }
  func.func @transform_0(%arg0: i32) -> (i32, i32) {
    %c0_i32 = arith.constant 0 : i32
    %c0_i32_0 = arith.constant 0 : i32
    return %arg0, %c0_i32 : i32, i32
  }
  func.func @transform_1(%arg0: i32) -> (i32, i32) {
    %c0_i32 = arith.constant 0 : i32
    %c0_i32_0 = arith.constant 0 : i32
    %c0_i32_1 = arith.constant 0 : i32
    return %c0_i32, %c0_i32_0 : i32, i32
  }
  func.func @transform_2(%arg0: i32) -> (i32, i32) {
    %c0_i32 = arith.constant 0 : i32
    %c0_i32_0 = arith.constant 0 : i32
    %c0_i32_1 = arith.constant 0 : i32
    return %c0_i32, %c0_i32_0 : i32, i32
  }
  func.func @transform_3(%arg0: i32) -> (i32, i32) {
    %c0_i32 = arith.constant 0 : i32
    %c0_i32_0 = arith.constant 0 : i32
    return %arg0, %c0_i32 : i32, i32
  }
}

module attributes {stable_mosaic.version = 11 : i64} {
  func.func @_conv_bn_kernel(%arg0: i32, %arg1: memref<32x288xbf16, #tpu.memory_space<vmem>>, %arg2: memref<288x128xbf16, #tpu.memory_space<vmem>>, %arg3: memref<1x128xf32, #tpu.memory_space<vmem>>, %arg4: memref<32x128xbf16, #tpu.memory_space<vmem>>) attributes {dimension_semantics = [#tpu.dimension_semantics<parallel>], iteration_bounds = array<i64: 1>, scalar_prefetch = 0 : i64, scratch_operands = 0 : i64, tpu.core_type = #tpu.core_type<tc>, window_params = [{transform_indices = @transform_0, window_bounds = array<i64: 32, 288>}, {pipeline_mode = #tpu.pipeline_mode<synchronous>, transform_indices = @transform_1, window_bounds = array<i64: 288, 128>}, {pipeline_mode = #tpu.pipeline_mode<synchronous>, transform_indices = @transform_2, window_bounds = array<i64: 1, 128>}, {transform_indices = @transform_3, window_bounds = array<i64: 32, 128>}]} {
    %c0 = arith.constant 0 : index
    %c0_0 = arith.constant 0 : index
    %0 = vector.load %arg1[%c0, %c0_0] : memref<32x288xbf16, #tpu.memory_space<vmem>>, vector<32x288xbf16>
    %c0_1 = arith.constant 0 : index
    %c0_2 = arith.constant 0 : index
    %1 = vector.load %arg2[%c0_1, %c0_2] : memref<288x128xbf16, #tpu.memory_space<vmem>>, vector<288x128xbf16>
    %cst = arith.constant dense<0.000000e+00> : vector<32x128xf32>
    %2 = tpu.matmul %0, %1, %cst {dimension_numbers = #tpu.dot_dimension_numbers<[1], [0], [0], [1], [0, 0, 1, 1], [], []>} : vector<32x288xbf16>, vector<288x128xbf16>, vector<32x128xf32> -> vector<32x128xf32>
    %c0_3 = arith.constant 0 : index
    %c0_4 = arith.constant 0 : index
    %3 = vector.load %arg3[%c0_3, %c0_4] : memref<1x128xf32, #tpu.memory_space<vmem>>, vector<1x128xf32>
    %4 = vector.broadcast %3 : vector<1x128xf32> to vector<32x128xf32>
    %5 = arith.addf %2, %4 : vector<32x128xf32>
    %cst_5 = arith.constant 0.000000e+00 : f32
    %6 = vector.broadcast %cst_5 : f32 to vector<32x128xf32>
    %7 = arith.maximumf %5, %6 : vector<32x128xf32>
    %8 = arith.truncf %7 : vector<32x128xf32> to vector<32x128xbf16>
    %c0_6 = arith.constant 0 : index
    %c0_7 = arith.constant 0 : index
    %9 = vector.load %arg4[%c0_6, %c0_7] : memref<32x128xbf16, #tpu.memory_space<vmem>>, vector<32x128xbf16>
    tpu.vector_store %arg4[%c0_6, %c0_7], %8 {strides = array<i32>} : memref<32x128xbf16, #tpu.memory_space<vmem>>, vector<32x128xbf16>,
    return
  }
  func.func @transform_0(%arg0: i32) -> (i32, i32) {
    %c0_i32 = arith.constant 0 : i32
    %c0_i32_0 = arith.constant 0 : i32
    return %arg0, %c0_i32 : i32, i32
  }
  func.func @transform_1(%arg0: i32) -> (i32, i32) {
    %c0_i32 = arith.constant 0 : i32
    %c0_i32_0 = arith.constant 0 : i32
    %c0_i32_1 = arith.constant 0 : i32
    return %c0_i32, %c0_i32_0 : i32, i32
  }
  func.func @transform_2(%arg0: i32) -> (i32, i32) {
    %c0_i32 = arith.constant 0 : i32
    %c0_i32_0 = arith.constant 0 : i32
    %c0_i32_1 = arith.constant 0 : i32
    return %c0_i32, %c0_i32_0 : i32, i32
  }
  func.func @transform_3(%arg0: i32) -> (i32, i32) {
    %c0_i32 = arith.constant 0 : i32
    %c0_i32_0 = arith.constant 0 : i32
    return %arg0, %c0_i32 : i32, i32
  }
}

module attributes {stable_mosaic.version = 11 : i64} {
  func.func @_conv_bn_kernel(%arg0: i32, %arg1: memref<32x32xbf16, #tpu.memory_space<vmem>>, %arg2: memref<32x128xbf16, #tpu.memory_space<vmem>>, %arg3: memref<1x128xf32, #tpu.memory_space<vmem>>, %arg4: memref<32x128xbf16, #tpu.memory_space<vmem>>) attributes {dimension_semantics = [#tpu.dimension_semantics<parallel>], iteration_bounds = array<i64: 1>, scalar_prefetch = 0 : i64, scratch_operands = 0 : i64, tpu.core_type = #tpu.core_type<tc>, window_params = [{transform_indices = @transform_0, window_bounds = array<i64: 32, 32>}, {pipeline_mode = #tpu.pipeline_mode<synchronous>, transform_indices = @transform_1, window_bounds = array<i64: 32, 128>}, {pipeline_mode = #tpu.pipeline_mode<synchronous>, transform_indices = @transform_2, window_bounds = array<i64: 1, 128>}, {transform_indices = @transform_3, window_bounds = array<i64: 32, 128>}]} {
    %c0 = arith.constant 0 : index
    %c0_0 = arith.constant 0 : index
    %0 = vector.load %arg1[%c0, %c0_0] : memref<32x32xbf16, #tpu.memory_space<vmem>>, vector<32x32xbf16>
    %c0_1 = arith.constant 0 : index
    %c0_2 = arith.constant 0 : index
    %1 = vector.load %arg2[%c0_1, %c0_2] : memref<32x128xbf16, #tpu.memory_space<vmem>>, vector<32x128xbf16>
    %cst = arith.constant dense<0.000000e+00> : vector<32x128xf32>
    %2 = tpu.matmul %0, %1, %cst {dimension_numbers = #tpu.dot_dimension_numbers<[1], [0], [0], [1], [0, 0, 1, 1], [], []>} : vector<32x32xbf16>, vector<32x128xbf16>, vector<32x128xf32> -> vector<32x128xf32>
    %c0_3 = arith.constant 0 : index
    %c0_4 = arith.constant 0 : index
    %3 = vector.load %arg3[%c0_3, %c0_4] : memref<1x128xf32, #tpu.memory_space<vmem>>, vector<1x128xf32>
    %4 = vector.broadcast %3 : vector<1x128xf32> to vector<32x128xf32>
    %5 = arith.addf %2, %4 : vector<32x128xf32>
    %6 = arith.truncf %5 : vector<32x128xf32> to vector<32x128xbf16>
    %c0_5 = arith.constant 0 : index
    %c0_6 = arith.constant 0 : index
    %7 = vector.load %arg4[%c0_5, %c0_6] : memref<32x128xbf16, #tpu.memory_space<vmem>>, vector<32x128xbf16>
    tpu.vector_store %arg4[%c0_5, %c0_6], %6 {strides = array<i32>} : memref<32x128xbf16, #tpu.memory_space<vmem>>, vector<32x128xbf16>,
    return
  }
  func.func @transform_0(%arg0: i32) -> (i32, i32) {
    %c0_i32 = arith.constant 0 : i32
    %c0_i32_0 = arith.constant 0 : i32
    return %arg0, %c0_i32 : i32, i32
  }
  func.func @transform_1(%arg0: i32) -> (i32, i32) {
    %c0_i32 = arith.constant 0 : i32
    %c0_i32_0 = arith.constant 0 : i32
    %c0_i32_1 = arith.constant 0 : i32
    return %c0_i32, %c0_i32_0 : i32, i32
  }
  func.func @transform_2(%arg0: i32) -> (i32, i32) {
    %c0_i32 = arith.constant 0 : i32
    %c0_i32_0 = arith.constant 0 : i32
    %c0_i32_1 = arith.constant 0 : i32
    return %c0_i32, %c0_i32_0 : i32, i32
  }
  func.func @transform_3(%arg0: i32) -> (i32, i32) {
    %c0_i32 = arith.constant 0 : i32
    %c0_i32_0 = arith.constant 0 : i32
    return %arg0, %c0_i32 : i32, i32
  }
}

module attributes {stable_mosaic.version = 11 : i64} {
  func.func @_conv_bn_res_kernel(%arg0: i32, %arg1: memref<32x576xbf16, #tpu.memory_space<vmem>>, %arg2: memref<576x128xbf16, #tpu.memory_space<vmem>>, %arg3: memref<1x128xf32, #tpu.memory_space<vmem>>, %arg4: memref<32x128xbf16, #tpu.memory_space<vmem>>, %arg5: memref<32x128xbf16, #tpu.memory_space<vmem>>) attributes {dimension_semantics = [#tpu.dimension_semantics<parallel>], iteration_bounds = array<i64: 1>, scalar_prefetch = 0 : i64, scratch_operands = 0 : i64, tpu.core_type = #tpu.core_type<tc>, window_params = [{transform_indices = @transform_0, window_bounds = array<i64: 32, 576>}, {pipeline_mode = #tpu.pipeline_mode<synchronous>, transform_indices = @transform_1, window_bounds = array<i64: 576, 128>}, {pipeline_mode = #tpu.pipeline_mode<synchronous>, transform_indices = @transform_2, window_bounds = array<i64: 1, 128>}, {transform_indices = @transform_3, window_bounds = array<i64: 32, 128>}, {transform_indices = @transform_4, window_bounds = array<i64: 32, 128>}]} {
    %c0 = arith.constant 0 : index
    %c0_0 = arith.constant 0 : index
    %0 = vector.load %arg1[%c0, %c0_0] : memref<32x576xbf16, #tpu.memory_space<vmem>>, vector<32x576xbf16>
    %c0_1 = arith.constant 0 : index
    %c0_2 = arith.constant 0 : index
    %1 = vector.load %arg2[%c0_1, %c0_2] : memref<576x128xbf16, #tpu.memory_space<vmem>>, vector<576x128xbf16>
    %cst = arith.constant dense<0.000000e+00> : vector<32x128xf32>
    %2 = tpu.matmul %0, %1, %cst {dimension_numbers = #tpu.dot_dimension_numbers<[1], [0], [0], [1], [0, 0, 1, 1], [], []>} : vector<32x576xbf16>, vector<576x128xbf16>, vector<32x128xf32> -> vector<32x128xf32>
    %c0_3 = arith.constant 0 : index
    %c0_4 = arith.constant 0 : index
    %3 = vector.load %arg3[%c0_3, %c0_4] : memref<1x128xf32, #tpu.memory_space<vmem>>, vector<1x128xf32>
    %4 = vector.broadcast %3 : vector<1x128xf32> to vector<32x128xf32>
    %5 = arith.addf %2, %4 : vector<32x128xf32>
    %c0_5 = arith.constant 0 : index
    %c0_6 = arith.constant 0 : index
    %6 = vector.load %arg4[%c0_5, %c0_6] : memref<32x128xbf16, #tpu.memory_space<vmem>>, vector<32x128xbf16>
    %7 = arith.extf %6 : vector<32x128xbf16> to vector<32x128xf32>
    %8 = arith.addf %5, %7 : vector<32x128xf32>
    %cst_7 = arith.constant 0.000000e+00 : f32
    %9 = vector.broadcast %cst_7 : f32 to vector<32x128xf32>
    %10 = arith.maximumf %8, %9 : vector<32x128xf32>
    %11 = arith.truncf %10 : vector<32x128xf32> to vector<32x128xbf16>
    %c0_8 = arith.constant 0 : index
    %c0_9 = arith.constant 0 : index
    %12 = vector.load %arg5[%c0_8, %c0_9] : memref<32x128xbf16, #tpu.memory_space<vmem>>, vector<32x128xbf16>
    tpu.vector_store %arg5[%c0_8, %c0_9], %11 {strides = array<i32>} : memref<32x128xbf16, #tpu.memory_space<vmem>>, vector<32x128xbf16>,
    return
  }
  func.func @transform_0(%arg0: i32) -> (i32, i32) {
    %c0_i32 = arith.constant 0 : i32
    %c0_i32_0 = arith.constant 0 : i32
    return %arg0, %c0_i32 : i32, i32
  }
  func.func @transform_1(%arg0: i32) -> (i32, i32) {
    %c0_i32 = arith.constant 0 : i32
    %c0_i32_0 = arith.constant 0 : i32
    %c0_i32_1 = arith.constant 0 : i32
    return %c0_i32, %c0_i32_0 : i32, i32
  }
  func.func @transform_2(%arg0: i32) -> (i32, i32) {
    %c0_i32 = arith.constant 0 : i32
    %c0_i32_0 = arith.constant 0 : i32
    %c0_i32_1 = arith.constant 0 : i32
    return %c0_i32, %c0_i32_0 : i32, i32
  }
  func.func @transform_3(%arg0: i32) -> (i32, i32) {
    %c0_i32 = arith.constant 0 : i32
    %c0_i32_0 = arith.constant 0 : i32
    return %arg0, %c0_i32 : i32, i32
  }
  func.func @transform_4(%arg0: i32) -> (i32, i32) {
    %c0_i32 = arith.constant 0 : i32
    %c0_i32_0 = arith.constant 0 : i32
    return %arg0, %c0_i32 : i32, i32
  }
}

module attributes {stable_mosaic.version = 11 : i64} {
  func.func @_conv_bn_kernel(%arg0: i32, %arg1: memref<32x576xbf16, #tpu.memory_space<vmem>>, %arg2: memref<576x128xbf16, #tpu.memory_space<vmem>>, %arg3: memref<1x128xf32, #tpu.memory_space<vmem>>, %arg4: memref<32x128xbf16, #tpu.memory_space<vmem>>) attributes {dimension_semantics = [#tpu.dimension_semantics<parallel>], iteration_bounds = array<i64: 1>, scalar_prefetch = 0 : i64, scratch_operands = 0 : i64, tpu.core_type = #tpu.core_type<tc>, window_params = [{transform_indices = @transform_0, window_bounds = array<i64: 32, 576>}, {pipeline_mode = #tpu.pipeline_mode<synchronous>, transform_indices = @transform_1, window_bounds = array<i64: 576, 128>}, {pipeline_mode = #tpu.pipeline_mode<synchronous>, transform_indices = @transform_2, window_bounds = array<i64: 1, 128>}, {transform_indices = @transform_3, window_bounds = array<i64: 32, 128>}]} {
    %c0 = arith.constant 0 : index
    %c0_0 = arith.constant 0 : index
    %0 = vector.load %arg1[%c0, %c0_0] : memref<32x576xbf16, #tpu.memory_space<vmem>>, vector<32x576xbf16>
    %c0_1 = arith.constant 0 : index
    %c0_2 = arith.constant 0 : index
    %1 = vector.load %arg2[%c0_1, %c0_2] : memref<576x128xbf16, #tpu.memory_space<vmem>>, vector<576x128xbf16>
    %cst = arith.constant dense<0.000000e+00> : vector<32x128xf32>
    %2 = tpu.matmul %0, %1, %cst {dimension_numbers = #tpu.dot_dimension_numbers<[1], [0], [0], [1], [0, 0, 1, 1], [], []>} : vector<32x576xbf16>, vector<576x128xbf16>, vector<32x128xf32> -> vector<32x128xf32>
    %c0_3 = arith.constant 0 : index
    %c0_4 = arith.constant 0 : index
    %3 = vector.load %arg3[%c0_3, %c0_4] : memref<1x128xf32, #tpu.memory_space<vmem>>, vector<1x128xf32>
    %4 = vector.broadcast %3 : vector<1x128xf32> to vector<32x128xf32>
    %5 = arith.addf %2, %4 : vector<32x128xf32>
    %cst_5 = arith.constant 0.000000e+00 : f32
    %6 = vector.broadcast %cst_5 : f32 to vector<32x128xf32>
    %7 = arith.maximumf %5, %6 : vector<32x128xf32>
    %8 = arith.truncf %7 : vector<32x128xf32> to vector<32x128xbf16>
    %c0_6 = arith.constant 0 : index
    %c0_7 = arith.constant 0 : index
    %9 = vector.load %arg4[%c0_6, %c0_7] : memref<32x128xbf16, #tpu.memory_space<vmem>>, vector<32x128xbf16>
    tpu.vector_store %arg4[%c0_6, %c0_7], %8 {strides = array<i32>} : memref<32x128xbf16, #tpu.memory_space<vmem>>, vector<32x128xbf16>,
    return
  }
  func.func @transform_0(%arg0: i32) -> (i32, i32) {
    %c0_i32 = arith.constant 0 : i32
    %c0_i32_0 = arith.constant 0 : i32
    return %arg0, %c0_i32 : i32, i32
  }
  func.func @transform_1(%arg0: i32) -> (i32, i32) {
    %c0_i32 = arith.constant 0 : i32
    %c0_i32_0 = arith.constant 0 : i32
    %c0_i32_1 = arith.constant 0 : i32
    return %c0_i32, %c0_i32_0 : i32, i32
  }
  func.func @transform_2(%arg0: i32) -> (i32, i32) {
    %c0_i32 = arith.constant 0 : i32
    %c0_i32_0 = arith.constant 0 : i32
    %c0_i32_1 = arith.constant 0 : i32
    return %c0_i32, %c0_i32_0 : i32, i32
  }
  func.func @transform_3(%arg0: i32) -> (i32, i32) {
    %c0_i32 = arith.constant 0 : i32
    %c0_i32_0 = arith.constant 0 : i32
    return %arg0, %c0_i32 : i32, i32
  }
}

module attributes {stable_mosaic.version = 11 : i64} {
  func.func @_avgpool_kernel(%arg0: i32, %arg1: memref<2x16x128xbf16, #tpu.memory_space<vmem>>, %arg2: memref<2x128xf32, #tpu.memory_space<vmem>>) attributes {dimension_semantics = [#tpu.dimension_semantics<arbitrary>], iteration_bounds = array<i64: 1>, scalar_prefetch = 0 : i64, scratch_operands = 0 : i64, tpu.core_type = #tpu.core_type<tc>, window_params = [{pipeline_mode = #tpu.pipeline_mode<synchronous>, transform_indices = @transform_0, window_bounds = array<i64: 2, 16, 128>}, {pipeline_mode = #tpu.pipeline_mode<synchronous>, transform_indices = @transform_1, window_bounds = array<i64: 2, 128>}]} {
    %c0 = arith.constant 0 : index
    %c0_0 = arith.constant 0 : index
    %c0_1 = arith.constant 0 : index
    %0 = vector.load %arg1[%c0, %c0_0, %c0_1] : memref<2x16x128xbf16, #tpu.memory_space<vmem>>, vector<2x16x128xbf16>
    %1 = arith.extf %0 : vector<2x16x128xbf16> to vector<2x16x128xf32>
    %cst = arith.constant dense<0.000000e+00> : vector<2x128xf32>
    %2 = vector.multi_reduction <add>, %1, %cst [1] : vector<2x16x128xf32> to vector<2x128xf32>
    %cst_2 = arith.constant 1.600000e+01 : f32
    %3 = vector.broadcast %cst_2 : f32 to vector<2x128xf32>
    %4 = arith.divf %2, %3 : vector<2x128xf32>
    %c0_3 = arith.constant 0 : index
    %c0_4 = arith.constant 0 : index
    %5 = vector.load %arg2[%c0_3, %c0_4] : memref<2x128xf32, #tpu.memory_space<vmem>>, vector<2x128xf32>
    tpu.vector_store %arg2[%c0_3, %c0_4], %4 {strides = array<i32>} : memref<2x128xf32, #tpu.memory_space<vmem>>, vector<2x128xf32>,
    return
  }
  func.func @transform_0(%arg0: i32) -> (i32, i32, i32) {
    %c0_i32 = arith.constant 0 : i32
    %c0_i32_0 = arith.constant 0 : i32
    %c0_i32_1 = arith.constant 0 : i32
    %c0_i32_2 = arith.constant 0 : i32
    return %c0_i32, %c0_i32_0, %c0_i32_1 : i32, i32, i32
  }
  func.func @transform_1(%arg0: i32) -> (i32, i32) {
    %c0_i32 = arith.constant 0 : i32
    %c0_i32_0 = arith.constant 0 : i32
    %c0_i32_1 = arith.constant 0 : i32
    return %c0_i32, %c0_i32_0 : i32, i32
  }
}

</mosaic_0001>

<bundles_post_ra>
// kernel: resnet_features.22
= control target key start
LH: loop header
LB: loop body
LE: loop exit
PB: predicated region body
PF: predicated region fallthrough
CT: control target
= control target key end

     0   :  { %s3652_s12 = smov 0   ;;  %s4101_s0 = inlined_call_operand.vmem [shape: bf16[8192,147], index: 0, kind: input, shape index: {}]   ;;  %s4102_s1 = inlined_call_operand.vmem [shape: bf16[147,128], index: 1, kind: input, shape index: {}]   ;;  %s4103_s2 = inlined_call_operand.vmem [shape: f32[1,128], index: 2, kind: input, shape index: {}]   ;;  %s4104_s3 = inlined_call_operand.vmem [shape: bf16[8192,128], index: 3, kind: output, shape index: {}]  }
   0x1 LB: > { %s2534_s13 = sadd.s32 4294967295, %s3628_s12   ;;  %p2538_p0 = scmp.ge.s32.totalorder %s3628_s12, 1  ;;  %s3628_s12 = sphi %s3652_s12, %s13_s12  }
   0x2   : > { %p139_p1 = scmp.lt.s32.totalorder %s3628_s12, 9 }
   0x4   : > { %p140_p2 = pnand %p2538_p0, %p139_p1 }
   0x5   : > { %v3419_v0 = vld [vmem:[%s4102_s1] sm:$0xff] (!%p140_p2)   ;;  %v3630_v1 = vmov (!%p140_p2), 0   ;;  %v3420_v2 = vld [vmem:[%s4102_s1 + $0x8] sm:$0xff] (!%p140_p2)   ;;  %v3421_v3 = vld [vmem:[%s4102_s1 + $0x10] sm:$0xff] (!%p140_p2)   ;;  %s2539_s20 = sshll.u32 (!%p140_p2), %s2534_s13, 7  ;;  %vm965_vm0 = vcmask (!%p140_p2), 154624  }
   0x6   : > { %143 = sbr.rel (%p140_p2) target bundleno = 515 (0x203), region = 32  ;;  %1165 = vmatprep.subr.bf16.mxu0 (!%p140_p2), %v3630_v1  ;;  %3389 = vmatprep.subr.bf16.mxu1 (!%p140_p2), %v3630_v1  ;;  %p165_p3 = scmp.lt.s32.totalorder (!%p140_p2), %s2539_s20, 1023  ;;  %v3422_v4 = vld [vmem:[%s4102_s1 + $0x18] sm:$0xff] (!%p140_p2)   ;;  %v3423_v5 = vld [vmem:[%s4102_s1 + $0x20] sm:$0xff] (!%p140_p2)   ;;  %v3424_v8 = vld [vmem:[%s4102_s1 + $0x28] sm:$0xff] (!%p140_p2)   ;;  %vm1158_vm1 = vcmask (!%p140_p2), 1040384  }
   0x7   : > { %1166 = vmatpush1.bf16.msra.mxu0 (!%p140_p2), %v3419_v0  ;;  %3399 = vmatpush1.bf16.msra.mxu1 (!%p140_p2), %v3419_v0  ;;  %v3425_v9 = vld [vmem:[%s4102_s1 + $0x30] sm:$0xff] (!%p140_p2)   ;;  %v3426_v10 = vld [vmem:[%s4102_s1 + $0x38] sm:$0xff] (!%p140_p2)   ;;  %vm1159_vm2 = vcmask (!%p140_p2), 1041408   ;;  %v3631_v11 = vmov (!%p140_p2), 65535   ;;  %v3427_v13 = vld [vmem:[%s4102_s1 + $0x40] sm:$0xff] (!%p140_p2)  }
   0x8   : > { %1167 = vmatprep.subr.bf16.mxu0 (!%p140_p2), %v3630_v1  ;;  %3390 = vmatprep.subr.bf16.mxu1 (!%p140_p2), %v3630_v1  ;;  %v1160_v12 = vsel (!%p140_p2), %vm1158_vm1, 4294967295, %v3631_v11  ;;  %v3428_v14 = vld [vmem:[%s4102_s1 + $0x48] ss:$0 sps:$4 sm:$0x33] (!%p140_p2)  }
   0x9   : > { %v1161_v15 = vsel (!%p140_p2), %vm1159_vm2, %v1160_v12, 0 }
   0xa   : > { %v1163_v16 = vand.u32 (!%p140_p2), %v3428_v14, %v1161_v15 }
   0xb   : > { %1168 = vmatpush1.bf16.msra.mxu0 (!%p140_p2), %v3420_v2  ;;  %3400 = vmatpush1.bf16.msra.mxu1 (!%p140_p2), %v3420_v2 }
   0xc   : > { %1169 = vmatprep.subr.bf16.mxu0 (!%p140_p2), %v3630_v1  ;;  %3391 = vmatprep.subr.bf16.mxu1 (!%p140_p2), %v3630_v1 }
   0xd   : > { %s4106_s20 = smov (!%p165_p3, %s2539_s20), 1023 }
   0xe   : > { %s2877_s23 = sshll.u32 %s4106_s20, 3  ;;  %s2543_s15 = sshll.u32 %s4106_s20, 2 }
   0xf   : > { %1170 = vmatpush1.bf16.msra.mxu0 %v3421_v3  ;;  %3401 = vmatpush1.bf16.msra.mxu1 %v3421_v3  ;;  %s3678_s26 = scalar_lea.vmem %s4101_s0, %s2877_s23  ;;  %s3881_s18 = scalar_lea.vmem %s4104_s3, %s2543_s15 }
  0x10   : > { %1171 = vmatprep.subr.bf16.mxu0 %v3630_v1  ;;  %3392 = vmatprep.subr.bf16.mxu1 %v3630_v1  ;;  %v3431_v6 = vld [vmem:[%s3678_s26 + $0x4] ss:$8 sps:$4 sm:$0xff]   ;;  %v3429_v17 = vld [vmem:[%s3678_s26] ss:$8 sps:$4 sm:$0xff]   ;;  %v3435_v19 = vld [vmem:[%s3678_s26 + $0x14] ss:$8 sps:$4 sm:$0xff]  }
  0x11   : > { %v3434_v7 = vld [vmem:[%s3678_s26 + $0x204] ss:$8 sps:$4 sm:$0xff]   ;;  %2683 = vmatprep.mubr.msk.bf16.mxu0 %vm965_vm0, %v3431_v6  ;;  %v3432_v18 = vld [vmem:[%s3678_s26 + $0x200] ss:$8 sps:$4 sm:$0xff]   ;;  %v3437_v20 = vld [vmem:[%s3678_s26 + $0x214] ss:$8 sps:$4 sm:$0xff]  }
  0x12   : > { %2715 = vmatprep.mubr.msk.bf16.mxu1 %vm965_vm0, %v3434_v7  ;;  %v3439_v21 = vld [vmem:[%s3678_s26 + $0x10] ss:$8 sps:$4 sm:$0xff]   ;;  %v3441_v23 = vld [vmem:[%s3678_s26 + $0x24] ss:$8 sps:$4 sm:$0xff]   ;;  %v3445_v25 = vld [vmem:[%s3678_s26 + $0x20] ss:$8 sps:$4 sm:$0xff]  }
  0x13   : > { %1172 = vmatpush1.bf16.msra.mxu0 %v3422_v4  ;;  %3402 = vmatpush1.bf16.msra.mxu1 %v3422_v4  ;;  %v3440_v22 = vld [vmem:[%s3678_s26 + $0x210] ss:$8 sps:$4 sm:$0xff]   ;;  %v3443_v24 = vld [vmem:[%s3678_s26 + $0x224] ss:$8 sps:$4 sm:$0xff]   ;;  %v3446_v26 = vld [vmem:[%s3678_s26 + $0x220] ss:$8 sps:$4 sm:$0xff]  }
  0x14   : > { %1173 = vmatprep.subr.bf16.mxu0 %v3630_v1  ;;  %3393 = vmatprep.subr.bf16.mxu1 %v3630_v1  ;;  %v3447_v27 = vld [vmem:[%s3678_s26 + $0x34] ss:$8 sps:$4 sm:$0xff]   ;;  %v3451_v29 = vld [vmem:[%s3678_s26 + $0x30] ss:$8 sps:$4 sm:$0xff]   ;;  %v3453_v31 = vld [vmem:[%s3678_s26 + $0x44] ss:$8 sps:$4 sm:$0xff]  }
  0x15   : > { %v3449_v28 = vld [vmem:[%s3678_s26 + $0x234] ss:$8 sps:$4 sm:$0xff]   ;;  %v3452_v30 = vld [vmem:[%s3678_s26 + $0x230] ss:$8 sps:$4 sm:$0xff]   ;;  %v3455_v32 = vld [vmem:[%s3678_s26 + $0x244] ss:$8 sps:$4 sm:$0xff]  }
  0x16   : > { %v3457_v33 = vld [vmem:[%s3678_s26 + $0x40] ss:$8 sps:$4 sm:$0xff]   ;;  %v3459_v35 = vld [vmem:[%s3678_s26 + $0x54] ss:$8 sps:$4 sm:$0xff]   ;;  %v3463_v37 = vld [vmem:[%s3678_s26 + $0x50] ss:$8 sps:$4 sm:$0xff]  }
  0x17   : > { %1174 = vmatpush1.bf16.msra.mxu0 %v3423_v5  ;;  %3403 = vmatpush1.bf16.msra.mxu1 %v3423_v5  ;;  %v3458_v34 = vld [vmem:[%s3678_s26 + $0x240] ss:$8 sps:$4 sm:$0xff]   ;;  %v3461_v36 = vld [vmem:[%s3678_s26 + $0x254] ss:$8 sps:$4 sm:$0xff]   ;;  %v3464_v38 = vld [vmem:[%s3678_s26 + $0x250] ss:$8 sps:$4 sm:$0xff]  }
  0x18   : > { %1175 = vmatprep.subr.bf16.mxu0 %v3630_v1  ;;  %3394 = vmatprep.subr.bf16.mxu1 %v3630_v1  ;;  %v3465_v39 = vld [vmem:[%s3678_s26 + $0x64] ss:$8 sps:$4 sm:$0xff]   ;;  %v3469_v41 = vld [vmem:[%s3678_s26 + $0x60] ss:$8 sps:$4 sm:$0xff]   ;;  %v3471_v43 = vld [vmem:[%s3678_s26 + $0x74] ss:$8 sps:$4 sm:$0xff]  }
  0x19   : > { %v3467_v40 = vld [vmem:[%s3678_s26 + $0x264] ss:$8 sps:$4 sm:$0xff]   ;;  %v3470_v42 = vld [vmem:[%s3678_s26 + $0x260] ss:$8 sps:$4 sm:$0xff]   ;;  %v3473_v44 = vld [vmem:[%s3678_s26 + $0x274] ss:$8 sps:$4 sm:$0xff]  }
  0x1a   : > { %v3475_v45 = vld [vmem:[%s3678_s26 + $0x70] ss:$8 sps:$4 sm:$0xff]   ;;  %v3477_v47 = vld [vmem:[%s3678_s26 + $0x84] ss:$8 sps:$4 sm:$0xff]   ;;  %v3481_v49 = vld [vmem:[%s3678_s26 + $0x80] ss:$8 sps:$4 sm:$0xff]  }
  0x1b   : > { %1176 = vmatpush1.bf16.msra.mxu0 %v3424_v8  ;;  %3404 = vmatpush1.bf16.msra.mxu1 %v3424_v8  ;;  %v3476_v46 = vld [vmem:[%s3678_s26 + $0x270] ss:$8 sps:$4 sm:$0xff]   ;;  %v3479_v48 = vld [vmem:[%s3678_s26 + $0x284] ss:$8 sps:$4 sm:$0xff]   ;;  %v3482_v50 = vld [vmem:[%s3678_s26 + $0x280] ss:$8 sps:$4 sm:$0xff]  }
  0x1c   : > { %1177 = vmatprep.subr.bf16.mxu0 %v3630_v1  ;;  %3395 = vmatprep.subr.bf16.mxu1 %v3630_v1  ;;  %v3483_v51 = vld [vmem:[%s3678_s26 + $0x94] ss:$8 sps:$4 sm:$0xff]   ;;  %v3487_v53 = vld [vmem:[%s3678_s26 + $0x90] ss:$8 sps:$4 sm:$0xff]   ;;  %v3489_v55 = vld [vmem:[%s3678_s26 + $0xa4] ss:$8 sps:$4 sm:$0xff]  }
  0x1d   : > { %v3485_v52 = vld [vmem:[%s3678_s26 + $0x294] ss:$8 sps:$4 sm:$0xff]   ;;  %v3488_v54 = vld [vmem:[%s3678_s26 + $0x290] ss:$8 sps:$4 sm:$0xff]   ;;  %v3491_v56 = vld [vmem:[%s3678_s26 + $0x2a4] ss:$8 sps:$4 sm:$0xff]  }
  0x1e   : > { %v3493_v57 = vld [vmem:[%s3678_s26 + $0xa0] ss:$8 sps:$4 sm:$0xff]   ;;  %v3495_v59 = vld [vmem:[%s3678_s26 + $0xb4] ss:$8 sps:$4 sm:$0xff]   ;;  %v3499_v61 = vld [vmem:[%s3678_s26 + $0xb0] ss:$8 sps:$4 sm:$0xff]  }
  0x1f   : > { %1178 = vmatpush1.bf16.msra.mxu0 %v3425_v9  ;;  %3405 = vmatpush1.bf16.msra.mxu1 %v3425_v9  ;;  %v3494_v58 = vld [vmem:[%s3678_s26 + $0x2a0] ss:$8 sps:$4 sm:$0xff]   ;;  %v3497_v60 = vld [vmem:[%s3678_s26 + $0x2b4] ss:$8 sps:$4 sm:$0xff]   ;;  %v3500_v62 = vld [vmem:[%s3678_s26 + $0x2b0] ss:$8 sps:$4 sm:$0xff]  }
  0x20   : > { %1179 = vmatprep.subr.bf16.mxu0 %v3630_v1  ;;  %3396 = vmatprep.subr.bf16.mxu1 %v3630_v1  ;;  %v3501_v63 = vld [vmem:[%s3678_s26 + $0xc4] ss:$8 sps:$4 sm:$0xff]   ;;  %v3506_v2 = vld [vmem:[%s3678_s26 + $0x2c0] ss:$8 sps:$4 sm:$0xff]   ;;  %v3507_v3 = vld [vmem:[%s3678_s26 + $0xd4] ss:$8 sps:$4 sm:$0xff]  }
  0x21   : > { %v3503_v0 = vld [vmem:[%s3678_s26 + $0x2c4] ss:$8 sps:$4 sm:$0xff]   ;;  %v3509_v4 = vld [vmem:[%s3678_s26 + $0x2d4] ss:$8 sps:$4 sm:$0xff]   ;;  %v3511_v5 = vld [vmem:[%s3678_s26 + $0xd0] ss:$8 sps:$4 sm:$0xff]  }
  0x22   : > { %v3512_v6 = vld [vmem:[%s3678_s26 + $0x2d0] ss:$8 sps:$4 sm:$0xff]   ;;  %v3513_v7 = vld [vmem:[%s3678_s26 + $0xe4] ss:$8 sps:$4 sm:$0xff]   ;;  %v3517_v9 = vld [vmem:[%s3678_s26 + $0xe0] ss:$8 sps:$4 sm:$0xff]  }
  0x23   : > { %1180 = vmatpush1.bf16.msra.mxu0 %v3426_v10  ;;  %3406 = vmatpush1.bf16.msra.mxu1 %v3426_v10  ;;  %v3515_v8 = vld [vmem:[%s3678_s26 + $0x2e4] ss:$8 sps:$4 sm:$0xff]   ;;  %v3518_v10 = vld [vmem:[%s3678_s26 + $0x2e0] ss:$8 sps:$4 sm:$0xff]   ;;  %v3519_v11 = vld [vmem:[%s3678_s26 + $0xf4] ss:$8 sps:$4 sm:$0xff]  }
  0x24   : > { %1181 = vmatprep.subr.bf16.mxu0 %v3630_v1  ;;  %3397 = vmatprep.subr.bf16.mxu1 %v3630_v1  ;;  %v3521_v12 = vld [vmem:[%s3678_s26 + $0x2f4] ss:$8 sps:$4 sm:$0xff]   ;;  %v3524_v14 = vld [vmem:[%s3678_s26 + $0x2f0] ss:$8 sps:$4 sm:$0xff]   ;;  %v3525_v15 = vld [vmem:[%s3678_s26 + $0x104] ss:$8 sps:$4 sm:$0xff]  }
  0x27   : > { %1182 = vmatpush1.bf16.msra.mxu0 %v3427_v13  ;;  %3407 = vmatpush1.bf16.msra.mxu1 %v3427_v13  ;;  %v3523_v13 = vld [vmem:[%s3678_s26 + $0xf0] ss:$8 sps:$4 sm:$0xff]  }
  0x28   : > { %1183 = vmatprep.subr.bf16.mxu0 %v3630_v1  ;;  %3398 = vmatprep.subr.bf16.mxu1 %v3630_v1  ;;  %v3505_v1 = vld [vmem:[%s3678_s26 + $0xc0] ss:$8 sps:$4 sm:$0xff]  }
  0x2b   : > { %1184 = vmatpush1.bf16.msra.mxu0 %v1163_v16  ;;  %3408 = vmatpush1.bf16.msra.mxu1 %v1163_v16  ;;  %v3527_v16 = vld [vmem:[%s3678_s26 + $0x304] ss:$8 sps:$4 sm:$0xff]  }
  0x2e   : > { %1198 = vmatmul.mubr.bf16.vlgmr.msra.gmra.mrb[0].mxu0 %v3429_v17  ;;  %1454 = vmatmul.mubr.bf16.vlgmr.msra.gmra.mrb[0].mxu1 %v3432_v18  ;;  %v3529_v17 = vld [vmem:[%s3678_s26 + $0x100] ss:$8 sps:$4 sm:$0xff]  }
  0x2f   : > { %2684 = vmatprep.mubr.msk.bf16.mxu0 %vm965_vm0, %v3435_v19  ;;  %2716 = vmatprep.mubr.msk.bf16.mxu1 %vm965_vm0, %v3437_v20  ;;  %v3530_v18 = vld [vmem:[%s3678_s26 + $0x300] ss:$8 sps:$4 sm:$0xff]   ;;  %v3531_v19 = vld [vmem:[%s3678_s26 + $0x114] ss:$8 sps:$4 sm:$0xff]  }
  0x30   : > { %v3533_v20 = vld [vmem:[%s3678_s26 + $0x314] ss:$8 sps:$4 sm:$0xff]  }
  0x36   : > { %1206 = vmatmul.mubr.bf16.gmra.mrb[4].mxu0 %v3439_v21  ;;  %1462 = vmatmul.mubr.bf16.gmra.mrb[4].mxu1 %v3440_v22  ;;  %v3535_v21 = vld [vmem:[%s3678_s26 + $0x110] ss:$8 sps:$4 sm:$0xff]  }
  0x37   : > { %2685 = vmatprep.mubr.msk.bf16.mxu0 %vm965_vm0, %v3441_v23  ;;  %2717 = vmatprep.mubr.msk.bf16.mxu1 %vm965_vm0, %v3443_v24  ;;  %v3536_v22 = vld [vmem:[%s3678_s26 + $0x310] ss:$8 sps:$4 sm:$0xff]   ;;  %v3537_v23 = vld [vmem:[%s3678_s26 + $0x124] ss:$8 sps:$4 sm:$0xff]  }
  0x38   : > { %v3539_v24 = vld [vmem:[%s3678_s26 + $0x324] ss:$8 sps:$4 sm:$0xff]  }
  0x3e   : > { %1214 = vmatmul.mubr.bf16.gmra.mrb[8].mxu0 %v3445_v25  ;;  %1470 = vmatmul.mubr.bf16.gmra.mrb[8].mxu1 %v3446_v26  ;;  %v3541_v25 = vld [vmem:[%s3678_s26 + $0x120] ss:$8 sps:$4 sm:$0xff]  }
  0x3f   : > { %2686 = vmatprep.mubr.msk.bf16.mxu0 %vm965_vm0, %v3447_v27  ;;  %2718 = vmatprep.mubr.msk.bf16.mxu1 %vm965_vm0, %v3449_v28  ;;  %v3542_v26 = vld [vmem:[%s3678_s26 + $0x320] ss:$8 sps:$4 sm:$0xff]   ;;  %v3543_v27 = vld [vmem:[%s3678_s26 + $0x134] ss:$8 sps:$4 sm:$0xff]  }
  0x40   : > { %v3545_v28 = vld [vmem:[%s3678_s26 + $0x334] ss:$8 sps:$4 sm:$0xff]  }
  0x46   : > { %1222 = vmatmul.mubr.bf16.gmra.mrb[12].mxu0 %v3451_v29  ;;  %1478 = vmatmul.mubr.bf16.gmra.mrb[12].mxu1 %v3452_v30  ;;  %v3547_v29 = vld [vmem:[%s3678_s26 + $0x130] ss:$8 sps:$4 sm:$0xff]  }
  0x47   : > { %2687 = vmatprep.mubr.msk.bf16.mxu0 %vm965_vm0, %v3453_v31  ;;  %2719 = vmatprep.mubr.msk.bf16.mxu1 %vm965_vm0, %v3455_v32  ;;  %v3548_v30 = vld [vmem:[%s3678_s26 + $0x330] ss:$8 sps:$4 sm:$0xff]   ;;  %v3549_v31 = vld [vmem:[%s3678_s26 + $0x144] ss:$8 sps:$4 sm:$0xff]  }
  0x48   : > { %v3551_v32 = vld [vmem:[%s3678_s26 + $0x344] ss:$8 sps:$4 sm:$0xff]  }
  0x4e   : > { %1230 = vmatmul.mubr.bf16.gmra.mrb[16].mxu0 %v3457_v33  ;;  %1486 = vmatmul.mubr.bf16.gmra.mrb[16].mxu1 %v3458_v34  ;;  %v3553_v33 = vld [vmem:[%s3678_s26 + $0x140] ss:$8 sps:$4 sm:$0xff]  }
  0x4f   : > { %2688 = vmatprep.mubr.msk.bf16.mxu0 %vm965_vm0, %v3459_v35  ;;  %2720 = vmatprep.mubr.msk.bf16.mxu1 %vm965_vm0, %v3461_v36  ;;  %v3554_v34 = vld [vmem:[%s3678_s26 + $0x340] ss:$8 sps:$4 sm:$0xff]   ;;  %v3555_v35 = vld [vmem:[%s3678_s26 + $0x154] ss:$8 sps:$4 sm:$0xff]  }
  0x50   : > { %v3557_v36 = vld [vmem:[%s3678_s26 + $0x354] ss:$8 sps:$4 sm:$0xff]  }
  0x56   : > { %1238 = vmatmul.mubr.bf16.gmra.mrb[20].mxu0 %v3463_v37  ;;  %1494 = vmatmul.mubr.bf16.gmra.mrb[20].mxu1 %v3464_v38  ;;  %v3559_v37 = vld [vmem:[%s3678_s26 + $0x150] ss:$8 sps:$4 sm:$0xff]  }
  0x57   : > { %2689 = vmatprep.mubr.msk.bf16.mxu0 %vm965_vm0, %v3465_v39  ;;  %2721 = vmatprep.mubr.msk.bf16.mxu1 %vm965_vm0, %v3467_v40  ;;  %v3560_v38 = vld [vmem:[%s3678_s26 + $0x350] ss:$8 sps:$4 sm:$0xff]   ;;  %v3561_v39 = vld [vmem:[%s3678_s26 + $0x164] ss:$8 sps:$4 sm:$0xff]  }
  0x58   : > { %v3563_v40 = vld [vmem:[%s3678_s26 + $0x364] ss:$8 sps:$4 sm:$0xff]  }
  0x5e   : > { %1246 = vmatmul.mubr.bf16.gmra.mrb[24].mxu0 %v3469_v41  ;;  %1502 = vmatmul.mubr.bf16.gmra.mrb[24].mxu1 %v3470_v42  ;;  %v3565_v41 = vld [vmem:[%s3678_s26 + $0x160] ss:$8 sps:$4 sm:$0xff]  }
  0x5f   : > { %2690 = vmatprep.mubr.msk.bf16.mxu0 %vm965_vm0, %v3471_v43  ;;  %2722 = vmatprep.mubr.msk.bf16.mxu1 %vm965_vm0, %v3473_v44  ;;  %v3566_v42 = vld [vmem:[%s3678_s26 + $0x360] ss:$8 sps:$4 sm:$0xff]   ;;  %v3567_v43 = vld [vmem:[%s3678_s26 + $0x174] ss:$8 sps:$4 sm:$0xff]  }
  0x60   : > { %v3569_v44 = vld [vmem:[%s3678_s26 + $0x374] ss:$8 sps:$4 sm:$0xff]  }
  0x66   : > { %1254 = vmatmul.mubr.bf16.gmra.mrb[28].mxu0 %v3475_v45  ;;  %1510 = vmatmul.mubr.bf16.gmra.mrb[28].mxu1 %v3476_v46  ;;  %v3571_v45 = vld [vmem:[%s3678_s26 + $0x170] ss:$8 sps:$4 sm:$0xff]  }
  0x67   : > { %2691 = vmatprep.mubr.msk.bf16.mxu0 %vm965_vm0, %v3477_v47  ;;  %2723 = vmatprep.mubr.msk.bf16.mxu1 %vm965_vm0, %v3479_v48  ;;  %v3572_v46 = vld [vmem:[%s3678_s26 + $0x370] ss:$8 sps:$4 sm:$0xff]   ;;  %v3573_v47 = vld [vmem:[%s3678_s26 + $0x184] ss:$8 sps:$4 sm:$0xff]  }
  0x68   : > { %v3575_v48 = vld [vmem:[%s3678_s26 + $0x384] ss:$8 sps:$4 sm:$0xff]  }
  0x6e   : > { %1262 = vmatmul.mubr.bf16.gmra.mrb[32].mxu0 %v3481_v49  ;;  %1518 = vmatmul.mubr.bf16.gmra.mrb[32].mxu1 %v3482_v50  ;;  %v3577_v49 = vld [vmem:[%s3678_s26 + $0x180] ss:$8 sps:$4 sm:$0xff]  }
  0x6f   : > { %2692 = vmatprep.mubr.msk.bf16.mxu0 %vm965_vm0, %v3483_v51  ;;  %2724 = vmatprep.mubr.msk.bf16.mxu1 %vm965_vm0, %v3485_v52  ;;  %v3578_v50 = vld [vmem:[%s3678_s26 + $0x380] ss:$8 sps:$4 sm:$0xff]   ;;  %v3579_v51 = vld [vmem:[%s3678_s26 + $0x194] ss:$8 sps:$4 sm:$0xff]  }
  0x70   : > { %v3581_v52 = vld [vmem:[%s3678_s26 + $0x394] ss:$8 sps:$4 sm:$0xff]  }
  0x76   : > { %1270 = vmatmul.mubr.bf16.gmra.mrb[36].mxu0 %v3487_v53  ;;  %1526 = vmatmul.mubr.bf16.gmra.mrb[36].mxu1 %v3488_v54  ;;  %v3583_v53 = vld [vmem:[%s3678_s26 + $0x190] ss:$8 sps:$4 sm:$0xff]  }
  0x77   : > { %2693 = vmatprep.mubr.msk.bf16.mxu0 %vm965_vm0, %v3489_v55  ;;  %2725 = vmatprep.mubr.msk.bf16.mxu1 %vm965_vm0, %v3491_v56  ;;  %v3584_v54 = vld [vmem:[%s3678_s26 + $0x390] ss:$8 sps:$4 sm:$0xff]   ;;  %v3585_v55 = vld [vmem:[%s3678_s26 + $0x1a4] ss:$8 sps:$4 sm:$0xff]  }
  0x78   : > { %v3587_v56 = vld [vmem:[%s3678_s26 + $0x3a4] ss:$8 sps:$4 sm:$0xff]  }
  0x7e   : > { %1278 = vmatmul.mubr.bf16.gmra.mrb[40].mxu0 %v3493_v57  ;;  %1534 = vmatmul.mubr.bf16.gmra.mrb[40].mxu1 %v3494_v58  ;;  %v3589_v57 = vld [vmem:[%s3678_s26 + $0x1a0] ss:$8 sps:$4 sm:$0xff]  }
  0x7f   : > { %2694 = vmatprep.mubr.msk.bf16.mxu0 %vm965_vm0, %v3495_v59  ;;  %2726 = vmatprep.mubr.msk.bf16.mxu1 %vm965_vm0, %v3497_v60  ;;  %v3590_v58 = vld [vmem:[%s3678_s26 + $0x3a0] ss:$8 sps:$4 sm:$0xff]   ;;  %v3591_v59 = vld [vmem:[%s3678_s26 + $0x1b4] ss:$8 sps:$4 sm:$0xff]  }
  0x80   : > { %v3593_v60 = vld [vmem:[%s3678_s26 + $0x3b4] ss:$8 sps:$4 sm:$0xff]  }
  0x86   : > { %1286 = vmatmul.mubr.bf16.gmra.mrb[44].mxu0 %v3499_v61  ;;  %1542 = vmatmul.mubr.bf16.gmra.mrb[44].mxu1 %v3500_v62  ;;  %v3865_v61 = vld [vmem:[%s4103_s2] ss:$0 sm:$0xff] }
  0x87   : > { %2695 = vmatprep.mubr.msk.bf16.mxu0 %vm965_vm0, %v3501_v63  ;;  %2727 = vmatprep.mubr.msk.bf16.mxu1 %vm965_vm0, %v3503_v0 }
  0x8e   : > { %1294 = vmatmul.mubr.bf16.gmra.mrb[48].mxu0 %v3505_v1  ;;  %1550 = vmatmul.mubr.bf16.gmra.mrb[48].mxu1 %v3506_v2 }
  0x8f   : > { %2696 = vmatprep.mubr.msk.bf16.mxu0 %vm965_vm0, %v3507_v3  ;;  %2728 = vmatprep.mubr.msk.bf16.mxu1 %vm965_vm0, %v3509_v4  ;;  %v3595_v4 = vld [vmem:[%s3678_s26 + $0x1b0] ss:$8 sps:$4 sm:$0xff]  }
  0x96   : > { %1302 = vmatmul.mubr.bf16.gmra.mrb[52].mxu0 %v3511_v5  ;;  %1558 = vmatmul.mubr.bf16.gmra.mrb[52].mxu1 %v3512_v6  ;;  %v3596_v5 = vld [vmem:[%s3678_s26 + $0x3b0] ss:$8 sps:$4 sm:$0xff]  }
  0x97   : > { %2697 = vmatprep.mubr.msk.bf16.mxu0 %vm965_vm0, %v3513_v7  ;;  %2729 = vmatprep.mubr.msk.bf16.mxu1 %vm965_vm0, %v3515_v8  ;;  %v3597_v8 = vld [vmem:[%s3678_s26 + $0x1c4] ss:$8 sps:$4 sm:$0xff]  }
  0x9e   : > { %1310 = vmatmul.mubr.bf16.gmra.mrb[56].mxu0 %v3517_v9  ;;  %1566 = vmatmul.mubr.bf16.gmra.mrb[56].mxu1 %v3518_v10  ;;  %v3599_v9 = vld [vmem:[%s3678_s26 + $0x3c4] ss:$8 sps:$4 sm:$0xff]  }
  0x9f   : > { %2698 = vmatprep.mubr.msk.bf16.mxu0 %vm965_vm0, %v3519_v11  ;;  %2730 = vmatprep.mubr.msk.bf16.mxu1 %vm965_vm0, %v3521_v12 }
  0xa6   : > { %1318 = vmatmul.mubr.bf16.gmra.mrb[60].mxu0 %v3523_v13  ;;  %1574 = vmatmul.mubr.bf16.gmra.mrb[60].mxu1 %v3524_v14 }
  0xa7   : > { %2699 = vmatprep.mubr.msk.bf16.mxu0 %vm965_vm0, %v3525_v15  ;;  %2731 = vmatprep.mubr.msk.bf16.mxu1 %vm965_vm0, %v3527_v16 }
  0xae   : > { %1326 = vmatmul.mubr.bf16.gmra.mrb[64].mxu0 %v3529_v17  ;;  %1582 = vmatmul.mubr.bf16.gmra.mrb[64].mxu1 %v3530_v18 }
  0xaf   : > { %2700 = vmatprep.mubr.msk.bf16.mxu0 %vm965_vm0, %v3531_v19  ;;  %2732 = vmatprep.mubr.msk.bf16.mxu1 %vm965_vm0, %v3533_v20 }
  0xb6   : > { %1334 = vmatmul.mubr.bf16.gmra.mrb[68].mxu0 %v3535_v21  ;;  %1590 = vmatmul.mubr.bf16.gmra.mrb[68].mxu1 %v3536_v22 }
  0xb7   : > { %2701 = vmatprep.mubr.msk.bf16.mxu0 %vm965_vm0, %v3537_v23  ;;  %2733 = vmatprep.mubr.msk.bf16.mxu1 %vm965_vm0, %v3539_v24 }
  0xbe   : > { %1342 = vmatmul.mubr.bf16.gmra.mrb[72].mxu0 %v3541_v25  ;;  %1598 = vmatmul.mubr.bf16.gmra.mrb[72].mxu1 %v3542_v26  ;;  %v3601_v26 = vld [vmem:[%s3678_s26 + $0x1c0] ss:$8 sps:$4 sm:$0xff]  }
  0xbf   : > { %2702 = vmatprep.mubr.msk.bf16.mxu0 %vm965_vm0, %v3543_v27  ;;  %2734 = vmatprep.mubr.msk.bf16.mxu1 %vm965_vm0, %v3545_v28  ;;  %v3602_v27 = vld [vmem:[%s3678_s26 + $0x3c0] ss:$8 sps:$4 sm:$0xff]  }
  0xc6   : > { %1350 = vmatmul.mubr.bf16.gmra.mrb[76].mxu0 %v3547_v29  ;;  %1606 = vmatmul.mubr.bf16.gmra.mrb[76].mxu1 %v3548_v30  ;;  %v3603_v30 = vld [vmem:[%s3678_s26 + $0x1d4] ss:$8 sps:$4 sm:$0xff]  }
  0xc7   : > { %2703 = vmatprep.mubr.msk.bf16.mxu0 %vm965_vm0, %v3549_v31  ;;  %2735 = vmatprep.mubr.msk.bf16.mxu1 %vm965_vm0, %v3551_v32  ;;  %v3605_v31 = vld [vmem:[%s3678_s26 + $0x3d4] ss:$8 sps:$4 sm:$0xff]  }
  0xce   : > { %1358 = vmatmul.mubr.bf16.gmra.mrb[80].mxu0 %v3553_v33  ;;  %1614 = vmatmul.mubr.bf16.gmra.mrb[80].mxu1 %v3554_v34 }
  0xcf   : > { %2704 = vmatprep.mubr.msk.bf16.mxu0 %vm965_vm0, %v3555_v35  ;;  %2736 = vmatprep.mubr.msk.bf16.mxu1 %vm965_vm0, %v3557_v36 }
  0xd6   : > { %1366 = vmatmul.mubr.bf16.gmra.mrb[84].mxu0 %v3559_v37  ;;  %1622 = vmatmul.mubr.bf16.gmra.mrb[84].mxu1 %v3560_v38 }
  0xd7   : > { %2705 = vmatprep.mubr.msk.bf16.mxu0 %vm965_vm0, %v3561_v39  ;;  %2737 = vmatprep.mubr.msk.bf16.mxu1 %vm965_vm0, %v3563_v40 }
  0xde   : > { %1374 = vmatmul.mubr.bf16.gmra.mrb[88].mxu0 %v3565_v41  ;;  %1630 = vmatmul.mubr.bf16.gmra.mrb[88].mxu1 %v3566_v42 }
  0xdf   : > { %2706 = vmatprep.mubr.msk.bf16.mxu0 %vm965_vm0, %v3567_v43  ;;  %2738 = vmatprep.mubr.msk.bf16.mxu1 %vm965_vm0, %v3569_v44 }
  0xe6   : > { %1382 = vmatmul.mubr.bf16.gmra.mrb[92].mxu0 %v3571_v45  ;;  %1638 = vmatmul.mubr.bf16.gmra.mrb[92].mxu1 %v3572_v46 }
  0xe7   : > { %2707 = vmatprep.mubr.msk.bf16.mxu0 %vm965_vm0, %v3573_v47  ;;  %2739 = vmatprep.mubr.msk.bf16.mxu1 %vm965_vm0, %v3575_v48  ;;  %v3607_v48 = vld [vmem:[%s3678_s26 + $0x1d0] ss:$8 sps:$4 sm:$0xff]  }
  0xee   : > { %1390 = vmatmul.mubr.bf16.gmra.mrb[96].mxu0 %v3577_v49  ;;  %1646 = vmatmul.mubr.bf16.gmra.mrb[96].mxu1 %v3578_v50  ;;  %v3608_v49 = vld [vmem:[%s3678_s26 + $0x3d0] ss:$8 sps:$4 sm:$0xff]  }
  0xef   : > { %2708 = vmatprep.mubr.msk.bf16.mxu0 %vm965_vm0, %v3579_v51  ;;  %2740 = vmatprep.mubr.msk.bf16.mxu1 %vm965_vm0, %v3581_v52  ;;  %v3609_v52 = vld [vmem:[%s3678_s26 + $0x1e4] ss:$8 sps:$4 sm:$0xff]  }
  0xf6   : > { %1398 = vmatmul.mubr.bf16.gmra.mrb[100].mxu0 %v3583_v53  ;;  %1654 = vmatmul.mubr.bf16.gmra.mrb[100].mxu1 %v3584_v54  ;;  %v3611_v53 = vld [vmem:[%s3678_s26 + $0x3e4] ss:$8 sps:$4 sm:$0xff]  }
  0xf7   : > { %2709 = vmatprep.mubr.msk.bf16.mxu0 %vm965_vm0, %v3585_v55  ;;  %2741 = vmatprep.mubr.msk.bf16.mxu1 %vm965_vm0, %v3587_v56 }
  0xfe   : > { %1406 = vmatmul.mubr.bf16.gmra.mrb[104].mxu0 %v3589_v57  ;;  %1662 = vmatmul.mubr.bf16.gmra.mrb[104].mxu1 %v3590_v58 }
  0xff   : > { %2710 = vmatprep.mubr.msk.bf16.mxu0 %vm965_vm0, %v3591_v59  ;;  %2742 = vmatprep.mubr.msk.bf16.mxu1 %vm965_vm0, %v3593_v60 }
 0x101   : > { %v1199_v62 = vpop.f32.mrb[0].mxu0  ;;  %v1455_v63 = vpop.f32.mrb[0].mxu1 }
 0x102   : > { %v1200_v0 = vadd.f32 %v3865_v61, %v1199_v62  ;;  %v1456_v1 = vadd.f32 %v3865_v61, %v1455_v63  ;;  %v1201_v2 = vpop.f32.mrb[1].mxu0  ;;  %v1457_v3 = vpop.f32.mrb[1].mxu1 }
 0x103   : > { %v1202_v6 = vpop.f32.mrb[2].mxu0  ;;  %v1458_v7 = vpop.f32.mrb[2].mxu1 }
 0x104   : > { %v1203_v10 = vadd.f32 %v3865_v61, %v1202_v6  ;;  %v1459_v11 = vadd.f32 %v3865_v61, %v1458_v7  ;;  %v1204_v12 = vpop.f32.mrb[3].mxu0  ;;  %v1460_v13 = vpop.f32.mrb[3].mxu1  ;;  %v1710_v14 = vmax.f32 %v1200_v0, 0.0  ;;  %v1774_v15 = vmax.f32 %v1456_v1, 0.0  ;;  %v3613_v7 = vld [vmem:[%s3678_s26 + $0x1e0] ss:$8 sps:$4 sm:$0xff]  }
 0x105   : > { %v3617_v12 = vld [vmem:[%s3678_s26 + $0x3f4] ss:$8 sps:$4 sm:$0xff]  }
 0x106   : > { %v1711_v16 = vmax.f32 %v1203_v10, 0.0  ;;  %v1775_v17 = vmax.f32 %v1459_v11, 0.0  ;;  %1414 = vmatmul.mubr.bf16.gmra.mrb[108].mxu0 %v3595_v4  ;;  %1670 = vmatmul.mubr.bf16.gmra.mrb[108].mxu1 %v3596_v5  ;;  %v3615_v11 = vld [vmem:[%s3678_s26 + $0x1f4] ss:$8 sps:$4 sm:$0xff]  }
 0x107   : > { %2711 = vmatprep.mubr.msk.bf16.mxu0 %vm965_vm0, %v3597_v8  ;;  %2743 = vmatprep.mubr.msk.bf16.mxu1 %vm965_vm0, %v3599_v9  ;;  %v3614_v8 = vld [vmem:[%s3678_s26 + $0x3e0] ss:$8 sps:$4 sm:$0xff]  }
 0x108   : > { %v3009_v18 = vpack.c.bf16 %v1711_v16, %v1710_v14  ;;  %v3169_v19 = vpack.c.bf16 %v1775_v17, %v1774_v15 }
 0x109   : > { %v1207_v20 = vpop.f32.mrb[4].mxu0  ;;  %v1463_v21 = vpop.f32.mrb[4].mxu1 }
 0x10a   : > { %3010 = vst [vmem:[%s3881_s18] sm:$0xff] %v3009_v18   ;;  %3357 = vst [vmem:[%s3881_s18 + $0x100] sm:$0xff] %v3169_v19   ;;  %v1208_v22 = vadd.f32 %v3865_v61, %v1207_v20  ;;  %v1464_v23 = vadd.f32 %v3865_v61, %v1463_v21  ;;  %v1209_v24 = vpop.f32.mrb[5].mxu0  ;;  %v1465_v25 = vpop.f32.mrb[5].mxu1 }
 0x10b   : > { %v1210_v28 = vpop.f32.mrb[6].mxu0  ;;  %v1466_v29 = vpop.f32.mrb[6].mxu1 }
 0x10c   : > { %v1211_v32 = vadd.f32 %v3865_v61, %v1210_v28  ;;  %v1467_v33 = vadd.f32 %v3865_v61, %v1466_v29  ;;  %v1212_v34 = vpop.f32.mrb[7].mxu0  ;;  %v1468_v35 = vpop.f32.mrb[7].mxu1  ;;  %v1712_v36 = vmax.f32 %v1208_v22, 0.0  ;;  %v1776_v37 = vmax.f32 %v1464_v23, 0.0  ;;  %v3619_v29 = vld [vmem:[%s3678_s26 + $0x1f0] ss:$8 sps:$4 sm:$0xff]  }
 0x10e   : > { %v1713_v38 = vmax.f32 %v1211_v32, 0.0  ;;  %v1777_v39 = vmax.f32 %v1467_v33, 0.0  ;;  %1422 = vmatmul.mubr.bf16.gmra.mrb[112].mxu0 %v3601_v26  ;;  %1678 = vmatmul.mubr.bf16.gmra.mrb[112].mxu1 %v3602_v27 }
 0x10f   : > { %2712 = vmatprep.mubr.msk.bf16.mxu0 %vm965_vm0, %v3603_v30  ;;  %2744 = vmatprep.mubr.msk.bf16.mxu1 %vm965_vm0, %v3605_v31  ;;  %v3620_v30 = vld [vmem:[%s3678_s26 + $0x3f0] ss:$8 sps:$4 sm:$0xff]  }
 0x110   : > { %v3014_v40 = vpack.c.bf16 %v1713_v38, %v1712_v36  ;;  %v3174_v41 = vpack.c.bf16 %v1777_v39, %v1776_v37 }
 0x111   : > { %v1215_v42 = vpop.f32.mrb[8].mxu0  ;;  %v1471_v43 = vpop.f32.mrb[8].mxu1 }
 0x112   : > { %3326 = vst [vmem:[%s3881_s18 + $0x8] sm:$0xff] %v3014_v40   ;;  %3358 = vst [vmem:[%s3881_s18 + $0x108] sm:$0xff] %v3174_v41   ;;  %v1216_v44 = vadd.f32 %v3865_v61, %v1215_v42  ;;  %v1472_v45 = vadd.f32 %v3865_v61, %v1471_v43  ;;  %v1217_v46 = vpop.f32.mrb[9].mxu0  ;;  %v1473_v47 = vpop.f32.mrb[9].mxu1 }
 0x113   : > { %v1218_v50 = vpop.f32.mrb[10].mxu0  ;;  %v1474_v51 = vpop.f32.mrb[10].mxu1 }
 0x114   : > { %v1219_v54 = vadd.f32 %v3865_v61, %v1218_v50  ;;  %v1475_v55 = vadd.f32 %v3865_v61, %v1474_v51  ;;  %v1220_v56 = vpop.f32.mrb[11].mxu0  ;;  %v1476_v57 = vpop.f32.mrb[11].mxu1  ;;  %v1714_v58 = vmax.f32 %v1216_v44, 0.0  ;;  %v1778_v59 = vmax.f32 %v1472_v45, 0.0 }
 0x116   : > { %v1715_v60 = vmax.f32 %v1219_v54, 0.0  ;;  %v1779_v62 = vmax.f32 %v1475_v55, 0.0  ;;  %1430 = vmatmul.mubr.bf16.gmra.mrb[116].mxu0 %v3607_v48  ;;  %1686 = vmatmul.mubr.bf16.gmra.mrb[116].mxu1 %v3608_v49 }
 0x117   : > { %2713 = vmatprep.mubr.msk.bf16.mxu0 %vm965_vm0, %v3609_v52  ;;  %2745 = vmatprep.mubr.msk.bf16.mxu1 %vm965_vm0, %v3611_v53 }
 0x118   : > { %v3019_v63 = vpack.c.bf16 %v1715_v60, %v1714_v58  ;;  %v3179_v0 = vpack.c.bf16 %v1779_v62, %v1778_v59 }
 0x119   : > { %v1223_v1 = vpop.f32.mrb[12].mxu0  ;;  %v1479_v2 = vpop.f32.mrb[12].mxu1 }
 0x11a   : > { %3327 = vst [vmem:[%s3881_s18 + $0x10] sm:$0xff] %v3019_v63   ;;  %3359 = vst [vmem:[%s3881_s18 + $0x110] sm:$0xff] %v3179_v0   ;;  %v1224_v3 = vadd.f32 %v3865_v61, %v1223_v1  ;;  %v1480_v4 = vadd.f32 %v3865_v61, %v1479_v2  ;;  %v1225_v5 = vpop.f32.mrb[13].mxu0  ;;  %v1481_v6 = vpop.f32.mrb[13].mxu1 }
 0x11b   : > { %v1226_v9 = vpop.f32.mrb[14].mxu0  ;;  %v1482_v10 = vpop.f32.mrb[14].mxu1 }
 0x11c   : > { %v1227_v13 = vadd.f32 %v3865_v61, %v1226_v9  ;;  %v1483_v14 = vadd.f32 %v3865_v61, %v1482_v10  ;;  %v1228_v15 = vpop.f32.mrb[15].mxu0  ;;  %v1484_v16 = vpop.f32.mrb[15].mxu1  ;;  %v1716_v17 = vmax.f32 %v1224_v3, 0.0  ;;  %v1780_v18 = vmax.f32 %v1480_v4, 0.0 }
 0x11e   : > { %v1717_v19 = vmax.f32 %v1227_v13, 0.0  ;;  %v1781_v20 = vmax.f32 %v1483_v14, 0.0  ;;  %1438 = vmatmul.mubr.bf16.gmra.mrb[120].mxu0 %v3613_v7  ;;  %1694 = vmatmul.mubr.bf16.gmra.mrb[120].mxu1 %v3614_v8 }
 0x11f   : > { %2714 = vmatprep.mubr.msk.bf16.mxu0 %vm965_vm0, %v3615_v11  ;;  %2746 = vmatprep.mubr.msk.bf16.mxu1 %vm965_vm0, %v3617_v12 }
 0x120   : > { %v3024_v21 = vpack.c.bf16 %v1717_v19, %v1716_v17  ;;  %v3184_v22 = vpack.c.bf16 %v1781_v20, %v1780_v18 }
 0x121   : > { %v1231_v23 = vpop.f32.mrb[16].mxu0  ;;  %v1487_v24 = vpop.f32.mrb[16].mxu1 }
 0x122   : > { %3328 = vst [vmem:[%s3881_s18 + $0x18] sm:$0xff] %v3024_v21   ;;  %3360 = vst [vmem:[%s3881_s18 + $0x118] sm:$0xff] %v3184_v22   ;;  %v1232_v25 = vadd.f32 %v3865_v61, %v1231_v23  ;;  %v1488_v26 = vadd.f32 %v3865_v61, %v1487_v24  ;;  %v1233_v27 = vpop.f32.mrb[17].mxu0  ;;  %v1489_v28 = vpop.f32.mrb[17].mxu1 }
 0x123   : > { %v1234_v31 = vpop.f32.mrb[18].mxu0  ;;  %v1490_v32 = vpop.f32.mrb[18].mxu1 }
 0x124   : > { %v1235_v33 = vadd.f32 %v3865_v61, %v1234_v31  ;;  %v1491_v34 = vadd.f32 %v3865_v61, %v1490_v32  ;;  %v1236_v35 = vpop.f32.mrb[19].mxu0  ;;  %v1492_v36 = vpop.f32.mrb[19].mxu1  ;;  %v1718_v37 = vmax.f32 %v1232_v25, 0.0  ;;  %v1782_v38 = vmax.f32 %v1488_v26, 0.0 }
 0x126   : > { %v1719_v39 = vmax.f32 %v1235_v33, 0.0  ;;  %v1783_v40 = vmax.f32 %v1491_v34, 0.0  ;;  %1446 = vmatmul.mubr.bf16.gmra.mrb[124].mxu0 %v3619_v29  ;;  %1702 = vmatmul.mubr.bf16.gmra.mrb[124].mxu1 %v3620_v30 }
 0x128   : > { %v3029_v41 = vpack.c.bf16 %v1719_v39, %v1718_v37  ;;  %v3189_v42 = vpack.c.bf16 %v1783_v40, %v1782_v38 }
 0x129   : > { %v1239_v43 = vpop.f32.mrb[20].mxu0  ;;  %v1495_v44 = vpop.f32.mrb[20].mxu1 }
 0x12a   : > { %3329 = vst [vmem:[%s3881_s18 + $0x20] sm:$0xff] %v3029_v41   ;;  %3361 = vst [vmem:[%s3881_s18 + $0x120] sm:$0xff] %v3189_v42   ;;  %v1240_v45 = vadd.f32 %v3865_v61, %v1239_v43  ;;  %v1496_v46 = vadd.f32 %v3865_v61, %v1495_v44  ;;  %v1241_v47 = vpop.f32.mrb[21].mxu0  ;;  %v1497_v48 = vpop.f32.mrb[21].mxu1 }
 0x12b   : > { %v1242_v49 = vpop.f32.mrb[22].mxu0  ;;  %v1498_v50 = vpop.f32.mrb[22].mxu1 }
 0x12c   : > { %v1243_v51 = vadd.f32 %v3865_v61, %v1242_v49  ;;  %v1499_v52 = vadd.f32 %v3865_v61, %v1498_v50  ;;  %v1244_v53 = vpop.f32.mrb[23].mxu0  ;;  %v1500_v54 = vpop.f32.mrb[23].mxu1  ;;  %v1720_v55 = vmax.f32 %v1240_v45, 0.0  ;;  %v1784_v56 = vmax.f32 %v1496_v46, 0.0 }
 0x12e   : > { %v1721_v57 = vmax.f32 %v1243_v51, 0.0  ;;  %v1785_v58 = vmax.f32 %v1499_v52, 0.0 }
 0x130   : > { %v3034_v59 = vpack.c.bf16 %v1721_v57, %v1720_v55  ;;  %v3194_v60 = vpack.c.bf16 %v1785_v58, %v1784_v56 }
 0x131   : > { %v1247_v62 = vpop.f32.mrb[24].mxu0  ;;  %v1503_v63 = vpop.f32.mrb[24].mxu1 }
 0x132   : > { %3330 = vst [vmem:[%s3881_s18 + $0x28] sm:$0xff] %v3034_v59   ;;  %3362 = vst [vmem:[%s3881_s18 + $0x128] sm:$0xff] %v3194_v60   ;;  %v1248_v0 = vadd.f32 %v3865_v61, %v1247_v62  ;;  %v1504_v1 = vadd.f32 %v3865_v61, %v1503_v63  ;;  %v1249_v2 = vpop.f32.mrb[25].mxu0  ;;  %v1505_v3 = vpop.f32.mrb[25].mxu1 }
 0x133   : > { %v1250_v4 = vpop.f32.mrb[26].mxu0  ;;  %v1506_v5 = vpop.f32.mrb[26].mxu1 }
 0x134   : > { %v1251_v6 = vadd.f32 %v3865_v61, %v1250_v4  ;;  %v1507_v7 = vadd.f32 %v3865_v61, %v1506_v5  ;;  %v1252_v8 = vpop.f32.mrb[27].mxu0  ;;  %v1508_v9 = vpop.f32.mrb[27].mxu1  ;;  %v1722_v10 = vmax.f32 %v1248_v0, 0.0  ;;  %v1786_v11 = vmax.f32 %v1504_v1, 0.0 }
 0x136   : > { %v1723_v12 = vmax.f32 %v1251_v6, 0.0  ;;  %v1787_v13 = vmax.f32 %v1507_v7, 0.0 }
 0x138   : > { %v3039_v14 = vpack.c.bf16 %v1723_v12, %v1722_v10  ;;  %v3199_v15 = vpack.c.bf16 %v1787_v13, %v1786_v11 }
 0x139   : > { %v1255_v16 = vpop.f32.mrb[28].mxu0  ;;  %v1511_v17 = vpop.f32.mrb[28].mxu1 }
 0x13a   : > { %3331 = vst [vmem:[%s3881_s18 + $0x30] sm:$0xff] %v3039_v14   ;;  %3363 = vst [vmem:[%s3881_s18 + $0x130] sm:$0xff] %v3199_v15   ;;  %v1256_v18 = vadd.f32 %v3865_v61, %v1255_v16  ;;  %v1512_v19 = vadd.f32 %v3865_v61, %v1511_v17  ;;  %v1257_v20 = vpop.f32.mrb[29].mxu0  ;;  %v1513_v21 = vpop.f32.mrb[29].mxu1 }
 0x13b   : > { %v1258_v22 = vpop.f32.mrb[30].mxu0  ;;  %v1514_v23 = vpop.f32.mrb[30].mxu1 }
 0x13c   : > { %v1259_v24 = vadd.f32 %v3865_v61, %v1258_v22  ;;  %v1515_v25 = vadd.f32 %v3865_v61, %v1514_v23  ;;  %v1260_v26 = vpop.f32.mrb[31].mxu0  ;;  %v1516_v27 = vpop.f32.mrb[31].mxu1  ;;  %v1724_v28 = vmax.f32 %v1256_v18, 0.0  ;;  %v1788_v29 = vmax.f32 %v1512_v19, 0.0 }
 0x13e   : > { %v1725_v30 = vmax.f32 %v1259_v24, 0.0  ;;  %v1789_v31 = vmax.f32 %v1515_v25, 0.0 }
 0x140   : > { %v3044_v32 = vpack.c.bf16 %v1725_v30, %v1724_v28  ;;  %v3204_v33 = vpack.c.bf16 %v1789_v31, %v1788_v29 }
 0x141   : > { %v1263_v34 = vpop.f32.mrb[32].mxu0  ;;  %v1519_v35 = vpop.f32.mrb[32].mxu1 }
 0x142   : > { %3332 = vst [vmem:[%s3881_s18 + $0x38] sm:$0xff] %v3044_v32   ;;  %3364 = vst [vmem:[%s3881_s18 + $0x138] sm:$0xff] %v3204_v33   ;;  %v1264_v36 = vadd.f32 %v3865_v61, %v1263_v34  ;;  %v1520_v37 = vadd.f32 %v3865_v61, %v1519_v35  ;;  %v1265_v38 = vpop.f32.mrb[33].mxu0  ;;  %v1521_v39 = vpop.f32.mrb[33].mxu1 }
 0x143   : > { %v1266_v40 = vpop.f32.mrb[34].mxu0  ;;  %v1522_v41 = vpop.f32.mrb[34].mxu1 }
 0x144   : > { %v1267_v42 = vadd.f32 %v3865_v61, %v1266_v40  ;;  %v1523_v43 = vadd.f32 %v3865_v61, %v1522_v41  ;;  %v1268_v44 = vpop.f32.mrb[35].mxu0  ;;  %v1524_v45 = vpop.f32.mrb[35].mxu1  ;;  %v1726_v46 = vmax.f32 %v1264_v36, 0.0  ;;  %v1790_v47 = vmax.f32 %v1520_v37, 0.0 }
 0x146   : > { %v1727_v48 = vmax.f32 %v1267_v42, 0.0  ;;  %v1791_v49 = vmax.f32 %v1523_v43, 0.0 }
 0x148   : > { %v3049_v50 = vpack.c.bf16 %v1727_v48, %v1726_v46  ;;  %v3209_v51 = vpack.c.bf16 %v1791_v49, %v1790_v47 }
 0x149   : > { %v1271_v52 = vpop.f32.mrb[36].mxu0  ;;  %v1527_v53 = vpop.f32.mrb[36].mxu1 }
 0x14a   : > { %3333 = vst [vmem:[%s3881_s18 + $0x40] sm:$0xff] %v3049_v50   ;;  %3365 = vst [vmem:[%s3881_s18 + $0x140] sm:$0xff] %v3209_v51   ;;  %v1272_v54 = vadd.f32 %v3865_v61, %v1271_v52  ;;  %v1528_v55 = vadd.f32 %v3865_v61, %v1527_v53  ;;  %v1273_v56 = vpop.f32.mrb[37].mxu0  ;;  %v1529_v57 = vpop.f32.mrb[37].mxu1 }
 0x14b   : > { %v1274_v58 = vpop.f32.mrb[38].mxu0  ;;  %v1530_v59 = vpop.f32.mrb[38].mxu1 }
 0x14c   : > { %v1275_v60 = vadd.f32 %v3865_v61, %v1274_v58  ;;  %v1531_v62 = vadd.f32 %v3865_v61, %v1530_v59  ;;  %v1276_v63 = vpop.f32.mrb[39].mxu0  ;;  %v1532_v0 = vpop.f32.mrb[39].mxu1  ;;  %v1728_v1 = vmax.f32 %v1272_v54, 0.0  ;;  %v1792_v2 = vmax.f32 %v1528_v55, 0.0 }
 0x14e   : > { %v1729_v3 = vmax.f32 %v1275_v60, 0.0  ;;  %v1793_v4 = vmax.f32 %v1531_v62, 0.0 }
 0x150   : > { %v3054_v5 = vpack.c.bf16 %v1729_v3, %v1728_v1  ;;  %v3214_v6 = vpack.c.bf16 %v1793_v4, %v1792_v2 }
 0x151   : > { %v1279_v7 = vpop.f32.mrb[40].mxu0  ;;  %v1535_v8 = vpop.f32.mrb[40].mxu1 }
 0x152   : > { %3334 = vst [vmem:[%s3881_s18 + $0x48] sm:$0xff] %v3054_v5   ;;  %3366 = vst [vmem:[%s3881_s18 + $0x148] sm:$0xff] %v3214_v6   ;;  %v1280_v9 = vadd.f32 %v3865_v61, %v1279_v7  ;;  %v1536_v10 = vadd.f32 %v3865_v61, %v1535_v8  ;;  %v1281_v11 = vpop.f32.mrb[41].mxu0  ;;  %v1537_v12 = vpop.f32.mrb[41].mxu1 }
 0x153   : > { %v1282_v13 = vpop.f32.mrb[42].mxu0  ;;  %v1538_v14 = vpop.f32.mrb[42].mxu1 }
 0x154   : > { %v1283_v15 = vadd.f32 %v3865_v61, %v1282_v13  ;;  %v1539_v16 = vadd.f32 %v3865_v61, %v1538_v14  ;;  %v1284_v17 = vpop.f32.mrb[43].mxu0  ;;  %v1540_v18 = vpop.f32.mrb[43].mxu1  ;;  %v1730_v19 = vmax.f32 %v1280_v9, 0.0  ;;  %v1794_v20 = vmax.f32 %v1536_v10, 0.0 }
 0x156   : > { %v1731_v21 = vmax.f32 %v1283_v15, 0.0  ;;  %v1795_v22 = vmax.f32 %v1539_v16, 0.0 }
 0x158   : > { %v3059_v23 = vpack.c.bf16 %v1731_v21, %v1730_v19  ;;  %v3219_v24 = vpack.c.bf16 %v1795_v22, %v1794_v20 }
 0x159   : > { %v1287_v25 = vpop.f32.mrb[44].mxu0  ;;  %v1543_v26 = vpop.f32.mrb[44].mxu1 }
 0x15a   : > { %3335 = vst [vmem:[%s3881_s18 + $0x50] sm:$0xff] %v3059_v23   ;;  %3367 = vst [vmem:[%s3881_s18 + $0x150] sm:$0xff] %v3219_v24   ;;  %v1288_v27 = vadd.f32 %v3865_v61, %v1287_v25  ;;  %v1544_v28 = vadd.f32 %v3865_v61, %v1543_v26  ;;  %v1289_v29 = vpop.f32.mrb[45].mxu0  ;;  %v1545_v30 = vpop.f32.mrb[45].mxu1 }
 0x15b   : > { %v1290_v31 = vpop.f32.mrb[46].mxu0  ;;  %v1546_v32 = vpop.f32.mrb[46].mxu1 }
 0x15c   : > { %v1291_v33 = vadd.f32 %v3865_v61, %v1290_v31  ;;  %v1547_v34 = vadd.f32 %v3865_v61, %v1546_v32  ;;  %v1292_v35 = vpop.f32.mrb[47].mxu0  ;;  %v1548_v36 = vpop.f32.mrb[47].mxu1  ;;  %v1732_v37 = vmax.f32 %v1288_v27, 0.0  ;;  %v1796_v38 = vmax.f32 %v1544_v28, 0.0 }
 0x15e   : > { %v1733_v39 = vmax.f32 %v1291_v33, 0.0  ;;  %v1797_v40 = vmax.f32 %v1547_v34, 0.0 }
 0x160   : > { %v3064_v41 = vpack.c.bf16 %v1733_v39, %v1732_v37  ;;  %v3224_v42 = vpack.c.bf16 %v1797_v40, %v1796_v38 }
 0x161   : > { %v1295_v43 = vpop.f32.mrb[48].mxu0  ;;  %v1551_v44 = vpop.f32.mrb[48].mxu1 }
 0x162   : > { %3336 = vst [vmem:[%s3881_s18 + $0x58] sm:$0xff] %v3064_v41   ;;  %3368 = vst [vmem:[%s3881_s18 + $0x158] sm:$0xff] %v3224_v42   ;;  %v1296_v45 = vadd.f32 %v3865_v61, %v1295_v43  ;;  %v1552_v46 = vadd.f32 %v3865_v61, %v1551_v44  ;;  %v1297_v47 = vpop.f32.mrb[49].mxu0  ;;  %v1553_v48 = vpop.f32.mrb[49].mxu1 }
 0x163   : > { %v1298_v49 = vpop.f32.mrb[50].mxu0  ;;  %v1554_v50 = vpop.f32.mrb[50].mxu1 }
 0x164   : > { %v1299_v51 = vadd.f32 %v3865_v61, %v1298_v49  ;;  %v1555_v52 = vadd.f32 %v3865_v61, %v1554_v50  ;;  %v1300_v53 = vpop.f32.mrb[51].mxu0  ;;  %v1556_v54 = vpop.f32.mrb[51].mxu1  ;;  %v1734_v55 = vmax.f32 %v1296_v45, 0.0  ;;  %v1798_v56 = vmax.f32 %v1552_v46, 0.0 }
 0x166   : > { %v1735_v57 = vmax.f32 %v1299_v51, 0.0  ;;  %v1799_v58 = vmax.f32 %v1555_v52, 0.0 }
 0x168   : > { %v3069_v59 = vpack.c.bf16 %v1735_v57, %v1734_v55  ;;  %v3229_v60 = vpack.c.bf16 %v1799_v58, %v1798_v56 }
 0x169   : > { %v1303_v62 = vpop.f32.mrb[52].mxu0  ;;  %v1559_v63 = vpop.f32.mrb[52].mxu1 }
 0x16a   : > { %3337 = vst [vmem:[%s3881_s18 + $0x60] sm:$0xff] %v3069_v59   ;;  %3369 = vst [vmem:[%s3881_s18 + $0x160] sm:$0xff] %v3229_v60   ;;  %v1304_v0 = vadd.f32 %v3865_v61, %v1303_v62  ;;  %v1560_v1 = vadd.f32 %v3865_v61, %v1559_v63  ;;  %v1305_v2 = vpop.f32.mrb[53].mxu0  ;;  %v1561_v3 = vpop.f32.mrb[53].mxu1 }
 0x16b   : > { %v1306_v4 = vpop.f32.mrb[54].mxu0  ;;  %v1562_v5 = vpop.f32.mrb[54].mxu1 }
 0x16c   : > { %v1307_v6 = vadd.f32 %v3865_v61, %v1306_v4  ;;  %v1563_v7 = vadd.f32 %v3865_v61, %v1562_v5  ;;  %v1308_v8 = vpop.f32.mrb[55].mxu0  ;;  %v1564_v9 = vpop.f32.mrb[55].mxu1  ;;  %v1736_v10 = vmax.f32 %v1304_v0, 0.0  ;;  %v1800_v11 = vmax.f32 %v1560_v1, 0.0 }
 0x16e   : > { %v1737_v12 = vmax.f32 %v1307_v6, 0.0  ;;  %v1801_v13 = vmax.f32 %v1563_v7, 0.0 }
 0x170   : > { %v3074_v14 = vpack.c.bf16 %v1737_v12, %v1736_v10  ;;  %v3234_v15 = vpack.c.bf16 %v1801_v13, %v1800_v11 }
 0x171   : > { %v1311_v16 = vpop.f32.mrb[56].mxu0  ;;  %v1567_v17 = vpop.f32.mrb[56].mxu1 }
 0x172   : > { %3338 = vst [vmem:[%s3881_s18 + $0x68] sm:$0xff] %v3074_v14   ;;  %3370 = vst [vmem:[%s3881_s18 + $0x168] sm:$0xff] %v3234_v15   ;;  %v1312_v18 = vadd.f32 %v3865_v61, %v1311_v16  ;;  %v1568_v19 = vadd.f32 %v3865_v61, %v1567_v17  ;;  %v1313_v20 = vpop.f32.mrb[57].mxu0  ;;  %v1569_v21 = vpop.f32.mrb[57].mxu1 }
 0x173   : > { %v1314_v22 = vpop.f32.mrb[58].mxu0  ;;  %v1570_v23 = vpop.f32.mrb[58].mxu1 }
 0x174   : > { %v1315_v24 = vadd.f32 %v3865_v61, %v1314_v22  ;;  %v1571_v25 = vadd.f32 %v3865_v61, %v1570_v23  ;;  %v1316_v26 = vpop.f32.mrb[59].mxu0  ;;  %v1572_v27 = vpop.f32.mrb[59].mxu1  ;;  %v1738_v28 = vmax.f32 %v1312_v18, 0.0  ;;  %v1802_v29 = vmax.f32 %v1568_v19, 0.0 }
 0x176   : > { %v1739_v30 = vmax.f32 %v1315_v24, 0.0  ;;  %v1803_v31 = vmax.f32 %v1571_v25, 0.0 }
 0x178   : > { %v3079_v32 = vpack.c.bf16 %v1739_v30, %v1738_v28  ;;  %v3239_v33 = vpack.c.bf16 %v1803_v31, %v1802_v29 }
 0x179   : > { %v1319_v34 = vpop.f32.mrb[60].mxu0  ;;  %v1575_v35 = vpop.f32.mrb[60].mxu1 }
 0x17a   : > { %3339 = vst [vmem:[%s3881_s18 + $0x70] sm:$0xff] %v3079_v32   ;;  %3371 = vst [vmem:[%s3881_s18 + $0x170] sm:$0xff] %v3239_v33   ;;  %v1320_v36 = vadd.f32 %v3865_v61, %v1319_v34  ;;  %v1576_v37 = vadd.f32 %v3865_v61, %v1575_v35  ;;  %v1321_v38 = vpop.f32.mrb[61].mxu0  ;;  %v1577_v39 = vpop.f32.mrb[61].mxu1 }
 0x17b   : > { %v1322_v40 = vpop.f32.mrb[62].mxu0  ;;  %v1578_v41 = vpop.f32.mrb[62].mxu1 }
 0x17c   : > { %v1323_v42 = vadd.f32 %v3865_v61, %v1322_v40  ;;  %v1579_v43 = vadd.f32 %v3865_v61, %v1578_v41  ;;  %v1324_v44 = vpop.f32.mrb[63].mxu0  ;;  %v1580_v45 = vpop.f32.mrb[63].mxu1  ;;  %v1740_v46 = vmax.f32 %v1320_v36, 0.0  ;;  %v1804_v47 = vmax.f32 %v1576_v37, 0.0 }
 0x17e   : > { %v1741_v48 = vmax.f32 %v1323_v42, 0.0  ;;  %v1805_v49 = vmax.f32 %v1579_v43, 0.0 }
 0x180   : > { %v3084_v50 = vpack.c.bf16 %v1741_v48, %v1740_v46  ;;  %v3244_v51 = vpack.c.bf16 %v1805_v49, %v1804_v47 }
 0x181   : > { %v1327_v52 = vpop.f32.mrb[64].mxu0  ;;  %v1583_v53 = vpop.f32.mrb[64].mxu1 }
 0x182   : > { %3340 = vst [vmem:[%s3881_s18 + $0x78] sm:$0xff] %v3084_v50   ;;  %3372 = vst [vmem:[%s3881_s18 + $0x178] sm:$0xff] %v3244_v51   ;;  %v1328_v54 = vadd.f32 %v3865_v61, %v1327_v52  ;;  %v1584_v55 = vadd.f32 %v3865_v61, %v1583_v53  ;;  %v1329_v56 = vpop.f32.mrb[65].mxu0  ;;  %v1585_v57 = vpop.f32.mrb[65].mxu1 }
 0x183   : > { %v1330_v58 = vpop.f32.mrb[66].mxu0  ;;  %v1586_v59 = vpop.f32.mrb[66].mxu1 }
 0x184   : > { %v1331_v60 = vadd.f32 %v3865_v61, %v1330_v58  ;;  %v1587_v62 = vadd.f32 %v3865_v61, %v1586_v59  ;;  %v1332_v63 = vpop.f32.mrb[67].mxu0  ;;  %v1588_v0 = vpop.f32.mrb[67].mxu1  ;;  %v1742_v1 = vmax.f32 %v1328_v54, 0.0  ;;  %v1806_v2 = vmax.f32 %v1584_v55, 0.0 }
 0x186   : > { %v1743_v3 = vmax.f32 %v1331_v60, 0.0  ;;  %v1807_v4 = vmax.f32 %v1587_v62, 0.0 }
 0x188   : > { %v3089_v5 = vpack.c.bf16 %v1743_v3, %v1742_v1  ;;  %v3249_v6 = vpack.c.bf16 %v1807_v4, %v1806_v2 }
 0x189   : > { %v1335_v7 = vpop.f32.mrb[68].mxu0  ;;  %v1591_v8 = vpop.f32.mrb[68].mxu1 }
 0x18a   : > { %3341 = vst [vmem:[%s3881_s18 + $0x80] sm:$0xff] %v3089_v5   ;;  %3373 = vst [vmem:[%s3881_s18 + $0x180] sm:$0xff] %v3249_v6   ;;  %v1336_v9 = vadd.f32 %v3865_v61, %v1335_v7  ;;  %v1592_v10 = vadd.f32 %v3865_v61, %v1591_v8  ;;  %v1337_v11 = vpop.f32.mrb[69].mxu0  ;;  %v1593_v12 = vpop.f32.mrb[69].mxu1 }
 0x18b   : > { %v1338_v13 = vpop.f32.mrb[70].mxu0  ;;  %v1594_v14 = vpop.f32.mrb[70].mxu1 }
 0x18c   : > { %v1339_v15 = vadd.f32 %v3865_v61, %v1338_v13  ;;  %v1595_v16 = vadd.f32 %v3865_v61, %v1594_v14  ;;  %v1340_v17 = vpop.f32.mrb[71].mxu0  ;;  %v1596_v18 = vpop.f32.mrb[71].mxu1  ;;  %v1744_v19 = vmax.f32 %v1336_v9, 0.0  ;;  %v1808_v20 = vmax.f32 %v1592_v10, 0.0 }
 0x18e   : > { %v1745_v21 = vmax.f32 %v1339_v15, 0.0  ;;  %v1809_v22 = vmax.f32 %v1595_v16, 0.0 }
 0x190   : > { %v3094_v23 = vpack.c.bf16 %v1745_v21, %v1744_v19  ;;  %v3254_v24 = vpack.c.bf16 %v1809_v22, %v1808_v20 }
 0x191   : > { %v1343_v25 = vpop.f32.mrb[72].mxu0  ;;  %v1599_v26 = vpop.f32.mrb[72].mxu1 }
 0x192   : > { %3342 = vst [vmem:[%s3881_s18 + $0x88] sm:$0xff] %v3094_v23   ;;  %3374 = vst [vmem:[%s3881_s18 + $0x188] sm:$0xff] %v3254_v24   ;;  %v1344_v27 = vadd.f32 %v3865_v61, %v1343_v25  ;;  %v1600_v28 = vadd.f32 %v3865_v61, %v1599_v26  ;;  %v1345_v29 = vpop.f32.mrb[73].mxu0  ;;  %v1601_v30 = vpop.f32.mrb[73].mxu1 }
 0x193   : > { %v1346_v31 = vpop.f32.mrb[74].mxu0  ;;  %v1602_v32 = vpop.f32.mrb[74].mxu1 }
 0x194   : > { %v1347_v33 = vadd.f32 %v3865_v61, %v1346_v31  ;;  %v1603_v34 = vadd.f32 %v3865_v61, %v1602_v32  ;;  %v1348_v35 = vpop.f32.mrb[75].mxu0  ;;  %v1604_v36 = vpop.f32.mrb[75].mxu1  ;;  %v1746_v37 = vmax.f32 %v1344_v27, 0.0  ;;  %v1810_v38 = vmax.f32 %v1600_v28, 0.0 }
 0x196   : > { %v1747_v39 = vmax.f32 %v1347_v33, 0.0  ;;  %v1811_v40 = vmax.f32 %v1603_v34, 0.0 }
 0x198   : > { %v3099_v41 = vpack.c.bf16 %v1747_v39, %v1746_v37  ;;  %v3259_v42 = vpack.c.bf16 %v1811_v40, %v1810_v38 }
 0x199   : > { %v1351_v43 = vpop.f32.mrb[76].mxu0  ;;  %v1607_v44 = vpop.f32.mrb[76].mxu1 }
 0x19a   : > { %3343 = vst [vmem:[%s3881_s18 + $0x90] sm:$0xff] %v3099_v41   ;;  %3375 = vst [vmem:[%s3881_s18 + $0x190] sm:$0xff] %v3259_v42   ;;  %v1352_v45 = vadd.f32 %v3865_v61, %v1351_v43  ;;  %v1608_v46 = vadd.f32 %v3865_v61, %v1607_v44  ;;  %v1353_v47 = vpop.f32.mrb[77].mxu0  ;;  %v1609_v48 = vpop.f32.mrb[77].mxu1 }
 0x19b   : > { %v1354_v49 = vpop.f32.mrb[78].mxu0  ;;  %v1610_v50 = vpop.f32.mrb[78].mxu1 }
 0x19c   : > { %v1355_v51 = vadd.f32 %v3865_v61, %v1354_v49  ;;  %v1611_v52 = vadd.f32 %v3865_v61, %v1610_v50  ;;  %v1356_v53 = vpop.f32.mrb[79].mxu0  ;;  %v1612_v54 = vpop.f32.mrb[79].mxu1  ;;  %v1748_v55 = vmax.f32 %v1352_v45, 0.0  ;;  %v1812_v56 = vmax.f32 %v1608_v46, 0.0 }
 0x19e   : > { %v1749_v57 = vmax.f32 %v1355_v51, 0.0  ;;  %v1813_v58 = vmax.f32 %v1611_v52, 0.0 }
 0x1a0   : > { %v3104_v59 = vpack.c.bf16 %v1749_v57, %v1748_v55  ;;  %v3264_v60 = vpack.c.bf16 %v1813_v58, %v1812_v56 }
 0x1a1   : > { %v1359_v62 = vpop.f32.mrb[80].mxu0  ;;  %v1615_v63 = vpop.f32.mrb[80].mxu1 }
 0x1a2   : > { %3344 = vst [vmem:[%s3881_s18 + $0x98] sm:$0xff] %v3104_v59   ;;  %3376 = vst [vmem:[%s3881_s18 + $0x198] sm:$0xff] %v3264_v60   ;;  %v1360_v0 = vadd.f32 %v3865_v61, %v1359_v62  ;;  %v1616_v1 = vadd.f32 %v3865_v61, %v1615_v63  ;;  %v1361_v2 = vpop.f32.mrb[81].mxu0  ;;  %v1617_v3 = vpop.f32.mrb[81].mxu1 }
 0x1a3   : > { %v1362_v4 = vpop.f32.mrb[82].mxu0  ;;  %v1618_v5 = vpop.f32.mrb[82].mxu1 }
 0x1a4   : > { %v1363_v6 = vadd.f32 %v3865_v61, %v1362_v4  ;;  %v1619_v7 = vadd.f32 %v3865_v61, %v1618_v5  ;;  %v1364_v8 = vpop.f32.mrb[83].mxu0  ;;  %v1620_v9 = vpop.f32.mrb[83].mxu1  ;;  %v1750_v10 = vmax.f32 %v1360_v0, 0.0  ;;  %v1814_v11 = vmax.f32 %v1616_v1, 0.0 }
 0x1a5   : > { %v4048_v9 = vld [vmem:[%s4103_s2] ss:$0 sm:$0xff] }
 0x1a6   : > { %v1751_v12 = vmax.f32 %v1363_v6, 0.0  ;;  %v1815_v13 = vmax.f32 %v1619_v7, 0.0 }
 0x1a8   : > { %v3109_v14 = vpack.c.bf16 %v1751_v12, %v1750_v10  ;;  %v3269_v15 = vpack.c.bf16 %v1815_v13, %v1814_v11 }
 0x1a9   : > { %v1367_v16 = vpop.f32.mrb[84].mxu0  ;;  %v1623_v17 = vpop.f32.mrb[84].mxu1 }
 0x1aa   : > { %3345 = vst [vmem:[%s3881_s18 + $0xa0] sm:$0xff] %v3109_v14   ;;  %3377 = vst [vmem:[%s3881_s18 + $0x1a0] sm:$0xff] %v3269_v15   ;;  %v1368_v18 = vadd.f32 %v3865_v61, %v1367_v16  ;;  %v1624_v19 = vadd.f32 %v3865_v61, %v1623_v17  ;;  %v1369_v20 = vpop.f32.mrb[85].mxu0  ;;  %v1625_v21 = vpop.f32.mrb[85].mxu1 }
 0x1ab   : > { %v1370_v22 = vpop.f32.mrb[86].mxu0  ;;  %v1626_v23 = vpop.f32.mrb[86].mxu1 }
 0x1ac   : > { %v1371_v24 = vadd.f32 %v3865_v61, %v1370_v22  ;;  %v1627_v25 = vadd.f32 %v3865_v61, %v1626_v23  ;;  %v1372_v26 = vpop.f32.mrb[87].mxu0  ;;  %v1628_v27 = vpop.f32.mrb[87].mxu1  ;;  %v1752_v28 = vmax.f32 %v1368_v18, 0.0  ;;  %v1816_v29 = vmax.f32 %v1624_v19, 0.0 }
 0x1ae   : > { %v1753_v30 = vmax.f32 %v1371_v24, 0.0  ;;  %v1817_v31 = vmax.f32 %v1627_v25, 0.0 }
 0x1b0   : > { %v3114_v32 = vpack.c.bf16 %v1753_v30, %v1752_v28  ;;  %v3274_v33 = vpack.c.bf16 %v1817_v31, %v1816_v29 }
 0x1b1   : > { %v1375_v34 = vpop.f32.mrb[88].mxu0  ;;  %v1631_v35 = vpop.f32.mrb[88].mxu1 }
 0x1b2   : > { %3346 = vst [vmem:[%s3881_s18 + $0xa8] sm:$0xff] %v3114_v32   ;;  %3378 = vst [vmem:[%s3881_s18 + $0x1a8] sm:$0xff] %v3274_v33   ;;  %v1376_v36 = vadd.f32 %v3865_v61, %v1375_v34  ;;  %v1632_v37 = vadd.f32 %v3865_v61, %v1631_v35  ;;  %v1377_v38 = vpop.f32.mrb[89].mxu0  ;;  %v1633_v39 = vpop.f32.mrb[89].mxu1 }
 0x1b3   : > { %v1378_v40 = vpop.f32.mrb[90].mxu0  ;;  %v1634_v41 = vpop.f32.mrb[90].mxu1 }
 0x1b4   : > { %v1379_v42 = vadd.f32 %v3865_v61, %v1378_v40  ;;  %v1635_v43 = vadd.f32 %v3865_v61, %v1634_v41  ;;  %v1380_v44 = vpop.f32.mrb[91].mxu0  ;;  %v1636_v45 = vpop.f32.mrb[91].mxu1  ;;  %v1754_v46 = vmax.f32 %v1376_v36, 0.0  ;;  %v1818_v47 = vmax.f32 %v1632_v37, 0.0 }
 0x1b6   : > { %v1755_v48 = vmax.f32 %v1379_v42, 0.0  ;;  %v1819_v49 = vmax.f32 %v1635_v43, 0.0 }
 0x1b8   : > { %v3119_v50 = vpack.c.bf16 %v1755_v48, %v1754_v46  ;;  %v3279_v51 = vpack.c.bf16 %v1819_v49, %v1818_v47 }
 0x1b9   : > { %v1383_v52 = vpop.f32.mrb[92].mxu0  ;;  %v1639_v53 = vpop.f32.mrb[92].mxu1 }
 0x1ba   : > { %3347 = vst [vmem:[%s3881_s18 + $0xb0] sm:$0xff] %v3119_v50   ;;  %3379 = vst [vmem:[%s3881_s18 + $0x1b0] sm:$0xff] %v3279_v51   ;;  %v1384_v54 = vadd.f32 %v3865_v61, %v1383_v52  ;;  %v1640_v55 = vadd.f32 %v3865_v61, %v1639_v53  ;;  %v1385_v56 = vpop.f32.mrb[93].mxu0  ;;  %v1641_v57 = vpop.f32.mrb[93].mxu1 }
 0x1bb   : > { %v1386_v58 = vpop.f32.mrb[94].mxu0  ;;  %v1642_v59 = vpop.f32.mrb[94].mxu1 }
 0x1bc   : > { %v1387_v60 = vadd.f32 %v3865_v61, %v1386_v58  ;;  %v1643_v62 = vadd.f32 %v3865_v61, %v1642_v59  ;;  %v1388_v63 = vpop.f32.mrb[95].mxu0  ;;  %v1644_v0 = vpop.f32.mrb[95].mxu1  ;;  %v1756_v1 = vmax.f32 %v1384_v54, 0.0  ;;  %v1820_v2 = vmax.f32 %v1640_v55, 0.0 }
 0x1be   : > { %v1757_v3 = vmax.f32 %v1387_v60, 0.0  ;;  %v1821_v4 = vmax.f32 %v1643_v62, 0.0 }
 0x1c0   : > { %v3124_v5 = vpack.c.bf16 %v1757_v3, %v1756_v1  ;;  %v3284_v6 = vpack.c.bf16 %v1821_v4, %v1820_v2 }
 0x1c1   : > { %v1391_v7 = vpop.f32.mrb[96].mxu0  ;;  %v1647_v8 = vpop.f32.mrb[96].mxu1 }
 0x1c2   : > { %3348 = vst [vmem:[%s3881_s18 + $0xb8] sm:$0xff] %v3124_v5   ;;  %3380 = vst [vmem:[%s3881_s18 + $0x1b8] sm:$0xff] %v3284_v6   ;;  %v1392_v10 = vadd.f32 %v4048_v9, %v1391_v7  ;;  %v1648_v61 = vadd.f32 %v4048_v9, %v1647_v8  ;;  %v1393_v11 = vpop.f32.mrb[97].mxu0  ;;  %v1649_v12 = vpop.f32.mrb[97].mxu1 }
 0x1c3   : > { %v1394_v13 = vpop.f32.mrb[98].mxu0  ;;  %v1650_v14 = vpop.f32.mrb[98].mxu1 }
 0x1c4   : > { %v1395_v15 = vadd.f32 %v4048_v9, %v1394_v13  ;;  %v1651_v16 = vadd.f32 %v4048_v9, %v1650_v14  ;;  %v1396_v17 = vpop.f32.mrb[99].mxu0  ;;  %v1652_v18 = vpop.f32.mrb[99].mxu1  ;;  %v1758_v19 = vmax.f32 %v1392_v10, 0.0  ;;  %v1822_v20 = vmax.f32 %v1648_v61, 0.0 }
 0x1c6   : > { %v1759_v21 = vmax.f32 %v1395_v15, 0.0  ;;  %v1823_v22 = vmax.f32 %v1651_v16, 0.0 }
 0x1c8   : > { %v3129_v23 = vpack.c.bf16 %v1759_v21, %v1758_v19  ;;  %v3289_v24 = vpack.c.bf16 %v1823_v22, %v1822_v20 }
 0x1c9   : > { %v1399_v25 = vpop.f32.mrb[100].mxu0  ;;  %v1655_v26 = vpop.f32.mrb[100].mxu1 }
 0x1ca   : > { %3349 = vst [vmem:[%s3881_s18 + $0xc0] sm:$0xff] %v3129_v23   ;;  %3381 = vst [vmem:[%s3881_s18 + $0x1c0] sm:$0xff] %v3289_v24   ;;  %v1400_v27 = vadd.f32 %v4048_v9, %v1399_v25  ;;  %v1656_v28 = vadd.f32 %v4048_v9, %v1655_v26  ;;  %v1401_v29 = vpop.f32.mrb[101].mxu0  ;;  %v1657_v30 = vpop.f32.mrb[101].mxu1 }
 0x1cb   : > { %v1402_v31 = vpop.f32.mrb[102].mxu0  ;;  %v1658_v32 = vpop.f32.mrb[102].mxu1 }
 0x1cc   : > { %v1403_v33 = vadd.f32 %v4048_v9, %v1402_v31  ;;  %v1659_v34 = vadd.f32 %v4048_v9, %v1658_v32  ;;  %v1404_v35 = vpop.f32.mrb[103].mxu0  ;;  %v1660_v36 = vpop.f32.mrb[103].mxu1  ;;  %v1760_v37 = vmax.f32 %v1400_v27, 0.0  ;;  %v1824_v38 = vmax.f32 %v1656_v28, 0.0 }
 0x1ce   : > { %v1761_v39 = vmax.f32 %v1403_v33, 0.0  ;;  %v1825_v40 = vmax.f32 %v1659_v34, 0.0 }
 0x1d0   : > { %v3134_v41 = vpack.c.bf16 %v1761_v39, %v1760_v37  ;;  %v3294_v42 = vpack.c.bf16 %v1825_v40, %v1824_v38 }
 0x1d1   : > { %v1407_v43 = vpop.f32.mrb[104].mxu0  ;;  %v1663_v44 = vpop.f32.mrb[104].mxu1 }
 0x1d2   : > { %3350 = vst [vmem:[%s3881_s18 + $0xc8] sm:$0xff] %v3134_v41   ;;  %3382 = vst [vmem:[%s3881_s18 + $0x1c8] sm:$0xff] %v3294_v42   ;;  %v1408_v45 = vadd.f32 %v4048_v9, %v1407_v43  ;;  %v1664_v46 = vadd.f32 %v4048_v9, %v1663_v44  ;;  %v1409_v47 = vpop.f32.mrb[105].mxu0  ;;  %v1665_v48 = vpop.f32.mrb[105].mxu1 }
 0x1d3   : > { %v1410_v49 = vpop.f32.mrb[106].mxu0  ;;  %v1666_v50 = vpop.f32.mrb[106].mxu1 }
 0x1d4   : > { %v1411_v51 = vadd.f32 %v4048_v9, %v1410_v49  ;;  %v1667_v52 = vadd.f32 %v4048_v9, %v1666_v50  ;;  %v1412_v53 = vpop.f32.mrb[107].mxu0  ;;  %v1668_v54 = vpop.f32.mrb[107].mxu1  ;;  %v1762_v55 = vmax.f32 %v1408_v45, 0.0  ;;  %v1826_v56 = vmax.f32 %v1664_v46, 0.0 }
 0x1d6   : > { %v1763_v57 = vmax.f32 %v1411_v51, 0.0  ;;  %v1827_v58 = vmax.f32 %v1667_v52, 0.0 }
 0x1d8   : > { %v3139_v59 = vpack.c.bf16 %v1763_v57, %v1762_v55  ;;  %v3299_v60 = vpack.c.bf16 %v1827_v58, %v1826_v56 }
 0x1d9   : > { %v1415_v62 = vpop.f32.mrb[108].mxu0  ;;  %v1671_v63 = vpop.f32.mrb[108].mxu1 }
 0x1da   : > { %3351 = vst [vmem:[%s3881_s18 + $0xd0] sm:$0xff] %v3139_v59   ;;  %3383 = vst [vmem:[%s3881_s18 + $0x1d0] sm:$0xff] %v3299_v60   ;;  %v1416_v0 = vadd.f32 %v4048_v9, %v1415_v62  ;;  %v1672_v1 = vadd.f32 %v4048_v9, %v1671_v63  ;;  %v1417_v2 = vpop.f32.mrb[109].mxu0  ;;  %v1673_v3 = vpop.f32.mrb[109].mxu1 }
 0x1db   : > { %v1418_v4 = vpop.f32.mrb[110].mxu0  ;;  %v1674_v5 = vpop.f32.mrb[110].mxu1 }
 0x1dc   : > { %v1419_v6 = vadd.f32 %v4048_v9, %v1418_v4  ;;  %v1675_v7 = vadd.f32 %v4048_v9, %v1674_v5  ;;  %v1420_v8 = vpop.f32.mrb[111].mxu0  ;;  %v1676_v10 = vpop.f32.mrb[111].mxu1  ;;  %v1764_v61 = vmax.f32 %v1416_v0, 0.0  ;;  %v1828_v11 = vmax.f32 %v1672_v1, 0.0 }
 0x1de   : > { %v1765_v12 = vmax.f32 %v1419_v6, 0.0  ;;  %v1829_v13 = vmax.f32 %v1675_v7, 0.0 }
 0x1e0   : > { %v3144_v14 = vpack.c.bf16 %v1765_v12, %v1764_v61  ;;  %v3304_v15 = vpack.c.bf16 %v1829_v13, %v1828_v11 }
 0x1e1   : > { %v1423_v16 = vpop.f32.mrb[112].mxu0  ;;  %v1679_v17 = vpop.f32.mrb[112].mxu1 }
 0x1e2   : > { %3352 = vst [vmem:[%s3881_s18 + $0xd8] sm:$0xff] %v3144_v14   ;;  %3384 = vst [vmem:[%s3881_s18 + $0x1d8] sm:$0xff] %v3304_v15   ;;  %v1424_v18 = vadd.f32 %v4048_v9, %v1423_v16  ;;  %v1680_v19 = vadd.f32 %v4048_v9, %v1679_v17  ;;  %v1425_v20 = vpop.f32.mrb[113].mxu0  ;;  %v1681_v21 = vpop.f32.mrb[113].mxu1 }
 0x1e3   : > { %v1426_v22 = vpop.f32.mrb[114].mxu0  ;;  %v1682_v23 = vpop.f32.mrb[114].mxu1 }
 0x1e4   : > { %v1427_v24 = vadd.f32 %v4048_v9, %v1426_v22  ;;  %v1683_v25 = vadd.f32 %v4048_v9, %v1682_v23  ;;  %v1428_v26 = vpop.f32.mrb[115].mxu0  ;;  %v1684_v27 = vpop.f32.mrb[115].mxu1  ;;  %v1766_v28 = vmax.f32 %v1424_v18, 0.0  ;;  %v1830_v29 = vmax.f32 %v1680_v19, 0.0 }
 0x1e6   : > { %v1767_v30 = vmax.f32 %v1427_v24, 0.0  ;;  %v1831_v31 = vmax.f32 %v1683_v25, 0.0 }
 0x1e8   : > { %v3149_v32 = vpack.c.bf16 %v1767_v30, %v1766_v28  ;;  %v3309_v33 = vpack.c.bf16 %v1831_v31, %v1830_v29 }
 0x1e9   : > { %v1431_v34 = vpop.f32.mrb[116].mxu0  ;;  %v1687_v35 = vpop.f32.mrb[116].mxu1 }
 0x1ea   : > { %3353 = vst [vmem:[%s3881_s18 + $0xe0] sm:$0xff] %v3149_v32   ;;  %3385 = vst [vmem:[%s3881_s18 + $0x1e0] sm:$0xff] %v3309_v33   ;;  %v1432_v36 = vadd.f32 %v4048_v9, %v1431_v34  ;;  %v1688_v37 = vadd.f32 %v4048_v9, %v1687_v35  ;;  %v1433_v38 = vpop.f32.mrb[117].mxu0  ;;  %v1689_v39 = vpop.f32.mrb[117].mxu1 }
 0x1eb   : > { %v1434_v40 = vpop.f32.mrb[118].mxu0  ;;  %v1690_v41 = vpop.f32.mrb[118].mxu1 }
 0x1ec   : > { %v1435_v42 = vadd.f32 %v4048_v9, %v1434_v40  ;;  %v1691_v43 = vadd.f32 %v4048_v9, %v1690_v41  ;;  %v1436_v44 = vpop.f32.mrb[119].mxu0  ;;  %v1692_v45 = vpop.f32.mrb[119].mxu1  ;;  %v1768_v46 = vmax.f32 %v1432_v36, 0.0  ;;  %v1832_v47 = vmax.f32 %v1688_v37, 0.0 }
 0x1ee   : > { %v1769_v48 = vmax.f32 %v1435_v42, 0.0  ;;  %v1833_v49 = vmax.f32 %v1691_v43, 0.0 }
 0x1f0   : > { %v3154_v50 = vpack.c.bf16 %v1769_v48, %v1768_v46  ;;  %v3314_v51 = vpack.c.bf16 %v1833_v49, %v1832_v47 }
 0x1f1   : > { %v1439_v52 = vpop.f32.mrb[120].mxu0  ;;  %v1695_v53 = vpop.f32.mrb[120].mxu1 }
 0x1f2   : > { %3354 = vst [vmem:[%s3881_s18 + $0xe8] sm:$0xff] %v3154_v50   ;;  %3386 = vst [vmem:[%s3881_s18 + $0x1e8] sm:$0xff] %v3314_v51   ;;  %v1440_v54 = vadd.f32 %v4048_v9, %v1439_v52  ;;  %v1696_v55 = vadd.f32 %v4048_v9, %v1695_v53  ;;  %v1441_v56 = vpop.f32.mrb[121].mxu0  ;;  %v1697_v57 = vpop.f32.mrb[121].mxu1 }
 0x1f3   : > { %v1442_v58 = vpop.f32.mrb[122].mxu0  ;;  %v1698_v59 = vpop.f32.mrb[122].mxu1 }
 0x1f4   : > { %v1443_v60 = vadd.f32 %v4048_v9, %v1442_v58  ;;  %v1699_v62 = vadd.f32 %v4048_v9, %v1698_v59  ;;  %v1444_v63 = vpop.f32.mrb[123].mxu0  ;;  %v1700_v0 = vpop.f32.mrb[123].mxu1  ;;  %v1770_v1 = vmax.f32 %v1440_v54, 0.0  ;;  %v1834_v2 = vmax.f32 %v1696_v55, 0.0 }
 0x1f6   : > { %v1771_v3 = vmax.f32 %v1443_v60, 0.0  ;;  %v1835_v4 = vmax.f32 %v1699_v62, 0.0 }
 0x1f8   : > { %v3159_v5 = vpack.c.bf16 %v1771_v3, %v1770_v1  ;;  %v3319_v6 = vpack.c.bf16 %v1835_v4, %v1834_v2 }
 0x1f9   : > { %v1447_v7 = vpop.f32.mrb[124].mxu0  ;;  %v1703_v8 = vpop.f32.mrb[124].mxu1 }
 0x1fa   : > { %3355 = vst [vmem:[%s3881_s18 + $0xf0] sm:$0xff] %v3159_v5   ;;  %3387 = vst [vmem:[%s3881_s18 + $0x1f0] sm:$0xff] %v3319_v6   ;;  %v1448_v10 = vadd.f32 %v4048_v9, %v1447_v7  ;;  %v1704_v61 = vadd.f32 %v4048_v9, %v1703_v8  ;;  %v1449_v11 = vpop.f32.mrb[125].mxu0  ;;  %v1705_v12 = vpop.f32.mrb[125].mxu1 }
 0x1fb   : > { %v1450_v13 = vpop.f32.mrb[126].mxu0  ;;  %v1706_v14 = vpop.f32.mrb[126].mxu1 }
 0x1fc   : > { %v1451_v15 = vadd.f32 %v4048_v9, %v1450_v13  ;;  %v1707_v16 = vadd.f32 %v4048_v9, %v1706_v14  ;;  %v1452_v17 = vpop.f32.mrb[127].mxu0  ;;  %v1708_v18 = vpop.f32.mrb[127].mxu1  ;;  %v1772_v19 = vmax.f32 %v1448_v10, 0.0  ;;  %v1836_v20 = vmax.f32 %v1704_v61, 0.0 }
 0x1fe   : > { %v1773_v21 = vmax.f32 %v1451_v15, 0.0  ;;  %v1837_v22 = vmax.f32 %v1707_v16, 0.0 }
 0x200   : > { %v3164_v23 = vpack.c.bf16 %v1773_v21, %v1772_v19  ;;  %v3324_v24 = vpack.c.bf16 %v1837_v22, %v1836_v20 }
 0x202   : > { %3356 = vst [vmem:[%s3881_s18 + $0xf8] sm:$0xff] %v3164_v23   ;;  %3388 = vst [vmem:[%s3881_s18 + $0x1f8] sm:$0xff] %v3324_v24  }
 0x203 PF: > { %s13_s12 = sadd.s32 1, %s3628_s12  }
 0x204   : > { %p10_p4 = scmp.ge.s32.totalorder %s13_s12, 10  }
 0x206   :  { %12 = sbr.rel (!%p10_p4) target bundleno = 1 (0x1), region = 62 }

// kernel: resnet_features.23
= control target key start
LH: loop header
LB: loop body
LE: loop exit
PB: predicated region body
PF: predicated region fallthrough
CT: control target
= control target key end

     0   :  { %s2997_s6 = smov 0   ;;  %s2999_s7 = smov 0   ;;  %s3941_s0 = inlined_call_operand.vmem [shape: bf16[9,2048,128], index: 0, kind: input, shape index: {}]   ;;  %s3942_s1 = inlined_call_operand.vmem [shape: bf16[2048,128], index: 1, kind: output, shape index: {}]  }
   0x1   :  { %s3001_s8 = smov 0  }
   0x2 LB: > { %s2814_s9 = sadd.s32 4294967295, %s2985_s8   ;;  %s3014_s10 = sadd.s32 1, %s2985_s8   ;;  %s2985_s8 = sphi %s3001_s8, %s3945_s8   ;;  %s2981_s7 = sphi %s2999_s7, %s3944_s7   ;;  %s2977_s6 = sphi %s2997_s6, %s3943_s6  }
   0x3   : > { %s15_s11 = ssub.s32 %s2985_s8, %s3014_s10  ;;  %s18_s12 = sadd.s32 1, %s2981_s7 }
   0x4   : > { %p16_p0 = scmp.eq.s32.totalorder %s15_s11, 0  ;;  %p25_p1 = scmp.ne.s32.totalorder %s2981_s7, %s2977_s6 }
   0x5   : > { %p26_p2 = scmp.eq.s32.totalorder %s2985_s8, 0  ;;  %p2817_p4 = scmp.ge.s32.totalorder %s2985_s8, 8 }
   0x6   : > { %s3023_s13 = scalar_select %p16_p0, %s2981_s7, %s18_s12  }
   0x7   : > { %p27_p3 = por %p26_p2, %p25_p1  ;;  %77 = sbr.rel (%p2817_p4) target bundleno = 91 (0x5b), region = 16 }
   0xe   : > { %80 = sbr.rel (!%p27_p3) target bundleno = 91 (0x5b), region = 20  ;;  %s82_s14 = sand.u32 (%p27_p3), 1, %s2981_s7  }
   0xf   : > { %s2825_s15 = sshll.u32 (%p27_p3), %s2985_s8, 7  ;;  %s2937_s16 = smul.u32 (%p27_p3), 1152, %s82_s14 }
  0x10   : > { %s3031_s19 = scalar_lea.vmem (%p27_p3), %s3941_s0, %s2825_s15 }
  0x11   : > { %v103_v0 = vld [vmem:[%s3031_s19] sm:$0xff] (%p27_p3)   ;;  %v107_v1 = vld [vmem:[%s3031_s19 + $0x8] sm:$0xff] (%p27_p3)   ;;  %v111_v2 = vld [vmem:[%s3031_s19 + $0x10] sm:$0xff] (%p27_p3)   ;;  %s3039_s20 = scalar_lea.vmem (%p27_p3), [#allocation2], %s2937_s16 }
  0x12   : > { %v115_v3 = vld [vmem:[%s3031_s19 + $0x18] sm:$0xff] (%p27_p3)   ;;  %v119_v4 = vld [vmem:[%s3031_s19 + $0x20] sm:$0xff] (%p27_p3)   ;;  %v123_v5 = vld [vmem:[%s3031_s19 + $0x28] sm:$0xff] (%p27_p3)   ;;  %104 = vst [vmem:[%s3039_s20] sm:$0xff] (%p27_p3), %v103_v0  }
  0x13   : > { %108 = vst [vmem:[%s3039_s20 + $0x8] sm:$0xff] (%p27_p3), %v107_v1   ;;  %112 = vst [vmem:[%s3039_s20 + $0x10] sm:$0xff] (%p27_p3), %v111_v2   ;;  %v127_v6 = vld [vmem:[%s3031_s19 + $0x30] sm:$0xff] (%p27_p3)   ;;  %v131_v7 = vld [vmem:[%s3031_s19 + $0x38] sm:$0xff] (%p27_p3)  }
  0x14   : > { %116 = vst [vmem:[%s3039_s20 + $0x18] sm:$0xff] (%p27_p3), %v115_v3   ;;  %120 = vst [vmem:[%s3039_s20 + $0x20] sm:$0xff] (%p27_p3), %v119_v4   ;;  %v135_v8 = vld [vmem:[%s3031_s19 + $0x40] sm:$0xff] (%p27_p3)   ;;  %v139_v9 = vld [vmem:[%s3031_s19 + $0x48] sm:$0xff] (%p27_p3)  }
  0x15   : > { %124 = vst [vmem:[%s3039_s20 + $0x28] sm:$0xff] %v123_v5   ;;  %128 = vst [vmem:[%s3039_s20 + $0x30] sm:$0xff] %v127_v6   ;;  %v143_v10 = vld [vmem:[%s3031_s19 + $0x50] sm:$0xff]   ;;  %v147_v11 = vld [vmem:[%s3031_s19 + $0x58] sm:$0xff]  }
  0x16   : > { %132 = vst [vmem:[%s3039_s20 + $0x38] sm:$0xff] %v131_v7   ;;  %136 = vst [vmem:[%s3039_s20 + $0x40] sm:$0xff] %v135_v8   ;;  %v151_v12 = vld [vmem:[%s3031_s19 + $0x60] sm:$0xff]   ;;  %v155_v13 = vld [vmem:[%s3031_s19 + $0x68] sm:$0xff]  }
  0x17   : > { %140 = vst [vmem:[%s3039_s20 + $0x48] sm:$0xff] %v139_v9   ;;  %144 = vst [vmem:[%s3039_s20 + $0x50] sm:$0xff] %v143_v10   ;;  %v159_v14 = vld [vmem:[%s3031_s19 + $0x70] sm:$0xff]   ;;  %v163_v15 = vld [vmem:[%s3031_s19 + $0x78] sm:$0xff]  }
  0x18   : > { %148 = vst [vmem:[%s3039_s20 + $0x58] sm:$0xff] %v147_v11   ;;  %152 = vst [vmem:[%s3039_s20 + $0x60] sm:$0xff] %v151_v12   ;;  %v167_v16 = vld [vmem:[%s3031_s19 + $0x400] sm:$0xff]   ;;  %v171_v17 = vld [vmem:[%s3031_s19 + $0x408] sm:$0xff]  }
  0x19   : > { %156 = vst [vmem:[%s3039_s20 + $0x68] sm:$0xff] %v155_v13   ;;  %160 = vst [vmem:[%s3039_s20 + $0x70] sm:$0xff] %v159_v14   ;;  %v175_v18 = vld [vmem:[%s3031_s19 + $0x410] sm:$0xff]   ;;  %v179_v19 = vld [vmem:[%s3031_s19 + $0x418] sm:$0xff]  }
  0x1a   : > { %164 = vst [vmem:[%s3039_s20 + $0x78] sm:$0xff] %v163_v15   ;;  %168 = vst [vmem:[%s3039_s20 + $0x80] sm:$0xff] %v167_v16   ;;  %v183_v20 = vld [vmem:[%s3031_s19 + $0x420] sm:$0xff]   ;;  %v187_v21 = vld [vmem:[%s3031_s19 + $0x428] sm:$0xff]  }
  0x1b   : > { %172 = vst [vmem:[%s3039_s20 + $0x88] sm:$0xff] %v171_v17   ;;  %176 = vst [vmem:[%s3039_s20 + $0x90] sm:$0xff] %v175_v18   ;;  %v191_v22 = vld [vmem:[%s3031_s19 + $0x430] sm:$0xff]   ;;  %v195_v23 = vld [vmem:[%s3031_s19 + $0x438] sm:$0xff]  }
  0x1c   : > { %180 = vst [vmem:[%s3039_s20 + $0x98] sm:$0xff] %v179_v19   ;;  %184 = vst [vmem:[%s3039_s20 + $0xa0] sm:$0xff] %v183_v20   ;;  %v199_v24 = vld [vmem:[%s3031_s19 + $0x440] sm:$0xff]   ;;  %v203_v25 = vld [vmem:[%s3031_s19 + $0x448] sm:$0xff]  }
  0x1d   : > { %188 = vst [vmem:[%s3039_s20 + $0xa8] sm:$0xff] %v187_v21   ;;  %192 = vst [vmem:[%s3039_s20 + $0xb0] sm:$0xff] %v191_v22   ;;  %v207_v26 = vld [vmem:[%s3031_s19 + $0x450] sm:$0xff]   ;;  %v211_v27 = vld [vmem:[%s3031_s19 + $0x458] sm:$0xff]  }
  0x1e   : > { %196 = vst [vmem:[%s3039_s20 + $0xb8] sm:$0xff] %v195_v23   ;;  %200 = vst [vmem:[%s3039_s20 + $0xc0] sm:$0xff] %v199_v24   ;;  %v215_v28 = vld [vmem:[%s3031_s19 + $0x460] sm:$0xff]   ;;  %v219_v29 = vld [vmem:[%s3031_s19 + $0x468] sm:$0xff]  }
  0x1f   : > { %204 = vst [vmem:[%s3039_s20 + $0xc8] sm:$0xff] %v203_v25   ;;  %208 = vst [vmem:[%s3039_s20 + $0xd0] sm:$0xff] %v207_v26   ;;  %v223_v30 = vld [vmem:[%s3031_s19 + $0x470] sm:$0xff]   ;;  %v227_v31 = vld [vmem:[%s3031_s19 + $0x478] sm:$0xff]  }
  0x20   : > { %212 = vst [vmem:[%s3039_s20 + $0xd8] sm:$0xff] %v211_v27   ;;  %216 = vst [vmem:[%s3039_s20 + $0xe0] sm:$0xff] %v215_v28   ;;  %v231_v32 = vld [vmem:[%s3031_s19 + $0x800] sm:$0xff]   ;;  %v235_v33 = vld [vmem:[%s3031_s19 + $0x808] sm:$0xff]  }
  0x21   : > { %220 = vst [vmem:[%s3039_s20 + $0xe8] sm:$0xff] %v219_v29   ;;  %224 = vst [vmem:[%s3039_s20 + $0xf0] sm:$0xff] %v223_v30   ;;  %v239_v34 = vld [vmem:[%s3031_s19 + $0x810] sm:$0xff]   ;;  %v243_v35 = vld [vmem:[%s3031_s19 + $0x818] sm:$0xff]  }
  0x22   : > { %228 = vst [vmem:[%s3039_s20 + $0xf8] sm:$0xff] %v227_v31   ;;  %232 = vst [vmem:[%s3039_s20 + $0x100] sm:$0xff] %v231_v32   ;;  %v247_v36 = vld [vmem:[%s3031_s19 + $0x820] sm:$0xff]   ;;  %v251_v37 = vld [vmem:[%s3031_s19 + $0x828] sm:$0xff]  }
  0x23   : > { %236 = vst [vmem:[%s3039_s20 + $0x108] sm:$0xff] %v235_v33   ;;  %240 = vst [vmem:[%s3039_s20 + $0x110] sm:$0xff] %v239_v34   ;;  %v255_v38 = vld [vmem:[%s3031_s19 + $0x830] sm:$0xff]   ;;  %v259_v39 = vld [vmem:[%s3031_s19 + $0x838] sm:$0xff]  }
  0x24   : > { %244 = vst [vmem:[%s3039_s20 + $0x118] sm:$0xff] %v243_v35   ;;  %248 = vst [vmem:[%s3039_s20 + $0x120] sm:$0xff] %v247_v36   ;;  %v263_v40 = vld [vmem:[%s3031_s19 + $0x840] sm:$0xff]   ;;  %v267_v41 = vld [vmem:[%s3031_s19 + $0x848] sm:$0xff]  }
  0x25   : > { %252 = vst [vmem:[%s3039_s20 + $0x128] sm:$0xff] %v251_v37   ;;  %256 = vst [vmem:[%s3039_s20 + $0x130] sm:$0xff] %v255_v38   ;;  %v271_v42 = vld [vmem:[%s3031_s19 + $0x850] sm:$0xff]   ;;  %v275_v43 = vld [vmem:[%s3031_s19 + $0x858] sm:$0xff]  }
  0x26   : > { %260 = vst [vmem:[%s3039_s20 + $0x138] sm:$0xff] %v259_v39   ;;  %264 = vst [vmem:[%s3039_s20 + $0x140] sm:$0xff] %v263_v40   ;;  %v279_v44 = vld [vmem:[%s3031_s19 + $0x860] sm:$0xff]   ;;  %v283_v45 = vld [vmem:[%s3031_s19 + $0x868] sm:$0xff]  }
  0x27   : > { %268 = vst [vmem:[%s3039_s20 + $0x148] sm:$0xff] %v267_v41   ;;  %272 = vst [vmem:[%s3039_s20 + $0x150] sm:$0xff] %v271_v42   ;;  %v287_v46 = vld [vmem:[%s3031_s19 + $0x870] sm:$0xff]   ;;  %v291_v47 = vld [vmem:[%s3031_s19 + $0x878] sm:$0xff]  }
  0x28   : > { %276 = vst [vmem:[%s3039_s20 + $0x158] sm:$0xff] %v275_v43   ;;  %280 = vst [vmem:[%s3039_s20 + $0x160] sm:$0xff] %v279_v44   ;;  %v295_v48 = vld [vmem:[%s3031_s19 + $0xc00] sm:$0xff]   ;;  %v299_v49 = vld [vmem:[%s3031_s19 + $0xc08] sm:$0xff]  }
  0x29   : > { %284 = vst [vmem:[%s3039_s20 + $0x168] sm:$0xff] %v283_v45   ;;  %288 = vst [vmem:[%s3039_s20 + $0x170] sm:$0xff] %v287_v46   ;;  %v303_v50 = vld [vmem:[%s3031_s19 + $0xc10] sm:$0xff]   ;;  %v307_v51 = vld [vmem:[%s3031_s19 + $0xc18] sm:$0xff]  }
  0x2a   : > { %292 = vst [vmem:[%s3039_s20 + $0x178] sm:$0xff] %v291_v47   ;;  %296 = vst [vmem:[%s3039_s20 + $0x180] sm:$0xff] %v295_v48   ;;  %v311_v52 = vld [vmem:[%s3031_s19 + $0xc20] sm:$0xff]   ;;  %v315_v53 = vld [vmem:[%s3031_s19 + $0xc28] sm:$0xff]  }
  0x2b   : > { %300 = vst [vmem:[%s3039_s20 + $0x188] sm:$0xff] %v299_v49   ;;  %304 = vst [vmem:[%s3039_s20 + $0x190] sm:$0xff] %v303_v50   ;;  %v319_v54 = vld [vmem:[%s3031_s19 + $0xc30] sm:$0xff]   ;;  %v323_v55 = vld [vmem:[%s3031_s19 + $0xc38] sm:$0xff]  }
  0x2c   : > { %308 = vst [vmem:[%s3039_s20 + $0x198] sm:$0xff] %v307_v51   ;;  %312 = vst [vmem:[%s3039_s20 + $0x1a0] sm:$0xff] %v311_v52   ;;  %v327_v56 = vld [vmem:[%s3031_s19 + $0xc40] sm:$0xff]   ;;  %v331_v57 = vld [vmem:[%s3031_s19 + $0xc48] sm:$0xff]  }
  0x2d   : > { %316 = vst [vmem:[%s3039_s20 + $0x1a8] sm:$0xff] %v315_v53   ;;  %320 = vst [vmem:[%s3039_s20 + $0x1b0] sm:$0xff] %v319_v54   ;;  %v335_v58 = vld [vmem:[%s3031_s19 + $0xc50] sm:$0xff]   ;;  %v339_v59 = vld [vmem:[%s3031_s19 + $0xc58] sm:$0xff]  }
  0x2e   : > { %324 = vst [vmem:[%s3039_s20 + $0x1b8] sm:$0xff] %v323_v55   ;;  %328 = vst [vmem:[%s3039_s20 + $0x1c0] sm:$0xff] %v327_v56   ;;  %v343_v60 = vld [vmem:[%s3031_s19 + $0xc60] sm:$0xff]   ;;  %v347_v61 = vld [vmem:[%s3031_s19 + $0xc68] sm:$0xff]  }
  0x2f   : > { %332 = vst [vmem:[%s3039_s20 + $0x1c8] sm:$0xff] %v331_v57   ;;  %336 = vst [vmem:[%s3039_s20 + $0x1d0] sm:$0xff] %v335_v58   ;;  %v351_v62 = vld [vmem:[%s3031_s19 + $0xc70] sm:$0xff]   ;;  %v355_v63 = vld [vmem:[%s3031_s19 + $0xc78] sm:$0xff]  }
  0x30   : > { %340 = vst [vmem:[%s3039_s20 + $0x1d8] sm:$0xff] %v339_v59   ;;  %344 = vst [vmem:[%s3039_s20 + $0x1e0] sm:$0xff] %v343_v60   ;;  %v359_v0 = vld [vmem:[%s3031_s19 + $0x1000] sm:$0xff]   ;;  %v363_v1 = vld [vmem:[%s3031_s19 + $0x1008] sm:$0xff]  }
  0x31   : > { %348 = vst [vmem:[%s3039_s20 + $0x1e8] sm:$0xff] %v347_v61   ;;  %352 = vst [vmem:[%s3039_s20 + $0x1f0] sm:$0xff] %v351_v62   ;;  %v367_v2 = vld [vmem:[%s3031_s19 + $0x1010] sm:$0xff]   ;;  %v371_v3 = vld [vmem:[%s3031_s19 + $0x1018] sm:$0xff]  }
  0x32   : > { %356 = vst [vmem:[%s3039_s20 + $0x1f8] sm:$0xff] %v355_v63   ;;  %360 = vst [vmem:[%s3039_s20 + $0x200] sm:$0xff] %v359_v0   ;;  %v375_v4 = vld [vmem:[%s3031_s19 + $0x1020] sm:$0xff]   ;;  %v379_v5 = vld [vmem:[%s3031_s19 + $0x1028] sm:$0xff]  }
  0x33   : > { %364 = vst [vmem:[%s3039_s20 + $0x208] sm:$0xff] %v363_v1   ;;  %368 = vst [vmem:[%s3039_s20 + $0x210] sm:$0xff] %v367_v2   ;;  %v383_v6 = vld [vmem:[%s3031_s19 + $0x1030] sm:$0xff]   ;;  %v387_v7 = vld [vmem:[%s3031_s19 + $0x1038] sm:$0xff]  }
  0x34   : > { %372 = vst [vmem:[%s3039_s20 + $0x218] sm:$0xff] %v371_v3   ;;  %376 = vst [vmem:[%s3039_s20 + $0x220] sm:$0xff] %v375_v4   ;;  %v391_v8 = vld [vmem:[%s3031_s19 + $0x1040] sm:$0xff]   ;;  %v395_v9 = vld [vmem:[%s3031_s19 + $0x1048] sm:$0xff]  }
  0x35   : > { %380 = vst [vmem:[%s3039_s20 + $0x228] sm:$0xff] %v379_v5   ;;  %384 = vst [vmem:[%s3039_s20 + $0x230] sm:$0xff] %v383_v6   ;;  %v399_v10 = vld [vmem:[%s3031_s19 + $0x1050] sm:$0xff]   ;;  %v403_v11 = vld [vmem:[%s3031_s19 + $0x1058] sm:$0xff]  }
  0x36   : > { %388 = vst [vmem:[%s3039_s20 + $0x238] sm:$0xff] %v387_v7   ;;  %392 = vst [vmem:[%s3039_s20 + $0x240] sm:$0xff] %v391_v8   ;;  %v407_v12 = vld [vmem:[%s3031_s19 + $0x1060] sm:$0xff]   ;;  %v411_v13 = vld [vmem:[%s3031_s19 + $0x1068] sm:$0xff]  }
  0x37   : > { %396 = vst [vmem:[%s3039_s20 + $0x248] sm:$0xff] %v395_v9   ;;  %400 = vst [vmem:[%s3039_s20 + $0x250] sm:$0xff] %v399_v10   ;;  %v415_v14 = vld [vmem:[%s3031_s19 + $0x1070] sm:$0xff]   ;;  %v419_v15 = vld [vmem:[%s3031_s19 + $0x1078] sm:$0xff]  }
  0x38   : > { %404 = vst [vmem:[%s3039_s20 + $0x258] sm:$0xff] %v403_v11   ;;  %408 = vst [vmem:[%s3039_s20 + $0x260] sm:$0xff] %v407_v12   ;;  %v423_v16 = vld [vmem:[%s3031_s19 + $0x1400] sm:$0xff]   ;;  %v427_v17 = vld [vmem:[%s3031_s19 + $0x1408] sm:$0xff]  }
  0x39   : > { %412 = vst [vmem:[%s3039_s20 + $0x268] sm:$0xff] %v411_v13   ;;  %416 = vst [vmem:[%s3039_s20 + $0x270] sm:$0xff] %v415_v14   ;;  %v431_v18 = vld [vmem:[%s3031_s19 + $0x1410] sm:$0xff]   ;;  %v435_v19 = vld [vmem:[%s3031_s19 + $0x1418] sm:$0xff]  }
  0x3a   : > { %420 = vst [vmem:[%s3039_s20 + $0x278] sm:$0xff] %v419_v15   ;;  %424 = vst [vmem:[%s3039_s20 + $0x280] sm:$0xff] %v423_v16   ;;  %v439_v20 = vld [vmem:[%s3031_s19 + $0x1420] sm:$0xff]   ;;  %v443_v21 = vld [vmem:[%s3031_s19 + $0x1428] sm:$0xff]  }
  0x3b   : > { %428 = vst [vmem:[%s3039_s20 + $0x288] sm:$0xff] %v427_v17   ;;  %432 = vst [vmem:[%s3039_s20 + $0x290] sm:$0xff] %v431_v18   ;;  %v447_v22 = vld [vmem:[%s3031_s19 + $0x1430] sm:$0xff]   ;;  %v451_v23 = vld [vmem:[%s3031_s19 + $0x1438] sm:$0xff]  }
  0x3c   : > { %436 = vst [vmem:[%s3039_s20 + $0x298] sm:$0xff] %v435_v19   ;;  %440 = vst [vmem:[%s3039_s20 + $0x2a0] sm:$0xff] %v439_v20   ;;  %v455_v24 = vld [vmem:[%s3031_s19 + $0x1440] sm:$0xff]   ;;  %v459_v25 = vld [vmem:[%s3031_s19 + $0x1448] sm:$0xff]  }
  0x3d   : > { %444 = vst [vmem:[%s3039_s20 + $0x2a8] sm:$0xff] %v443_v21   ;;  %448 = vst [vmem:[%s3039_s20 + $0x2b0] sm:$0xff] %v447_v22   ;;  %v463_v26 = vld [vmem:[%s3031_s19 + $0x1450] sm:$0xff]   ;;  %v467_v27 = vld [vmem:[%s3031_s19 + $0x1458] sm:$0xff]  }
  0x3e   : > { %452 = vst [vmem:[%s3039_s20 + $0x2b8] sm:$0xff] %v451_v23   ;;  %456 = vst [vmem:[%s3039_s20 + $0x2c0] sm:$0xff] %v455_v24   ;;  %v471_v28 = vld [vmem:[%s3031_s19 + $0x1460] sm:$0xff]   ;;  %v475_v29 = vld [vmem:[%s3031_s19 + $0x1468] sm:$0xff]  }
  0x3f   : > { %460 = vst [vmem:[%s3039_s20 + $0x2c8] sm:$0xff] %v459_v25   ;;  %464 = vst [vmem:[%s3039_s20 + $0x2d0] sm:$0xff] %v463_v26   ;;  %v479_v30 = vld [vmem:[%s3031_s19 + $0x1470] sm:$0xff]   ;;  %v483_v31 = vld [vmem:[%s3031_s19 + $0x1478] sm:$0xff]  }
  0x40   : > { %468 = vst [vmem:[%s3039_s20 + $0x2d8] sm:$0xff] %v467_v27   ;;  %472 = vst [vmem:[%s3039_s20 + $0x2e0] sm:$0xff] %v471_v28   ;;  %v487_v32 = vld [vmem:[%s3031_s19 + $0x1800] sm:$0xff]   ;;  %v491_v33 = vld [vmem:[%s3031_s19 + $0x1808] sm:$0xff]  }
  0x41   : > { %476 = vst [vmem:[%s3039_s20 + $0x2e8] sm:$0xff] %v475_v29   ;;  %480 = vst [vmem:[%s3039_s20 + $0x2f0] sm:$0xff] %v479_v30   ;;  %v495_v34 = vld [vmem:[%s3031_s19 + $0x1810] sm:$0xff]   ;;  %v499_v35 = vld [vmem:[%s3031_s19 + $0x1818] sm:$0xff]  }
  0x42   : > { %484 = vst [vmem:[%s3039_s20 + $0x2f8] sm:$0xff] %v483_v31   ;;  %488 = vst [vmem:[%s3039_s20 + $0x300] sm:$0xff] %v487_v32   ;;  %v503_v36 = vld [vmem:[%s3031_s19 + $0x1820] sm:$0xff]   ;;  %v507_v37 = vld [vmem:[%s3031_s19 + $0x1828] sm:$0xff]  }
  0x43   : > { %492 = vst [vmem:[%s3039_s20 + $0x308] sm:$0xff] %v491_v33   ;;  %496 = vst [vmem:[%s3039_s20 + $0x310] sm:$0xff] %v495_v34   ;;  %v511_v38 = vld [vmem:[%s3031_s19 + $0x1830] sm:$0xff]   ;;  %v515_v39 = vld [vmem:[%s3031_s19 + $0x1838] sm:$0xff]  }
  0x44   : > { %500 = vst [vmem:[%s3039_s20 + $0x318] sm:$0xff] %v499_v35   ;;  %504 = vst [vmem:[%s3039_s20 + $0x320] sm:$0xff] %v503_v36   ;;  %v519_v40 = vld [vmem:[%s3031_s19 + $0x1840] sm:$0xff]   ;;  %v523_v41 = vld [vmem:[%s3031_s19 + $0x1848] sm:$0xff]  }
  0x45   : > { %508 = vst [vmem:[%s3039_s20 + $0x328] sm:$0xff] %v507_v37   ;;  %512 = vst [vmem:[%s3039_s20 + $0x330] sm:$0xff] %v511_v38   ;;  %v527_v42 = vld [vmem:[%s3031_s19 + $0x1850] sm:$0xff]   ;;  %v531_v43 = vld [vmem:[%s3031_s19 + $0x1858] sm:$0xff]  }
  0x46   : > { %516 = vst [vmem:[%s3039_s20 + $0x338] sm:$0xff] %v515_v39   ;;  %520 = vst [vmem:[%s3039_s20 + $0x340] sm:$0xff] %v519_v40   ;;  %v535_v44 = vld [vmem:[%s3031_s19 + $0x1860] sm:$0xff]   ;;  %v539_v45 = vld [vmem:[%s3031_s19 + $0x1868] sm:$0xff]  }
  0x47   : > { %524 = vst [vmem:[%s3039_s20 + $0x348] sm:$0xff] %v523_v41   ;;  %528 = vst [vmem:[%s3039_s20 + $0x350] sm:$0xff] %v527_v42   ;;  %v543_v46 = vld [vmem:[%s3031_s19 + $0x1870] sm:$0xff]   ;;  %v547_v47 = vld [vmem:[%s3031_s19 + $0x1878] sm:$0xff]  }
  0x48   : > { %532 = vst [vmem:[%s3039_s20 + $0x358] sm:$0xff] %v531_v43   ;;  %536 = vst [vmem:[%s3039_s20 + $0x360] sm:$0xff] %v535_v44   ;;  %v551_v48 = vld [vmem:[%s3031_s19 + $0x1c00] sm:$0xff]   ;;  %v555_v49 = vld [vmem:[%s3031_s19 + $0x1c08] sm:$0xff]  }
  0x49   : > { %540 = vst [vmem:[%s3039_s20 + $0x368] sm:$0xff] %v539_v45   ;;  %544 = vst [vmem:[%s3039_s20 + $0x370] sm:$0xff] %v543_v46   ;;  %v559_v50 = vld [vmem:[%s3031_s19 + $0x1c10] sm:$0xff]   ;;  %v563_v51 = vld [vmem:[%s3031_s19 + $0x1c18] sm:$0xff]  }
  0x4a   : > { %548 = vst [vmem:[%s3039_s20 + $0x378] sm:$0xff] %v547_v47   ;;  %552 = vst [vmem:[%s3039_s20 + $0x380] sm:$0xff] %v551_v48   ;;  %v567_v52 = vld [vmem:[%s3031_s19 + $0x1c20] sm:$0xff]   ;;  %v571_v53 = vld [vmem:[%s3031_s19 + $0x1c28] sm:$0xff]  }
  0x4b   : > { %556 = vst [vmem:[%s3039_s20 + $0x388] sm:$0xff] %v555_v49   ;;  %560 = vst [vmem:[%s3039_s20 + $0x390] sm:$0xff] %v559_v50   ;;  %v575_v54 = vld [vmem:[%s3031_s19 + $0x1c30] sm:$0xff]   ;;  %v579_v55 = vld [vmem:[%s3031_s19 + $0x1c38] sm:$0xff]  }
  0x4c   : > { %564 = vst [vmem:[%s3039_s20 + $0x398] sm:$0xff] %v563_v51   ;;  %568 = vst [vmem:[%s3039_s20 + $0x3a0] sm:$0xff] %v567_v52   ;;  %v583_v56 = vld [vmem:[%s3031_s19 + $0x1c40] sm:$0xff]   ;;  %v587_v57 = vld [vmem:[%s3031_s19 + $0x1c48] sm:$0xff]  }
  0x4d   : > { %572 = vst [vmem:[%s3039_s20 + $0x3a8] sm:$0xff] %v571_v53   ;;  %576 = vst [vmem:[%s3039_s20 + $0x3b0] sm:$0xff] %v575_v54   ;;  %v591_v58 = vld [vmem:[%s3031_s19 + $0x1c50] sm:$0xff]   ;;  %v595_v59 = vld [vmem:[%s3031_s19 + $0x1c58] sm:$0xff]  }
  0x4e   : > { %580 = vst [vmem:[%s3039_s20 + $0x3b8] sm:$0xff] %v579_v55   ;;  %584 = vst [vmem:[%s3039_s20 + $0x3c0] sm:$0xff] %v583_v56   ;;  %v599_v60 = vld [vmem:[%s3031_s19 + $0x1c60] sm:$0xff]   ;;  %v603_v61 = vld [vmem:[%s3031_s19 + $0x1c68] sm:$0xff]  }
  0x4f   : > { %588 = vst [vmem:[%s3039_s20 + $0x3c8] sm:$0xff] %v587_v57   ;;  %592 = vst [vmem:[%s3039_s20 + $0x3d0] sm:$0xff] %v591_v58   ;;  %v607_v62 = vld [vmem:[%s3031_s19 + $0x1c70] sm:$0xff]   ;;  %v611_v63 = vld [vmem:[%s3031_s19 + $0x1c78] sm:$0xff]  }
  0x50   : > { %596 = vst [vmem:[%s3039_s20 + $0x3d8] sm:$0xff] %v595_v59   ;;  %600 = vst [vmem:[%s3039_s20 + $0x3e0] sm:$0xff] %v599_v60   ;;  %v615_v0 = vld [vmem:[%s3031_s19 + $0x2000] sm:$0xff]   ;;  %v619_v1 = vld [vmem:[%s3031_s19 + $0x2008] sm:$0xff]  }
  0x51   : > { %604 = vst [vmem:[%s3039_s20 + $0x3e8] sm:$0xff] %v603_v61   ;;  %608 = vst [vmem:[%s3039_s20 + $0x3f0] sm:$0xff] %v607_v62   ;;  %v623_v2 = vld [vmem:[%s3031_s19 + $0x2010] sm:$0xff]   ;;  %v627_v3 = vld [vmem:[%s3031_s19 + $0x2018] sm:$0xff]  }
  0x52   : > { %612 = vst [vmem:[%s3039_s20 + $0x3f8] sm:$0xff] %v611_v63   ;;  %616 = vst [vmem:[%s3039_s20 + $0x400] sm:$0xff] %v615_v0   ;;  %v631_v4 = vld [vmem:[%s3031_s19 + $0x2020] sm:$0xff]   ;;  %v635_v5 = vld [vmem:[%s3031_s19 + $0x2028] sm:$0xff]  }
  0x53   : > { %620 = vst [vmem:[%s3039_s20 + $0x408] sm:$0xff] %v619_v1   ;;  %624 = vst [vmem:[%s3039_s20 + $0x410] sm:$0xff] %v623_v2   ;;  %v639_v6 = vld [vmem:[%s3031_s19 + $0x2030] sm:$0xff]   ;;  %v643_v7 = vld [vmem:[%s3031_s19 + $0x2038] sm:$0xff]  }
  0x54   : > { %628 = vst [vmem:[%s3039_s20 + $0x418] sm:$0xff] %v627_v3   ;;  %632 = vst [vmem:[%s3039_s20 + $0x420] sm:$0xff] %v631_v4   ;;  %v647_v8 = vld [vmem:[%s3031_s19 + $0x2040] sm:$0xff]   ;;  %v651_v9 = vld [vmem:[%s3031_s19 + $0x2048] sm:$0xff]  }
  0x55   : > { %636 = vst [vmem:[%s3039_s20 + $0x428] sm:$0xff] %v635_v5   ;;  %640 = vst [vmem:[%s3039_s20 + $0x430] sm:$0xff] %v639_v6   ;;  %v655_v10 = vld [vmem:[%s3031_s19 + $0x2050] sm:$0xff]   ;;  %v659_v11 = vld [vmem:[%s3031_s19 + $0x2058] sm:$0xff]  }
  0x56   : > { %644 = vst [vmem:[%s3039_s20 + $0x438] sm:$0xff] %v643_v7   ;;  %648 = vst [vmem:[%s3039_s20 + $0x440] sm:$0xff] %v647_v8   ;;  %v663_v12 = vld [vmem:[%s3031_s19 + $0x2060] sm:$0xff]   ;;  %v667_v13 = vld [vmem:[%s3031_s19 + $0x2068] sm:$0xff]  }
  0x57   : > { %652 = vst [vmem:[%s3039_s20 + $0x448] sm:$0xff] %v651_v9   ;;  %656 = vst [vmem:[%s3039_s20 + $0x450] sm:$0xff] %v655_v10   ;;  %v671_v14 = vld [vmem:[%s3031_s19 + $0x2070] sm:$0xff]   ;;  %v675_v15 = vld [vmem:[%s3031_s19 + $0x2078] sm:$0xff]  }
  0x58   : > { %660 = vst [vmem:[%s3039_s20 + $0x458] sm:$0xff] %v659_v11   ;;  %664 = vst [vmem:[%s3039_s20 + $0x460] sm:$0xff] %v663_v12  }
  0x59   : > { %668 = vst [vmem:[%s3039_s20 + $0x468] sm:$0xff] %v667_v13   ;;  %672 = vst [vmem:[%s3039_s20 + $0x470] sm:$0xff] %v671_v14  }
  0x5a   : > { %676 = vst [vmem:[%s3039_s20 + $0x478] sm:$0xff] %v675_v15  }
  0x5b PF: > { %p2820_p5 = scmp.ge.s32.totalorder %s2985_s8, 1  ;;  %p1276_p6 = scmp.lt.s32.totalorder %s2985_s8, 9 }
  0x5d   : > { %p1277_p7 = pnand %p2820_p5, %p1276_p6 }
  0x5e   : > { %s1283_s21 = sand.u32 (!%p1277_p7), 1, %s2977_s6   ;;  %vm1598_vm0 = vcmask (!%p1277_p7), 1043456   ;;  %s2821_s24 = sshll.u32 (!%p1277_p7), %s2814_s9, 5 }
  0x5f   : > { %1280 = sbr.rel (%p1277_p7) target bundleno = 309 (0x135), region = 61  ;;  %p1304_p8 = scmp.lt.s32.totalorder (!%p1277_p7), %s2821_s24, 255 }
  0x60   : > { %s2938_s22 = smul.u32 (!%p1277_p7), 1152, %s1283_s21 }
  0x62   : > { %s3326_s23 = scalar_lea.vmem (!%p1277_p7), [#allocation2], %s2938_s22 }
  0x63   : > { %v1310_v16 = vld [vmem:[%s3326_s23] sm:$0xf] (!%p1277_p7)  ;;  %v1311_v19 = vld [vmem:[%s3326_s23 + $0x4] sm:$0xf] (!%p1277_p7)  ;;  %v1312_v54 = vld [vmem:[%s3326_s23 + $0x8] sm:$0xf] (!%p1277_p7) }
  0x64   : > { %v1342_v17 = vld [vmem:[%s3326_s23 + $0x80] sm:$0xf] (!%p1277_p7)  ;;  %v1343_v20 = vld [vmem:[%s3326_s23 + $0x84] sm:$0xf] (!%p1277_p7)  ;;  %v1601_v22 = vsel (!%p1277_p7), %vm1598_vm0, %v1310_v16, 4286644096 }
  0x65   : > { %v1374_v18 = vld [vmem:[%s3326_s23 + $0x100] sm:$0xf] (!%p1277_p7)  ;;  %v1375_v23 = vld [vmem:[%s3326_s23 + $0x104] sm:$0xf] (!%p1277_p7)  ;;  %v1604_v24 = vsel (!%p1277_p7), %vm1598_vm0, %v1342_v17, 4286644096 }
  0x66   : > { %v1406_v21 = vld [vmem:[%s3326_s23 + $0x180] sm:$0xf]  ;;  %v1608_v25 = vsel %vm1598_vm0, %v1374_v18, 4286644096  ;;  %v1606_v27 = vmax.bf16 %v1604_v24, %v1601_v22  ;;  %v1407_v28 = vld [vmem:[%s3326_s23 + $0x184] sm:$0xf] }
  0x67   : > { %v1438_v26 = vld [vmem:[%s3326_s23 + $0x200] sm:$0xf]  ;;  %v1612_v29 = vsel %vm1598_vm0, %v1406_v21, 4286644096  ;;  %v1636_v30 = vsel %vm1598_vm0, %v1311_v19, 4286644096 }
  0x68   : > { %v1470_v31 = vld [vmem:[%s3326_s23 + $0x280] sm:$0xf]  ;;  %v1610_v32 = vmax.bf16 %v1608_v25, %v1606_v27  ;;  %v1639_v33 = vsel %vm1598_vm0, %v1343_v20, 4286644096  ;;  %v1643_v34 = vsel %vm1598_vm0, %v1375_v23, 4286644096 }
  0x69   : > { %v1439_v35 = vld [vmem:[%s3326_s23 + $0x204] sm:$0xf]  ;;  %v1616_v36 = vsel %vm1598_vm0, %v1438_v26, 4286644096  ;;  %v1641_v37 = vmax.bf16 %v1639_v33, %v1636_v30  ;;  %v1502_v38 = vld [vmem:[%s3326_s23 + $0x300] sm:$0xf] }
  0x6a   : > { %v1534_v39 = vld [vmem:[%s3326_s23 + $0x380] sm:$0xf]  ;;  %v1614_v40 = vmax.bf16 %v1612_v29, %v1610_v32  ;;  %v1647_v41 = vsel %vm1598_vm0, %v1407_v28, 4286644096  ;;  %s3947_s24 = smov (!%p1304_p8, %s2821_s24), 255 }
  0x6b   : > { %v1471_v42 = vld [vmem:[%s3326_s23 + $0x284] sm:$0xf]  ;;  %v1620_v43 = vsel %vm1598_vm0, %v1470_v31, 4286644096  ;;  %v1645_v44 = vmax.bf16 %v1643_v34, %v1641_v37  ;;  %v1566_v46 = vld [vmem:[%s3326_s23 + $0x400] sm:$0xf] }
  0x6c   : > { %v1503_v45 = vld [vmem:[%s3326_s23 + $0x304] sm:$0xf]  ;;  %v1618_v47 = vmax.bf16 %v1616_v36, %v1614_v40  ;;  %v1651_v48 = vsel %vm1598_vm0, %v1439_v35, 4286644096  ;;  %v1624_v51 = vsel %vm1598_vm0, %v1502_v38, 4286644096 }
  0x6d   : > { %v1535_v49 = vld [vmem:[%s3326_s23 + $0x384] sm:$0xf]  ;;  %v1628_v52 = vsel %vm1598_vm0, %v1534_v39, 4286644096  ;;  %v1649_v53 = vmax.bf16 %v1647_v41, %v1645_v44  ;;  %v1655_v56 = vsel %vm1598_vm0, %v1471_v42, 4286644096 }
  0x6e   : > { %v1567_v50 = vld [vmem:[%s3326_s23 + $0x404] sm:$0xf]  ;;  %v1622_v55 = vmax.bf16 %v1620_v43, %v1618_v47  ;;  %v1344_v57 = vld [vmem:[%s3326_s23 + $0x88] sm:$0xf]  ;;  %v1632_v59 = vsel %vm1598_vm0, %v1566_v46, 4286644096 }
  0x6f   : > { %v1376_v58 = vld [vmem:[%s3326_s23 + $0x108] sm:$0xf]  ;;  %v1653_v60 = vmax.bf16 %v1651_v48, %v1649_v53  ;;  %v1659_v61 = vsel %vm1598_vm0, %v1503_v45, 4286644096  ;;  %v1313_v62 = vld [vmem:[%s3326_s23 + $0xc] sm:$0xf] }
  0x70   : > { %v1626_v63 = vmax.bf16 %v1624_v51, %v1622_v55  ;;  %v1345_v0 = vld [vmem:[%s3326_s23 + $0x8c] sm:$0xf]  ;;  %v1408_v1 = vld [vmem:[%s3326_s23 + $0x188] sm:$0xf]  ;;  %v1671_v2 = vsel %vm1598_vm0, %v1312_v54, 4286644096 }
  0x71   : > { %v1657_v3 = vmax.bf16 %v1655_v56, %v1653_v60  ;;  %v1440_v4 = vld [vmem:[%s3326_s23 + $0x208] sm:$0xf]  ;;  %v1674_v5 = vsel %vm1598_vm0, %v1344_v57, 4286644096  ;;  %v1678_v6 = vsel %vm1598_vm0, %v1376_v58, 4286644096 }
  0x72   : > { %v1630_v7 = vmax.bf16 %v1628_v52, %v1626_v63  ;;  %v1663_v8 = vsel %vm1598_vm0, %v1535_v49, 4286644096  ;;  %v1667_v9 = vsel %vm1598_vm0, %v1567_v50, 4286644096  ;;  %v1377_v10 = vld [vmem:[%s3326_s23 + $0x10c] sm:$0xf]  ;;  %v1676_v11 = vmax.bf16 %v1674_v5, %v1671_v2 }
  0x73   : > { %v1661_v12 = vmax.bf16 %v1659_v61, %v1657_v3  ;;  %v1409_v13 = vld [vmem:[%s3326_s23 + $0x18c] sm:$0xf]  ;;  %v1472_v14 = vld [vmem:[%s3326_s23 + $0x288] sm:$0xf]  ;;  %v1682_v15 = vsel %vm1598_vm0, %v1408_v1, 4286644096 }
  0x74   : > { %v1680_v16 = vmax.bf16 %v1678_v6, %v1676_v11  ;;  %v1686_v17 = vsel %vm1598_vm0, %v1440_v4, 4286644096  ;;  %v1706_v18 = vsel %vm1598_vm0, %v1313_v62, 4286644096  ;;  %v1709_v19 = vsel %vm1598_vm0, %v1345_v0, 4286644096 }
  0x75   : > { %s2822_s25 = sshll.u32 %s3947_s24, 2  ;;  %v1634_v20 = vmax.bf16 %v1632_v59, %v1630_v7  ;;  %v1665_v21 = vmax.bf16 %v1663_v8, %v1661_v12  ;;  %v1441_v22 = vld [vmem:[%s3326_s23 + $0x20c] sm:$0xf]  ;;  %v1711_v23 = vmax.bf16 %v1709_v19, %v1706_v18  ;;  %v1713_v24 = vsel %vm1598_vm0, %v1377_v10, 4286644096 }
  0x76   : > { %v1504_v25 = vld [vmem:[%s3326_s23 + $0x308] sm:$0xf]  ;;  %v1684_v27 = vmax.bf16 %v1682_v15, %v1680_v16  ;;  %v1717_v28 = vsel %vm1598_vm0, %v1409_v13, 4286644096  ;;  %v1473_v30 = vld [vmem:[%s3326_s23 + $0x28c] sm:$0xf]  ;;  %s3397_s28 = scalar_lea.vmem %s3942_s1, %s2822_s25 }
  0x77   : > { %v1536_v26 = vld [vmem:[%s3326_s23 + $0x388] sm:$0xf]  ;;  %v1669_v29 = vmax.bf16 %v1667_v9, %v1665_v21  ;;  %v1690_v31 = vsel %vm1598_vm0, %v1472_v14, 4286644096  ;;  %v1715_v32 = vmax.bf16 %v1713_v24, %v1711_v23  ;;  %v1505_v33 = vld [vmem:[%s3326_s23 + $0x30c] sm:$0xf] }
  0x78   : > { %v1568_v34 = vld [vmem:[%s3326_s23 + $0x408] sm:$0xf]  ;;  %v1688_v35 = vmax.bf16 %v1686_v17, %v1684_v27  ;;  %v1721_v36 = vsel %vm1598_vm0, %v1441_v22, 4286644096  ;;  %v1537_v38 = vld [vmem:[%s3326_s23 + $0x38c] sm:$0xf] }
  0x79   : > { %v2906_v37 = vcombine.low %v1634_v20, %v1669_v29  ;;  %v1569_v39 = vld [vmem:[%s3326_s23 + $0x40c] sm:$0xf]  ;;  %v1694_v40 = vsel %vm1598_vm0, %v1504_v25, 4286644096  ;;  %v1698_v41 = vsel %vm1598_vm0, %v1536_v26, 4286644096  ;;  %v1719_v42 = vmax.bf16 %v1717_v28, %v1715_v32 }
  0x7a   : > { %v1314_v43 = vld [vmem:[%s3326_s23 + $0x10] sm:$0xf]  ;;  %v1692_v44 = vmax.bf16 %v1690_v31, %v1688_v35  ;;  %v1725_v45 = vsel %vm1598_vm0, %v1473_v30, 4286644096  ;;  %v1702_v48 = vsel %vm1598_vm0, %v1568_v34, 4286644096 }
  0x7b   : > { %v1346_v46 = vld [vmem:[%s3326_s23 + $0x90] sm:$0xf]  ;;  %2830 = vst [vmem:[%s3397_s28] sm:$0xff] %v2906_v37   ;;  %v1723_v49 = vmax.bf16 %v1721_v36, %v1719_v42  ;;  %v1729_v50 = vsel %vm1598_vm0, %v1505_v33, 4286644096  ;;  %v1315_v51 = vld [vmem:[%s3326_s23 + $0x14] sm:$0xf] }
  0x7c   : > { %v1378_v47 = vld [vmem:[%s3326_s23 + $0x110] sm:$0xf]  ;;  %v1696_v52 = vmax.bf16 %v1694_v40, %v1692_v44  ;;  %v1347_v53 = vld [vmem:[%s3326_s23 + $0x94] sm:$0xf]  ;;  %v1741_v55 = vsel %vm1598_vm0, %v1314_v43, 4286644096 }
  0x7d   : > { %v1410_v54 = vld [vmem:[%s3326_s23 + $0x190] sm:$0xf]  ;;  %v1727_v56 = vmax.bf16 %v1725_v45, %v1723_v49  ;;  %v1744_v58 = vsel %vm1598_vm0, %v1346_v46, 4286644096  ;;  %v1748_v59 = vsel %vm1598_vm0, %v1378_v47, 4286644096 }
  0x7e   : > { %v1442_v57 = vld [vmem:[%s3326_s23 + $0x210] sm:$0xf]  ;;  %v1700_v60 = vmax.bf16 %v1698_v41, %v1696_v52  ;;  %v1733_v61 = vsel %vm1598_vm0, %v1537_v38, 4286644096  ;;  %v1737_v62 = vsel %vm1598_vm0, %v1569_v39, 4286644096  ;;  %v1746_v0 = vmax.bf16 %v1744_v58, %v1741_v55 }
  0x7f   : > { %v1379_v63 = vld [vmem:[%s3326_s23 + $0x114] sm:$0xf]  ;;  %v1731_v1 = vmax.bf16 %v1729_v50, %v1727_v56  ;;  %v1474_v3 = vld [vmem:[%s3326_s23 + $0x290] sm:$0xf]  ;;  %v1752_v4 = vsel %vm1598_vm0, %v1410_v54, 4286644096 }
  0x80   : > { %v1411_v2 = vld [vmem:[%s3326_s23 + $0x194] sm:$0xf]  ;;  %v1750_v5 = vmax.bf16 %v1748_v59, %v1746_v0  ;;  %v1756_v6 = vsel %vm1598_vm0, %v1442_v57, 4286644096  ;;  %v1776_v7 = vsel %vm1598_vm0, %v1315_v51, 4286644096  ;;  %v1704_v9 = vmax.bf16 %v1702_v48, %v1700_v60 }
  0x81   : > { %v1779_v8 = vsel %vm1598_vm0, %v1347_v53, 4286644096  ;;  %v1735_v10 = vmax.bf16 %v1733_v61, %v1731_v1  ;;  %v1443_v11 = vld [vmem:[%s3326_s23 + $0x214] sm:$0xf]  ;;  %v1783_v13 = vsel %vm1598_vm0, %v1379_v63, 4286644096 }
  0x82   : > { %v1781_v12 = vmax.bf16 %v1779_v8, %v1776_v7  ;;  %v1506_v14 = vld [vmem:[%s3326_s23 + $0x310] sm:$0xf]  ;;  %v1754_v16 = vmax.bf16 %v1752_v4, %v1750_v5  ;;  %v1787_v17 = vsel %vm1598_vm0, %v1411_v2, 4286644096  ;;  %v1475_v19 = vld [vmem:[%s3326_s23 + $0x294] sm:$0xf] }
  0x83   : > { %v1538_v15 = vld [vmem:[%s3326_s23 + $0x390] sm:$0xf]  ;;  %v1739_v18 = vmax.bf16 %v1737_v62, %v1735_v10  ;;  %v1760_v20 = vsel %vm1598_vm0, %v1474_v3, 4286644096  ;;  %v1507_v22 = vld [vmem:[%s3326_s23 + $0x314] sm:$0xf] }
  0x84   : > { %v1785_v21 = vmax.bf16 %v1783_v13, %v1781_v12  ;;  %v1570_v23 = vld [vmem:[%s3326_s23 + $0x410] sm:$0xf]  ;;  %v1758_v24 = vmax.bf16 %v1756_v6, %v1754_v16  ;;  %v1791_v25 = vsel %vm1598_vm0, %v1443_v11, 4286644096  ;;  %v1539_v27 = vld [vmem:[%s3326_s23 + $0x394] sm:$0xf] }
  0x85   : > { %v2907_v26 = vcombine.low %v1704_v9, %v1739_v18  ;;  %v1571_v28 = vld [vmem:[%s3326_s23 + $0x414] sm:$0xf]  ;;  %v1764_v29 = vsel %vm1598_vm0, %v1506_v14, 4286644096  ;;  %v1768_v30 = vsel %vm1598_vm0, %v1538_v15, 4286644096 }
  0x86   : > { %v1789_v31 = vmax.bf16 %v1787_v17, %v1785_v21  ;;  %v1316_v32 = vld [vmem:[%s3326_s23 + $0x18] sm:$0xf]  ;;  %v1762_v33 = vmax.bf16 %v1760_v20, %v1758_v24  ;;  %v1795_v34 = vsel %vm1598_vm0, %v1475_v19, 4286644096  ;;  %v1772_v37 = vsel %vm1598_vm0, %v1570_v23, 4286644096 }
  0x87   : > { %v1348_v35 = vld [vmem:[%s3326_s23 + $0x98] sm:$0xf]  ;;  %2908 = vst [vmem:[%s3397_s28 + $0x8] sm:$0xff] %v2907_v26   ;;  %v1799_v39 = vsel %vm1598_vm0, %v1507_v22, 4286644096 }
  0x88   : > { %v1380_v36 = vld [vmem:[%s3326_s23 + $0x118] sm:$0xf]  ;;  %v1793_v38 = vmax.bf16 %v1791_v25, %v1789_v31  ;;  %v1317_v40 = vld [vmem:[%s3326_s23 + $0x1c] sm:$0xf]  ;;  %v1766_v41 = vmax.bf16 %v1764_v29, %v1762_v33  ;;  %v1811_v44 = vsel %vm1598_vm0, %v1316_v32, 4286644096 }
  0x89   : > { %v1349_v42 = vld [vmem:[%s3326_s23 + $0x9c] sm:$0xf]  ;;  %v1412_v43 = vld [vmem:[%s3326_s23 + $0x198] sm:$0xf]  ;;  %v1814_v47 = vsel %vm1598_vm0, %v1348_v35, 4286644096 }
  0x8a   : > { %v1797_v45 = vmax.bf16 %v1795_v34, %v1793_v38  ;;  %v1444_v46 = vld [vmem:[%s3326_s23 + $0x218] sm:$0xf]  ;;  %v1818_v48 = vsel %vm1598_vm0, %v1380_v36, 4286644096  ;;  %v1770_v49 = vmax.bf16 %v1768_v30, %v1766_v41  ;;  %v1803_v50 = vsel %vm1598_vm0, %v1539_v27, 4286644096 }
  0x8b   : > { %v1807_v51 = vsel %vm1598_vm0, %v1571_v28, 4286644096  ;;  %v1381_v52 = vld [vmem:[%s3326_s23 + $0x11c] sm:$0xf]  ;;  %v1816_v53 = vmax.bf16 %v1814_v47, %v1811_v44  ;;  %v1476_v56 = vld [vmem:[%s3326_s23 + $0x298] sm:$0xf] }
  0x8c   : > { %v1801_v54 = vmax.bf16 %v1799_v39, %v1797_v45  ;;  %v1413_v55 = vld [vmem:[%s3326_s23 + $0x19c] sm:$0xf]  ;;  %v1822_v57 = vsel %vm1598_vm0, %v1412_v43, 4286644096  ;;  %v1826_v59 = vsel %vm1598_vm0, %v1444_v46, 4286644096  ;;  %v1774_v62 = vmax.bf16 %v1772_v37, %v1770_v49 }
  0x8d   : > { %v1820_v58 = vmax.bf16 %v1818_v48, %v1816_v53  ;;  %v1846_v60 = vsel %vm1598_vm0, %v1317_v40, 4286644096  ;;  %v1849_v61 = vsel %vm1598_vm0, %v1349_v42, 4286644096  ;;  %v1445_v0 = vld [vmem:[%s3326_s23 + $0x21c] sm:$0xf] }
  0x8e   : > { %v1805_v63 = vmax.bf16 %v1803_v50, %v1801_v54  ;;  %v1851_v1 = vmax.bf16 %v1849_v61, %v1846_v60  ;;  %v1853_v2 = vsel %vm1598_vm0, %v1381_v52, 4286644096  ;;  %v1508_v3 = vld [vmem:[%s3326_s23 + $0x318] sm:$0xf]  ;;  %v1857_v6 = vsel %vm1598_vm0, %v1413_v55, 4286644096 }
  0x8f   : > { %v1540_v4 = vld [vmem:[%s3326_s23 + $0x398] sm:$0xf]  ;;  %v1824_v5 = vmax.bf16 %v1822_v57, %v1820_v58  ;;  %v1477_v8 = vld [vmem:[%s3326_s23 + $0x29c] sm:$0xf]  ;;  %v1830_v9 = vsel %vm1598_vm0, %v1476_v56, 4286644096 }
  0x90   : > { %v1809_v7 = vmax.bf16 %v1807_v51, %v1805_v63  ;;  %v1855_v10 = vmax.bf16 %v1853_v2, %v1851_v1  ;;  %v1509_v11 = vld [vmem:[%s3326_s23 + $0x31c] sm:$0xf]  ;;  %v1572_v12 = vld [vmem:[%s3326_s23 + $0x418] sm:$0xf]  ;;  %v1861_v14 = vsel %vm1598_vm0, %v1445_v0, 4286644096 }
  0x91   : > { %v1828_v13 = vmax.bf16 %v1826_v59, %v1824_v5  ;;  %v1541_v16 = vld [vmem:[%s3326_s23 + $0x39c] sm:$0xf]  ;;  %v1834_v18 = vsel %vm1598_vm0, %v1508_v3, 4286644096  ;;  %v1838_v19 = vsel %vm1598_vm0, %v1540_v4, 4286644096 }
  0x92   : > { %v2909_v15 = vcombine.low %v1774_v62, %v1809_v7  ;;  %v1573_v17 = vld [vmem:[%s3326_s23 + $0x41c] sm:$0xf]  ;;  %v1859_v20 = vmax.bf16 %v1857_v6, %v1855_v10  ;;  %v1318_v21 = vld [vmem:[%s3326_s23 + $0x20] sm:$0xf]  ;;  %v1865_v23 = vsel %vm1598_vm0, %v1477_v8, 4286644096 }
  0x93   : > { %v1832_v22 = vmax.bf16 %v1830_v9, %v1828_v13  ;;  %v1350_v24 = vld [vmem:[%s3326_s23 + $0xa0] sm:$0xf]  ;;  %v1842_v26 = vsel %vm1598_vm0, %v1572_v12, 4286644096  ;;  %v1869_v28 = vsel %vm1598_vm0, %v1509_v11, 4286644096 }
  0x94   : > { %v1382_v25 = vld [vmem:[%s3326_s23 + $0x120] sm:$0xf]  ;;  %2910 = vst [vmem:[%s3397_s28 + $0x10] sm:$0xff] %v2909_v15   ;;  %v1863_v27 = vmax.bf16 %v1861_v14, %v1859_v20  ;;  %v1319_v29 = vld [vmem:[%s3326_s23 + $0x24] sm:$0xf] }
  0x95   : > { %v1836_v30 = vmax.bf16 %v1834_v18, %v1832_v22  ;;  %v1351_v31 = vld [vmem:[%s3326_s23 + $0xa4] sm:$0xf]  ;;  %v1414_v32 = vld [vmem:[%s3326_s23 + $0x1a0] sm:$0xf]  ;;  %v1881_v33 = vsel %vm1598_vm0, %v1318_v21, 4286644096 }
  0x96   : > { %v1867_v34 = vmax.bf16 %v1865_v23, %v1863_v27  ;;  %v1446_v35 = vld [vmem:[%s3326_s23 + $0x220] sm:$0xf]  ;;  %v1884_v36 = vsel %vm1598_vm0, %v1350_v24, 4286644096  ;;  %v1888_v37 = vsel %vm1598_vm0, %v1382_v25, 4286644096 }
  0x97   : > { %v1840_v38 = vmax.bf16 %v1838_v19, %v1836_v30  ;;  %v1873_v39 = vsel %vm1598_vm0, %v1541_v16, 4286644096  ;;  %v1877_v40 = vsel %vm1598_vm0, %v1573_v17, 4286644096  ;;  %v1383_v41 = vld [vmem:[%s3326_s23 + $0x124] sm:$0xf]  ;;  %v1886_v42 = vmax.bf16 %v1884_v36, %v1881_v33 }
  0x98   : > { %v1871_v43 = vmax.bf16 %v1869_v28, %v1867_v34  ;;  %v1415_v44 = vld [vmem:[%s3326_s23 + $0x1a4] sm:$0xf]  ;;  %v1478_v45 = vld [vmem:[%s3326_s23 + $0x2a0] sm:$0xf]  ;;  %v1892_v46 = vsel %vm1598_vm0, %v1414_v32, 4286644096 }
  0x99   : > { %v1890_v47 = vmax.bf16 %v1888_v37, %v1886_v42  ;;  %v1896_v48 = vsel %vm1598_vm0, %v1446_v35, 4286644096  ;;  %v1916_v49 = vsel %vm1598_vm0, %v1319_v29, 4286644096  ;;  %v1919_v50 = vsel %vm1598_vm0, %v1351_v31, 4286644096 }
  0x9a   : > { %v1844_v51 = vmax.bf16 %v1842_v26, %v1840_v38  ;;  %v1875_v52 = vmax.bf16 %v1873_v39, %v1871_v43  ;;  %v1447_v53 = vld [vmem:[%s3326_s23 + $0x224] sm:$0xf]  ;;  %v1921_v54 = vmax.bf16 %v1919_v50, %v1916_v49  ;;  %v1923_v55 = vsel %vm1598_vm0, %v1383_v41, 4286644096  ;;  %v1510_v56 = vld [vmem:[%s3326_s23 + $0x320] sm:$0xf] }
  0x9b   : > { %v1542_v57 = vld [vmem:[%s3326_s23 + $0x3a0] sm:$0xf]  ;;  %v1894_v58 = vmax.bf16 %v1892_v46, %v1890_v47  ;;  %v1927_v59 = vsel %vm1598_vm0, %v1415_v44, 4286644096  ;;  %v1479_v61 = vld [vmem:[%s3326_s23 + $0x2a4] sm:$0xf] }
  0x9c   : > { %v1879_v60 = vmax.bf16 %v1877_v40, %v1875_v52  ;;  %v1900_v62 = vsel %vm1598_vm0, %v1478_v45, 4286644096  ;;  %v1925_v63 = vmax.bf16 %v1923_v55, %v1921_v54  ;;  %v1511_v0 = vld [vmem:[%s3326_s23 + $0x324] sm:$0xf]  ;;  %v1574_v1 = vld [vmem:[%s3326_s23 + $0x420] sm:$0xf] }
  0x9d   : > { %v1898_v2 = vmax.bf16 %v1896_v48, %v1894_v58  ;;  %v1931_v3 = vsel %vm1598_vm0, %v1447_v53, 4286644096  ;;  %v1543_v5 = vld [vmem:[%s3326_s23 + $0x3a4] sm:$0xf]  ;;  %v1904_v7 = vsel %vm1598_vm0, %v1510_v56, 4286644096 }
  0x9e   : > { %v2911_v4 = vcombine.low %v1844_v51, %v1879_v60  ;;  %v1575_v6 = vld [vmem:[%s3326_s23 + $0x424] sm:$0xf]  ;;  %v1908_v8 = vsel %vm1598_vm0, %v1542_v57, 4286644096  ;;  %v1929_v9 = vmax.bf16 %v1927_v59, %v1925_v63  ;;  %v1320_v10 = vld [vmem:[%s3326_s23 + $0x28] sm:$0xf] }
  0x9f   : > { %v1902_v11 = vmax.bf16 %v1900_v62, %v1898_v2  ;;  %v1935_v12 = vsel %vm1598_vm0, %v1479_v61, 4286644096  ;;  %v1352_v13 = vld [vmem:[%s3326_s23 + $0xa8] sm:$0xf]  ;;  %v1912_v15 = vsel %vm1598_vm0, %v1574_v1, 4286644096 }
  0xa0   : > { %v1384_v14 = vld [vmem:[%s3326_s23 + $0x128] sm:$0xf]  ;;  %2912 = vst [vmem:[%s3397_s28 + $0x18] sm:$0xff] %v2911_v4   ;;  %v1933_v16 = vmax.bf16 %v1931_v3, %v1929_v9  ;;  %v1939_v17 = vsel %vm1598_vm0, %v1511_v0, 4286644096 }
  0xa1   : > { %v1321_v18 = vld [vmem:[%s3326_s23 + $0x2c] sm:$0xf]  ;;  %v1906_v19 = vmax.bf16 %v1904_v7, %v1902_v11  ;;  %v1416_v21 = vld [vmem:[%s3326_s23 + $0x1a8] sm:$0xf]  ;;  %v1951_v22 = vsel %vm1598_vm0, %v1320_v10, 4286644096 }
  0xa2   : > { %v1353_v20 = vld [vmem:[%s3326_s23 + $0xac] sm:$0xf]  ;;  %v1937_v23 = vmax.bf16 %v1935_v12, %v1933_v16  ;;  %v1448_v24 = vld [vmem:[%s3326_s23 + $0x228] sm:$0xf]  ;;  %v1954_v25 = vsel %vm1598_vm0, %v1352_v13, 4286644096 }
  0xa3   : > { %v1958_v26 = vsel %vm1598_vm0, %v1384_v14, 4286644096  ;;  %v1910_v27 = vmax.bf16 %v1908_v8, %v1906_v19  ;;  %v1943_v28 = vsel %vm1598_vm0, %v1543_v5, 4286644096  ;;  %v1947_v29 = vsel %vm1598_vm0, %v1575_v6, 4286644096 }
  0xa4   : > { %v1385_v30 = vld [vmem:[%s3326_s23 + $0x12c] sm:$0xf]  ;;  %v1956_v31 = vmax.bf16 %v1954_v25, %v1951_v22  ;;  %v1941_v32 = vmax.bf16 %v1939_v17, %v1937_v23  ;;  %v1480_v34 = vld [vmem:[%s3326_s23 + $0x2a8] sm:$0xf]  ;;  %v1962_v35 = vsel %vm1598_vm0, %v1416_v21, 4286644096 }
  0xa5   : > { %v1417_v33 = vld [vmem:[%s3326_s23 + $0x1ac] sm:$0xf]  ;;  %v1966_v37 = vsel %vm1598_vm0, %v1448_v24, 4286644096  ;;  %v1986_v38 = vsel %vm1598_vm0, %v1321_v18, 4286644096  ;;  %v1914_v40 = vmax.bf16 %v1912_v15, %v1910_v27 }
  0xa6   : > { %v1960_v36 = vmax.bf16 %v1958_v26, %v1956_v31  ;;  %v1989_v39 = vsel %vm1598_vm0, %v1353_v20, 4286644096  ;;  %v1945_v41 = vmax.bf16 %v1943_v28, %v1941_v32  ;;  %v1449_v42 = vld [vmem:[%s3326_s23 + $0x22c] sm:$0xf]  ;;  %v1993_v44 = vsel %vm1598_vm0, %v1385_v30, 4286644096 }
  0xa7   : > { %v1991_v43 = vmax.bf16 %v1989_v39, %v1986_v38  ;;  %v1512_v45 = vld [vmem:[%s3326_s23 + $0x328] sm:$0xf]  ;;  %v1997_v48 = vsel %vm1598_vm0, %v1417_v33, 4286644096  ;;  %v1481_v50 = vld [vmem:[%s3326_s23 + $0x2ac] sm:$0xf] }
  0xa8   : > { %v1544_v46 = vld [vmem:[%s3326_s23 + $0x3a8] sm:$0xf]  ;;  %v1964_v47 = vmax.bf16 %v1962_v35, %v1960_v36  ;;  %v1949_v49 = vmax.bf16 %v1947_v29, %v1945_v41  ;;  %v1970_v51 = vsel %vm1598_vm0, %v1480_v34, 4286644096  ;;  %v1513_v53 = vld [vmem:[%s3326_s23 + $0x32c] sm:$0xf] }
  0xa9   : > { %v1995_v52 = vmax.bf16 %v1993_v44, %v1991_v43  ;;  %v1576_v54 = vld [vmem:[%s3326_s23 + $0x428] sm:$0xf]  ;;  %v2001_v56 = vsel %vm1598_vm0, %v1449_v42, 4286644096  ;;  %v1545_v58 = vld [vmem:[%s3326_s23 + $0x3ac] sm:$0xf] }
  0xaa   : > { %v1968_v55 = vmax.bf16 %v1966_v37, %v1964_v47  ;;  %v2913_v57 = vcombine.low %v1914_v40, %v1949_v49  ;;  %v1577_v59 = vld [vmem:[%s3326_s23 + $0x42c] sm:$0xf]  ;;  %v1974_v60 = vsel %vm1598_vm0, %v1512_v45, 4286644096  ;;  %v1978_v61 = vsel %vm1598_vm0, %v1544_v46, 4286644096 }
  0xab   : > { %v1999_v62 = vmax.bf16 %v1997_v48, %v1995_v52  ;;  %v1322_v63 = vld [vmem:[%s3326_s23 + $0x30] sm:$0xf]  ;;  %v2005_v1 = vsel %vm1598_vm0, %v1481_v50, 4286644096  ;;  %v1982_v4 = vsel %vm1598_vm0, %v1576_v54, 4286644096 }
  0xac   : > { %v1972_v0 = vmax.bf16 %v1970_v51, %v1968_v55  ;;  %v1354_v2 = vld [vmem:[%s3326_s23 + $0xb0] sm:$0xf]  ;;  %2914 = vst [vmem:[%s3397_s28 + $0x20] sm:$0xff] %v2913_v57   ;;  %v2009_v6 = vsel %vm1598_vm0, %v1513_v53, 4286644096 }
  0xad   : > { %v1386_v3 = vld [vmem:[%s3326_s23 + $0x130] sm:$0xf]  ;;  %v2003_v5 = vmax.bf16 %v2001_v56, %v1999_v62  ;;  %v1323_v7 = vld [vmem:[%s3326_s23 + $0x34] sm:$0xf]  ;;  %v2021_v11 = vsel %vm1598_vm0, %v1322_v63, 4286644096 }
  0xae   : > { %v1976_v8 = vmax.bf16 %v1974_v60, %v1972_v0  ;;  %v1355_v9 = vld [vmem:[%s3326_s23 + $0xb4] sm:$0xf]  ;;  %v1418_v10 = vld [vmem:[%s3326_s23 + $0x1b0] sm:$0xf]  ;;  %v2024_v14 = vsel %vm1598_vm0, %v1354_v2, 4286644096 }
  0xaf   : > { %v2007_v12 = vmax.bf16 %v2005_v1, %v2003_v5  ;;  %v1450_v13 = vld [vmem:[%s3326_s23 + $0x230] sm:$0xf]  ;;  %v2028_v15 = vsel %vm1598_vm0, %v1386_v3, 4286644096  ;;  %v2013_v17 = vsel %vm1598_vm0, %v1545_v58, 4286644096  ;;  %v2026_v20 = vmax.bf16 %v2024_v14, %v2021_v11 }
  0xb0   : > { %v1980_v16 = vmax.bf16 %v1978_v61, %v1976_v8  ;;  %v2017_v18 = vsel %vm1598_vm0, %v1577_v59, 4286644096  ;;  %v1387_v19 = vld [vmem:[%s3326_s23 + $0x134] sm:$0xf]  ;;  %v1482_v23 = vld [vmem:[%s3326_s23 + $0x2b0] sm:$0xf] }
  0xb1   : > { %v2011_v21 = vmax.bf16 %v2009_v6, %v2007_v12  ;;  %v1419_v22 = vld [vmem:[%s3326_s23 + $0x1b4] sm:$0xf]  ;;  %v2032_v24 = vsel %vm1598_vm0, %v1418_v10, 4286644096  ;;  %v2030_v25 = vmax.bf16 %v2028_v15, %v2026_v20  ;;  %v2036_v26 = vsel %vm1598_vm0, %v1450_v13, 4286644096 }
  0xb2   : > { %v2056_v27 = vsel %vm1598_vm0, %v1323_v7, 4286644096  ;;  %v2059_v28 = vsel %vm1598_vm0, %v1355_v9, 4286644096  ;;  %v1984_v29 = vmax.bf16 %v1982_v4, %v1980_v16  ;;  %v1451_v31 = vld [vmem:[%s3326_s23 + $0x234] sm:$0xf] }
  0xb3   : > { %v2015_v30 = vmax.bf16 %v2013_v17, %v2011_v21  ;;  %v2061_v32 = vmax.bf16 %v2059_v28, %v2056_v27  ;;  %v2063_v33 = vsel %vm1598_vm0, %v1387_v19, 4286644096  ;;  %v1514_v34 = vld [vmem:[%s3326_s23 + $0x330] sm:$0xf]  ;;  %v2034_v36 = vmax.bf16 %v2032_v24, %v2030_v25  ;;  %v1483_v39 = vld [vmem:[%s3326_s23 + $0x2b4] sm:$0xf] }
  0xb4   : > { %v1546_v35 = vld [vmem:[%s3326_s23 + $0x3b0] sm:$0xf]  ;;  %v2067_v37 = vsel %vm1598_vm0, %v1419_v22, 4286644096  ;;  %v2040_v40 = vsel %vm1598_vm0, %v1482_v23, 4286644096 }
  0xb5   : > { %v2019_v38 = vmax.bf16 %v2017_v18, %v2015_v30  ;;  %v2065_v41 = vmax.bf16 %v2063_v33, %v2061_v32  ;;  %v1515_v42 = vld [vmem:[%s3326_s23 + $0x334] sm:$0xf]  ;;  %v1578_v43 = vld [vmem:[%s3326_s23 + $0x430] sm:$0xf]  ;;  %v2038_v44 = vmax.bf16 %v2036_v26, %v2034_v36  ;;  %v2071_v45 = vsel %vm1598_vm0, %v1451_v31, 4286644096 }
  0xb6   : > { %v1547_v47 = vld [vmem:[%s3326_s23 + $0x3b4] sm:$0xf]  ;;  %v2044_v49 = vsel %vm1598_vm0, %v1514_v34, 4286644096  ;;  %v2048_v50 = vsel %vm1598_vm0, %v1546_v35, 4286644096 }
  0xb7   : > { %v2915_v46 = vcombine.low %v1984_v29, %v2019_v38  ;;  %v1579_v48 = vld [vmem:[%s3326_s23 + $0x434] sm:$0xf]  ;;  %v2069_v51 = vmax.bf16 %v2067_v37, %v2065_v41  ;;  %v1324_v52 = vld [vmem:[%s3326_s23 + $0x38] sm:$0xf]  ;;  %v2042_v53 = vmax.bf16 %v2040_v40, %v2038_v44  ;;  %v2075_v54 = vsel %vm1598_vm0, %v1483_v39, 4286644096 }
  0xb8   : > { %v1356_v55 = vld [vmem:[%s3326_s23 + $0xb8] sm:$0xf]  ;;  %v2052_v57 = vsel %vm1598_vm0, %v1578_v43, 4286644096  ;;  %v2079_v59 = vsel %vm1598_vm0, %v1515_v42, 4286644096 }
  0xb9   : > { %v1388_v56 = vld [vmem:[%s3326_s23 + $0x138] sm:$0xf]  ;;  %2916 = vst [vmem:[%s3397_s28 + $0x28] sm:$0xff] %v2915_v46   ;;  %v2073_v58 = vmax.bf16 %v2071_v45, %v2069_v51  ;;  %v1325_v60 = vld [vmem:[%s3326_s23 + $0x3c] sm:$0xf]  ;;  %v2046_v61 = vmax.bf16 %v2044_v49, %v2042_v53 }
  0xba   : > { %v1357_v62 = vld [vmem:[%s3326_s23 + $0xbc] sm:$0xf]  ;;  %v1420_v63 = vld [vmem:[%s3326_s23 + $0x1b8] sm:$0xf]  ;;  %v2091_v0 = vsel %vm1598_vm0, %v1324_v52, 4286644096 }
  0xbb   : > { %v2077_v1 = vmax.bf16 %v2075_v54, %v2073_v58  ;;  %v1452_v2 = vld [vmem:[%s3326_s23 + $0x238] sm:$0xf]  ;;  %v2094_v3 = vsel %vm1598_vm0, %v1356_v55, 4286644096  ;;  %v2098_v4 = vsel %vm1598_vm0, %v1388_v56, 4286644096  ;;  %v2050_v5 = vmax.bf16 %v2048_v50, %v2046_v61 }
  0xbc   : > { %v2083_v6 = vsel %vm1598_vm0, %v1547_v47, 4286644096  ;;  %v2087_v7 = vsel %vm1598_vm0, %v1579_v48, 4286644096  ;;  %v1389_v8 = vld [vmem:[%s3326_s23 + $0x13c] sm:$0xf]  ;;  %v2096_v9 = vmax.bf16 %v2094_v3, %v2091_v0 }
  0xbd   : > { %v2081_v10 = vmax.bf16 %v2079_v59, %v2077_v1  ;;  %v1421_v11 = vld [vmem:[%s3326_s23 + $0x1bc] sm:$0xf]  ;;  %v1484_v12 = vld [vmem:[%s3326_s23 + $0x2b8] sm:$0xf]  ;;  %v2102_v13 = vsel %vm1598_vm0, %v1420_v63, 4286644096  ;;  %v2054_v18 = vmax.bf16 %v2052_v57, %v2050_v5 }
  0xbe   : > { %v2100_v14 = vmax.bf16 %v2098_v4, %v2096_v9  ;;  %v2106_v15 = vsel %vm1598_vm0, %v1452_v2, 4286644096  ;;  %v2126_v16 = vsel %vm1598_vm0, %v1325_v60, 4286644096  ;;  %v2129_v17 = vsel %vm1598_vm0, %v1357_v62, 4286644096 }
  0xbf   : > { %v2085_v19 = vmax.bf16 %v2083_v6, %v2081_v10  ;;  %v1453_v20 = vld [vmem:[%s3326_s23 + $0x23c] sm:$0xf]  ;;  %v2131_v21 = vmax.bf16 %v2129_v17, %v2126_v16  ;;  %v2133_v22 = vsel %vm1598_vm0, %v1389_v8, 4286644096  ;;  %v1516_v23 = vld [vmem:[%s3326_s23 + $0x338] sm:$0xf] }
  0xc0   : > { %v1548_v24 = vld [vmem:[%s3326_s23 + $0x3b8] sm:$0xf]  ;;  %v2104_v25 = vmax.bf16 %v2102_v13, %v2100_v14  ;;  %v2137_v26 = vsel %vm1598_vm0, %v1421_v11, 4286644096  ;;  %v1485_v28 = vld [vmem:[%s3326_s23 + $0x2bc] sm:$0xf] }
  0xc1   : > { %v2089_v27 = vmax.bf16 %v2087_v7, %v2085_v19  ;;  %v2110_v29 = vsel %vm1598_vm0, %v1484_v12, 4286644096  ;;  %v2135_v30 = vmax.bf16 %v2133_v22, %v2131_v21  ;;  %v1517_v31 = vld [vmem:[%s3326_s23 + $0x33c] sm:$0xf]  ;;  %v1580_v32 = vld [vmem:[%s3326_s23 + $0x438] sm:$0xf] }
  0xc2   : > { %v2108_v33 = vmax.bf16 %v2106_v15, %v2104_v25  ;;  %v2141_v34 = vsel %vm1598_vm0, %v1453_v20, 4286644096  ;;  %v1549_v36 = vld [vmem:[%s3326_s23 + $0x3bc] sm:$0xf]  ;;  %v2114_v38 = vsel %vm1598_vm0, %v1516_v23, 4286644096 }
  0xc3   : > { %v2917_v35 = vcombine.low %v2054_v18, %v2089_v27  ;;  %v1581_v37 = vld [vmem:[%s3326_s23 + $0x43c] sm:$0xf]  ;;  %v2118_v39 = vsel %vm1598_vm0, %v1548_v24, 4286644096  ;;  %v2139_v40 = vmax.bf16 %v2137_v26, %v2135_v30  ;;  %v1326_v41 = vld [vmem:[%s3326_s23 + $0x40] sm:$0xf] }
  0xc4   : > { %v2112_v42 = vmax.bf16 %v2110_v29, %v2108_v33  ;;  %v2145_v43 = vsel %vm1598_vm0, %v1485_v28, 4286644096  ;;  %v1358_v44 = vld [vmem:[%s3326_s23 + $0xc0] sm:$0xf]  ;;  %v2122_v46 = vsel %vm1598_vm0, %v1580_v32, 4286644096 }
  0xc5   : > { %v1390_v45 = vld [vmem:[%s3326_s23 + $0x140] sm:$0xf]  ;;  %2918 = vst [vmem:[%s3397_s28 + $0x30] sm:$0xff] %v2917_v35   ;;  %v2143_v47 = vmax.bf16 %v2141_v34, %v2139_v40  ;;  %v2149_v48 = vsel %vm1598_vm0, %v1517_v31, 4286644096 }
  0xc6   : > { %v1327_v49 = vld [vmem:[%s3326_s23 + $0x44] sm:$0xf]  ;;  %v2116_v50 = vmax.bf16 %v2114_v38, %v2112_v42  ;;  %v1422_v52 = vld [vmem:[%s3326_s23 + $0x1c0] sm:$0xf]  ;;  %v2161_v53 = vsel %vm1598_vm0, %v1326_v41, 4286644096 }
  0xc7   : > { %v1359_v51 = vld [vmem:[%s3326_s23 + $0xc4] sm:$0xf]  ;;  %v2147_v54 = vmax.bf16 %v2145_v43, %v2143_v47  ;;  %v1454_v55 = vld [vmem:[%s3326_s23 + $0x240] sm:$0xf]  ;;  %v2164_v56 = vsel %vm1598_vm0, %v1358_v44, 4286644096 }
  0xc8   : > { %v2168_v57 = vsel %vm1598_vm0, %v1390_v45, 4286644096  ;;  %v2120_v58 = vmax.bf16 %v2118_v39, %v2116_v50  ;;  %v2153_v59 = vsel %vm1598_vm0, %v1549_v36, 4286644096  ;;  %v2157_v60 = vsel %vm1598_vm0, %v1581_v37, 4286644096 }
  0xc9   : > { %v1391_v61 = vld [vmem:[%s3326_s23 + $0x144] sm:$0xf]  ;;  %v2166_v62 = vmax.bf16 %v2164_v56, %v2161_v53  ;;  %v2151_v63 = vmax.bf16 %v2149_v48, %v2147_v54  ;;  %v1486_v1 = vld [vmem:[%s3326_s23 + $0x2c0] sm:$0xf]  ;;  %v2172_v2 = vsel %vm1598_vm0, %v1422_v52, 4286644096 }
  0xca   : > { %v1423_v0 = vld [vmem:[%s3326_s23 + $0x1c4] sm:$0xf]  ;;  %v2176_v4 = vsel %vm1598_vm0, %v1454_v55, 4286644096  ;;  %v2196_v5 = vsel %vm1598_vm0, %v1327_v49, 4286644096  ;;  %v2124_v7 = vmax.bf16 %v2122_v46, %v2120_v58 }
  0xcb   : > { %v2170_v3 = vmax.bf16 %v2168_v57, %v2166_v62  ;;  %v2199_v6 = vsel %vm1598_vm0, %v1359_v51, 4286644096  ;;  %v2155_v8 = vmax.bf16 %v2153_v59, %v2151_v63  ;;  %v1455_v9 = vld [vmem:[%s3326_s23 + $0x244] sm:$0xf]  ;;  %v2203_v11 = vsel %vm1598_vm0, %v1391_v61, 4286644096 }
  0xcc   : > { %v2201_v10 = vmax.bf16 %v2199_v6, %v2196_v5  ;;  %v1518_v12 = vld [vmem:[%s3326_s23 + $0x340] sm:$0xf]  ;;  %v2207_v15 = vsel %vm1598_vm0, %v1423_v0, 4286644096  ;;  %v1487_v17 = vld [vmem:[%s3326_s23 + $0x2c4] sm:$0xf] }
  0xcd   : > { %v1550_v13 = vld [vmem:[%s3326_s23 + $0x3c0] sm:$0xf]  ;;  %v2174_v14 = vmax.bf16 %v2172_v2, %v2170_v3  ;;  %v2159_v16 = vmax.bf16 %v2157_v60, %v2155_v8  ;;  %v2180_v18 = vsel %vm1598_vm0, %v1486_v1, 4286644096  ;;  %v1519_v20 = vld [vmem:[%s3326_s23 + $0x344] sm:$0xf] }
  0xce   : > { %v2205_v19 = vmax.bf16 %v2203_v11, %v2201_v10  ;;  %v1582_v21 = vld [vmem:[%s3326_s23 + $0x440] sm:$0xf]  ;;  %v2211_v23 = vsel %vm1598_vm0, %v1455_v9, 4286644096  ;;  %v1551_v25 = vld [vmem:[%s3326_s23 + $0x3c4] sm:$0xf] }
  0xcf   : > { %v2178_v22 = vmax.bf16 %v2176_v4, %v2174_v14  ;;  %v2919_v24 = vcombine.low %v2124_v7, %v2159_v16  ;;  %v1583_v26 = vld [vmem:[%s3326_s23 + $0x444] sm:$0xf]  ;;  %v2184_v27 = vsel %vm1598_vm0, %v1518_v12, 4286644096  ;;  %v2188_v28 = vsel %vm1598_vm0, %v1550_v13, 4286644096 }
  0xd0   : > { %v2209_v29 = vmax.bf16 %v2207_v15, %v2205_v19  ;;  %v1328_v30 = vld [vmem:[%s3326_s23 + $0x48] sm:$0xf]  ;;  %v2215_v32 = vsel %vm1598_vm0, %v1487_v17, 4286644096  ;;  %v2192_v35 = vsel %vm1598_vm0, %v1582_v21, 4286644096 }
  0xd1   : > { %v2182_v31 = vmax.bf16 %v2180_v18, %v2178_v22  ;;  %v1360_v33 = vld [vmem:[%s3326_s23 + $0xc8] sm:$0xf]  ;;  %2920 = vst [vmem:[%s3397_s28 + $0x38] sm:$0xff] %v2919_v24   ;;  %v2219_v37 = vsel %vm1598_vm0, %v1519_v20, 4286644096 }
  0xd2   : > { %v1392_v34 = vld [vmem:[%s3326_s23 + $0x148] sm:$0xf]  ;;  %v2213_v36 = vmax.bf16 %v2211_v23, %v2209_v29  ;;  %v1329_v38 = vld [vmem:[%s3326_s23 + $0x4c] sm:$0xf]  ;;  %v2231_v42 = vsel %vm1598_vm0, %v1328_v30, 4286644096 }
  0xd3   : > { %v2186_v39 = vmax.bf16 %v2184_v27, %v2182_v31  ;;  %v1361_v40 = vld [vmem:[%s3326_s23 + $0xcc] sm:$0xf]  ;;  %v1424_v41 = vld [vmem:[%s3326_s23 + $0x1c8] sm:$0xf]  ;;  %v2234_v45 = vsel %vm1598_vm0, %v1360_v33, 4286644096 }
  0xd4   : > { %v2217_v43 = vmax.bf16 %v2215_v32, %v2213_v36  ;;  %v1456_v44 = vld [vmem:[%s3326_s23 + $0x248] sm:$0xf]  ;;  %v2238_v46 = vsel %vm1598_vm0, %v1392_v34, 4286644096  ;;  %v2223_v48 = vsel %vm1598_vm0, %v1551_v25, 4286644096  ;;  %v2236_v51 = vmax.bf16 %v2234_v45, %v2231_v42 }
  0xd5   : > { %v2190_v47 = vmax.bf16 %v2188_v28, %v2186_v39  ;;  %v2227_v49 = vsel %vm1598_vm0, %v1583_v26, 4286644096  ;;  %v1393_v50 = vld [vmem:[%s3326_s23 + $0x14c] sm:$0xf]  ;;  %v1488_v54 = vld [vmem:[%s3326_s23 + $0x2c8] sm:$0xf] }
  0xd6   : > { %v2221_v52 = vmax.bf16 %v2219_v37, %v2217_v43  ;;  %v1425_v53 = vld [vmem:[%s3326_s23 + $0x1cc] sm:$0xf]  ;;  %v2242_v55 = vsel %vm1598_vm0, %v1424_v41, 4286644096  ;;  %v2240_v56 = vmax.bf16 %v2238_v46, %v2236_v51  ;;  %v2246_v57 = vsel %vm1598_vm0, %v1456_v44, 4286644096 }
  0xd7   : > { %v2266_v58 = vsel %vm1598_vm0, %v1329_v38, 4286644096  ;;  %v2269_v59 = vsel %vm1598_vm0, %v1361_v40, 4286644096  ;;  %v2194_v60 = vmax.bf16 %v2192_v35, %v2190_v47  ;;  %v1457_v62 = vld [vmem:[%s3326_s23 + $0x24c] sm:$0xf] }
  0xd8   : > { %v2225_v61 = vmax.bf16 %v2223_v48, %v2221_v52  ;;  %v2271_v63 = vmax.bf16 %v2269_v59, %v2266_v58  ;;  %v2273_v0 = vsel %vm1598_vm0, %v1393_v50, 4286644096  ;;  %v1520_v1 = vld [vmem:[%s3326_s23 + $0x348] sm:$0xf]  ;;  %v2244_v3 = vmax.bf16 %v2242_v55, %v2240_v56  ;;  %v1489_v6 = vld [vmem:[%s3326_s23 + $0x2cc] sm:$0xf] }
  0xd9   : > { %v1552_v2 = vld [vmem:[%s3326_s23 + $0x3c8] sm:$0xf]  ;;  %v2277_v4 = vsel %vm1598_vm0, %v1425_v53, 4286644096  ;;  %v2250_v7 = vsel %vm1598_vm0, %v1488_v54, 4286644096 }
  0xda   : > { %v2229_v5 = vmax.bf16 %v2227_v49, %v2225_v61  ;;  %v2275_v8 = vmax.bf16 %v2273_v0, %v2271_v63  ;;  %v1521_v9 = vld [vmem:[%s3326_s23 + $0x34c] sm:$0xf]  ;;  %v1584_v10 = vld [vmem:[%s3326_s23 + $0x448] sm:$0xf]  ;;  %v2248_v11 = vmax.bf16 %v2246_v57, %v2244_v3  ;;  %v2281_v12 = vsel %vm1598_vm0, %v1457_v62, 4286644096 }
  0xdb   : > { %v1553_v14 = vld [vmem:[%s3326_s23 + $0x3cc] sm:$0xf]  ;;  %v2254_v16 = vsel %vm1598_vm0, %v1520_v1, 4286644096  ;;  %v2258_v17 = vsel %vm1598_vm0, %v1552_v2, 4286644096 }
  0xdc   : > { %v2921_v13 = vcombine.low %v2194_v60, %v2229_v5  ;;  %v1585_v15 = vld [vmem:[%s3326_s23 + $0x44c] sm:$0xf]  ;;  %v2279_v18 = vmax.bf16 %v2277_v4, %v2275_v8  ;;  %v1330_v19 = vld [vmem:[%s3326_s23 + $0x50] sm:$0xf]  ;;  %v2252_v20 = vmax.bf16 %v2250_v7, %v2248_v11  ;;  %v2285_v21 = vsel %vm1598_vm0, %v1489_v6, 4286644096 }
  0xdd   : > { %v1362_v22 = vld [vmem:[%s3326_s23 + $0xd0] sm:$0xf]  ;;  %v2262_v24 = vsel %vm1598_vm0, %v1584_v10, 4286644096  ;;  %v2289_v26 = vsel %vm1598_vm0, %v1521_v9, 4286644096 }
  0xde   : > { %v1394_v23 = vld [vmem:[%s3326_s23 + $0x150] sm:$0xf]  ;;  %2922 = vst [vmem:[%s3397_s28 + $0x40] sm:$0xff] %v2921_v13   ;;  %v2283_v25 = vmax.bf16 %v2281_v12, %v2279_v18  ;;  %v1331_v27 = vld [vmem:[%s3326_s23 + $0x54] sm:$0xf]  ;;  %v2256_v28 = vmax.bf16 %v2254_v16, %v2252_v20 }
  0xdf   : > { %v1363_v29 = vld [vmem:[%s3326_s23 + $0xd4] sm:$0xf]  ;;  %v1426_v30 = vld [vmem:[%s3326_s23 + $0x1d0] sm:$0xf]  ;;  %v2301_v31 = vsel %vm1598_vm0, %v1330_v19, 4286644096 }
  0xe0   : > { %v2287_v32 = vmax.bf16 %v2285_v21, %v2283_v25  ;;  %v1458_v33 = vld [vmem:[%s3326_s23 + $0x250] sm:$0xf]  ;;  %v2304_v34 = vsel %vm1598_vm0, %v1362_v22, 4286644096  ;;  %v2308_v35 = vsel %vm1598_vm0, %v1394_v23, 4286644096  ;;  %v2260_v36 = vmax.bf16 %v2258_v17, %v2256_v28 }
  0xe1   : > { %v2293_v37 = vsel %vm1598_vm0, %v1553_v14, 4286644096  ;;  %v2297_v38 = vsel %vm1598_vm0, %v1585_v15, 4286644096  ;;  %v1395_v39 = vld [vmem:[%s3326_s23 + $0x154] sm:$0xf]  ;;  %v2306_v40 = vmax.bf16 %v2304_v34, %v2301_v31 }
  0xe2   : > { %v2291_v41 = vmax.bf16 %v2289_v26, %v2287_v32  ;;  %v1427_v42 = vld [vmem:[%s3326_s23 + $0x1d4] sm:$0xf]  ;;  %v1490_v43 = vld [vmem:[%s3326_s23 + $0x2d0] sm:$0xf]  ;;  %v2312_v44 = vsel %vm1598_vm0, %v1426_v30, 4286644096  ;;  %v2264_v49 = vmax.bf16 %v2262_v24, %v2260_v36 }
  0xe3   : > { %v2310_v45 = vmax.bf16 %v2308_v35, %v2306_v40  ;;  %v2316_v46 = vsel %vm1598_vm0, %v1458_v33, 4286644096  ;;  %v2336_v47 = vsel %vm1598_vm0, %v1331_v27, 4286644096  ;;  %v2339_v48 = vsel %vm1598_vm0, %v1363_v29, 4286644096 }
  0xe4   : > { %v2295_v50 = vmax.bf16 %v2293_v37, %v2291_v41  ;;  %v1459_v51 = vld [vmem:[%s3326_s23 + $0x254] sm:$0xf]  ;;  %v2341_v52 = vmax.bf16 %v2339_v48, %v2336_v47  ;;  %v2343_v53 = vsel %vm1598_vm0, %v1395_v39, 4286644096  ;;  %v1522_v54 = vld [vmem:[%s3326_s23 + $0x350] sm:$0xf] }
  0xe5   : > { %v1554_v55 = vld [vmem:[%s3326_s23 + $0x3d0] sm:$0xf]  ;;  %v2314_v56 = vmax.bf16 %v2312_v44, %v2310_v45  ;;  %v2347_v57 = vsel %vm1598_vm0, %v1427_v42, 4286644096  ;;  %v1491_v59 = vld [vmem:[%s3326_s23 + $0x2d4] sm:$0xf] }
  0xe6   : > { %v2299_v58 = vmax.bf16 %v2297_v38, %v2295_v50  ;;  %v2320_v60 = vsel %vm1598_vm0, %v1490_v43, 4286644096  ;;  %v2345_v61 = vmax.bf16 %v2343_v53, %v2341_v52  ;;  %v1523_v62 = vld [vmem:[%s3326_s23 + $0x354] sm:$0xf]  ;;  %v1586_v63 = vld [vmem:[%s3326_s23 + $0x450] sm:$0xf] }
  0xe7   : > { %v2318_v0 = vmax.bf16 %v2316_v46, %v2314_v56  ;;  %v2351_v1 = vsel %vm1598_vm0, %v1459_v51, 4286644096  ;;  %v1555_v3 = vld [vmem:[%s3326_s23 + $0x3d4] sm:$0xf]  ;;  %v2324_v5 = vsel %vm1598_vm0, %v1522_v54, 4286644096 }
  0xe8   : > { %v2923_v2 = vcombine.low %v2264_v49, %v2299_v58  ;;  %v1587_v4 = vld [vmem:[%s3326_s23 + $0x454] sm:$0xf]  ;;  %v2328_v6 = vsel %vm1598_vm0, %v1554_v55, 4286644096  ;;  %v2349_v7 = vmax.bf16 %v2347_v57, %v2345_v61  ;;  %v1332_v8 = vld [vmem:[%s3326_s23 + $0x58] sm:$0xf] }
  0xe9   : > { %v2322_v9 = vmax.bf16 %v2320_v60, %v2318_v0  ;;  %v2355_v10 = vsel %vm1598_vm0, %v1491_v59, 4286644096  ;;  %v1364_v11 = vld [vmem:[%s3326_s23 + $0xd8] sm:$0xf]  ;;  %v2332_v13 = vsel %vm1598_vm0, %v1586_v63, 4286644096 }
  0xea   : > { %v1396_v12 = vld [vmem:[%s3326_s23 + $0x158] sm:$0xf]  ;;  %2924 = vst [vmem:[%s3397_s28 + $0x48] sm:$0xff] %v2923_v2   ;;  %v2353_v14 = vmax.bf16 %v2351_v1, %v2349_v7  ;;  %v2359_v15 = vsel %vm1598_vm0, %v1523_v62, 4286644096 }
  0xeb   : > { %v1333_v16 = vld [vmem:[%s3326_s23 + $0x5c] sm:$0xf]  ;;  %v2326_v17 = vmax.bf16 %v2324_v5, %v2322_v9  ;;  %v1428_v19 = vld [vmem:[%s3326_s23 + $0x1d8] sm:$0xf]  ;;  %v2371_v20 = vsel %vm1598_vm0, %v1332_v8, 4286644096 }
  0xec   : > { %v1365_v18 = vld [vmem:[%s3326_s23 + $0xdc] sm:$0xf]  ;;  %v2357_v21 = vmax.bf16 %v2355_v10, %v2353_v14  ;;  %v1460_v22 = vld [vmem:[%s3326_s23 + $0x258] sm:$0xf]  ;;  %v2374_v23 = vsel %vm1598_vm0, %v1364_v11, 4286644096 }
  0xed   : > { %v2378_v24 = vsel %vm1598_vm0, %v1396_v12, 4286644096  ;;  %v2330_v25 = vmax.bf16 %v2328_v6, %v2326_v17  ;;  %v2363_v26 = vsel %vm1598_vm0, %v1555_v3, 4286644096  ;;  %v2367_v27 = vsel %vm1598_vm0, %v1587_v4, 4286644096 }
  0xee   : > { %v1397_v28 = vld [vmem:[%s3326_s23 + $0x15c] sm:$0xf]  ;;  %v2376_v29 = vmax.bf16 %v2374_v23, %v2371_v20  ;;  %v2361_v30 = vmax.bf16 %v2359_v15, %v2357_v21  ;;  %v1492_v32 = vld [vmem:[%s3326_s23 + $0x2d8] sm:$0xf]  ;;  %v2382_v33 = vsel %vm1598_vm0, %v1428_v19, 4286644096 }
  0xef   : > { %v1429_v31 = vld [vmem:[%s3326_s23 + $0x1dc] sm:$0xf]  ;;  %v2386_v35 = vsel %vm1598_vm0, %v1460_v22, 4286644096  ;;  %v2406_v36 = vsel %vm1598_vm0, %v1333_v16, 4286644096  ;;  %v2334_v38 = vmax.bf16 %v2332_v13, %v2330_v25 }
  0xf0   : > { %v2380_v34 = vmax.bf16 %v2378_v24, %v2376_v29  ;;  %v2409_v37 = vsel %vm1598_vm0, %v1365_v18, 4286644096  ;;  %v2365_v39 = vmax.bf16 %v2363_v26, %v2361_v30  ;;  %v1461_v40 = vld [vmem:[%s3326_s23 + $0x25c] sm:$0xf]  ;;  %v2413_v42 = vsel %vm1598_vm0, %v1397_v28, 4286644096 }
  0xf1   : > { %v2411_v41 = vmax.bf16 %v2409_v37, %v2406_v36  ;;  %v1524_v43 = vld [vmem:[%s3326_s23 + $0x358] sm:$0xf]  ;;  %v2417_v46 = vsel %vm1598_vm0, %v1429_v31, 4286644096  ;;  %v1493_v48 = vld [vmem:[%s3326_s23 + $0x2dc] sm:$0xf] }
  0xf2   : > { %v1556_v44 = vld [vmem:[%s3326_s23 + $0x3d8] sm:$0xf]  ;;  %v2384_v45 = vmax.bf16 %v2382_v33, %v2380_v34  ;;  %v2369_v47 = vmax.bf16 %v2367_v27, %v2365_v39  ;;  %v2390_v49 = vsel %vm1598_vm0, %v1492_v32, 4286644096  ;;  %v1525_v51 = vld [vmem:[%s3326_s23 + $0x35c] sm:$0xf] }
  0xf3   : > { %v2415_v50 = vmax.bf16 %v2413_v42, %v2411_v41  ;;  %v1588_v52 = vld [vmem:[%s3326_s23 + $0x458] sm:$0xf]  ;;  %v2421_v54 = vsel %vm1598_vm0, %v1461_v40, 4286644096  ;;  %v1557_v56 = vld [vmem:[%s3326_s23 + $0x3dc] sm:$0xf] }
  0xf4   : > { %v2388_v53 = vmax.bf16 %v2386_v35, %v2384_v45  ;;  %v2925_v55 = vcombine.low %v2334_v38, %v2369_v47  ;;  %v1589_v57 = vld [vmem:[%s3326_s23 + $0x45c] sm:$0xf]  ;;  %v2394_v58 = vsel %vm1598_vm0, %v1524_v43, 4286644096  ;;  %v2398_v59 = vsel %vm1598_vm0, %v1556_v44, 4286644096 }
  0xf5   : > { %v2419_v60 = vmax.bf16 %v2417_v46, %v2415_v50  ;;  %v1334_v61 = vld [vmem:[%s3326_s23 + $0x60] sm:$0xf]  ;;  %v2425_v63 = vsel %vm1598_vm0, %v1493_v48, 4286644096  ;;  %v2402_v2 = vsel %vm1598_vm0, %v1588_v52, 4286644096 }
  0xf6   : > { %v2392_v62 = vmax.bf16 %v2390_v49, %v2388_v53  ;;  %v1366_v0 = vld [vmem:[%s3326_s23 + $0xe0] sm:$0xf]  ;;  %2926 = vst [vmem:[%s3397_s28 + $0x50] sm:$0xff] %v2925_v55   ;;  %v2429_v4 = vsel %vm1598_vm0, %v1525_v51, 4286644096 }
  0xf7   : > { %v1398_v1 = vld [vmem:[%s3326_s23 + $0x160] sm:$0xf]  ;;  %v2423_v3 = vmax.bf16 %v2421_v54, %v2419_v60  ;;  %v1335_v5 = vld [vmem:[%s3326_s23 + $0x64] sm:$0xf]  ;;  %v2441_v9 = vsel %vm1598_vm0, %v1334_v61, 4286644096 }
  0xf8   : > { %v2396_v6 = vmax.bf16 %v2394_v58, %v2392_v62  ;;  %v1367_v7 = vld [vmem:[%s3326_s23 + $0xe4] sm:$0xf]  ;;  %v1430_v8 = vld [vmem:[%s3326_s23 + $0x1e0] sm:$0xf]  ;;  %v2444_v12 = vsel %vm1598_vm0, %v1366_v0, 4286644096 }
  0xf9   : > { %v2427_v10 = vmax.bf16 %v2425_v63, %v2423_v3  ;;  %v1462_v11 = vld [vmem:[%s3326_s23 + $0x260] sm:$0xf]  ;;  %v2448_v13 = vsel %vm1598_vm0, %v1398_v1, 4286644096  ;;  %v2433_v15 = vsel %vm1598_vm0, %v1557_v56, 4286644096  ;;  %v2446_v18 = vmax.bf16 %v2444_v12, %v2441_v9 }
  0xfa   : > { %v2400_v14 = vmax.bf16 %v2398_v59, %v2396_v6  ;;  %v2437_v16 = vsel %vm1598_vm0, %v1589_v57, 4286644096  ;;  %v1399_v17 = vld [vmem:[%s3326_s23 + $0x164] sm:$0xf]  ;;  %v1494_v21 = vld [vmem:[%s3326_s23 + $0x2e0] sm:$0xf] }
  0xfb   : > { %v2431_v19 = vmax.bf16 %v2429_v4, %v2427_v10  ;;  %v1431_v20 = vld [vmem:[%s3326_s23 + $0x1e4] sm:$0xf]  ;;  %v2452_v22 = vsel %vm1598_vm0, %v1430_v8, 4286644096  ;;  %v2450_v23 = vmax.bf16 %v2448_v13, %v2446_v18  ;;  %v2456_v24 = vsel %vm1598_vm0, %v1462_v11, 4286644096 }
  0xfc   : > { %v2476_v25 = vsel %vm1598_vm0, %v1335_v5, 4286644096  ;;  %v2479_v26 = vsel %vm1598_vm0, %v1367_v7, 4286644096  ;;  %v2404_v27 = vmax.bf16 %v2402_v2, %v2400_v14  ;;  %v1463_v29 = vld [vmem:[%s3326_s23 + $0x264] sm:$0xf] }
  0xfd   : > { %v2435_v28 = vmax.bf16 %v2433_v15, %v2431_v19  ;;  %v2481_v30 = vmax.bf16 %v2479_v26, %v2476_v25  ;;  %v2483_v31 = vsel %vm1598_vm0, %v1399_v17, 4286644096  ;;  %v1526_v32 = vld [vmem:[%s3326_s23 + $0x360] sm:$0xf]  ;;  %v2454_v34 = vmax.bf16 %v2452_v22, %v2450_v23  ;;  %v1495_v37 = vld [vmem:[%s3326_s23 + $0x2e4] sm:$0xf] }
  0xfe   : > { %v1558_v33 = vld [vmem:[%s3326_s23 + $0x3e0] sm:$0xf]  ;;  %v2487_v35 = vsel %vm1598_vm0, %v1431_v20, 4286644096  ;;  %v2460_v38 = vsel %vm1598_vm0, %v1494_v21, 4286644096 }
  0xff   : > { %v2439_v36 = vmax.bf16 %v2437_v16, %v2435_v28  ;;  %v2485_v39 = vmax.bf16 %v2483_v31, %v2481_v30  ;;  %v1527_v40 = vld [vmem:[%s3326_s23 + $0x364] sm:$0xf]  ;;  %v1590_v41 = vld [vmem:[%s3326_s23 + $0x460] sm:$0xf]  ;;  %v2458_v42 = vmax.bf16 %v2456_v24, %v2454_v34  ;;  %v2491_v43 = vsel %vm1598_vm0, %v1463_v29, 4286644096 }
 0x100   : > { %v1559_v45 = vld [vmem:[%s3326_s23 + $0x3e4] sm:$0xf]  ;;  %v2464_v47 = vsel %vm1598_vm0, %v1526_v32, 4286644096  ;;  %v2468_v48 = vsel %vm1598_vm0, %v1558_v33, 4286644096 }
 0x101   : > { %v2927_v44 = vcombine.low %v2404_v27, %v2439_v36  ;;  %v1591_v46 = vld [vmem:[%s3326_s23 + $0x464] sm:$0xf]  ;;  %v2489_v49 = vmax.bf16 %v2487_v35, %v2485_v39  ;;  %v1336_v50 = vld [vmem:[%s3326_s23 + $0x68] sm:$0xf]  ;;  %v2462_v51 = vmax.bf16 %v2460_v38, %v2458_v42  ;;  %v2495_v52 = vsel %vm1598_vm0, %v1495_v37, 4286644096 }
 0x102   : > { %v1368_v53 = vld [vmem:[%s3326_s23 + $0xe8] sm:$0xf]  ;;  %v2472_v55 = vsel %vm1598_vm0, %v1590_v41, 4286644096  ;;  %v2499_v57 = vsel %vm1598_vm0, %v1527_v40, 4286644096 }
 0x103   : > { %v1400_v54 = vld [vmem:[%s3326_s23 + $0x168] sm:$0xf]  ;;  %2928 = vst [vmem:[%s3397_s28 + $0x58] sm:$0xff] %v2927_v44   ;;  %v2493_v56 = vmax.bf16 %v2491_v43, %v2489_v49  ;;  %v1337_v58 = vld [vmem:[%s3326_s23 + $0x6c] sm:$0xf]  ;;  %v2466_v59 = vmax.bf16 %v2464_v47, %v2462_v51 }
 0x104   : > { %v1369_v60 = vld [vmem:[%s3326_s23 + $0xec] sm:$0xf]  ;;  %v1432_v61 = vld [vmem:[%s3326_s23 + $0x1e8] sm:$0xf]  ;;  %v2511_v62 = vsel %vm1598_vm0, %v1336_v50, 4286644096 }
 0x105   : > { %v2497_v63 = vmax.bf16 %v2495_v52, %v2493_v56  ;;  %v1464_v0 = vld [vmem:[%s3326_s23 + $0x268] sm:$0xf]  ;;  %v2514_v1 = vsel %vm1598_vm0, %v1368_v53, 4286644096  ;;  %v2518_v2 = vsel %vm1598_vm0, %v1400_v54, 4286644096  ;;  %v2470_v3 = vmax.bf16 %v2468_v48, %v2466_v59 }
 0x106   : > { %v2503_v4 = vsel %vm1598_vm0, %v1559_v45, 4286644096  ;;  %v2507_v5 = vsel %vm1598_vm0, %v1591_v46, 4286644096  ;;  %v1401_v6 = vld [vmem:[%s3326_s23 + $0x16c] sm:$0xf]  ;;  %v2516_v7 = vmax.bf16 %v2514_v1, %v2511_v62 }
 0x107   : > { %v2501_v8 = vmax.bf16 %v2499_v57, %v2497_v63  ;;  %v1433_v9 = vld [vmem:[%s3326_s23 + $0x1ec] sm:$0xf]  ;;  %v1496_v10 = vld [vmem:[%s3326_s23 + $0x2e8] sm:$0xf]  ;;  %v2522_v11 = vsel %vm1598_vm0, %v1432_v61, 4286644096  ;;  %v2474_v16 = vmax.bf16 %v2472_v55, %v2470_v3 }
 0x108   : > { %v2520_v12 = vmax.bf16 %v2518_v2, %v2516_v7  ;;  %v2526_v13 = vsel %vm1598_vm0, %v1464_v0, 4286644096  ;;  %v2546_v14 = vsel %vm1598_vm0, %v1337_v58, 4286644096  ;;  %v2549_v15 = vsel %vm1598_vm0, %v1369_v60, 4286644096 }
 0x109   : > { %v2505_v17 = vmax.bf16 %v2503_v4, %v2501_v8  ;;  %v1465_v18 = vld [vmem:[%s3326_s23 + $0x26c] sm:$0xf]  ;;  %v2551_v19 = vmax.bf16 %v2549_v15, %v2546_v14  ;;  %v2553_v20 = vsel %vm1598_vm0, %v1401_v6, 4286644096  ;;  %v1528_v21 = vld [vmem:[%s3326_s23 + $0x368] sm:$0xf] }
 0x10a   : > { %v1560_v22 = vld [vmem:[%s3326_s23 + $0x3e8] sm:$0xf]  ;;  %v2524_v23 = vmax.bf16 %v2522_v11, %v2520_v12  ;;  %v2557_v24 = vsel %vm1598_vm0, %v1433_v9, 4286644096  ;;  %v1497_v26 = vld [vmem:[%s3326_s23 + $0x2ec] sm:$0xf] }
 0x10b   : > { %v2509_v25 = vmax.bf16 %v2507_v5, %v2505_v17  ;;  %v2530_v27 = vsel %vm1598_vm0, %v1496_v10, 4286644096  ;;  %v2555_v28 = vmax.bf16 %v2553_v20, %v2551_v19  ;;  %v1529_v29 = vld [vmem:[%s3326_s23 + $0x36c] sm:$0xf]  ;;  %v1592_v30 = vld [vmem:[%s3326_s23 + $0x468] sm:$0xf] }
 0x10c   : > { %v2528_v31 = vmax.bf16 %v2526_v13, %v2524_v23  ;;  %v2561_v32 = vsel %vm1598_vm0, %v1465_v18, 4286644096  ;;  %v1561_v34 = vld [vmem:[%s3326_s23 + $0x3ec] sm:$0xf]  ;;  %v2534_v36 = vsel %vm1598_vm0, %v1528_v21, 4286644096 }
 0x10d   : > { %v2929_v33 = vcombine.low %v2474_v16, %v2509_v25  ;;  %v1593_v35 = vld [vmem:[%s3326_s23 + $0x46c] sm:$0xf]  ;;  %v2538_v37 = vsel %vm1598_vm0, %v1560_v22, 4286644096  ;;  %v2559_v38 = vmax.bf16 %v2557_v24, %v2555_v28  ;;  %v1338_v39 = vld [vmem:[%s3326_s23 + $0x70] sm:$0xf] }
 0x10e   : > { %v2532_v40 = vmax.bf16 %v2530_v27, %v2528_v31  ;;  %v2565_v41 = vsel %vm1598_vm0, %v1497_v26, 4286644096  ;;  %v1370_v42 = vld [vmem:[%s3326_s23 + $0xf0] sm:$0xf]  ;;  %v2542_v44 = vsel %vm1598_vm0, %v1592_v30, 4286644096 }
 0x10f   : > { %v1402_v43 = vld [vmem:[%s3326_s23 + $0x170] sm:$0xf]  ;;  %2930 = vst [vmem:[%s3397_s28 + $0x60] sm:$0xff] %v2929_v33   ;;  %v2563_v45 = vmax.bf16 %v2561_v32, %v2559_v38  ;;  %v2569_v46 = vsel %vm1598_vm0, %v1529_v29, 4286644096 }
 0x110   : > { %v1339_v47 = vld [vmem:[%s3326_s23 + $0x74] sm:$0xf]  ;;  %v2536_v48 = vmax.bf16 %v2534_v36, %v2532_v40  ;;  %v1434_v50 = vld [vmem:[%s3326_s23 + $0x1f0] sm:$0xf]  ;;  %v2581_v51 = vsel %vm1598_vm0, %v1338_v39, 4286644096 }
 0x111   : > { %v1371_v49 = vld [vmem:[%s3326_s23 + $0xf4] sm:$0xf]  ;;  %v2567_v52 = vmax.bf16 %v2565_v41, %v2563_v45  ;;  %v1466_v53 = vld [vmem:[%s3326_s23 + $0x270] sm:$0xf]  ;;  %v2584_v54 = vsel %vm1598_vm0, %v1370_v42, 4286644096 }
 0x112   : > { %v2588_v55 = vsel %vm1598_vm0, %v1402_v43, 4286644096  ;;  %v2540_v56 = vmax.bf16 %v2538_v37, %v2536_v48  ;;  %v2573_v57 = vsel %vm1598_vm0, %v1561_v34, 4286644096  ;;  %v2577_v58 = vsel %vm1598_vm0, %v1593_v35, 4286644096 }
 0x113   : > { %v1403_v59 = vld [vmem:[%s3326_s23 + $0x174] sm:$0xf]  ;;  %v2586_v60 = vmax.bf16 %v2584_v54, %v2581_v51  ;;  %v2571_v61 = vmax.bf16 %v2569_v46, %v2567_v52  ;;  %v1498_v63 = vld [vmem:[%s3326_s23 + $0x2f0] sm:$0xf]  ;;  %v2592_v0 = vsel %vm1598_vm0, %v1434_v50, 4286644096 }
 0x114   : > { %v1435_v62 = vld [vmem:[%s3326_s23 + $0x1f4] sm:$0xf]  ;;  %v2596_v2 = vsel %vm1598_vm0, %v1466_v53, 4286644096  ;;  %v2616_v3 = vsel %vm1598_vm0, %v1339_v47, 4286644096  ;;  %v2544_v5 = vmax.bf16 %v2542_v44, %v2540_v56 }
 0x115   : > { %v2590_v1 = vmax.bf16 %v2588_v55, %v2586_v60  ;;  %v2619_v4 = vsel %vm1598_vm0, %v1371_v49, 4286644096  ;;  %v2575_v6 = vmax.bf16 %v2573_v57, %v2571_v61  ;;  %v1467_v7 = vld [vmem:[%s3326_s23 + $0x274] sm:$0xf]  ;;  %v2623_v9 = vsel %vm1598_vm0, %v1403_v59, 4286644096 }
 0x116   : > { %v2621_v8 = vmax.bf16 %v2619_v4, %v2616_v3  ;;  %v1530_v10 = vld [vmem:[%s3326_s23 + $0x370] sm:$0xf]  ;;  %v2627_v13 = vsel %vm1598_vm0, %v1435_v62, 4286644096  ;;  %v1499_v15 = vld [vmem:[%s3326_s23 + $0x2f4] sm:$0xf] }
 0x117   : > { %v1562_v11 = vld [vmem:[%s3326_s23 + $0x3f0] sm:$0xf]  ;;  %v2594_v12 = vmax.bf16 %v2592_v0, %v2590_v1  ;;  %v2579_v14 = vmax.bf16 %v2577_v58, %v2575_v6  ;;  %v2600_v16 = vsel %vm1598_vm0, %v1498_v63, 4286644096  ;;  %v1531_v18 = vld [vmem:[%s3326_s23 + $0x374] sm:$0xf] }
 0x118   : > { %v2625_v17 = vmax.bf16 %v2623_v9, %v2621_v8  ;;  %v1594_v19 = vld [vmem:[%s3326_s23 + $0x470] sm:$0xf]  ;;  %v2631_v21 = vsel %vm1598_vm0, %v1467_v7, 4286644096  ;;  %v1563_v23 = vld [vmem:[%s3326_s23 + $0x3f4] sm:$0xf] }
 0x119   : > { %v2598_v20 = vmax.bf16 %v2596_v2, %v2594_v12  ;;  %v2931_v22 = vcombine.low %v2544_v5, %v2579_v14  ;;  %v1595_v24 = vld [vmem:[%s3326_s23 + $0x474] sm:$0xf]  ;;  %v2604_v25 = vsel %vm1598_vm0, %v1530_v10, 4286644096  ;;  %v2608_v26 = vsel %vm1598_vm0, %v1562_v11, 4286644096 }
 0x11a   : > { %v2629_v27 = vmax.bf16 %v2627_v13, %v2625_v17  ;;  %v1340_v28 = vld [vmem:[%s3326_s23 + $0x78] sm:$0xf]  ;;  %v2635_v30 = vsel %vm1598_vm0, %v1499_v15, 4286644096  ;;  %v2612_v33 = vsel %vm1598_vm0, %v1594_v19, 4286644096 }
 0x11b   : > { %v2602_v29 = vmax.bf16 %v2600_v16, %v2598_v20  ;;  %v1372_v31 = vld [vmem:[%s3326_s23 + $0xf8] sm:$0xf]  ;;  %2932 = vst [vmem:[%s3397_s28 + $0x68] sm:$0xff] %v2931_v22   ;;  %v2639_v35 = vsel %vm1598_vm0, %v1531_v18, 4286644096 }
 0x11c   : > { %v1404_v32 = vld [vmem:[%s3326_s23 + $0x178] sm:$0xf]  ;;  %v2633_v34 = vmax.bf16 %v2631_v21, %v2629_v27  ;;  %v1341_v36 = vld [vmem:[%s3326_s23 + $0x7c] sm:$0xf]  ;;  %v2651_v40 = vsel %vm1598_vm0, %v1340_v28, 4286644096 }
 0x11d   : > { %v2606_v37 = vmax.bf16 %v2604_v25, %v2602_v29  ;;  %v1373_v38 = vld [vmem:[%s3326_s23 + $0xfc] sm:$0xf]  ;;  %v1436_v39 = vld [vmem:[%s3326_s23 + $0x1f8] sm:$0xf]  ;;  %v2654_v43 = vsel %vm1598_vm0, %v1372_v31, 4286644096 }
 0x11e   : > { %v2637_v41 = vmax.bf16 %v2635_v30, %v2633_v34  ;;  %v1468_v42 = vld [vmem:[%s3326_s23 + $0x278] sm:$0xf]  ;;  %v2658_v44 = vsel %vm1598_vm0, %v1404_v32, 4286644096  ;;  %v2643_v46 = vsel %vm1598_vm0, %v1563_v23, 4286644096  ;;  %v2656_v49 = vmax.bf16 %v2654_v43, %v2651_v40 }
 0x11f   : > { %v2610_v45 = vmax.bf16 %v2608_v26, %v2606_v37  ;;  %v2647_v47 = vsel %vm1598_vm0, %v1595_v24, 4286644096  ;;  %v1405_v48 = vld [vmem:[%s3326_s23 + $0x17c] sm:$0xf]  ;;  %v1500_v52 = vld [vmem:[%s3326_s23 + $0x2f8] sm:$0xf] }
 0x120   : > { %v2641_v50 = vmax.bf16 %v2639_v35, %v2637_v41  ;;  %v1437_v51 = vld [vmem:[%s3326_s23 + $0x1fc] sm:$0xf]  ;;  %v2662_v53 = vsel %vm1598_vm0, %v1436_v39, 4286644096  ;;  %v2660_v54 = vmax.bf16 %v2658_v44, %v2656_v49  ;;  %v2666_v55 = vsel %vm1598_vm0, %v1468_v42, 4286644096 }
 0x121   : > { %v2686_v56 = vsel %vm1598_vm0, %v1341_v36, 4286644096  ;;  %v2689_v57 = vsel %vm1598_vm0, %v1373_v38, 4286644096  ;;  %v2614_v58 = vmax.bf16 %v2612_v33, %v2610_v45  ;;  %v1469_v60 = vld [vmem:[%s3326_s23 + $0x27c] sm:$0xf] }
 0x122   : > { %v2645_v59 = vmax.bf16 %v2643_v46, %v2641_v50  ;;  %v2691_v61 = vmax.bf16 %v2689_v57, %v2686_v56  ;;  %v2693_v62 = vsel %vm1598_vm0, %v1405_v48, 4286644096  ;;  %v1532_v63 = vld [vmem:[%s3326_s23 + $0x378] sm:$0xf]  ;;  %v2664_v0 = vmax.bf16 %v2662_v53, %v2660_v54  ;;  %v1501_v3 = vld [vmem:[%s3326_s23 + $0x2fc] sm:$0xf] }
 0x123   : > { %v2697_v1 = vsel %vm1598_vm0, %v1437_v51, 4286644096  ;;  %v2670_v4 = vsel %vm1598_vm0, %v1500_v52, 4286644096  ;;  %v1564_v6 = vld [vmem:[%s3326_s23 + $0x3f8] sm:$0xf] }
 0x124   : > { %v2649_v2 = vmax.bf16 %v2647_v47, %v2645_v59  ;;  %v2695_v5 = vmax.bf16 %v2693_v62, %v2691_v61  ;;  %v2668_v7 = vmax.bf16 %v2666_v55, %v2664_v0  ;;  %v2701_v8 = vsel %vm1598_vm0, %v1469_v60, 4286644096  ;;  %v1533_v10 = vld [vmem:[%s3326_s23 + $0x37c] sm:$0xf]  ;;  %v1596_v16 = vld [vmem:[%s3326_s23 + $0x478] sm:$0xf] }
 0x125   : > { %v2674_v11 = vsel %vm1598_vm0, %v1532_v63, 4286644096  ;;  %v2705_v14 = vsel %vm1598_vm0, %v1501_v3, 4286644096  ;;  %v1565_v15 = vld [vmem:[%s3326_s23 + $0x3fc] sm:$0xf] }
 0x126   : > { %v2933_v9 = vcombine.low %v2614_v58, %v2649_v2  ;;  %v2699_v12 = vmax.bf16 %v2697_v1, %v2695_v5  ;;  %v2672_v13 = vmax.bf16 %v2670_v4, %v2668_v7  ;;  %v2678_v17 = vsel %vm1598_vm0, %v1564_v6, 4286644096  ;;  %v1597_v21 = vld [vmem:[%s3326_s23 + $0x47c] sm:$0xf] }
 0x127   : > { %v2709_v20 = vsel %vm1598_vm0, %v1533_v10, 4286644096  ;;  %v2682_v24 = vsel %vm1598_vm0, %v1596_v16, 4286644096  ;;  %v2713_v25 = vsel %vm1598_vm0, %v1565_v15, 4286644096 }
 0x128   : > { %2934 = vst [vmem:[%s3397_s28 + $0x70] sm:$0xff] %v2933_v9   ;;  %v2703_v18 = vmax.bf16 %v2701_v8, %v2699_v12  ;;  %v2676_v19 = vmax.bf16 %v2674_v11, %v2672_v13  ;;  %v2717_v27 = vsel %vm1598_vm0, %v1597_v21, 4286644096 }
 0x12a   : > { %v2707_v22 = vmax.bf16 %v2705_v14, %v2703_v18  ;;  %v2680_v23 = vmax.bf16 %v2678_v17, %v2676_v19 }
 0x12c   : > { %v2711_v26 = vmax.bf16 %v2709_v20, %v2707_v22  ;;  %v2684_v28 = vmax.bf16 %v2682_v24, %v2680_v23 }
 0x12e   : > { %v2715_v29 = vmax.bf16 %v2713_v25, %v2711_v26 }
 0x130   : > { %v2719_v30 = vmax.bf16 %v2717_v27, %v2715_v29 }
 0x132   : > { %v2935_v31 = vcombine.low %v2684_v28, %v2719_v30 }
 0x134   : > { %2936 = vst [vmem:[%s3397_s28 + $0x78] sm:$0xff] %v2935_v31  }
 0x135 PF: > { %p8_p9 = scmp.ge.s32.totalorder %s3014_s10, 10   ;;  %s3943_s6 = smov %s2981_s7 }
 0x136   : > { %s3944_s7 = smov %s3023_s13  ;;  %s3945_s8 = smov %s3014_s10 }
 0x137   :  { %10 = sbr.rel (!%p8_p9) target bundleno = 2 (0x2), region = 100 }

// kernel: resnet_features.24
= control target key start
LH: loop header
LB: loop body
LE: loop exit
PB: predicated region body
PF: predicated region fallthrough
CT: control target
= control target key end

     0   :  { %s1132_s12 = smov 0   ;;  %s1260_s0 = inlined_call_operand.vmem [shape: bf16[2048,72], index: 0, kind: input, shape index: {}]   ;;  %s1261_s1 = inlined_call_operand.vmem [shape: bf16[72,128], index: 1, kind: input, shape index: {}]   ;;  %s1262_s2 = inlined_call_operand.vmem [shape: f32[1,128], index: 2, kind: input, shape index: {}]   ;;  %s1263_s3 = inlined_call_operand.vmem [shape: bf16[2048,128], index: 3, kind: output, shape index: {}]  }
   0x1 LB: > { %s792_s13 = sadd.s32 4294967295, %s1110_s12   ;;  %p796_p0 = scmp.ge.s32.totalorder %s1110_s12, 1  ;;  %s1110_s12 = sphi %s1132_s12, %s13_s12  }
   0x2   : > { %p138_p1 = scmp.lt.s32.totalorder %s1110_s12, 9 }
   0x4   : > { %p139_p2 = pnand %p796_p0, %p138_p1 }
   0x5   : > { %v1083_v0 = vld [vmem:[%s1261_s1] sm:$0xff] (!%p139_p2)   ;;  %v1084_v1 = vld [vmem:[%s1261_s1 + $0x8] sm:$0xff] (!%p139_p2)   ;;  %s797_s18 = sshll.u32 (!%p139_p2), %s792_s13, 5  ;;  %v1085_v2 = vld [vmem:[%s1261_s1 + $0x10] sm:$0xff] (!%p139_p2)   ;;  %vm330_vm0 = vcmask (!%p139_p2), 588800   ;;  %vm379_vm1 = vcmask (!%p139_p2), 1043456  }
   0x6   : > { %142 = sbr.rel (%p139_p2) target bundleno = 272 (0x110), region = 32  ;;  %1021 = vmatprep.subr.bf16.mxu0 (!%p139_p2), %v1083_v0  ;;  %1063 = vmatprep.subr.bf16.mxu1 (!%p139_p2), %v1083_v0  ;;  %p163_p3 = scmp.lt.s32.totalorder (!%p139_p2), %s797_s18, 255  ;;  %v1086_v3 = vld [vmem:[%s1261_s1 + $0x18] sm:$0xff] (!%p139_p2)   ;;  %v1087_v6 = vld [vmem:[%s1261_s1 + $0x20] ss:$0 sps:$4 sm:$0xff] (!%p139_p2)  }
   0x7   : > { %1022 = vmatpush3.bf16.msra.mxu0 (!%p139_p2), %v1083_v0  ;;  %1068 = vmatpush3.bf16.msra.mxu1 (!%p139_p2), %v1083_v0  ;;  %v381_v7 = vsel (!%p139_p2), %vm379_vm1, %v1087_v6, 0  ;;  %v1200_v22 = vld [vmem:[%s1262_s2] ss:$0 sm:$0xff] (!%p139_p2) }
   0x8   : > { %1023 = vmatprep.subr.bf16.mxu0 (!%p139_p2), %v1084_v1  ;;  %1064 = vmatprep.subr.bf16.mxu1 (!%p139_p2), %v1084_v1 }
   0xb   : > { %1024 = vmatpush3.bf16.msra.mxu0 (!%p139_p2), %v1084_v1  ;;  %1069 = vmatpush3.bf16.msra.mxu1 (!%p139_p2), %v1084_v1 }
   0xc   : > { %1025 = vmatprep.subr.bf16.mxu0 (!%p139_p2), %v1085_v2  ;;  %1065 = vmatprep.subr.bf16.mxu1 (!%p139_p2), %v1085_v2 }
   0xd   : > { %s1265_s18 = smov (!%p163_p3, %s797_s18), 255 }
   0xe   : > { %s798_s21 = sshll.u32 %s1265_s18, 2 }
   0xf   : > { %s1160_s26 = scalar_lea.vmem %s1260_s0, %s798_s21  ;;  %1026 = vmatpush3.bf16.msra.mxu0 %v1085_v2  ;;  %1070 = vmatpush3.bf16.msra.mxu1 %v1085_v2  ;;  %s1215_s6 = scalar_lea.vmem %s1263_s3, %s798_s21 }
  0x10   : > { %v1088_v4 = vld [vmem:[%s1160_s26] sm:$0xff]   ;;  %1027 = vmatprep.subr.bf16.mxu0 %v1086_v3  ;;  %1066 = vmatprep.subr.bf16.mxu1 %v1086_v3  ;;  %v1090_v8 = vld [vmem:[%s1160_s26 + $0x8] sm:$0xff]   ;;  %v1092_v10 = vld [vmem:[%s1160_s26 + $0x10] sm:$0xff]  }
  0x11   : > { %v1089_v5 = vld [vmem:[%s1160_s26 + $0x40] sm:$0xff]   ;;  %1031 = vmatprep.mubr.msk.bf16.mxu0 %vm330_vm0, %v1088_v4  ;;  %v1091_v9 = vld [vmem:[%s1160_s26 + $0x48] sm:$0xff]   ;;  %v1093_v11 = vld [vmem:[%s1160_s26 + $0x50] sm:$0xff]  }
  0x12   : > { %1047 = vmatprep.mubr.msk.bf16.mxu1 %vm330_vm0, %v1089_v5  ;;  %v1094_v12 = vld [vmem:[%s1160_s26 + $0x18] sm:$0xff]   ;;  %v1096_v14 = vld [vmem:[%s1160_s26 + $0x20] sm:$0xff]   ;;  %v1098_v16 = vld [vmem:[%s1160_s26 + $0x28] sm:$0xff]  }
  0x13   : > { %1028 = vmatpush3.bf16.msra.mxu0 %v1086_v3  ;;  %1071 = vmatpush3.bf16.msra.mxu1 %v1086_v3  ;;  %v1095_v13 = vld [vmem:[%s1160_s26 + $0x58] sm:$0xff]   ;;  %v1097_v15 = vld [vmem:[%s1160_s26 + $0x60] sm:$0xff]   ;;  %v1099_v17 = vld [vmem:[%s1160_s26 + $0x68] sm:$0xff]  }
  0x14   : > { %1073 = vmatprep.subr.msk.bf16.mxu0 %vm379_vm1, %v1087_v6  ;;  %1074 = vmatprep.subr.msk.bf16.mxu1 %vm379_vm1, %v1087_v6  ;;  %v1100_v18 = vld [vmem:[%s1160_s26 + $0x30] sm:$0xff]   ;;  %v1102_v20 = vld [vmem:[%s1160_s26 + $0x38] sm:$0xff]  }
  0x15   : > { %v1101_v19 = vld [vmem:[%s1160_s26 + $0x70] sm:$0xff]   ;;  %v1103_v21 = vld [vmem:[%s1160_s26 + $0x78] sm:$0xff]  }
  0x17   : > { %1030 = vmatpush3.bf16.msra.mxu0 %v381_v7  ;;  %1072 = vmatpush3.bf16.msra.mxu1 %v381_v7 }
  0x1a   : > { %1032 = vmatmul.mubr.msk.bf16.vlgmr.msra.gmra.mrb[0].mxu0 %vm330_vm0, %v1090_v8  ;;  %1048 = vmatmul.mubr.msk.bf16.vlgmr.msra.gmra.mrb[0].mxu1 %vm330_vm0, %v1091_v9 }
  0x1b   : > { %1035 = vmatprep.mubr.msk.bf16.mxu0 %vm330_vm0, %v1092_v10  ;;  %1051 = vmatprep.mubr.msk.bf16.mxu1 %vm330_vm0, %v1093_v11 }
  0x22   : > { %1036 = vmatmul.mubr.msk.bf16.gmra.mrb[4].mxu0 %vm330_vm0, %v1094_v12  ;;  %1052 = vmatmul.mubr.msk.bf16.gmra.mrb[4].mxu1 %vm330_vm0, %v1095_v13 }
  0x23   : > { %1039 = vmatprep.mubr.msk.bf16.mxu0 %vm330_vm0, %v1096_v14  ;;  %1055 = vmatprep.mubr.msk.bf16.mxu1 %vm330_vm0, %v1097_v15 }
  0x2a   : > { %1040 = vmatmul.mubr.msk.bf16.gmra.mrb[8].mxu0 %vm330_vm0, %v1098_v16  ;;  %1056 = vmatmul.mubr.msk.bf16.gmra.mrb[8].mxu1 %vm330_vm0, %v1099_v17 }
  0x2b   : > { %1043 = vmatprep.mubr.msk.bf16.mxu0 %vm330_vm0, %v1100_v18  ;;  %1059 = vmatprep.mubr.msk.bf16.mxu1 %vm330_vm0, %v1101_v19 }
  0x32   : > { %1044 = vmatmul.mubr.msk.bf16.gmra.mrb[12].mxu0 %vm330_vm0, %v1102_v20  ;;  %1060 = vmatmul.mubr.msk.bf16.gmra.mrb[12].mxu1 %vm330_vm0, %v1103_v21 }
  0xed   : > { %v1033_v23 = vpop.f32.mrb[0].mxu0  ;;  %v1049_v24 = vpop.f32.mrb[0].mxu1 }
  0xee   : > { %v426_v25 = vadd.f32 %v1033_v23, %v1200_v22  ;;  %v490_v26 = vadd.f32 %v1049_v24, %v1200_v22  ;;  %v417_v27 = vpop.f32.mrb[1].mxu0  ;;  %v481_v28 = vpop.f32.mrb[1].mxu1 }
  0xef   : > { %v418_v29 = vadd.f32 %v1200_v22, %v417_v27  ;;  %v482_v30 = vadd.f32 %v1200_v22, %v481_v28  ;;  %v1034_v31 = vpop.f32.mrb[2].mxu0  ;;  %v1050_v32 = vpop.f32.mrb[2].mxu1 }
  0xf0   : > { %v429_v33 = vadd.f32 %v1034_v31, %v1200_v22  ;;  %v493_v34 = vadd.f32 %v1050_v32, %v1200_v22  ;;  %v420_v35 = vpop.f32.mrb[3].mxu0  ;;  %v484_v36 = vpop.f32.mrb[3].mxu1  ;;  %v546_v39 = vmax.f32 %v426_v25, 0.0  ;;  %v562_v40 = vmax.f32 %v490_v26, 0.0 }
  0xf1   : > { %v421_v37 = vadd.f32 %v1200_v22, %v420_v35  ;;  %v485_v38 = vadd.f32 %v1200_v22, %v484_v36  ;;  %v544_v43 = vmax.f32 %v418_v29, 0.0  ;;  %v560_v44 = vmax.f32 %v482_v30, 0.0 }
  0xf2   : > { %v547_v41 = vmax.f32 %v429_v33, 0.0  ;;  %v563_v42 = vmax.f32 %v493_v34, 0.0 }
  0xf3   : > { %v545_v45 = vmax.f32 %v421_v37, 0.0  ;;  %v561_v46 = vmax.f32 %v485_v38, 0.0 }
  0xf4   : > { %v913_v47 = vpack.c.bf16 %v547_v41, %v546_v39  ;;  %v953_v48 = vpack.c.bf16 %v563_v42, %v562_v40 }
  0xf5   : > { %v908_v49 = vpack.c.bf16 %v545_v45, %v544_v43  ;;  %v948_v50 = vpack.c.bf16 %v561_v46, %v560_v44  ;;  %v1037_v51 = vpop.f32.mrb[4].mxu0  ;;  %v1053_v52 = vpop.f32.mrb[4].mxu1 }
  0xf6   : > { %985 = vst [vmem:[%s1215_s6 + $0x8] sm:$0xff] %v913_v47   ;;  %993 = vst [vmem:[%s1215_s6 + $0x48] sm:$0xff] %v953_v48   ;;  %v442_v53 = vadd.f32 %v1037_v51, %v1200_v22  ;;  %v506_v54 = vadd.f32 %v1053_v52, %v1200_v22  ;;  %v433_v55 = vpop.f32.mrb[5].mxu0  ;;  %v497_v56 = vpop.f32.mrb[5].mxu1 }
  0xf7   : > { %909 = vst [vmem:[%s1215_s6] sm:$0xff] %v908_v49   ;;  %992 = vst [vmem:[%s1215_s6 + $0x40] sm:$0xff] %v948_v50   ;;  %v434_v57 = vadd.f32 %v1200_v22, %v433_v55  ;;  %v498_v58 = vadd.f32 %v1200_v22, %v497_v56  ;;  %v1038_v59 = vpop.f32.mrb[6].mxu0  ;;  %v1054_v60 = vpop.f32.mrb[6].mxu1 }
  0xf8   : > { %v445_v61 = vadd.f32 %v1038_v59, %v1200_v22  ;;  %v509_v62 = vadd.f32 %v1054_v60, %v1200_v22  ;;  %v436_v63 = vpop.f32.mrb[7].mxu0  ;;  %v500_v0 = vpop.f32.mrb[7].mxu1  ;;  %v550_v3 = vmax.f32 %v442_v53, 0.0  ;;  %v566_v4 = vmax.f32 %v506_v54, 0.0 }
  0xf9   : > { %v437_v1 = vadd.f32 %v1200_v22, %v436_v63  ;;  %v501_v2 = vadd.f32 %v1200_v22, %v500_v0  ;;  %v548_v7 = vmax.f32 %v434_v57, 0.0  ;;  %v564_v8 = vmax.f32 %v498_v58, 0.0 }
  0xfa   : > { %v551_v5 = vmax.f32 %v445_v61, 0.0  ;;  %v567_v6 = vmax.f32 %v509_v62, 0.0 }
  0xfb   : > { %v549_v9 = vmax.f32 %v437_v1, 0.0  ;;  %v565_v10 = vmax.f32 %v501_v2, 0.0 }
  0xfc   : > { %v923_v11 = vpack.c.bf16 %v551_v5, %v550_v3  ;;  %v963_v12 = vpack.c.bf16 %v567_v6, %v566_v4 }
  0xfd   : > { %v918_v13 = vpack.c.bf16 %v549_v9, %v548_v7  ;;  %v958_v14 = vpack.c.bf16 %v565_v10, %v564_v8  ;;  %v1041_v15 = vpop.f32.mrb[8].mxu0  ;;  %v1057_v16 = vpop.f32.mrb[8].mxu1 }
  0xfe   : > { %987 = vst [vmem:[%s1215_s6 + $0x18] sm:$0xff] %v923_v11   ;;  %995 = vst [vmem:[%s1215_s6 + $0x58] sm:$0xff] %v963_v12   ;;  %v458_v17 = vadd.f32 %v1041_v15, %v1200_v22  ;;  %v522_v18 = vadd.f32 %v1057_v16, %v1200_v22  ;;  %v449_v19 = vpop.f32.mrb[9].mxu0  ;;  %v513_v20 = vpop.f32.mrb[9].mxu1 }
  0xff   : > { %986 = vst [vmem:[%s1215_s6 + $0x10] sm:$0xff] %v918_v13   ;;  %994 = vst [vmem:[%s1215_s6 + $0x50] sm:$0xff] %v958_v14   ;;  %v450_v21 = vadd.f32 %v1200_v22, %v449_v19  ;;  %v514_v23 = vadd.f32 %v1200_v22, %v513_v20  ;;  %v1042_v24 = vpop.f32.mrb[10].mxu0  ;;  %v1058_v25 = vpop.f32.mrb[10].mxu1 }
 0x100   : > { %v461_v26 = vadd.f32 %v1042_v24, %v1200_v22  ;;  %v525_v27 = vadd.f32 %v1058_v25, %v1200_v22  ;;  %v452_v28 = vpop.f32.mrb[11].mxu0  ;;  %v516_v29 = vpop.f32.mrb[11].mxu1  ;;  %v554_v32 = vmax.f32 %v458_v17, 0.0  ;;  %v570_v33 = vmax.f32 %v522_v18, 0.0 }
 0x101   : > { %v453_v30 = vadd.f32 %v1200_v22, %v452_v28  ;;  %v517_v31 = vadd.f32 %v1200_v22, %v516_v29  ;;  %v552_v36 = vmax.f32 %v450_v21, 0.0  ;;  %v568_v37 = vmax.f32 %v514_v23, 0.0 }
 0x102   : > { %v555_v34 = vmax.f32 %v461_v26, 0.0  ;;  %v571_v35 = vmax.f32 %v525_v27, 0.0 }
 0x103   : > { %v553_v38 = vmax.f32 %v453_v30, 0.0  ;;  %v569_v39 = vmax.f32 %v517_v31, 0.0 }
 0x104   : > { %v933_v40 = vpack.c.bf16 %v555_v34, %v554_v32  ;;  %v973_v41 = vpack.c.bf16 %v571_v35, %v570_v33 }
 0x105   : > { %v928_v42 = vpack.c.bf16 %v553_v38, %v552_v36  ;;  %v968_v43 = vpack.c.bf16 %v569_v39, %v568_v37  ;;  %v1045_v44 = vpop.f32.mrb[12].mxu0  ;;  %v1061_v45 = vpop.f32.mrb[12].mxu1 }
 0x106   : > { %989 = vst [vmem:[%s1215_s6 + $0x28] sm:$0xff] %v933_v40   ;;  %997 = vst [vmem:[%s1215_s6 + $0x68] sm:$0xff] %v973_v41   ;;  %v474_v46 = vadd.f32 %v1045_v44, %v1200_v22  ;;  %v538_v47 = vadd.f32 %v1061_v45, %v1200_v22  ;;  %v465_v48 = vpop.f32.mrb[13].mxu0  ;;  %v529_v49 = vpop.f32.mrb[13].mxu1 }
 0x107   : > { %988 = vst [vmem:[%s1215_s6 + $0x20] sm:$0xff] %v928_v42   ;;  %996 = vst [vmem:[%s1215_s6 + $0x60] sm:$0xff] %v968_v43   ;;  %v466_v50 = vadd.f32 %v1200_v22, %v465_v48  ;;  %v530_v51 = vadd.f32 %v1200_v22, %v529_v49  ;;  %v1046_v52 = vpop.f32.mrb[14].mxu0  ;;  %v1062_v53 = vpop.f32.mrb[14].mxu1 }
 0x108   : > { %v477_v54 = vadd.f32 %v1046_v52, %v1200_v22  ;;  %v541_v55 = vadd.f32 %v1062_v53, %v1200_v22  ;;  %v468_v56 = vpop.f32.mrb[15].mxu0  ;;  %v532_v57 = vpop.f32.mrb[15].mxu1  ;;  %v558_v60 = vmax.f32 %v474_v46, 0.0  ;;  %v574_v61 = vmax.f32 %v538_v47, 0.0 }
 0x109   : > { %v469_v58 = vadd.f32 %v1200_v22, %v468_v56  ;;  %v533_v59 = vadd.f32 %v1200_v22, %v532_v57  ;;  %v556_v0 = vmax.f32 %v466_v50, 0.0  ;;  %v572_v1 = vmax.f32 %v530_v51, 0.0 }
 0x10a   : > { %v559_v62 = vmax.f32 %v477_v54, 0.0  ;;  %v575_v63 = vmax.f32 %v541_v55, 0.0 }
 0x10b   : > { %v557_v2 = vmax.f32 %v469_v58, 0.0  ;;  %v573_v3 = vmax.f32 %v533_v59, 0.0 }
 0x10c   : > { %v943_v4 = vpack.c.bf16 %v559_v62, %v558_v60  ;;  %v983_v5 = vpack.c.bf16 %v575_v63, %v574_v61 }
 0x10d   : > { %v938_v6 = vpack.c.bf16 %v557_v2, %v556_v0  ;;  %v978_v7 = vpack.c.bf16 %v573_v3, %v572_v1 }
 0x10e   : > { %991 = vst [vmem:[%s1215_s6 + $0x38] sm:$0xff] %v943_v4   ;;  %999 = vst [vmem:[%s1215_s6 + $0x78] sm:$0xff] %v983_v5  }
 0x10f   : > { %990 = vst [vmem:[%s1215_s6 + $0x30] sm:$0xff] %v938_v6   ;;  %998 = vst [vmem:[%s1215_s6 + $0x70] sm:$0xff] %v978_v7  }
 0x110 PF: > { %s13_s12 = sadd.s32 1, %s1110_s12  }
 0x111   : > { %p10_p4 = scmp.ge.s32.totalorder %s13_s12, 10  }
 0x113   :  { %12 = sbr.rel (!%p10_p4) target bundleno = 1 (0x1), region = 62 }

// kernel: resnet_features.25
= control target key start
LH: loop header
LB: loop body
LE: loop exit
PB: predicated region body
PF: predicated region fallthrough
CT: control target
= control target key end

     0   :  { %s1375_s15 = smov 0   ;;  %s1610_s0 = inlined_call_operand.vmem [shape: bf16[2048,72], index: 0, kind: input, shape index: {}]   ;;  %s1611_s1 = inlined_call_operand.vmem [shape: bf16[72,128], index: 1, kind: input, shape index: {}]   ;;  %s1612_s2 = inlined_call_operand.vmem [shape: f32[1,128], index: 2, kind: input, shape index: {}]   ;;  %s1613_s3 = inlined_call_operand.vmem [shape: bf16[2048,128], index: 3, kind: input, shape index: {}]   ;;  %s1614_s4 = inlined_call_operand.vmem [shape: bf16[2048,128], index: 4, kind: output, shape index: {}]  }
   0x1 LB: > { %s949_s16 = sadd.s32 4294967295, %s1348_s15   ;;  %p953_p0 = scmp.ge.s32.totalorder %s1348_s15, 1  ;;  %s1348_s15 = sphi %s1375_s15, %s14_s15  }
   0x2   : > { %p174_p1 = scmp.lt.s32.totalorder %s1348_s15, 9 }
   0x4   : > { %p175_p2 = pnand %p953_p0, %p174_p1 }
   0x5   : > { %v1321_v0 = vld [vmem:[%s1611_s1] sm:$0xff] (!%p175_p2)   ;;  %v1322_v1 = vld [vmem:[%s1611_s1 + $0x8] sm:$0xff] (!%p175_p2)   ;;  %s954_s21 = sshll.u32 (!%p175_p2), %s949_s16, 5  ;;  %v1323_v2 = vld [vmem:[%s1611_s1 + $0x10] sm:$0xff] (!%p175_p2)   ;;  %vm379_vm0 = vcmask (!%p175_p2), 588800   ;;  %vm428_vm1 = vcmask (!%p175_p2), 1043456  }
   0x6   : > { %178 = sbr.rel (%p175_p2) target bundleno = 275 (0x113), region = 36  ;;  %1259 = vmatprep.subr.bf16.mxu0 (!%p175_p2), %v1321_v0  ;;  %1301 = vmatprep.subr.bf16.mxu1 (!%p175_p2), %v1321_v0  ;;  %p206_p3 = scmp.lt.s32.totalorder (!%p175_p2), %s954_s21, 255  ;;  %v1324_v3 = vld [vmem:[%s1611_s1 + $0x18] sm:$0xff] (!%p175_p2)   ;;  %v1325_v6 = vld [vmem:[%s1611_s1 + $0x20] ss:$0 sps:$4 sm:$0xff] (!%p175_p2)  }
   0x7   : > { %1260 = vmatpush3.bf16.msra.mxu0 (!%p175_p2), %v1321_v0  ;;  %1306 = vmatpush3.bf16.msra.mxu1 (!%p175_p2), %v1321_v0  ;;  %v430_v7 = vsel (!%p175_p2), %vm428_vm1, %v1325_v6, 0  ;;  %v1463_v34 = vld [vmem:[%s1612_s2] ss:$0 sm:$0xff] (!%p175_p2) }
   0x8   : > { %1261 = vmatprep.subr.bf16.mxu0 (!%p175_p2), %v1322_v1  ;;  %1302 = vmatprep.subr.bf16.mxu1 (!%p175_p2), %v1322_v1 }
   0xb   : > { %1262 = vmatpush3.bf16.msra.mxu0 (!%p175_p2), %v1322_v1  ;;  %1307 = vmatpush3.bf16.msra.mxu1 (!%p175_p2), %v1322_v1 }
   0xc   : > { %1263 = vmatprep.subr.bf16.mxu0 (!%p175_p2), %v1323_v2  ;;  %1303 = vmatprep.subr.bf16.mxu1 (!%p175_p2), %v1323_v2 }
   0xd   : > { %s1616_s21 = smov (!%p206_p3, %s954_s21), 255 }
   0xe   : > { %s1392_s24 = sshll.u32 %s1616_s21, 2 }
   0xf   : > { %s1401_s29 = scalar_lea.vmem %s1610_s0, %s1392_s24  ;;  %1264 = vmatpush3.bf16.msra.mxu0 %v1323_v2  ;;  %1308 = vmatpush3.bf16.msra.mxu1 %v1323_v2  ;;  %s1442_s8 = scalar_lea.vmem %s1613_s3, %s1392_s24 }
  0x10   : > { %v1326_v4 = vld [vmem:[%s1401_s29] sm:$0xff]   ;;  %1265 = vmatprep.subr.bf16.mxu0 %v1324_v3  ;;  %1304 = vmatprep.subr.bf16.mxu1 %v1324_v3  ;;  %v1328_v8 = vld [vmem:[%s1401_s29 + $0x8] sm:$0xff]   ;;  %v1330_v10 = vld [vmem:[%s1401_s29 + $0x10] sm:$0xff]   ;;  %s1505_s13 = scalar_lea.vmem %s1614_s4, %s1392_s24 }
  0x11   : > { %v1327_v5 = vld [vmem:[%s1401_s29 + $0x40] sm:$0xff]   ;;  %1269 = vmatprep.mubr.msk.bf16.mxu0 %vm379_vm0, %v1326_v4  ;;  %v1329_v9 = vld [vmem:[%s1401_s29 + $0x48] sm:$0xff]   ;;  %v1331_v11 = vld [vmem:[%s1401_s29 + $0x50] sm:$0xff]  }
  0x12   : > { %1285 = vmatprep.mubr.msk.bf16.mxu1 %vm379_vm0, %v1327_v5  ;;  %v1332_v12 = vld [vmem:[%s1401_s29 + $0x18] sm:$0xff]   ;;  %v1334_v14 = vld [vmem:[%s1401_s29 + $0x20] sm:$0xff]   ;;  %v1336_v16 = vld [vmem:[%s1401_s29 + $0x28] sm:$0xff]  }
  0x13   : > { %1266 = vmatpush3.bf16.msra.mxu0 %v1324_v3  ;;  %1309 = vmatpush3.bf16.msra.mxu1 %v1324_v3  ;;  %v1333_v13 = vld [vmem:[%s1401_s29 + $0x58] sm:$0xff]   ;;  %v1335_v15 = vld [vmem:[%s1401_s29 + $0x60] sm:$0xff]   ;;  %v1337_v17 = vld [vmem:[%s1401_s29 + $0x68] sm:$0xff]  }
  0x14   : > { %1311 = vmatprep.subr.msk.bf16.mxu0 %vm428_vm1, %v1325_v6  ;;  %1312 = vmatprep.subr.msk.bf16.mxu1 %vm428_vm1, %v1325_v6  ;;  %v1338_v18 = vld [vmem:[%s1401_s29 + $0x30] sm:$0xff]   ;;  %v1340_v20 = vld [vmem:[%s1401_s29 + $0x38] sm:$0xff]   ;;  %v1208_v22 = vld [vmem:[%s1442_s8 + $0x8] sm:$0xff]  }
  0x15   : > { %v1339_v19 = vld [vmem:[%s1401_s29 + $0x70] sm:$0xff]   ;;  %v1341_v21 = vld [vmem:[%s1401_s29 + $0x78] sm:$0xff]   ;;  %v1216_v23 = vld [vmem:[%s1442_s8 + $0x48] sm:$0xff]   ;;  %v1070_v30 = vunpack.c.l.bf16 %v1208_v22  ;;  %v1071_v35 = vunpack.c.h.bf16 %v1208_v22 }
  0x16   : > { %v1065_v24 = vld [vmem:[%s1442_s8] sm:$0xff]   ;;  %v1449_v26 = vld [vmem:[%s1442_s8 + $0x18] sm:$0xff]   ;;  %v1455_v28 = vld [vmem:[%s1442_s8 + $0x10] sm:$0xff]   ;;  %v1102_v31 = vunpack.c.l.bf16 %v1216_v23  ;;  %v1103_v36 = vunpack.c.h.bf16 %v1216_v23 }
  0x17   : > { %1268 = vmatpush3.bf16.msra.mxu0 %v430_v7  ;;  %1310 = vmatpush3.bf16.msra.mxu1 %v430_v7  ;;  %v1215_v25 = vld [vmem:[%s1442_s8 + $0x40] sm:$0xff]   ;;  %v1452_v27 = vld [vmem:[%s1442_s8 + $0x58] sm:$0xff]   ;;  %v1458_v29 = vld [vmem:[%s1442_s8 + $0x50] sm:$0xff]   ;;  %v1066_v32 = vunpack.c.l.bf16 %v1065_v24  ;;  %v1067_v37 = vunpack.c.h.bf16 %v1065_v24  ;;  %v1078_v41 = vunpack.c.l.bf16 %v1449_v26  ;;  %v1074_v43 = vunpack.c.l.bf16 %v1455_v28 }
  0x18   : > { %v1098_v33 = vunpack.c.l.bf16 %v1215_v25  ;;  %v1099_v38 = vunpack.c.h.bf16 %v1215_v25  ;;  %v1466_v39 = vld [vmem:[%s1442_s8 + $0x28] sm:$0xff]   ;;  %v1110_v42 = vunpack.c.l.bf16 %v1452_v27  ;;  %v1106_v44 = vunpack.c.l.bf16 %v1458_v29  ;;  %v1476_v45 = vld [vmem:[%s1442_s8 + $0x20] sm:$0xff]  }
  0x19   : > { %v1469_v40 = vld [vmem:[%s1442_s8 + $0x68] sm:$0xff]   ;;  %v1479_v46 = vld [vmem:[%s1442_s8 + $0x60] sm:$0xff]   ;;  %v1079_v49 = vunpack.c.h.bf16 %v1449_v26  ;;  %v1111_v50 = vunpack.c.h.bf16 %v1452_v27  ;;  %v1075_v51 = vunpack.c.h.bf16 %v1455_v28  ;;  %v1107_v52 = vunpack.c.h.bf16 %v1458_v29 }
  0x1a   : > { %1270 = vmatmul.mubr.msk.bf16.vlgmr.msra.gmra.mrb[0].mxu0 %vm379_vm0, %v1328_v8  ;;  %1286 = vmatmul.mubr.msk.bf16.vlgmr.msra.gmra.mrb[0].mxu1 %vm379_vm0, %v1329_v9  ;;  %v1086_v57 = vunpack.c.l.bf16 %v1466_v39  ;;  %v1118_v58 = vunpack.c.l.bf16 %v1469_v40  ;;  %v1082_v63 = vunpack.c.l.bf16 %v1476_v45  ;;  %v1114_v0 = vunpack.c.l.bf16 %v1479_v46 }
  0x1b   : > { %1273 = vmatprep.mubr.msk.bf16.mxu0 %vm379_vm0, %v1330_v10  ;;  %1289 = vmatprep.mubr.msk.bf16.mxu1 %vm379_vm0, %v1331_v11 }
  0x22   : > { %1274 = vmatmul.mubr.msk.bf16.gmra.mrb[4].mxu0 %vm379_vm0, %v1332_v12  ;;  %1290 = vmatmul.mubr.msk.bf16.gmra.mrb[4].mxu1 %vm379_vm0, %v1333_v13  ;;  %v1087_v13 = vunpack.c.h.bf16 %v1466_v39 }
  0x23   : > { %1277 = vmatprep.mubr.msk.bf16.mxu0 %vm379_vm0, %v1334_v14  ;;  %1293 = vmatprep.mubr.msk.bf16.mxu1 %vm379_vm0, %v1335_v15  ;;  %v1119_v14 = vunpack.c.h.bf16 %v1469_v40 }
  0x2a   : > { %1278 = vmatmul.mubr.msk.bf16.gmra.mrb[8].mxu0 %vm379_vm0, %v1336_v16  ;;  %1294 = vmatmul.mubr.msk.bf16.gmra.mrb[8].mxu1 %vm379_vm0, %v1337_v17  ;;  %v1083_v17 = vunpack.c.h.bf16 %v1476_v45 }
  0x2b   : > { %1281 = vmatprep.mubr.msk.bf16.mxu0 %vm379_vm0, %v1338_v18  ;;  %1297 = vmatprep.mubr.msk.bf16.mxu1 %vm379_vm0, %v1339_v19  ;;  %v1115_v18 = vunpack.c.h.bf16 %v1479_v46 }
  0x32   : > { %1282 = vmatmul.mubr.msk.bf16.gmra.mrb[12].mxu0 %vm379_vm0, %v1340_v20  ;;  %1298 = vmatmul.mubr.msk.bf16.gmra.mrb[12].mxu1 %vm379_vm0, %v1341_v21 }
  0xed   : > { %v1271_v47 = vpop.f32.mrb[0].mxu0  ;;  %v1287_v48 = vpop.f32.mrb[0].mxu1 }
  0xee   : > { %v475_v53 = vadd.f32 %v1271_v47, %v1463_v34  ;;  %v539_v54 = vadd.f32 %v1287_v48, %v1463_v34  ;;  %v466_v55 = vpop.f32.mrb[1].mxu0  ;;  %v530_v56 = vpop.f32.mrb[1].mxu1 }
  0xef   : > { %v467_v59 = vadd.f32 %v1463_v34, %v466_v55  ;;  %v531_v60 = vadd.f32 %v1463_v34, %v530_v56  ;;  %v1272_v61 = vpop.f32.mrb[2].mxu0  ;;  %v1288_v62 = vpop.f32.mrb[2].mxu1 }
  0xf0   : > { %v659_v1 = vadd.f32 %v1070_v30, %v475_v53  ;;  %v675_v2 = vadd.f32 %v1102_v31, %v539_v54  ;;  %v478_v3 = vadd.f32 %v1272_v61, %v1463_v34  ;;  %v542_v4 = vadd.f32 %v1288_v62, %v1463_v34  ;;  %v469_v5 = vpop.f32.mrb[3].mxu0  ;;  %v533_v6 = vpop.f32.mrb[3].mxu1  ;;  %v1515_v61 = vld [vmem:[%s1442_s8 + $0x78] sm:$0xff]  }
  0xf1   : > { %v657_v7 = vadd.f32 %v1066_v32, %v467_v59  ;;  %v673_v8 = vadd.f32 %v1098_v33, %v531_v60  ;;  %v470_v9 = vadd.f32 %v1463_v34, %v469_v5  ;;  %v534_v10 = vadd.f32 %v1463_v34, %v533_v6  ;;  %v1512_v60 = vld [vmem:[%s1442_s8 + $0x38] sm:$0xff]   ;;  %v1526_v6 = vld [vmem:[%s1442_s8 + $0x30] sm:$0xff]  }
  0xf2   : > { %v660_v11 = vadd.f32 %v1071_v35, %v478_v3  ;;  %v676_v12 = vadd.f32 %v1103_v36, %v542_v4  ;;  %v691_v19 = vmax.f32 %v659_v1, 0.0  ;;  %v707_v20 = vmax.f32 %v675_v2, 0.0 }
  0xf3   : > { %v658_v15 = vadd.f32 %v1067_v37, %v470_v9  ;;  %v674_v16 = vadd.f32 %v1099_v38, %v534_v10  ;;  %v689_v23 = vmax.f32 %v657_v7, 0.0  ;;  %v705_v24 = vmax.f32 %v673_v8, 0.0  ;;  %v1529_v7 = vld [vmem:[%s1442_s8 + $0x70] sm:$0xff]  }
  0xf4   : > { %v692_v21 = vmax.f32 %v660_v11, 0.0  ;;  %v708_v22 = vmax.f32 %v676_v12, 0.0  ;;  %v1094_v12 = vunpack.c.l.bf16 %v1512_v60 }
  0xf5   : > { %v690_v25 = vmax.f32 %v658_v15, 0.0  ;;  %v706_v30 = vmax.f32 %v674_v16, 0.0  ;;  %v1275_v31 = vpop.f32.mrb[4].mxu0  ;;  %v1291_v32 = vpop.f32.mrb[4].mxu1  ;;  %v1126_v15 = vunpack.c.l.bf16 %v1515_v61  ;;  %v1090_v16 = vunpack.c.l.bf16 %v1526_v6 }
  0xf6   : > { %v1136_v33 = vpack.c.bf16 %v692_v21, %v691_v19  ;;  %v1176_v35 = vpack.c.bf16 %v708_v22, %v707_v20  ;;  %v491_v36 = vadd.f32 %v1275_v31, %v1463_v34  ;;  %v555_v37 = vadd.f32 %v1291_v32, %v1463_v34  ;;  %v482_v38 = vpop.f32.mrb[5].mxu0  ;;  %v546_v47 = vpop.f32.mrb[5].mxu1 }
  0xf7   : > { %v1131_v48 = vpack.c.bf16 %v690_v25, %v689_v23  ;;  %v1171_v53 = vpack.c.bf16 %v706_v30, %v705_v24  ;;  %v483_v54 = vadd.f32 %v1463_v34, %v482_v38  ;;  %v547_v55 = vadd.f32 %v1463_v34, %v546_v47  ;;  %v1276_v56 = vpop.f32.mrb[6].mxu0  ;;  %v1292_v59 = vpop.f32.mrb[6].mxu1 }
  0xf8   : > { %1223 = vst [vmem:[%s1505_s13 + $0x8] sm:$0xff] %v1136_v33   ;;  %1231 = vst [vmem:[%s1505_s13 + $0x48] sm:$0xff] %v1176_v35   ;;  %v663_v62 = vadd.f32 %v1078_v41, %v491_v36  ;;  %v679_v1 = vadd.f32 %v1110_v42, %v555_v37  ;;  %v494_v2 = vadd.f32 %v1276_v56, %v1463_v34  ;;  %v485_v4 = vpop.f32.mrb[7].mxu0  ;;  %v549_v5 = vpop.f32.mrb[7].mxu1  ;;  %v1122_v19 = vunpack.c.l.bf16 %v1529_v7 }
  0xf9   : > { %v558_v3 = vadd.f32 %v1292_v59, %v1463_v34  ;;  %1132 = vst [vmem:[%s1505_s13] sm:$0xff] %v1131_v48   ;;  %1230 = vst [vmem:[%s1505_s13 + $0x40] sm:$0xff] %v1171_v53   ;;  %v661_v8 = vadd.f32 %v1074_v43, %v483_v54  ;;  %v677_v41 = vadd.f32 %v1106_v44, %v547_v55 }
  0xfa   : > { %v486_v42 = vadd.f32 %v1463_v34, %v485_v4  ;;  %v550_v9 = vadd.f32 %v1463_v34, %v549_v5  ;;  %v664_v10 = vadd.f32 %v1079_v49, %v494_v2  ;;  %v695_v20 = vmax.f32 %v663_v62, 0.0 }
  0xfb   : > { %v680_v11 = vadd.f32 %v1111_v50, %v558_v3  ;;  %v711_v26 = vmax.f32 %v679_v1, 0.0  ;;  %v693_v27 = vmax.f32 %v661_v8, 0.0  ;;  %v709_v50 = vmax.f32 %v677_v41, 0.0 }
  0xfc   : > { %v662_v43 = vadd.f32 %v1075_v51, %v486_v42  ;;  %v678_v44 = vadd.f32 %v1107_v52, %v550_v9  ;;  %v696_v49 = vmax.f32 %v664_v10, 0.0  ;;  %v1095_v3 = vunpack.c.h.bf16 %v1512_v60 }
  0xfd   : > { %v712_v21 = vmax.f32 %v680_v11, 0.0  ;;  %v1279_v24 = vpop.f32.mrb[8].mxu0  ;;  %v1295_v28 = vpop.f32.mrb[8].mxu1  ;;  %v1127_v4 = vunpack.c.h.bf16 %v1515_v61  ;;  %v1091_v5 = vunpack.c.h.bf16 %v1526_v6  ;;  %v1123_v8 = vunpack.c.h.bf16 %v1529_v7 }
  0xfe   : > { %v694_v22 = vmax.f32 %v662_v43, 0.0  ;;  %v710_v23 = vmax.f32 %v678_v44, 0.0  ;;  %v1146_v51 = vpack.c.bf16 %v696_v49, %v695_v20  ;;  %v507_v29 = vadd.f32 %v1279_v24, %v1463_v34  ;;  %v498_v30 = vpop.f32.mrb[9].mxu0  ;;  %v562_v31 = vpop.f32.mrb[9].mxu1 }
  0xff   : > { %v1186_v25 = vpack.c.bf16 %v712_v21, %v711_v26  ;;  %v571_v52 = vadd.f32 %v1295_v28, %v1463_v34  ;;  %v499_v35 = vadd.f32 %v1463_v34, %v498_v30  ;;  %v563_v36 = vadd.f32 %v1463_v34, %v562_v31  ;;  %v1280_v37 = vpop.f32.mrb[10].mxu0  ;;  %v1296_v38 = vpop.f32.mrb[10].mxu1 }
 0x100   : > { %v1141_v32 = vpack.c.bf16 %v694_v22, %v693_v27  ;;  %v1181_v33 = vpack.c.bf16 %v710_v23, %v709_v50  ;;  %1225 = vst [vmem:[%s1505_s13 + $0x18] sm:$0xff] %v1146_v51   ;;  %v667_v47 = vadd.f32 %v1086_v57, %v507_v29  ;;  %v510_v53 = vadd.f32 %v1280_v37, %v1463_v34  ;;  %v501_v55 = vpop.f32.mrb[11].mxu0  ;;  %v565_v56 = vpop.f32.mrb[11].mxu1 }
 0x101   : > { %1233 = vst [vmem:[%s1505_s13 + $0x58] sm:$0xff] %v1186_v25   ;;  %v683_v48 = vadd.f32 %v1118_v58, %v571_v52  ;;  %v574_v54 = vadd.f32 %v1296_v38, %v1463_v34  ;;  %v665_v59 = vadd.f32 %v1082_v63, %v499_v35  ;;  %v681_v62 = vadd.f32 %v1114_v0, %v563_v36 }
 0x102   : > { %1224 = vst [vmem:[%s1505_s13 + $0x10] sm:$0xff] %v1141_v32   ;;  %1232 = vst [vmem:[%s1505_s13 + $0x50] sm:$0xff] %v1181_v33   ;;  %v502_v1 = vadd.f32 %v1463_v34, %v501_v55  ;;  %v566_v57 = vadd.f32 %v1463_v34, %v565_v56  ;;  %v668_v58 = vadd.f32 %v1087_v13, %v510_v53  ;;  %v699_v41 = vmax.f32 %v667_v47, 0.0 }
 0x103   : > { %v684_v2 = vadd.f32 %v1119_v14, %v574_v54  ;;  %v715_v39 = vmax.f32 %v683_v48, 0.0  ;;  %v697_v40 = vmax.f32 %v665_v59, 0.0  ;;  %v713_v14 = vmax.f32 %v681_v62, 0.0 }
 0x104   : > { %v666_v63 = vadd.f32 %v1083_v17, %v502_v1  ;;  %v682_v0 = vadd.f32 %v1115_v18, %v566_v57  ;;  %v700_v13 = vmax.f32 %v668_v58, 0.0 }
 0x105   : > { %v716_v42 = vmax.f32 %v684_v2, 0.0  ;;  %v1283_v11 = vpop.f32.mrb[12].mxu0  ;;  %v1299_v45 = vpop.f32.mrb[12].mxu1 }
 0x106   : > { %v698_v9 = vmax.f32 %v666_v63, 0.0  ;;  %v714_v10 = vmax.f32 %v682_v0, 0.0  ;;  %v1156_v17 = vpack.c.bf16 %v700_v13, %v699_v41  ;;  %v523_v46 = vadd.f32 %v1283_v11, %v1463_v34  ;;  %v514_v44 = vpop.f32.mrb[13].mxu0  ;;  %v578_v20 = vpop.f32.mrb[13].mxu1 }
 0x107   : > { %v1196_v43 = vpack.c.bf16 %v716_v42, %v715_v39  ;;  %v587_v18 = vadd.f32 %v1299_v45, %v1463_v34  ;;  %v515_v21 = vadd.f32 %v1463_v34, %v514_v44  ;;  %v579_v27 = vadd.f32 %v1463_v34, %v578_v20  ;;  %v1284_v50 = vpop.f32.mrb[14].mxu0  ;;  %v1300_v22 = vpop.f32.mrb[14].mxu1 }
 0x108   : > { %v1151_v26 = vpack.c.bf16 %v698_v9, %v697_v40  ;;  %v1191_v49 = vpack.c.bf16 %v714_v10, %v713_v14  ;;  %1227 = vst [vmem:[%s1505_s13 + $0x28] sm:$0xff] %v1156_v17   ;;  %v671_v23 = vadd.f32 %v1094_v12, %v523_v46  ;;  %v526_v28 = vadd.f32 %v1284_v50, %v1463_v34  ;;  %v517_v25 = vpop.f32.mrb[15].mxu0  ;;  %v581_v29 = vpop.f32.mrb[15].mxu1 }
 0x109   : > { %1235 = vst [vmem:[%s1505_s13 + $0x68] sm:$0xff] %v1196_v43   ;;  %v687_v24 = vadd.f32 %v1126_v15, %v587_v18  ;;  %v590_v51 = vadd.f32 %v1300_v22, %v1463_v34  ;;  %v669_v52 = vadd.f32 %v1090_v16, %v515_v21  ;;  %v685_v30 = vadd.f32 %v1122_v19, %v579_v27 }
 0x10a   : > { %1226 = vst [vmem:[%s1505_s13 + $0x20] sm:$0xff] %v1151_v26   ;;  %1234 = vst [vmem:[%s1505_s13 + $0x60] sm:$0xff] %v1191_v49   ;;  %v518_v60 = vadd.f32 %v1463_v34, %v517_v25  ;;  %v582_v12 = vadd.f32 %v1463_v34, %v581_v29  ;;  %v672_v61 = vadd.f32 %v1095_v3, %v526_v28  ;;  %v703_v33 = vmax.f32 %v671_v23, 0.0 }
 0x10b   : > { %v688_v15 = vadd.f32 %v1127_v4, %v590_v51  ;;  %v719_v35 = vmax.f32 %v687_v24, 0.0  ;;  %v701_v16 = vmax.f32 %v669_v52, 0.0  ;;  %v717_v37 = vmax.f32 %v685_v30, 0.0 }
 0x10c   : > { %v670_v31 = vadd.f32 %v1091_v5, %v518_v60  ;;  %v686_v32 = vadd.f32 %v1123_v8, %v582_v12  ;;  %v704_v36 = vmax.f32 %v672_v61, 0.0 }
 0x10d   : > { %v720_v6 = vmax.f32 %v688_v15, 0.0 }
 0x10e   : > { %v702_v7 = vmax.f32 %v670_v31, 0.0  ;;  %v718_v19 = vmax.f32 %v686_v32, 0.0  ;;  %v1166_v38 = vpack.c.bf16 %v704_v36, %v703_v33 }
 0x10f   : > { %v1206_v47 = vpack.c.bf16 %v720_v6, %v719_v35 }
 0x110   : > { %v1161_v48 = vpack.c.bf16 %v702_v7, %v701_v16  ;;  %v1201_v34 = vpack.c.bf16 %v718_v19, %v717_v37  ;;  %1229 = vst [vmem:[%s1505_s13 + $0x38] sm:$0xff] %v1166_v38  }
 0x111   : > { %1237 = vst [vmem:[%s1505_s13 + $0x78] sm:$0xff] %v1206_v47  }
 0x112   : > { %1228 = vst [vmem:[%s1505_s13 + $0x30] sm:$0xff] %v1161_v48   ;;  %1236 = vst [vmem:[%s1505_s13 + $0x70] sm:$0xff] %v1201_v34  }
 0x113 PF: > { %s14_s15 = sadd.s32 1, %s1348_s15  }
 0x114   : > { %p11_p4 = scmp.ge.s32.totalorder %s14_s15, 10  }
 0x116   :  { %13 = sbr.rel (!%p11_p4) target bundleno = 1 (0x1), region = 69 }

// kernel: resnet_features.29
= control target key start
LH: loop header
LB: loop body
LE: loop exit
PB: predicated region body
PF: predicated region fallthrough
CT: control target
= control target key end

     0   :  { %vm282_vm0 = vcmask 588800   ;;  %vm379_vm1 = vcmask 1043456   ;;  %s1937_s1 = inlined_call_operand.vmem [shape: bf16[72,128], index: 1, kind: input, shape index: {}]   ;;  %s1938_s0 = inlined_call_operand.vmem [shape: bf16[512,72], index: 0, kind: input, shape index: {}]   ;;  %s1939_s2 = inlined_call_operand.vmem [shape: f32[1,128], index: 2, kind: input, shape index: {}]   ;;  %s1940_s3 = inlined_call_operand.vmem [shape: bf16[512,128], index: 3, kind: output, shape index: {}]  }
   0x1   :  { %v1572_v0 = vld [vmem:[%s1937_s1] sm:$0xff]   ;;  %v1573_v1 = vld [vmem:[%s1937_s1 + $0x8] sm:$0xff]   ;;  %v1574_v2 = vld [vmem:[%s1937_s1 + $0x10] sm:$0xff]  }
   0x2   :  { %1486 = vmatprep.subr.bf16.mxu0 %v1572_v0  ;;  %1560 = vmatprep.subr.bf16.mxu1 %v1572_v0  ;;  %v1577_v3 = vld [vmem:[%s1938_s0] sm:$0xff]   ;;  %v1575_v5 = vld [vmem:[%s1937_s1 + $0x18] sm:$0xff]   ;;  %v1579_v8 = vld [vmem:[%s1938_s0 + $0x8] sm:$0xff]  }
   0x3   :  { %1487 = vmatpush3.bf16.msra.mxu0 %v1572_v0  ;;  %1565 = vmatpush3.bf16.msra.mxu1 %v1572_v0  ;;  %v1578_v4 = vld [vmem:[%s1938_s0 + $0x80] sm:$0xff]   ;;  %v1580_v9 = vld [vmem:[%s1938_s0 + $0x88] sm:$0xff]   ;;  %v1581_v10 = vld [vmem:[%s1938_s0 + $0x10] sm:$0xff]  }
   0x4   :  { %1488 = vmatprep.subr.bf16.mxu0 %v1573_v1  ;;  %1561 = vmatprep.subr.bf16.mxu1 %v1573_v1  ;;  %v1576_v6 = vld [vmem:[%s1937_s1 + $0x20] ss:$0 sps:$4 sm:$0xff]   ;;  %v1582_v11 = vld [vmem:[%s1938_s0 + $0x90] sm:$0xff]   ;;  %v1583_v12 = vld [vmem:[%s1938_s0 + $0x18] sm:$0xff]  }
   0x5   :  { %1496 = vmatprep.mubr.msk.bf16.mxu0 %vm282_vm0, %v1577_v3  ;;  %1528 = vmatprep.mubr.msk.bf16.mxu1 %vm282_vm0, %v1578_v4  ;;  %v381_v7 = vsel %vm379_vm1, %v1576_v6, 0  ;;  %v1584_v13 = vld [vmem:[%s1938_s0 + $0x98] sm:$0xff]   ;;  %v1585_v14 = vld [vmem:[%s1938_s0 + $0x20] sm:$0xff]   ;;  %v1587_v16 = vld [vmem:[%s1938_s0 + $0x28] sm:$0xff]  }
   0x6   :  { %v1586_v15 = vld [vmem:[%s1938_s0 + $0xa0] sm:$0xff]   ;;  %v1588_v17 = vld [vmem:[%s1938_s0 + $0xa8] sm:$0xff]   ;;  %v1589_v18 = vld [vmem:[%s1938_s0 + $0x30] sm:$0xff]  }
   0x7   :  { %1489 = vmatpush3.bf16.msra.mxu0 %v1573_v1  ;;  %1566 = vmatpush3.bf16.msra.mxu1 %v1573_v1  ;;  %v1590_v19 = vld [vmem:[%s1938_s0 + $0xb0] sm:$0xff]   ;;  %v1591_v20 = vld [vmem:[%s1938_s0 + $0x38] sm:$0xff]   ;;  %v1593_v22 = vld [vmem:[%s1938_s0 + $0x40] sm:$0xff]  }
   0x8   :  { %1490 = vmatprep.subr.bf16.mxu0 %v1574_v2  ;;  %1562 = vmatprep.subr.bf16.mxu1 %v1574_v2  ;;  %v1592_v21 = vld [vmem:[%s1938_s0 + $0xb8] sm:$0xff]   ;;  %v1594_v23 = vld [vmem:[%s1938_s0 + $0xc0] sm:$0xff]   ;;  %v1595_v24 = vld [vmem:[%s1938_s0 + $0x48] sm:$0xff]  }
   0x9   :  { %v1596_v25 = vld [vmem:[%s1938_s0 + $0xc8] sm:$0xff]   ;;  %v1597_v26 = vld [vmem:[%s1938_s0 + $0x50] sm:$0xff]   ;;  %v1599_v28 = vld [vmem:[%s1938_s0 + $0x58] sm:$0xff]  }
   0xa   :  { %v1598_v27 = vld [vmem:[%s1938_s0 + $0xd0] sm:$0xff]   ;;  %v1600_v29 = vld [vmem:[%s1938_s0 + $0xd8] sm:$0xff]   ;;  %v1601_v30 = vld [vmem:[%s1938_s0 + $0x60] sm:$0xff]  }
   0xb   :  { %1491 = vmatpush3.bf16.msra.mxu0 %v1574_v2  ;;  %1567 = vmatpush3.bf16.msra.mxu1 %v1574_v2  ;;  %v1602_v31 = vld [vmem:[%s1938_s0 + $0xe0] sm:$0xff]   ;;  %v1603_v32 = vld [vmem:[%s1938_s0 + $0x68] sm:$0xff]   ;;  %v1605_v34 = vld [vmem:[%s1938_s0 + $0x70] sm:$0xff]  }
   0xc   :  { %1492 = vmatprep.subr.bf16.mxu0 %v1575_v5  ;;  %1563 = vmatprep.subr.bf16.mxu1 %v1575_v5  ;;  %v1604_v33 = vld [vmem:[%s1938_s0 + $0xe8] sm:$0xff]   ;;  %v1606_v35 = vld [vmem:[%s1938_s0 + $0xf0] sm:$0xff]   ;;  %v1607_v36 = vld [vmem:[%s1938_s0 + $0x78] sm:$0xff]  }
   0xd   :  { %v1608_v37 = vld [vmem:[%s1938_s0 + $0xf8] sm:$0xff]   ;;  %v1775_v38 = vld [vmem:[%s1939_s2] ss:$0 sm:$0xff] }
   0xf   :  { %1493 = vmatpush3.bf16.msra.mxu0 %v1575_v5  ;;  %1568 = vmatpush3.bf16.msra.mxu1 %v1575_v5 }
  0x10   :  { %1570 = vmatprep.subr.msk.bf16.mxu0 %vm379_vm1, %v1576_v6  ;;  %1571 = vmatprep.subr.msk.bf16.mxu1 %vm379_vm1, %v1576_v6 }
  0x13   :  { %1495 = vmatpush3.bf16.msra.mxu0 %v381_v7  ;;  %1569 = vmatpush3.bf16.msra.mxu1 %v381_v7 }
  0x16   :  { %1497 = vmatmul.mubr.msk.bf16.vlgmr.msra.gmra.mrb[0].mxu0 %vm282_vm0, %v1579_v8  ;;  %1529 = vmatmul.mubr.msk.bf16.vlgmr.msra.gmra.mrb[0].mxu1 %vm282_vm0, %v1580_v9 }
  0x17   :  { %1500 = vmatprep.mubr.msk.bf16.mxu0 %vm282_vm0, %v1581_v10  ;;  %1532 = vmatprep.mubr.msk.bf16.mxu1 %vm282_vm0, %v1582_v11 }
  0x1e   :  { %1501 = vmatmul.mubr.msk.bf16.gmra.mrb[4].mxu0 %vm282_vm0, %v1583_v12  ;;  %1533 = vmatmul.mubr.msk.bf16.gmra.mrb[4].mxu1 %vm282_vm0, %v1584_v13 }
  0x1f   :  { %1504 = vmatprep.mubr.msk.bf16.mxu0 %vm282_vm0, %v1585_v14  ;;  %1536 = vmatprep.mubr.msk.bf16.mxu1 %vm282_vm0, %v1586_v15 }
  0x26   :  { %1505 = vmatmul.mubr.msk.bf16.gmra.mrb[8].mxu0 %vm282_vm0, %v1587_v16  ;;  %1537 = vmatmul.mubr.msk.bf16.gmra.mrb[8].mxu1 %vm282_vm0, %v1588_v17 }
  0x27   :  { %1508 = vmatprep.mubr.msk.bf16.mxu0 %vm282_vm0, %v1589_v18  ;;  %1540 = vmatprep.mubr.msk.bf16.mxu1 %vm282_vm0, %v1590_v19 }
  0x2e   :  { %1509 = vmatmul.mubr.msk.bf16.gmra.mrb[12].mxu0 %vm282_vm0, %v1591_v20  ;;  %1541 = vmatmul.mubr.msk.bf16.gmra.mrb[12].mxu1 %vm282_vm0, %v1592_v21 }
  0x2f   :  { %1512 = vmatprep.mubr.msk.bf16.mxu0 %vm282_vm0, %v1593_v22  ;;  %1544 = vmatprep.mubr.msk.bf16.mxu1 %vm282_vm0, %v1594_v23 }
  0x36   :  { %1513 = vmatmul.mubr.msk.bf16.gmra.mrb[16].mxu0 %vm282_vm0, %v1595_v24  ;;  %1545 = vmatmul.mubr.msk.bf16.gmra.mrb[16].mxu1 %vm282_vm0, %v1596_v25 }
  0x37   :  { %1516 = vmatprep.mubr.msk.bf16.mxu0 %vm282_vm0, %v1597_v26  ;;  %1548 = vmatprep.mubr.msk.bf16.mxu1 %vm282_vm0, %v1598_v27 }
  0x3e   :  { %1517 = vmatmul.mubr.msk.bf16.gmra.mrb[20].mxu0 %vm282_vm0, %v1599_v28  ;;  %1549 = vmatmul.mubr.msk.bf16.gmra.mrb[20].mxu1 %vm282_vm0, %v1600_v29 }
  0x3f   :  { %1520 = vmatprep.mubr.msk.bf16.mxu0 %vm282_vm0, %v1601_v30  ;;  %1552 = vmatprep.mubr.msk.bf16.mxu1 %vm282_vm0, %v1602_v31 }
  0x46   :  { %1521 = vmatmul.mubr.msk.bf16.gmra.mrb[24].mxu0 %vm282_vm0, %v1603_v32  ;;  %1553 = vmatmul.mubr.msk.bf16.gmra.mrb[24].mxu1 %vm282_vm0, %v1604_v33 }
  0x47   :  { %1524 = vmatprep.mubr.msk.bf16.mxu0 %vm282_vm0, %v1605_v34  ;;  %1556 = vmatprep.mubr.msk.bf16.mxu1 %vm282_vm0, %v1606_v35 }
  0x4e   :  { %1525 = vmatmul.mubr.msk.bf16.gmra.mrb[28].mxu0 %vm282_vm0, %v1607_v36  ;;  %1557 = vmatmul.mubr.msk.bf16.gmra.mrb[28].mxu1 %vm282_vm0, %v1608_v37 }
  0xe9   :  { %v1498_v39 = vpop.f32.mrb[0].mxu0  ;;  %v1530_v40 = vpop.f32.mrb[0].mxu1 }
  0xea   :  { %v426_v41 = vadd.f32 %v1498_v39, %v1775_v38  ;;  %v554_v42 = vadd.f32 %v1530_v40, %v1775_v38  ;;  %v417_v43 = vpop.f32.mrb[1].mxu0  ;;  %v545_v44 = vpop.f32.mrb[1].mxu1 }
  0xeb   :  { %v418_v45 = vadd.f32 %v1775_v38, %v417_v43  ;;  %v546_v46 = vadd.f32 %v1775_v38, %v545_v44  ;;  %v1499_v47 = vpop.f32.mrb[2].mxu0  ;;  %v1531_v48 = vpop.f32.mrb[2].mxu1 }
  0xec   :  { %v429_v49 = vadd.f32 %v1499_v47, %v1775_v38  ;;  %v557_v50 = vadd.f32 %v1531_v48, %v1775_v38  ;;  %v420_v51 = vpop.f32.mrb[3].mxu0  ;;  %v548_v52 = vpop.f32.mrb[3].mxu1  ;;  %v674_v55 = vmax.f32 %v426_v41, 0.0  ;;  %v706_v56 = vmax.f32 %v554_v42, 0.0 }
  0xed   :  { %v421_v53 = vadd.f32 %v1775_v38, %v420_v51  ;;  %v549_v54 = vadd.f32 %v1775_v38, %v548_v52  ;;  %v672_v59 = vmax.f32 %v418_v45, 0.0  ;;  %v704_v60 = vmax.f32 %v546_v46, 0.0 }
  0xee   :  { %v675_v57 = vmax.f32 %v429_v49, 0.0  ;;  %v707_v58 = vmax.f32 %v557_v50, 0.0 }
  0xef   :  { %v673_v61 = vmax.f32 %v421_v53, 0.0  ;;  %v705_v62 = vmax.f32 %v549_v54, 0.0 }
  0xf0   :  { %v1266_v63 = vpack.c.bf16 %v675_v57, %v674_v55  ;;  %v1346_v0 = vpack.c.bf16 %v707_v58, %v706_v56 }
  0xf1   :  { %v1261_v1 = vpack.c.bf16 %v673_v61, %v672_v59  ;;  %v1341_v2 = vpack.c.bf16 %v705_v62, %v704_v60  ;;  %v1502_v3 = vpop.f32.mrb[4].mxu0  ;;  %v1534_v4 = vpop.f32.mrb[4].mxu1 }
  0xf2   :  { %1418 = vst [vmem:[%s1940_s3 + $0x8] sm:$0xff] %v1266_v63   ;;  %1434 = vst [vmem:[%s1940_s3 + $0x88] sm:$0xff] %v1346_v0   ;;  %v442_v5 = vadd.f32 %v1502_v3, %v1775_v38  ;;  %v570_v6 = vadd.f32 %v1534_v4, %v1775_v38  ;;  %v433_v7 = vpop.f32.mrb[5].mxu0  ;;  %v561_v8 = vpop.f32.mrb[5].mxu1 }
  0xf3   :  { %1262 = vst [vmem:[%s1940_s3] sm:$0xff] %v1261_v1   ;;  %1433 = vst [vmem:[%s1940_s3 + $0x80] sm:$0xff] %v1341_v2   ;;  %v434_v9 = vadd.f32 %v1775_v38, %v433_v7  ;;  %v562_v10 = vadd.f32 %v1775_v38, %v561_v8  ;;  %v1503_v11 = vpop.f32.mrb[6].mxu0  ;;  %v1535_v12 = vpop.f32.mrb[6].mxu1 }
  0xf4   :  { %v445_v13 = vadd.f32 %v1503_v11, %v1775_v38  ;;  %v573_v14 = vadd.f32 %v1535_v12, %v1775_v38  ;;  %v436_v15 = vpop.f32.mrb[7].mxu0  ;;  %v564_v16 = vpop.f32.mrb[7].mxu1  ;;  %v678_v19 = vmax.f32 %v442_v5, 0.0  ;;  %v710_v20 = vmax.f32 %v570_v6, 0.0 }
  0xf5   :  { %v437_v17 = vadd.f32 %v1775_v38, %v436_v15  ;;  %v565_v18 = vadd.f32 %v1775_v38, %v564_v16  ;;  %v676_v23 = vmax.f32 %v434_v9, 0.0  ;;  %v708_v24 = vmax.f32 %v562_v10, 0.0 }
  0xf6   :  { %v679_v21 = vmax.f32 %v445_v13, 0.0  ;;  %v711_v22 = vmax.f32 %v573_v14, 0.0 }
  0xf7   :  { %v677_v25 = vmax.f32 %v437_v17, 0.0  ;;  %v709_v26 = vmax.f32 %v565_v18, 0.0 }
  0xf8   :  { %v1276_v27 = vpack.c.bf16 %v679_v21, %v678_v19  ;;  %v1356_v28 = vpack.c.bf16 %v711_v22, %v710_v20 }
  0xf9   :  { %v1271_v29 = vpack.c.bf16 %v677_v25, %v676_v23  ;;  %v1351_v30 = vpack.c.bf16 %v709_v26, %v708_v24  ;;  %v1506_v31 = vpop.f32.mrb[8].mxu0  ;;  %v1538_v32 = vpop.f32.mrb[8].mxu1 }
  0xfa   :  { %1420 = vst [vmem:[%s1940_s3 + $0x18] sm:$0xff] %v1276_v27   ;;  %1436 = vst [vmem:[%s1940_s3 + $0x98] sm:$0xff] %v1356_v28   ;;  %v458_v33 = vadd.f32 %v1506_v31, %v1775_v38  ;;  %v586_v34 = vadd.f32 %v1538_v32, %v1775_v38  ;;  %v449_v35 = vpop.f32.mrb[9].mxu0  ;;  %v577_v36 = vpop.f32.mrb[9].mxu1 }
  0xfb   :  { %1419 = vst [vmem:[%s1940_s3 + $0x10] sm:$0xff] %v1271_v29   ;;  %1435 = vst [vmem:[%s1940_s3 + $0x90] sm:$0xff] %v1351_v30   ;;  %v450_v37 = vadd.f32 %v1775_v38, %v449_v35  ;;  %v578_v39 = vadd.f32 %v1775_v38, %v577_v36  ;;  %v1507_v40 = vpop.f32.mrb[10].mxu0  ;;  %v1539_v41 = vpop.f32.mrb[10].mxu1 }
  0xfc   :  { %v461_v42 = vadd.f32 %v1507_v40, %v1775_v38  ;;  %v589_v43 = vadd.f32 %v1539_v41, %v1775_v38  ;;  %v452_v44 = vpop.f32.mrb[11].mxu0  ;;  %v580_v45 = vpop.f32.mrb[11].mxu1  ;;  %v682_v48 = vmax.f32 %v458_v33, 0.0  ;;  %v714_v49 = vmax.f32 %v586_v34, 0.0 }
  0xfd   :  { %v453_v46 = vadd.f32 %v1775_v38, %v452_v44  ;;  %v581_v47 = vadd.f32 %v1775_v38, %v580_v45  ;;  %v680_v52 = vmax.f32 %v450_v37, 0.0  ;;  %v712_v53 = vmax.f32 %v578_v39, 0.0 }
  0xfe   :  { %v683_v50 = vmax.f32 %v461_v42, 0.0  ;;  %v715_v51 = vmax.f32 %v589_v43, 0.0 }
  0xff   :  { %v681_v54 = vmax.f32 %v453_v46, 0.0  ;;  %v713_v55 = vmax.f32 %v581_v47, 0.0 }
 0x100   :  { %v1286_v56 = vpack.c.bf16 %v683_v50, %v682_v48  ;;  %v1366_v57 = vpack.c.bf16 %v715_v51, %v714_v49 }
 0x101   :  { %v1281_v58 = vpack.c.bf16 %v681_v54, %v680_v52  ;;  %v1361_v59 = vpack.c.bf16 %v713_v55, %v712_v53  ;;  %v1510_v60 = vpop.f32.mrb[12].mxu0  ;;  %v1542_v61 = vpop.f32.mrb[12].mxu1 }
 0x102   :  { %1422 = vst [vmem:[%s1940_s3 + $0x28] sm:$0xff] %v1286_v56   ;;  %1438 = vst [vmem:[%s1940_s3 + $0xa8] sm:$0xff] %v1366_v57   ;;  %v474_v62 = vadd.f32 %v1510_v60, %v1775_v38  ;;  %v602_v63 = vadd.f32 %v1542_v61, %v1775_v38  ;;  %v465_v0 = vpop.f32.mrb[13].mxu0  ;;  %v593_v1 = vpop.f32.mrb[13].mxu1 }
 0x103   :  { %1421 = vst [vmem:[%s1940_s3 + $0x20] sm:$0xff] %v1281_v58   ;;  %1437 = vst [vmem:[%s1940_s3 + $0xa0] sm:$0xff] %v1361_v59   ;;  %v466_v2 = vadd.f32 %v1775_v38, %v465_v0  ;;  %v594_v3 = vadd.f32 %v1775_v38, %v593_v1  ;;  %v1511_v4 = vpop.f32.mrb[14].mxu0  ;;  %v1543_v5 = vpop.f32.mrb[14].mxu1 }
 0x104   :  { %v477_v6 = vadd.f32 %v1511_v4, %v1775_v38  ;;  %v605_v7 = vadd.f32 %v1543_v5, %v1775_v38  ;;  %v468_v8 = vpop.f32.mrb[15].mxu0  ;;  %v596_v9 = vpop.f32.mrb[15].mxu1  ;;  %v686_v12 = vmax.f32 %v474_v62, 0.0  ;;  %v718_v13 = vmax.f32 %v602_v63, 0.0 }
 0x105   :  { %v469_v10 = vadd.f32 %v1775_v38, %v468_v8  ;;  %v597_v11 = vadd.f32 %v1775_v38, %v596_v9  ;;  %v684_v16 = vmax.f32 %v466_v2, 0.0  ;;  %v716_v17 = vmax.f32 %v594_v3, 0.0 }
 0x106   :  { %v687_v14 = vmax.f32 %v477_v6, 0.0  ;;  %v719_v15 = vmax.f32 %v605_v7, 0.0 }
 0x107   :  { %v685_v18 = vmax.f32 %v469_v10, 0.0  ;;  %v717_v19 = vmax.f32 %v597_v11, 0.0 }
 0x108   :  { %v1296_v20 = vpack.c.bf16 %v687_v14, %v686_v12  ;;  %v1376_v21 = vpack.c.bf16 %v719_v15, %v718_v13 }
 0x109   :  { %v1291_v22 = vpack.c.bf16 %v685_v18, %v684_v16  ;;  %v1371_v23 = vpack.c.bf16 %v717_v19, %v716_v17  ;;  %v1514_v24 = vpop.f32.mrb[16].mxu0  ;;  %v1546_v25 = vpop.f32.mrb[16].mxu1 }
 0x10a   :  { %1424 = vst [vmem:[%s1940_s3 + $0x38] sm:$0xff] %v1296_v20   ;;  %1440 = vst [vmem:[%s1940_s3 + $0xb8] sm:$0xff] %v1376_v21   ;;  %v490_v26 = vadd.f32 %v1514_v24, %v1775_v38  ;;  %v618_v27 = vadd.f32 %v1546_v25, %v1775_v38  ;;  %v481_v28 = vpop.f32.mrb[17].mxu0  ;;  %v609_v29 = vpop.f32.mrb[17].mxu1 }
 0x10b   :  { %1423 = vst [vmem:[%s1940_s3 + $0x30] sm:$0xff] %v1291_v22   ;;  %1439 = vst [vmem:[%s1940_s3 + $0xb0] sm:$0xff] %v1371_v23   ;;  %v482_v30 = vadd.f32 %v1775_v38, %v481_v28  ;;  %v610_v31 = vadd.f32 %v1775_v38, %v609_v29  ;;  %v1515_v32 = vpop.f32.mrb[18].mxu0  ;;  %v1547_v33 = vpop.f32.mrb[18].mxu1 }
 0x10c   :  { %v493_v34 = vadd.f32 %v1515_v32, %v1775_v38  ;;  %v621_v35 = vadd.f32 %v1547_v33, %v1775_v38  ;;  %v484_v36 = vpop.f32.mrb[19].mxu0  ;;  %v612_v37 = vpop.f32.mrb[19].mxu1  ;;  %v690_v41 = vmax.f32 %v490_v26, 0.0  ;;  %v722_v42 = vmax.f32 %v618_v27, 0.0 }
 0x10d   :  { %v485_v39 = vadd.f32 %v1775_v38, %v484_v36  ;;  %v613_v40 = vadd.f32 %v1775_v38, %v612_v37  ;;  %v688_v45 = vmax.f32 %v482_v30, 0.0  ;;  %v720_v46 = vmax.f32 %v610_v31, 0.0 }
 0x10e   :  { %v691_v43 = vmax.f32 %v493_v34, 0.0  ;;  %v723_v44 = vmax.f32 %v621_v35, 0.0 }
 0x10f   :  { %v689_v47 = vmax.f32 %v485_v39, 0.0  ;;  %v721_v48 = vmax.f32 %v613_v40, 0.0 }
 0x110   :  { %v1306_v49 = vpack.c.bf16 %v691_v43, %v690_v41  ;;  %v1386_v50 = vpack.c.bf16 %v723_v44, %v722_v42 }
 0x111   :  { %v1301_v51 = vpack.c.bf16 %v689_v47, %v688_v45  ;;  %v1381_v52 = vpack.c.bf16 %v721_v48, %v720_v46  ;;  %v1518_v53 = vpop.f32.mrb[20].mxu0  ;;  %v1550_v54 = vpop.f32.mrb[20].mxu1 }
 0x112   :  { %1426 = vst [vmem:[%s1940_s3 + $0x48] sm:$0xff] %v1306_v49   ;;  %1442 = vst [vmem:[%s1940_s3 + $0xc8] sm:$0xff] %v1386_v50   ;;  %v506_v55 = vadd.f32 %v1518_v53, %v1775_v38  ;;  %v634_v56 = vadd.f32 %v1550_v54, %v1775_v38  ;;  %v497_v57 = vpop.f32.mrb[21].mxu0  ;;  %v625_v58 = vpop.f32.mrb[21].mxu1 }
 0x113   :  { %1425 = vst [vmem:[%s1940_s3 + $0x40] sm:$0xff] %v1301_v51   ;;  %1441 = vst [vmem:[%s1940_s3 + $0xc0] sm:$0xff] %v1381_v52   ;;  %v498_v59 = vadd.f32 %v1775_v38, %v497_v57  ;;  %v626_v60 = vadd.f32 %v1775_v38, %v625_v58  ;;  %v1519_v61 = vpop.f32.mrb[22].mxu0  ;;  %v1551_v62 = vpop.f32.mrb[22].mxu1 }
 0x114   :  { %v509_v63 = vadd.f32 %v1519_v61, %v1775_v38  ;;  %v637_v0 = vadd.f32 %v1551_v62, %v1775_v38  ;;  %v500_v1 = vpop.f32.mrb[23].mxu0  ;;  %v628_v2 = vpop.f32.mrb[23].mxu1  ;;  %v694_v5 = vmax.f32 %v506_v55, 0.0  ;;  %v726_v6 = vmax.f32 %v634_v56, 0.0 }
 0x115   :  { %v501_v3 = vadd.f32 %v1775_v38, %v500_v1  ;;  %v629_v4 = vadd.f32 %v1775_v38, %v628_v2  ;;  %v692_v9 = vmax.f32 %v498_v59, 0.0  ;;  %v724_v10 = vmax.f32 %v626_v60, 0.0 }
 0x116   :  { %v695_v7 = vmax.f32 %v509_v63, 0.0  ;;  %v727_v8 = vmax.f32 %v637_v0, 0.0 }
 0x117   :  { %v693_v11 = vmax.f32 %v501_v3, 0.0  ;;  %v725_v12 = vmax.f32 %v629_v4, 0.0 }
 0x118   :  { %v1316_v13 = vpack.c.bf16 %v695_v7, %v694_v5  ;;  %v1396_v14 = vpack.c.bf16 %v727_v8, %v726_v6 }
 0x119   :  { %v1311_v15 = vpack.c.bf16 %v693_v11, %v692_v9  ;;  %v1391_v16 = vpack.c.bf16 %v725_v12, %v724_v10  ;;  %v1522_v17 = vpop.f32.mrb[24].mxu0  ;;  %v1554_v18 = vpop.f32.mrb[24].mxu1 }
 0x11a   :  { %1428 = vst [vmem:[%s1940_s3 + $0x58] sm:$0xff] %v1316_v13   ;;  %1444 = vst [vmem:[%s1940_s3 + $0xd8] sm:$0xff] %v1396_v14   ;;  %v522_v19 = vadd.f32 %v1522_v17, %v1775_v38  ;;  %v650_v20 = vadd.f32 %v1554_v18, %v1775_v38  ;;  %v513_v21 = vpop.f32.mrb[25].mxu0  ;;  %v641_v22 = vpop.f32.mrb[25].mxu1 }
 0x11b   :  { %1427 = vst [vmem:[%s1940_s3 + $0x50] sm:$0xff] %v1311_v15   ;;  %1443 = vst [vmem:[%s1940_s3 + $0xd0] sm:$0xff] %v1391_v16   ;;  %v514_v23 = vadd.f32 %v1775_v38, %v513_v21  ;;  %v642_v24 = vadd.f32 %v1775_v38, %v641_v22  ;;  %v1523_v25 = vpop.f32.mrb[26].mxu0  ;;  %v1555_v26 = vpop.f32.mrb[26].mxu1 }
 0x11c   :  { %v525_v27 = vadd.f32 %v1523_v25, %v1775_v38  ;;  %v653_v28 = vadd.f32 %v1555_v26, %v1775_v38  ;;  %v516_v29 = vpop.f32.mrb[27].mxu0  ;;  %v644_v30 = vpop.f32.mrb[27].mxu1  ;;  %v698_v33 = vmax.f32 %v522_v19, 0.0  ;;  %v730_v34 = vmax.f32 %v650_v20, 0.0 }
 0x11d   :  { %v517_v31 = vadd.f32 %v1775_v38, %v516_v29  ;;  %v645_v32 = vadd.f32 %v1775_v38, %v644_v30  ;;  %v696_v37 = vmax.f32 %v514_v23, 0.0  ;;  %v728_v39 = vmax.f32 %v642_v24, 0.0 }
 0x11e   :  { %v699_v35 = vmax.f32 %v525_v27, 0.0  ;;  %v731_v36 = vmax.f32 %v653_v28, 0.0 }
 0x11f   :  { %v697_v40 = vmax.f32 %v517_v31, 0.0  ;;  %v729_v41 = vmax.f32 %v645_v32, 0.0 }
 0x120   :  { %v1326_v42 = vpack.c.bf16 %v699_v35, %v698_v33  ;;  %v1406_v43 = vpack.c.bf16 %v731_v36, %v730_v34 }
 0x121   :  { %v1321_v44 = vpack.c.bf16 %v697_v40, %v696_v37  ;;  %v1401_v45 = vpack.c.bf16 %v729_v41, %v728_v39  ;;  %v1526_v46 = vpop.f32.mrb[28].mxu0  ;;  %v1558_v47 = vpop.f32.mrb[28].mxu1 }
 0x122   :  { %1430 = vst [vmem:[%s1940_s3 + $0x68] sm:$0xff] %v1326_v42   ;;  %1446 = vst [vmem:[%s1940_s3 + $0xe8] sm:$0xff] %v1406_v43   ;;  %v538_v48 = vadd.f32 %v1526_v46, %v1775_v38  ;;  %v666_v49 = vadd.f32 %v1558_v47, %v1775_v38  ;;  %v529_v50 = vpop.f32.mrb[29].mxu0  ;;  %v657_v51 = vpop.f32.mrb[29].mxu1 }
 0x123   :  { %1429 = vst [vmem:[%s1940_s3 + $0x60] sm:$0xff] %v1321_v44   ;;  %1445 = vst [vmem:[%s1940_s3 + $0xe0] sm:$0xff] %v1401_v45   ;;  %v530_v52 = vadd.f32 %v1775_v38, %v529_v50  ;;  %v658_v53 = vadd.f32 %v1775_v38, %v657_v51  ;;  %v1527_v54 = vpop.f32.mrb[30].mxu0  ;;  %v1559_v55 = vpop.f32.mrb[30].mxu1 }
 0x124   :  { %v541_v56 = vadd.f32 %v1527_v54, %v1775_v38  ;;  %v669_v57 = vadd.f32 %v1559_v55, %v1775_v38  ;;  %v532_v58 = vpop.f32.mrb[31].mxu0  ;;  %v660_v59 = vpop.f32.mrb[31].mxu1  ;;  %v702_v62 = vmax.f32 %v538_v48, 0.0  ;;  %v734_v63 = vmax.f32 %v666_v49, 0.0 }
 0x125   :  { %v533_v60 = vadd.f32 %v1775_v38, %v532_v58  ;;  %v661_v61 = vadd.f32 %v1775_v38, %v660_v59  ;;  %v700_v2 = vmax.f32 %v530_v52, 0.0  ;;  %v732_v3 = vmax.f32 %v658_v53, 0.0 }
 0x126   :  { %v703_v0 = vmax.f32 %v541_v56, 0.0  ;;  %v735_v1 = vmax.f32 %v669_v57, 0.0 }
 0x127   :  { %v701_v4 = vmax.f32 %v533_v60, 0.0  ;;  %v733_v5 = vmax.f32 %v661_v61, 0.0 }
 0x128   :  { %v1336_v6 = vpack.c.bf16 %v703_v0, %v702_v62  ;;  %v1416_v7 = vpack.c.bf16 %v735_v1, %v734_v63 }
 0x129   :  { %v1331_v8 = vpack.c.bf16 %v701_v4, %v700_v2  ;;  %v1411_v9 = vpack.c.bf16 %v733_v5, %v732_v3 }
 0x12a   :  { %1432 = vst [vmem:[%s1940_s3 + $0x78] sm:$0xff] %v1336_v6   ;;  %1448 = vst [vmem:[%s1940_s3 + $0xf8] sm:$0xff] %v1416_v7  }
 0x12b   :  { %1431 = vst [vmem:[%s1940_s3 + $0x70] sm:$0xff] %v1331_v8   ;;  %1447 = vst [vmem:[%s1940_s3 + $0xf0] sm:$0xff] %v1411_v9  }

// kernel: resnet_features.28
= control target key start
LH: loop header
LB: loop body
LE: loop exit
PB: predicated region body
PF: predicated region fallthrough
CT: control target
= control target key end

     0   :  { %vm344_vm0 = vcmask 1043456   ;;  %vm247_vm1 = vcmask 64512   ;;  %s1796_s1 = inlined_call_operand.vmem [shape: bf16[8,128], index: 1, kind: input, shape index: {}]   ;;  %s1797_s0 = inlined_call_operand.vmem [shape: bf16[512,8], index: 0, kind: input, shape index: {}]   ;;  %s1798_s2 = inlined_call_operand.vmem [shape: f32[1,128], index: 2, kind: input, shape index: {}]   ;;  %s1799_s3 = inlined_call_operand.vmem [shape: bf16[512,128], index: 3, kind: output, shape index: {}]  }
   0x1   :  { %v79_v0 = vld [vmem:[%s1796_s1] sm:$0xf]  ;;  %v1450_v4 = vld [vmem:[%s1797_s0 + $0x8] sm:$0xff]   ;;  %v1452_v6 = vld [vmem:[%s1797_s0 + $0x10] sm:$0xff]  }
   0x2   :  { %1446 = vmatprep.subr.msk.bf16.mxu0 %vm344_vm0, %v79_v0  ;;  %1447 = vmatprep.subr.msk.bf16.mxu1 %vm344_vm0, %v79_v0  ;;  %v346_v1 = vsel %vm344_vm0, %v79_v0, 0  ;;  %v1448_v2 = vld [vmem:[%s1797_s0] sm:$0xff]   ;;  %v1451_v5 = vld [vmem:[%s1797_s0 + $0x88] sm:$0xff]   ;;  %v1453_v7 = vld [vmem:[%s1797_s0 + $0x90] sm:$0xff]  }
   0x3   :  { %1379 = vmatpush3.bf16.msra.mxu0 %v346_v1  ;;  %1445 = vmatpush3.bf16.msra.mxu1 %v346_v1  ;;  %v1449_v3 = vld [vmem:[%s1797_s0 + $0x80] sm:$0xff]   ;;  %v1454_v8 = vld [vmem:[%s1797_s0 + $0x18] sm:$0xff]   ;;  %v1458_v12 = vld [vmem:[%s1797_s0 + $0x28] sm:$0xff]  }
   0x4   :  { %1380 = vmatprep.mubr.msk.bf16.mxu0 %vm247_vm1, %v1448_v2  ;;  %1412 = vmatprep.mubr.msk.bf16.mxu1 %vm247_vm1, %v1449_v3  ;;  %v1455_v9 = vld [vmem:[%s1797_s0 + $0x98] sm:$0xff]   ;;  %v1456_v10 = vld [vmem:[%s1797_s0 + $0x20] sm:$0xff]   ;;  %v1459_v13 = vld [vmem:[%s1797_s0 + $0xa8] sm:$0xff]  }
   0x5   :  { %v1457_v11 = vld [vmem:[%s1797_s0 + $0xa0] sm:$0xff]   ;;  %v1460_v14 = vld [vmem:[%s1797_s0 + $0x30] sm:$0xff]   ;;  %v1462_v16 = vld [vmem:[%s1797_s0 + $0x38] sm:$0xff]  }
   0x6   :  { %1381 = vmatmul.mubr.msk.bf16.vlgmr.msra.gmra.mrb[0].mxu0 %vm247_vm1, %v1450_v4  ;;  %1413 = vmatmul.mubr.msk.bf16.vlgmr.msra.gmra.mrb[0].mxu1 %vm247_vm1, %v1451_v5  ;;  %v1461_v15 = vld [vmem:[%s1797_s0 + $0xb0] sm:$0xff]   ;;  %v1463_v17 = vld [vmem:[%s1797_s0 + $0xb8] sm:$0xff]   ;;  %v1464_v18 = vld [vmem:[%s1797_s0 + $0x40] sm:$0xff]  }
   0x7   :  { %1384 = vmatprep.mubr.msk.bf16.mxu0 %vm247_vm1, %v1452_v6  ;;  %1416 = vmatprep.mubr.msk.bf16.mxu1 %vm247_vm1, %v1453_v7  ;;  %v1465_v19 = vld [vmem:[%s1797_s0 + $0xc0] sm:$0xff]   ;;  %v1466_v20 = vld [vmem:[%s1797_s0 + $0x48] sm:$0xff]   ;;  %v1468_v22 = vld [vmem:[%s1797_s0 + $0x50] sm:$0xff]  }
   0x8   :  { %v1467_v21 = vld [vmem:[%s1797_s0 + $0xc8] sm:$0xff]   ;;  %v1469_v23 = vld [vmem:[%s1797_s0 + $0xd0] sm:$0xff]   ;;  %v1470_v24 = vld [vmem:[%s1797_s0 + $0x58] sm:$0xff]  }
   0x9   :  { %v1471_v25 = vld [vmem:[%s1797_s0 + $0xd8] sm:$0xff]   ;;  %v1472_v26 = vld [vmem:[%s1797_s0 + $0x60] sm:$0xff]   ;;  %v1474_v28 = vld [vmem:[%s1797_s0 + $0x68] sm:$0xff]  }
   0xa   :  { %v1473_v27 = vld [vmem:[%s1797_s0 + $0xe0] sm:$0xff]   ;;  %v1475_v29 = vld [vmem:[%s1797_s0 + $0xe8] sm:$0xff]   ;;  %v1476_v30 = vld [vmem:[%s1797_s0 + $0x70] sm:$0xff]  }
   0xb   :  { %v1477_v31 = vld [vmem:[%s1797_s0 + $0xf0] sm:$0xff]   ;;  %v1478_v32 = vld [vmem:[%s1797_s0 + $0x78] sm:$0xff]   ;;  %v1634_v35 = vld [vmem:[%s1798_s2] ss:$0 sm:$0xff] }
   0xc   :  { %v1479_v33 = vld [vmem:[%s1797_s0 + $0xf8] sm:$0xff]  }
   0xe   :  { %1385 = vmatmul.mubr.msk.bf16.gmra.mrb[4].mxu0 %vm247_vm1, %v1454_v8  ;;  %1417 = vmatmul.mubr.msk.bf16.gmra.mrb[4].mxu1 %vm247_vm1, %v1455_v9 }
   0xf   :  { %1388 = vmatprep.mubr.msk.bf16.mxu0 %vm247_vm1, %v1456_v10  ;;  %1420 = vmatprep.mubr.msk.bf16.mxu1 %vm247_vm1, %v1457_v11 }
  0x16   :  { %1389 = vmatmul.mubr.msk.bf16.gmra.mrb[8].mxu0 %vm247_vm1, %v1458_v12  ;;  %1421 = vmatmul.mubr.msk.bf16.gmra.mrb[8].mxu1 %vm247_vm1, %v1459_v13 }
  0x17   :  { %1392 = vmatprep.mubr.msk.bf16.mxu0 %vm247_vm1, %v1460_v14  ;;  %1424 = vmatprep.mubr.msk.bf16.mxu1 %vm247_vm1, %v1461_v15 }
  0x1e   :  { %1393 = vmatmul.mubr.msk.bf16.gmra.mrb[12].mxu0 %vm247_vm1, %v1462_v16  ;;  %1425 = vmatmul.mubr.msk.bf16.gmra.mrb[12].mxu1 %vm247_vm1, %v1463_v17 }
  0x1f   :  { %1396 = vmatprep.mubr.msk.bf16.mxu0 %vm247_vm1, %v1464_v18  ;;  %1428 = vmatprep.mubr.msk.bf16.mxu1 %vm247_vm1, %v1465_v19 }
  0x26   :  { %1397 = vmatmul.mubr.msk.bf16.gmra.mrb[16].mxu0 %vm247_vm1, %v1466_v20  ;;  %1429 = vmatmul.mubr.msk.bf16.gmra.mrb[16].mxu1 %vm247_vm1, %v1467_v21 }
  0x27   :  { %1400 = vmatprep.mubr.msk.bf16.mxu0 %vm247_vm1, %v1468_v22  ;;  %1432 = vmatprep.mubr.msk.bf16.mxu1 %vm247_vm1, %v1469_v23 }
  0x2e   :  { %1401 = vmatmul.mubr.msk.bf16.gmra.mrb[20].mxu0 %vm247_vm1, %v1470_v24  ;;  %1433 = vmatmul.mubr.msk.bf16.gmra.mrb[20].mxu1 %vm247_vm1, %v1471_v25 }
  0x2f   :  { %1404 = vmatprep.mubr.msk.bf16.mxu0 %vm247_vm1, %v1472_v26  ;;  %1436 = vmatprep.mubr.msk.bf16.mxu1 %vm247_vm1, %v1473_v27 }
  0x36   :  { %1405 = vmatmul.mubr.msk.bf16.gmra.mrb[24].mxu0 %vm247_vm1, %v1474_v28  ;;  %1437 = vmatmul.mubr.msk.bf16.gmra.mrb[24].mxu1 %vm247_vm1, %v1475_v29 }
  0x37   :  { %1408 = vmatprep.mubr.msk.bf16.mxu0 %vm247_vm1, %v1476_v30  ;;  %1440 = vmatprep.mubr.msk.bf16.mxu1 %vm247_vm1, %v1477_v31 }
  0x3e   :  { %1409 = vmatmul.mubr.msk.bf16.gmra.mrb[28].mxu0 %vm247_vm1, %v1478_v32  ;;  %1441 = vmatmul.mubr.msk.bf16.gmra.mrb[28].mxu1 %vm247_vm1, %v1479_v33 }
  0xd9   :  { %v1382_v34 = vpop.f32.mrb[0].mxu0  ;;  %v1414_v36 = vpop.f32.mrb[0].mxu1 }
  0xda   :  { %v382_v37 = vpop.f32.mrb[1].mxu0  ;;  %v510_v38 = vpop.f32.mrb[1].mxu1  ;;  %v391_v40 = vadd.f32 %v1382_v34, %v1634_v35  ;;  %v519_v44 = vadd.f32 %v1414_v36, %v1634_v35 }
  0xdb   :  { %v1383_v39 = vpop.f32.mrb[2].mxu0  ;;  %v1415_v42 = vpop.f32.mrb[2].mxu1  ;;  %v383_v45 = vadd.f32 %v1634_v35, %v382_v37  ;;  %v511_v49 = vadd.f32 %v1634_v35, %v510_v38 }
  0xdc   :  { %v394_v41 = vadd.f32 %v1383_v39, %v1634_v35  ;;  %v385_v43 = vpop.f32.mrb[3].mxu0  ;;  %v522_v46 = vadd.f32 %v1415_v42, %v1634_v35  ;;  %v513_v48 = vpop.f32.mrb[3].mxu1 }
  0xdd   :  { %v386_v47 = vadd.f32 %v1634_v35, %v385_v43  ;;  %v514_v51 = vadd.f32 %v1634_v35, %v513_v48 }
  0xde   :  { %v1162_v50 = vpack.c.bf16 %v394_v41, %v391_v40  ;;  %v1242_v52 = vpack.c.bf16 %v522_v46, %v519_v44 }
  0xdf   :  { %v1157_v53 = vpack.c.bf16 %v386_v47, %v383_v45  ;;  %v1237_v54 = vpack.c.bf16 %v514_v51, %v511_v49 }
  0xe0   :  { %1314 = vst [vmem:[%s1799_s3 + $0x8] sm:$0xff] %v1162_v50   ;;  %1330 = vst [vmem:[%s1799_s3 + $0x88] sm:$0xff] %v1242_v52  }
  0xe1   :  { %1158 = vst [vmem:[%s1799_s3] sm:$0xff] %v1157_v53   ;;  %v1386_v55 = vpop.f32.mrb[4].mxu0  ;;  %1329 = vst [vmem:[%s1799_s3 + $0x80] sm:$0xff] %v1237_v54   ;;  %v1418_v56 = vpop.f32.mrb[4].mxu1 }
  0xe2   :  { %v398_v57 = vpop.f32.mrb[5].mxu0  ;;  %v526_v58 = vpop.f32.mrb[5].mxu1  ;;  %v407_v60 = vadd.f32 %v1386_v55, %v1634_v35  ;;  %v535_v0 = vadd.f32 %v1418_v56, %v1634_v35 }
  0xe3   :  { %v1387_v59 = vpop.f32.mrb[6].mxu0  ;;  %v1419_v62 = vpop.f32.mrb[6].mxu1  ;;  %v399_v1 = vadd.f32 %v1634_v35, %v398_v57  ;;  %v527_v5 = vadd.f32 %v1634_v35, %v526_v58 }
  0xe4   :  { %v410_v61 = vadd.f32 %v1387_v59, %v1634_v35  ;;  %v401_v63 = vpop.f32.mrb[7].mxu0  ;;  %v538_v2 = vadd.f32 %v1419_v62, %v1634_v35  ;;  %v529_v4 = vpop.f32.mrb[7].mxu1 }
  0xe5   :  { %v402_v3 = vadd.f32 %v1634_v35, %v401_v63  ;;  %v530_v7 = vadd.f32 %v1634_v35, %v529_v4 }
  0xe6   :  { %v1172_v6 = vpack.c.bf16 %v410_v61, %v407_v60  ;;  %v1252_v8 = vpack.c.bf16 %v538_v2, %v535_v0 }
  0xe7   :  { %v1167_v9 = vpack.c.bf16 %v402_v3, %v399_v1  ;;  %v1247_v10 = vpack.c.bf16 %v530_v7, %v527_v5 }
  0xe8   :  { %1316 = vst [vmem:[%s1799_s3 + $0x18] sm:$0xff] %v1172_v6   ;;  %1332 = vst [vmem:[%s1799_s3 + $0x98] sm:$0xff] %v1252_v8  }
  0xe9   :  { %1315 = vst [vmem:[%s1799_s3 + $0x10] sm:$0xff] %v1167_v9   ;;  %v1390_v11 = vpop.f32.mrb[8].mxu0  ;;  %1331 = vst [vmem:[%s1799_s3 + $0x90] sm:$0xff] %v1247_v10   ;;  %v1422_v12 = vpop.f32.mrb[8].mxu1 }
  0xea   :  { %v414_v13 = vpop.f32.mrb[9].mxu0  ;;  %v542_v14 = vpop.f32.mrb[9].mxu1  ;;  %v423_v16 = vadd.f32 %v1390_v11, %v1634_v35  ;;  %v551_v20 = vadd.f32 %v1422_v12, %v1634_v35 }
  0xeb   :  { %v1391_v15 = vpop.f32.mrb[10].mxu0  ;;  %v1423_v18 = vpop.f32.mrb[10].mxu1  ;;  %v415_v21 = vadd.f32 %v1634_v35, %v414_v13  ;;  %v543_v25 = vadd.f32 %v1634_v35, %v542_v14 }
  0xec   :  { %v426_v17 = vadd.f32 %v1391_v15, %v1634_v35  ;;  %v417_v19 = vpop.f32.mrb[11].mxu0  ;;  %v554_v22 = vadd.f32 %v1423_v18, %v1634_v35  ;;  %v545_v24 = vpop.f32.mrb[11].mxu1 }
  0xed   :  { %v418_v23 = vadd.f32 %v1634_v35, %v417_v19  ;;  %v546_v27 = vadd.f32 %v1634_v35, %v545_v24 }
  0xee   :  { %v1182_v26 = vpack.c.bf16 %v426_v17, %v423_v16  ;;  %v1262_v28 = vpack.c.bf16 %v554_v22, %v551_v20 }
  0xef   :  { %v1177_v29 = vpack.c.bf16 %v418_v23, %v415_v21  ;;  %v1257_v30 = vpack.c.bf16 %v546_v27, %v543_v25 }
  0xf0   :  { %1318 = vst [vmem:[%s1799_s3 + $0x28] sm:$0xff] %v1182_v26   ;;  %1334 = vst [vmem:[%s1799_s3 + $0xa8] sm:$0xff] %v1262_v28  }
  0xf1   :  { %1317 = vst [vmem:[%s1799_s3 + $0x20] sm:$0xff] %v1177_v29   ;;  %v1394_v31 = vpop.f32.mrb[12].mxu0  ;;  %1333 = vst [vmem:[%s1799_s3 + $0xa0] sm:$0xff] %v1257_v30   ;;  %v1426_v32 = vpop.f32.mrb[12].mxu1 }
  0xf2   :  { %v430_v33 = vpop.f32.mrb[13].mxu0  ;;  %v558_v34 = vpop.f32.mrb[13].mxu1  ;;  %v439_v37 = vadd.f32 %v1394_v31, %v1634_v35  ;;  %v567_v41 = vadd.f32 %v1426_v32, %v1634_v35 }
  0xf3   :  { %v1395_v36 = vpop.f32.mrb[14].mxu0  ;;  %v1427_v39 = vpop.f32.mrb[14].mxu1  ;;  %v431_v42 = vadd.f32 %v1634_v35, %v430_v33  ;;  %v559_v46 = vadd.f32 %v1634_v35, %v558_v34 }
  0xf4   :  { %v442_v38 = vadd.f32 %v1395_v36, %v1634_v35  ;;  %v433_v40 = vpop.f32.mrb[15].mxu0  ;;  %v570_v43 = vadd.f32 %v1427_v39, %v1634_v35  ;;  %v561_v45 = vpop.f32.mrb[15].mxu1 }
  0xf5   :  { %v434_v44 = vadd.f32 %v1634_v35, %v433_v40  ;;  %v562_v48 = vadd.f32 %v1634_v35, %v561_v45 }
  0xf6   :  { %v1192_v47 = vpack.c.bf16 %v442_v38, %v439_v37  ;;  %v1272_v49 = vpack.c.bf16 %v570_v43, %v567_v41 }
  0xf7   :  { %v1187_v50 = vpack.c.bf16 %v434_v44, %v431_v42  ;;  %v1267_v51 = vpack.c.bf16 %v562_v48, %v559_v46 }
  0xf8   :  { %1320 = vst [vmem:[%s1799_s3 + $0x38] sm:$0xff] %v1192_v47   ;;  %1336 = vst [vmem:[%s1799_s3 + $0xb8] sm:$0xff] %v1272_v49  }
  0xf9   :  { %1319 = vst [vmem:[%s1799_s3 + $0x30] sm:$0xff] %v1187_v50   ;;  %v1398_v52 = vpop.f32.mrb[16].mxu0  ;;  %1335 = vst [vmem:[%s1799_s3 + $0xb0] sm:$0xff] %v1267_v51   ;;  %v1430_v53 = vpop.f32.mrb[16].mxu1 }
  0xfa   :  { %v446_v54 = vpop.f32.mrb[17].mxu0  ;;  %v574_v55 = vpop.f32.mrb[17].mxu1  ;;  %v455_v57 = vadd.f32 %v1398_v52, %v1634_v35  ;;  %v583_v61 = vadd.f32 %v1430_v53, %v1634_v35 }
  0xfb   :  { %v1399_v56 = vpop.f32.mrb[18].mxu0  ;;  %v1431_v59 = vpop.f32.mrb[18].mxu1  ;;  %v447_v62 = vadd.f32 %v1634_v35, %v446_v54  ;;  %v575_v2 = vadd.f32 %v1634_v35, %v574_v55 }
  0xfc   :  { %v458_v58 = vadd.f32 %v1399_v56, %v1634_v35  ;;  %v449_v60 = vpop.f32.mrb[19].mxu0  ;;  %v586_v63 = vadd.f32 %v1431_v59, %v1634_v35  ;;  %v577_v1 = vpop.f32.mrb[19].mxu1 }
  0xfd   :  { %v450_v0 = vadd.f32 %v1634_v35, %v449_v60  ;;  %v578_v4 = vadd.f32 %v1634_v35, %v577_v1 }
  0xfe   :  { %v1202_v3 = vpack.c.bf16 %v458_v58, %v455_v57  ;;  %v1282_v5 = vpack.c.bf16 %v586_v63, %v583_v61 }
  0xff   :  { %v1197_v6 = vpack.c.bf16 %v450_v0, %v447_v62  ;;  %v1277_v7 = vpack.c.bf16 %v578_v4, %v575_v2 }
 0x100   :  { %1322 = vst [vmem:[%s1799_s3 + $0x48] sm:$0xff] %v1202_v3   ;;  %1338 = vst [vmem:[%s1799_s3 + $0xc8] sm:$0xff] %v1282_v5  }
 0x101   :  { %1321 = vst [vmem:[%s1799_s3 + $0x40] sm:$0xff] %v1197_v6   ;;  %v1402_v8 = vpop.f32.mrb[20].mxu0  ;;  %1337 = vst [vmem:[%s1799_s3 + $0xc0] sm:$0xff] %v1277_v7   ;;  %v1434_v9 = vpop.f32.mrb[20].mxu1 }
 0x102   :  { %v462_v10 = vpop.f32.mrb[21].mxu0  ;;  %v590_v11 = vpop.f32.mrb[21].mxu1  ;;  %v471_v13 = vadd.f32 %v1402_v8, %v1634_v35  ;;  %v599_v17 = vadd.f32 %v1434_v9, %v1634_v35 }
 0x103   :  { %v1403_v12 = vpop.f32.mrb[22].mxu0  ;;  %v1435_v15 = vpop.f32.mrb[22].mxu1  ;;  %v463_v18 = vadd.f32 %v1634_v35, %v462_v10  ;;  %v591_v22 = vadd.f32 %v1634_v35, %v590_v11 }
 0x104   :  { %v474_v14 = vadd.f32 %v1403_v12, %v1634_v35  ;;  %v465_v16 = vpop.f32.mrb[23].mxu0  ;;  %v602_v19 = vadd.f32 %v1435_v15, %v1634_v35  ;;  %v593_v21 = vpop.f32.mrb[23].mxu1 }
 0x105   :  { %v466_v20 = vadd.f32 %v1634_v35, %v465_v16  ;;  %v594_v24 = vadd.f32 %v1634_v35, %v593_v21 }
 0x106   :  { %v1212_v23 = vpack.c.bf16 %v474_v14, %v471_v13  ;;  %v1292_v25 = vpack.c.bf16 %v602_v19, %v599_v17 }
 0x107   :  { %v1207_v26 = vpack.c.bf16 %v466_v20, %v463_v18  ;;  %v1287_v27 = vpack.c.bf16 %v594_v24, %v591_v22 }
 0x108   :  { %1324 = vst [vmem:[%s1799_s3 + $0x58] sm:$0xff] %v1212_v23   ;;  %1340 = vst [vmem:[%s1799_s3 + $0xd8] sm:$0xff] %v1292_v25  }
 0x109   :  { %1323 = vst [vmem:[%s1799_s3 + $0x50] sm:$0xff] %v1207_v26   ;;  %v1406_v28 = vpop.f32.mrb[24].mxu0  ;;  %1339 = vst [vmem:[%s1799_s3 + $0xd0] sm:$0xff] %v1287_v27   ;;  %v1438_v29 = vpop.f32.mrb[24].mxu1 }
 0x10a   :  { %v478_v30 = vpop.f32.mrb[25].mxu0  ;;  %v606_v31 = vpop.f32.mrb[25].mxu1  ;;  %v487_v33 = vadd.f32 %v1406_v28, %v1634_v35  ;;  %v615_v38 = vadd.f32 %v1438_v29, %v1634_v35 }
 0x10b   :  { %v1407_v32 = vpop.f32.mrb[26].mxu0  ;;  %v1439_v36 = vpop.f32.mrb[26].mxu1  ;;  %v479_v39 = vadd.f32 %v1634_v35, %v478_v30  ;;  %v607_v43 = vadd.f32 %v1634_v35, %v606_v31 }
 0x10c   :  { %v490_v34 = vadd.f32 %v1407_v32, %v1634_v35  ;;  %v481_v37 = vpop.f32.mrb[27].mxu0  ;;  %v618_v40 = vadd.f32 %v1439_v36, %v1634_v35  ;;  %v609_v42 = vpop.f32.mrb[27].mxu1 }
 0x10d   :  { %v482_v41 = vadd.f32 %v1634_v35, %v481_v37  ;;  %v610_v45 = vadd.f32 %v1634_v35, %v609_v42 }
 0x10e   :  { %v1222_v44 = vpack.c.bf16 %v490_v34, %v487_v33  ;;  %v1302_v46 = vpack.c.bf16 %v618_v40, %v615_v38 }
 0x10f   :  { %v1217_v47 = vpack.c.bf16 %v482_v41, %v479_v39  ;;  %v1297_v48 = vpack.c.bf16 %v610_v45, %v607_v43 }
 0x110   :  { %1326 = vst [vmem:[%s1799_s3 + $0x68] sm:$0xff] %v1222_v44   ;;  %1342 = vst [vmem:[%s1799_s3 + $0xe8] sm:$0xff] %v1302_v46  }
 0x111   :  { %1325 = vst [vmem:[%s1799_s3 + $0x60] sm:$0xff] %v1217_v47   ;;  %v1410_v49 = vpop.f32.mrb[28].mxu0  ;;  %1341 = vst [vmem:[%s1799_s3 + $0xe0] sm:$0xff] %v1297_v48   ;;  %v1442_v50 = vpop.f32.mrb[28].mxu1 }
 0x112   :  { %v494_v51 = vpop.f32.mrb[29].mxu0  ;;  %v622_v52 = vpop.f32.mrb[29].mxu1  ;;  %v503_v54 = vadd.f32 %v1410_v49, %v1634_v35  ;;  %v631_v58 = vadd.f32 %v1442_v50, %v1634_v35 }
 0x113   :  { %v1411_v53 = vpop.f32.mrb[30].mxu0  ;;  %v1443_v56 = vpop.f32.mrb[30].mxu1  ;;  %v495_v59 = vadd.f32 %v1634_v35, %v494_v51  ;;  %v623_v63 = vadd.f32 %v1634_v35, %v622_v52 }
 0x114   :  { %v506_v55 = vadd.f32 %v1411_v53, %v1634_v35  ;;  %v497_v57 = vpop.f32.mrb[31].mxu0  ;;  %v634_v60 = vadd.f32 %v1443_v56, %v1634_v35  ;;  %v625_v62 = vpop.f32.mrb[31].mxu1 }
 0x115   :  { %v498_v61 = vadd.f32 %v1634_v35, %v497_v57  ;;  %v626_v1 = vadd.f32 %v1634_v35, %v625_v62 }
 0x116   :  { %v1232_v0 = vpack.c.bf16 %v506_v55, %v503_v54  ;;  %v1312_v2 = vpack.c.bf16 %v634_v60, %v631_v58 }
 0x117   :  { %v1227_v3 = vpack.c.bf16 %v498_v61, %v495_v59  ;;  %v1307_v4 = vpack.c.bf16 %v626_v1, %v623_v63 }
 0x118   :  { %1328 = vst [vmem:[%s1799_s3 + $0x78] sm:$0xff] %v1232_v0   ;;  %1344 = vst [vmem:[%s1799_s3 + $0xf8] sm:$0xff] %v1312_v2  }
 0x119   :  { %1327 = vst [vmem:[%s1799_s3 + $0x70] sm:$0xff] %v1227_v3   ;;  %1343 = vst [vmem:[%s1799_s3 + $0xf0] sm:$0xff] %v1307_v4  }

// kernel: resnet_features.30
= control target key start
LH: loop header
LB: loop body
LE: loop exit
PB: predicated region body
PF: predicated region fallthrough
CT: control target
= control target key end

     0   :  { %v2123_v0 = vmov 0   ;;  %vm449_vm0 = vcmask 130048   ;;  %s2661_s1 = inlined_call_operand.vmem [shape: bf16[144,128], index: 1, kind: input, shape index: {}]   ;;  %s2662_s0 = inlined_call_operand.vmem [shape: bf16[512,144], index: 0, kind: input, shape index: {}]   ;;  %s2663_s3 = inlined_call_operand.vmem [shape: bf16[512,128], index: 3, kind: input, shape index: {}]   ;;  %s2664_s2 = inlined_call_operand.vmem [shape: f32[1,128], index: 2, kind: input, shape index: {}]   ;;  %s2665_s4 = inlined_call_operand.vmem [shape: bf16[512,128], index: 4, kind: output, shape index: {}]  }
   0x1   :  { %546 = vmatprep.subr.bf16.mxu0 %v2123_v0  ;;  %1999 = vmatprep.subr.bf16.mxu1 %v2123_v0  ;;  %v2018_v1 = vld [vmem:[%s2661_s1] sm:$0xff]   ;;  %v2019_v2 = vld [vmem:[%s2661_s1 + $0x8] sm:$0xff]   ;;  %v2020_v3 = vld [vmem:[%s2661_s1 + $0x10] sm:$0xff]  }
   0x2   :  { %547 = vmatpush1.bf16.msra.mxu0 %v2018_v1  ;;  %2008 = vmatpush1.bf16.msra.mxu1 %v2018_v1  ;;  %v2021_v4 = vld [vmem:[%s2661_s1 + $0x18] sm:$0xff]   ;;  %v2029_v5 = vld [vmem:[%s2662_s0 + $0x4] ss:$8 sps:$4 sm:$0xff]   ;;  %v2024_v9 = vld [vmem:[%s2661_s1 + $0x30] sm:$0xff]  }
   0x3   :  { %548 = vmatprep.subr.bf16.mxu0 %v2123_v0  ;;  %2000 = vmatprep.subr.bf16.mxu1 %v2123_v0  ;;  %v2032_v6 = vld [vmem:[%s2662_s0 + $0x104] ss:$8 sps:$4 sm:$0xff]   ;;  %v2025_v10 = vld [vmem:[%s2661_s1 + $0x38] sm:$0xff]   ;;  %v2027_v12 = vld [vmem:[%s2662_s0] ss:$8 sps:$4 sm:$0xff]  }
   0x4   :  { %1489 = vmatprep.mubr.msk.bf16.mxu0 %vm449_vm0, %v2029_v5  ;;  %1505 = vmatprep.mubr.msk.bf16.mxu1 %vm449_vm0, %v2032_v6  ;;  %v2022_v7 = vld [vmem:[%s2661_s1 + $0x20] sm:$0xff]   ;;  %v2023_v8 = vld [vmem:[%s2661_s1 + $0x28] sm:$0xff]   ;;  %v2033_v14 = vld [vmem:[%s2662_s0 + $0x14] ss:$8 sps:$4 sm:$0xff]  }
   0x5   :  { %v2026_v11 = vld [vmem:[%s2661_s1 + $0x40] sm:$0xff]   ;;  %v2035_v15 = vld [vmem:[%s2662_s0 + $0x114] ss:$8 sps:$4 sm:$0xff]   ;;  %v2037_v16 = vld [vmem:[%s2662_s0 + $0x10] ss:$8 sps:$4 sm:$0xff]  }
   0x6   :  { %549 = vmatpush1.bf16.msra.mxu0 %v2019_v2  ;;  %2009 = vmatpush1.bf16.msra.mxu1 %v2019_v2  ;;  %v2030_v13 = vld [vmem:[%s2662_s0 + $0x100] ss:$8 sps:$4 sm:$0xff]   ;;  %v2038_v17 = vld [vmem:[%s2662_s0 + $0x110] ss:$8 sps:$4 sm:$0xff]   ;;  %v2039_v18 = vld [vmem:[%s2662_s0 + $0x24] ss:$8 sps:$4 sm:$0xff]  }
   0x7   :  { %550 = vmatprep.subr.bf16.mxu0 %v2123_v0  ;;  %2001 = vmatprep.subr.bf16.mxu1 %v2123_v0  ;;  %v2041_v19 = vld [vmem:[%s2662_s0 + $0x124] ss:$8 sps:$4 sm:$0xff]   ;;  %v2043_v20 = vld [vmem:[%s2662_s0 + $0x20] ss:$8 sps:$4 sm:$0xff]   ;;  %v2045_v22 = vld [vmem:[%s2662_s0 + $0x34] ss:$8 sps:$4 sm:$0xff]  }
   0x8   :  { %v2044_v21 = vld [vmem:[%s2662_s0 + $0x120] ss:$8 sps:$4 sm:$0xff]   ;;  %v2047_v23 = vld [vmem:[%s2662_s0 + $0x134] ss:$8 sps:$4 sm:$0xff]   ;;  %v2049_v24 = vld [vmem:[%s2662_s0 + $0x30] ss:$8 sps:$4 sm:$0xff]  }
   0x9   :  { %v2050_v25 = vld [vmem:[%s2662_s0 + $0x130] ss:$8 sps:$4 sm:$0xff]   ;;  %v2051_v26 = vld [vmem:[%s2662_s0 + $0x44] ss:$8 sps:$4 sm:$0xff]   ;;  %v2055_v28 = vld [vmem:[%s2662_s0 + $0x40] ss:$8 sps:$4 sm:$0xff]  }
   0xa   :  { %551 = vmatpush1.bf16.msra.mxu0 %v2020_v3  ;;  %2010 = vmatpush1.bf16.msra.mxu1 %v2020_v3  ;;  %v2053_v27 = vld [vmem:[%s2662_s0 + $0x144] ss:$8 sps:$4 sm:$0xff]   ;;  %v2056_v29 = vld [vmem:[%s2662_s0 + $0x140] ss:$8 sps:$4 sm:$0xff]   ;;  %v2057_v30 = vld [vmem:[%s2662_s0 + $0x54] ss:$8 sps:$4 sm:$0xff]  }
   0xb   :  { %552 = vmatprep.subr.bf16.mxu0 %v2123_v0  ;;  %2002 = vmatprep.subr.bf16.mxu1 %v2123_v0  ;;  %v2059_v31 = vld [vmem:[%s2662_s0 + $0x154] ss:$8 sps:$4 sm:$0xff]   ;;  %v2061_v32 = vld [vmem:[%s2662_s0 + $0x50] ss:$8 sps:$4 sm:$0xff]   ;;  %v2063_v34 = vld [vmem:[%s2662_s0 + $0x64] ss:$8 sps:$4 sm:$0xff]  }
   0xc   :  { %v2062_v33 = vld [vmem:[%s2662_s0 + $0x150] ss:$8 sps:$4 sm:$0xff]   ;;  %v2065_v35 = vld [vmem:[%s2662_s0 + $0x164] ss:$8 sps:$4 sm:$0xff]   ;;  %v2067_v36 = vld [vmem:[%s2662_s0 + $0x60] ss:$8 sps:$4 sm:$0xff]  }
   0xd   :  { %v2068_v37 = vld [vmem:[%s2662_s0 + $0x160] ss:$8 sps:$4 sm:$0xff]   ;;  %v2069_v38 = vld [vmem:[%s2662_s0 + $0x74] ss:$8 sps:$4 sm:$0xff]   ;;  %v2073_v40 = vld [vmem:[%s2662_s0 + $0x70] ss:$8 sps:$4 sm:$0xff]  }
   0xe   :  { %553 = vmatpush1.bf16.msra.mxu0 %v2021_v4  ;;  %2011 = vmatpush1.bf16.msra.mxu1 %v2021_v4  ;;  %v2071_v39 = vld [vmem:[%s2662_s0 + $0x174] ss:$8 sps:$4 sm:$0xff]   ;;  %v2074_v41 = vld [vmem:[%s2662_s0 + $0x170] ss:$8 sps:$4 sm:$0xff]   ;;  %v2075_v42 = vld [vmem:[%s2662_s0 + $0x84] ss:$8 sps:$4 sm:$0xff]  }
   0xf   :  { %554 = vmatprep.subr.bf16.mxu0 %v2123_v0  ;;  %2003 = vmatprep.subr.bf16.mxu1 %v2123_v0  ;;  %v2077_v43 = vld [vmem:[%s2662_s0 + $0x184] ss:$8 sps:$4 sm:$0xff]   ;;  %v2079_v44 = vld [vmem:[%s2662_s0 + $0x80] ss:$8 sps:$4 sm:$0xff]   ;;  %v2081_v46 = vld [vmem:[%s2662_s0 + $0x94] ss:$8 sps:$4 sm:$0xff]  }
  0x10   :  { %v2080_v45 = vld [vmem:[%s2662_s0 + $0x180] ss:$8 sps:$4 sm:$0xff]   ;;  %v2083_v47 = vld [vmem:[%s2662_s0 + $0x194] ss:$8 sps:$4 sm:$0xff]   ;;  %v2085_v48 = vld [vmem:[%s2662_s0 + $0x90] ss:$8 sps:$4 sm:$0xff]  }
  0x11   :  { %v2086_v49 = vld [vmem:[%s2662_s0 + $0x190] ss:$8 sps:$4 sm:$0xff]   ;;  %v2087_v50 = vld [vmem:[%s2662_s0 + $0xa4] ss:$8 sps:$4 sm:$0xff]   ;;  %v2091_v52 = vld [vmem:[%s2662_s0 + $0xa0] ss:$8 sps:$4 sm:$0xff]  }
  0x12   :  { %555 = vmatpush1.bf16.msra.mxu0 %v2022_v7  ;;  %2012 = vmatpush1.bf16.msra.mxu1 %v2022_v7  ;;  %v2089_v51 = vld [vmem:[%s2662_s0 + $0x1a4] ss:$8 sps:$4 sm:$0xff]   ;;  %v2092_v53 = vld [vmem:[%s2662_s0 + $0x1a0] ss:$8 sps:$4 sm:$0xff]   ;;  %v2093_v54 = vld [vmem:[%s2662_s0 + $0xb4] ss:$8 sps:$4 sm:$0xff]  }
  0x13   :  { %556 = vmatprep.subr.bf16.mxu0 %v2123_v0  ;;  %2004 = vmatprep.subr.bf16.mxu1 %v2123_v0  ;;  %v2095_v55 = vld [vmem:[%s2662_s0 + $0x1b4] ss:$8 sps:$4 sm:$0xff]   ;;  %v2097_v56 = vld [vmem:[%s2662_s0 + $0xb0] ss:$8 sps:$4 sm:$0xff]   ;;  %v2099_v58 = vld [vmem:[%s2662_s0 + $0xc4] ss:$8 sps:$4 sm:$0xff]  }
  0x14   :  { %v2098_v57 = vld [vmem:[%s2662_s0 + $0x1b0] ss:$8 sps:$4 sm:$0xff]   ;;  %v2101_v59 = vld [vmem:[%s2662_s0 + $0x1c4] ss:$8 sps:$4 sm:$0xff]   ;;  %v2103_v60 = vld [vmem:[%s2662_s0 + $0xc0] ss:$8 sps:$4 sm:$0xff]  }
  0x15   :  { %v2104_v61 = vld [vmem:[%s2662_s0 + $0x1c0] ss:$8 sps:$4 sm:$0xff]   ;;  %v2105_v62 = vld [vmem:[%s2662_s0 + $0xd4] ss:$8 sps:$4 sm:$0xff]   ;;  %v2110_v1 = vld [vmem:[%s2662_s0 + $0x1d0] ss:$8 sps:$4 sm:$0xff]  }
  0x16   :  { %557 = vmatpush1.bf16.msra.mxu0 %v2023_v8  ;;  %2013 = vmatpush1.bf16.msra.mxu1 %v2023_v8  ;;  %v2107_v63 = vld [vmem:[%s2662_s0 + $0x1d4] ss:$8 sps:$4 sm:$0xff]   ;;  %v2111_v2 = vld [vmem:[%s2662_s0 + $0xe4] ss:$8 sps:$4 sm:$0xff]   ;;  %v2115_v4 = vld [vmem:[%s2662_s0 + $0xe0] ss:$8 sps:$4 sm:$0xff]  }
  0x17   :  { %558 = vmatprep.subr.bf16.mxu0 %v2123_v0  ;;  %2005 = vmatprep.subr.bf16.mxu1 %v2123_v0  ;;  %v2113_v3 = vld [vmem:[%s2662_s0 + $0x1e4] ss:$8 sps:$4 sm:$0xff]   ;;  %v2116_v5 = vld [vmem:[%s2662_s0 + $0x1e0] ss:$8 sps:$4 sm:$0xff]   ;;  %v2117_v6 = vld [vmem:[%s2662_s0 + $0xf4] ss:$8 sps:$4 sm:$0xff]  }
  0x18   :  { %v2119_v7 = vld [vmem:[%s2662_s0 + $0x1f4] ss:$8 sps:$4 sm:$0xff]   ;;  %v2121_v8 = vld [vmem:[%s2662_s0 + $0xf0] ss:$8 sps:$4 sm:$0xff]  }
  0x1a   :  { %559 = vmatpush1.bf16.msra.mxu0 %v2024_v9  ;;  %2014 = vmatpush1.bf16.msra.mxu1 %v2024_v9  ;;  %v2122_v9 = vld [vmem:[%s2662_s0 + $0x1f0] ss:$8 sps:$4 sm:$0xff]  }
  0x1b   :  { %560 = vmatprep.subr.bf16.mxu0 %v2123_v0  ;;  %2006 = vmatprep.subr.bf16.mxu1 %v2123_v0 }
  0x1e   :  { %561 = vmatpush1.bf16.msra.mxu0 %v2025_v10  ;;  %2015 = vmatpush1.bf16.msra.mxu1 %v2025_v10  ;;  %v1650_v10 = vld [vmem:[%s2663_s3] sm:$0xff]  }
  0x1f   :  { %562 = vmatprep.subr.bf16.mxu0 %v2123_v0  ;;  %2007 = vmatprep.subr.bf16.mxu1 %v2123_v0  ;;  %v2109_v0 = vld [vmem:[%s2662_s0 + $0xd0] ss:$8 sps:$4 sm:$0xff]  }
  0x22   :  { %563 = vmatpush1.bf16.msra.mxu0 %v2026_v11  ;;  %2016 = vmatpush1.bf16.msra.mxu1 %v2026_v11  ;;  %v1952_v11 = vld [vmem:[%s2663_s3 + $0x80] sm:$0xff]  }
  0x25   :  { %579 = vmatmul.mubr.bf16.vlgmr.msra.gmra.mrb[0].mxu0 %v2027_v12  ;;  %707 = vmatmul.mubr.bf16.vlgmr.msra.gmra.mrb[0].mxu1 %v2030_v13  ;;  %v2409_v12 = vld [vmem:[%s2664_s2] ss:$0 sm:$0xff]  ;;  %v1651_v13 = vunpack.c.l.bf16 %v1650_v10 }
  0x26   :  { %1490 = vmatprep.mubr.msk.bf16.mxu0 %vm449_vm0, %v2033_v14  ;;  %1506 = vmatprep.mubr.msk.bf16.mxu1 %vm449_vm0, %v2035_v15  ;;  %v1715_v14 = vunpack.c.l.bf16 %v1952_v11 }
  0x2d   :  { %587 = vmatmul.mubr.bf16.gmra.mrb[4].mxu0 %v2037_v16  ;;  %715 = vmatmul.mubr.bf16.gmra.mrb[4].mxu1 %v2038_v17 }
  0x2e   :  { %1491 = vmatprep.mubr.msk.bf16.mxu0 %vm449_vm0, %v2039_v18  ;;  %1507 = vmatprep.mubr.msk.bf16.mxu1 %vm449_vm0, %v2041_v19 }
  0x35   :  { %595 = vmatmul.mubr.bf16.gmra.mrb[8].mxu0 %v2043_v20  ;;  %723 = vmatmul.mubr.bf16.gmra.mrb[8].mxu1 %v2044_v21  ;;  %v1652_v21 = vunpack.c.h.bf16 %v1650_v10 }
  0x36   :  { %1492 = vmatprep.mubr.msk.bf16.mxu0 %vm449_vm0, %v2045_v22  ;;  %1508 = vmatprep.mubr.msk.bf16.mxu1 %vm449_vm0, %v2047_v23  ;;  %v1716_v22 = vunpack.c.h.bf16 %v1952_v11 }
  0x3d   :  { %603 = vmatmul.mubr.bf16.gmra.mrb[12].mxu0 %v2049_v24  ;;  %731 = vmatmul.mubr.bf16.gmra.mrb[12].mxu1 %v2050_v25 }
  0x3e   :  { %1493 = vmatprep.mubr.msk.bf16.mxu0 %vm449_vm0, %v2051_v26  ;;  %1509 = vmatprep.mubr.msk.bf16.mxu1 %vm449_vm0, %v2053_v27 }
  0x45   :  { %611 = vmatmul.mubr.bf16.gmra.mrb[16].mxu0 %v2055_v28  ;;  %739 = vmatmul.mubr.bf16.gmra.mrb[16].mxu1 %v2056_v29 }
  0x46   :  { %1494 = vmatprep.mubr.msk.bf16.mxu0 %vm449_vm0, %v2057_v30  ;;  %1510 = vmatprep.mubr.msk.bf16.mxu1 %vm449_vm0, %v2059_v31  ;;  %v1937_v31 = vld [vmem:[%s2663_s3 + $0x8] sm:$0xff]  }
  0x4d   :  { %619 = vmatmul.mubr.bf16.gmra.mrb[20].mxu0 %v2061_v32  ;;  %747 = vmatmul.mubr.bf16.gmra.mrb[20].mxu1 %v2062_v33  ;;  %v1953_v32 = vld [vmem:[%s2663_s3 + $0x88] sm:$0xff]  }
  0x4e   :  { %1495 = vmatprep.mubr.msk.bf16.mxu0 %vm449_vm0, %v2063_v34  ;;  %1511 = vmatprep.mubr.msk.bf16.mxu1 %vm449_vm0, %v2065_v35  ;;  %v1655_v35 = vunpack.c.l.bf16 %v1937_v31 }
  0x55   :  { %627 = vmatmul.mubr.bf16.gmra.mrb[24].mxu0 %v2067_v36  ;;  %755 = vmatmul.mubr.bf16.gmra.mrb[24].mxu1 %v2068_v37  ;;  %v1719_v36 = vunpack.c.l.bf16 %v1953_v32 }
  0x56   :  { %1496 = vmatprep.mubr.msk.bf16.mxu0 %vm449_vm0, %v2069_v38  ;;  %1512 = vmatprep.mubr.msk.bf16.mxu1 %vm449_vm0, %v2071_v39 }
  0x5d   :  { %635 = vmatmul.mubr.bf16.gmra.mrb[28].mxu0 %v2073_v40  ;;  %763 = vmatmul.mubr.bf16.gmra.mrb[28].mxu1 %v2074_v41 }
  0x5e   :  { %1497 = vmatprep.mubr.msk.bf16.mxu0 %vm449_vm0, %v2075_v42  ;;  %1513 = vmatprep.mubr.msk.bf16.mxu1 %vm449_vm0, %v2077_v43  ;;  %v1656_v43 = vunpack.c.h.bf16 %v1937_v31 }
  0x65   :  { %643 = vmatmul.mubr.bf16.gmra.mrb[32].mxu0 %v2079_v44  ;;  %771 = vmatmul.mubr.bf16.gmra.mrb[32].mxu1 %v2080_v45  ;;  %v1720_v44 = vunpack.c.h.bf16 %v1953_v32 }
  0x66   :  { %1498 = vmatprep.mubr.msk.bf16.mxu0 %vm449_vm0, %v2081_v46  ;;  %1514 = vmatprep.mubr.msk.bf16.mxu1 %vm449_vm0, %v2083_v47 }
  0x6d   :  { %651 = vmatmul.mubr.bf16.gmra.mrb[36].mxu0 %v2085_v48  ;;  %779 = vmatmul.mubr.bf16.gmra.mrb[36].mxu1 %v2086_v49 }
  0x6e   :  { %1499 = vmatprep.mubr.msk.bf16.mxu0 %vm449_vm0, %v2087_v50  ;;  %1515 = vmatprep.mubr.msk.bf16.mxu1 %vm449_vm0, %v2089_v51 }
  0x75   :  { %659 = vmatmul.mubr.bf16.gmra.mrb[40].mxu0 %v2091_v52  ;;  %787 = vmatmul.mubr.bf16.gmra.mrb[40].mxu1 %v2092_v53 }
  0x76   :  { %1500 = vmatprep.mubr.msk.bf16.mxu0 %vm449_vm0, %v2093_v54  ;;  %1516 = vmatprep.mubr.msk.bf16.mxu1 %vm449_vm0, %v2095_v55 }
  0x7d   :  { %667 = vmatmul.mubr.bf16.gmra.mrb[44].mxu0 %v2097_v56  ;;  %795 = vmatmul.mubr.bf16.gmra.mrb[44].mxu1 %v2098_v57 }
  0x7e   :  { %1501 = vmatprep.mubr.msk.bf16.mxu0 %vm449_vm0, %v2099_v58  ;;  %1517 = vmatprep.mubr.msk.bf16.mxu1 %vm449_vm0, %v2101_v59  ;;  %v1938_v59 = vld [vmem:[%s2663_s3 + $0x10] sm:$0xff]  }
  0x85   :  { %675 = vmatmul.mubr.bf16.gmra.mrb[48].mxu0 %v2103_v60  ;;  %803 = vmatmul.mubr.bf16.gmra.mrb[48].mxu1 %v2104_v61  ;;  %v1954_v60 = vld [vmem:[%s2663_s3 + $0x90] sm:$0xff]  }
  0x86   :  { %1502 = vmatprep.mubr.msk.bf16.mxu0 %vm449_vm0, %v2105_v62  ;;  %1518 = vmatprep.mubr.msk.bf16.mxu1 %vm449_vm0, %v2107_v63  ;;  %v1659_v63 = vunpack.c.l.bf16 %v1938_v59 }
  0x8d   :  { %683 = vmatmul.mubr.bf16.gmra.mrb[52].mxu0 %v2109_v0  ;;  %811 = vmatmul.mubr.bf16.gmra.mrb[52].mxu1 %v2110_v1  ;;  %v1723_v0 = vunpack.c.l.bf16 %v1954_v60 }
  0x8e   :  { %1503 = vmatprep.mubr.msk.bf16.mxu0 %vm449_vm0, %v2111_v2  ;;  %1519 = vmatprep.mubr.msk.bf16.mxu1 %vm449_vm0, %v2113_v3 }
  0x95   :  { %691 = vmatmul.mubr.bf16.gmra.mrb[56].mxu0 %v2115_v4  ;;  %819 = vmatmul.mubr.bf16.gmra.mrb[56].mxu1 %v2116_v5 }
  0x96   :  { %1504 = vmatprep.mubr.msk.bf16.mxu0 %vm449_vm0, %v2117_v6  ;;  %1520 = vmatprep.mubr.msk.bf16.mxu1 %vm449_vm0, %v2119_v7  ;;  %v1660_v7 = vunpack.c.h.bf16 %v1938_v59 }
  0x9d   :  { %699 = vmatmul.mubr.bf16.gmra.mrb[60].mxu0 %v2121_v8  ;;  %827 = vmatmul.mubr.bf16.gmra.mrb[60].mxu1 %v2122_v9  ;;  %v1724_v8 = vunpack.c.h.bf16 %v1954_v60 }
  0xf8   :  { %v580_v15 = vpop.f32.mrb[0].mxu0  ;;  %v708_v16 = vpop.f32.mrb[0].mxu1 }
  0xf9   :  { %v581_v17 = vadd.f32 %v2409_v12, %v580_v15  ;;  %v709_v18 = vadd.f32 %v2409_v12, %v708_v16  ;;  %v582_v19 = vpop.f32.mrb[1].mxu0  ;;  %v710_v20 = vpop.f32.mrb[1].mxu1 }
  0xfa   :  { %v583_v23 = vpop.f32.mrb[2].mxu0  ;;  %v711_v24 = vpop.f32.mrb[2].mxu1 }
  0xfb   :  { %v963_v25 = vadd.f32 %v1651_v13, %v581_v17  ;;  %v995_v26 = vadd.f32 %v1715_v14, %v709_v18  ;;  %v584_v27 = vadd.f32 %v2409_v12, %v583_v23  ;;  %v712_v28 = vadd.f32 %v2409_v12, %v711_v24  ;;  %v585_v29 = vpop.f32.mrb[3].mxu0  ;;  %v713_v30 = vpop.f32.mrb[3].mxu1  ;;  %v1939_v24 = vld [vmem:[%s2663_s3 + $0x18] sm:$0xff]  }
  0xfd   :  { %v964_v33 = vadd.f32 %v1652_v21, %v584_v27  ;;  %v996_v34 = vadd.f32 %v1716_v22, %v712_v28  ;;  %v1027_v37 = vmax.f32 %v963_v25, 0.0  ;;  %v1059_v38 = vmax.f32 %v995_v26, 0.0  ;;  %v1955_v25 = vld [vmem:[%s2663_s3 + $0x98] sm:$0xff]  }
  0xfe   :  { %v1663_v28 = vunpack.c.l.bf16 %v1939_v24  ;;  %v1727_v29 = vunpack.c.l.bf16 %v1955_v25 }
  0xff   :  { %v1028_v39 = vmax.f32 %v964_v33, 0.0  ;;  %v1060_v40 = vmax.f32 %v996_v34, 0.0 }
 0x100   :  { %v588_v41 = vpop.f32.mrb[4].mxu0  ;;  %v716_v42 = vpop.f32.mrb[4].mxu1 }
 0x101   :  { %v1780_v45 = vpack.c.bf16 %v1028_v39, %v1027_v37  ;;  %v1860_v46 = vpack.c.bf16 %v1060_v40, %v1059_v38  ;;  %v589_v47 = vadd.f32 %v2409_v12, %v588_v41  ;;  %v717_v48 = vadd.f32 %v2409_v12, %v716_v42  ;;  %v590_v49 = vpop.f32.mrb[5].mxu0  ;;  %v718_v50 = vpop.f32.mrb[5].mxu1 }
 0x102   :  { %v591_v51 = vpop.f32.mrb[6].mxu0  ;;  %v719_v52 = vpop.f32.mrb[6].mxu1  ;;  %v1728_v37 = vunpack.c.h.bf16 %v1955_v25 }
 0x103   :  { %1781 = vst [vmem:[%s2665_s4] sm:$0xff] %v1780_v45   ;;  %1983 = vst [vmem:[%s2665_s4 + $0x80] sm:$0xff] %v1860_v46   ;;  %v965_v53 = vadd.f32 %v1655_v35, %v589_v47  ;;  %v997_v54 = vadd.f32 %v1719_v36, %v717_v48  ;;  %v592_v55 = vadd.f32 %v2409_v12, %v591_v51  ;;  %v593_v57 = vpop.f32.mrb[7].mxu0  ;;  %v721_v58 = vpop.f32.mrb[7].mxu1  ;;  %v1664_v36 = vunpack.c.h.bf16 %v1939_v24 }
 0x104   :  { %v720_v56 = vadd.f32 %v2409_v12, %v719_v52  ;;  %v1940_v52 = vld [vmem:[%s2663_s3 + $0x20] sm:$0xff]  }
 0x105   :  { %v966_v61 = vadd.f32 %v1656_v43, %v592_v55  ;;  %v1029_v1 = vmax.f32 %v965_v53, 0.0  ;;  %v1061_v2 = vmax.f32 %v997_v54, 0.0  ;;  %v1956_v53 = vld [vmem:[%s2663_s3 + $0xa0] sm:$0xff]  }
 0x106   :  { %v998_v62 = vadd.f32 %v1720_v44, %v720_v56  ;;  %v1667_v56 = vunpack.c.l.bf16 %v1940_v52  ;;  %v1731_v57 = vunpack.c.l.bf16 %v1956_v53 }
 0x107   :  { %v1030_v3 = vmax.f32 %v966_v61, 0.0 }
 0x108   :  { %v1062_v4 = vmax.f32 %v998_v62, 0.0  ;;  %v596_v5 = vpop.f32.mrb[8].mxu0  ;;  %v724_v6 = vpop.f32.mrb[8].mxu1 }
 0x109   :  { %v1785_v9 = vpack.c.bf16 %v1030_v3, %v1029_v1  ;;  %v597_v11 = vadd.f32 %v2409_v12, %v596_v5  ;;  %v725_v13 = vadd.f32 %v2409_v12, %v724_v6  ;;  %v598_v14 = vpop.f32.mrb[9].mxu0  ;;  %v726_v15 = vpop.f32.mrb[9].mxu1  ;;  %v1732_v1 = vunpack.c.h.bf16 %v1956_v53 }
 0x10a   :  { %v1865_v10 = vpack.c.bf16 %v1062_v4, %v1061_v2  ;;  %v599_v16 = vpop.f32.mrb[10].mxu0  ;;  %v727_v17 = vpop.f32.mrb[10].mxu1 }
 0x10b   :  { %1968 = vst [vmem:[%s2665_s4 + $0x8] sm:$0xff] %v1785_v9   ;;  %v967_v18 = vadd.f32 %v1659_v63, %v597_v11  ;;  %v999_v19 = vadd.f32 %v1723_v0, %v725_v13  ;;  %v600_v20 = vadd.f32 %v2409_v12, %v599_v16  ;;  %v728_v21 = vadd.f32 %v2409_v12, %v727_v17  ;;  %v601_v22 = vpop.f32.mrb[11].mxu0  ;;  %v729_v23 = vpop.f32.mrb[11].mxu1  ;;  %v1941_v17 = vld [vmem:[%s2663_s3 + $0x28] sm:$0xff]  }
 0x10c   :  { %1984 = vst [vmem:[%s2665_s4 + $0x88] sm:$0xff] %v1865_v10   ;;  %v1668_v0 = vunpack.c.h.bf16 %v1940_v52 }
 0x10d   :  { %v968_v26 = vadd.f32 %v1660_v7, %v600_v20  ;;  %v1000_v27 = vadd.f32 %v1724_v8, %v728_v21  ;;  %v1031_v30 = vmax.f32 %v967_v18, 0.0  ;;  %v1063_v31 = vmax.f32 %v999_v19, 0.0  ;;  %v1957_v18 = vld [vmem:[%s2663_s3 + $0xa8] sm:$0xff]  }
 0x10e   :  { %v1671_v21 = vunpack.c.l.bf16 %v1941_v17  ;;  %v1735_v22 = vunpack.c.l.bf16 %v1957_v18 }
 0x10f   :  { %v1032_v32 = vmax.f32 %v968_v26, 0.0  ;;  %v1064_v33 = vmax.f32 %v1000_v27, 0.0 }
 0x110   :  { %v604_v34 = vpop.f32.mrb[12].mxu0  ;;  %v732_v35 = vpop.f32.mrb[12].mxu1 }
 0x111   :  { %v1790_v38 = vpack.c.bf16 %v1032_v32, %v1031_v30  ;;  %v1870_v39 = vpack.c.bf16 %v1064_v33, %v1063_v31  ;;  %v605_v40 = vadd.f32 %v2409_v12, %v604_v34  ;;  %v733_v41 = vadd.f32 %v2409_v12, %v732_v35  ;;  %v606_v42 = vpop.f32.mrb[13].mxu0  ;;  %v734_v43 = vpop.f32.mrb[13].mxu1 }
 0x112   :  { %v607_v44 = vpop.f32.mrb[14].mxu0  ;;  %v735_v45 = vpop.f32.mrb[14].mxu1  ;;  %v1736_v30 = vunpack.c.h.bf16 %v1957_v18 }
 0x113   :  { %1969 = vst [vmem:[%s2665_s4 + $0x10] sm:$0xff] %v1790_v38   ;;  %1985 = vst [vmem:[%s2665_s4 + $0x90] sm:$0xff] %v1870_v39   ;;  %v969_v46 = vadd.f32 %v1663_v28, %v605_v40  ;;  %v1001_v47 = vadd.f32 %v1727_v29, %v733_v41  ;;  %v608_v48 = vadd.f32 %v2409_v12, %v607_v44  ;;  %v609_v50 = vpop.f32.mrb[15].mxu0  ;;  %v737_v51 = vpop.f32.mrb[15].mxu1  ;;  %v1672_v29 = vunpack.c.h.bf16 %v1941_v17 }
 0x114   :  { %v736_v49 = vadd.f32 %v2409_v12, %v735_v45  ;;  %v1942_v45 = vld [vmem:[%s2663_s3 + $0x30] sm:$0xff]  }
 0x115   :  { %v970_v54 = vadd.f32 %v1664_v36, %v608_v48  ;;  %v1033_v58 = vmax.f32 %v969_v46, 0.0  ;;  %v1065_v59 = vmax.f32 %v1001_v47, 0.0  ;;  %v1958_v46 = vld [vmem:[%s2663_s3 + $0xb0] sm:$0xff]  }
 0x116   :  { %v1002_v55 = vadd.f32 %v1728_v37, %v736_v49  ;;  %v1675_v49 = vunpack.c.l.bf16 %v1942_v45  ;;  %v1739_v50 = vunpack.c.l.bf16 %v1958_v46 }
 0x117   :  { %v1034_v60 = vmax.f32 %v970_v54, 0.0 }
 0x118   :  { %v1066_v61 = vmax.f32 %v1002_v55, 0.0  ;;  %v612_v62 = vpop.f32.mrb[16].mxu0  ;;  %v740_v63 = vpop.f32.mrb[16].mxu1 }
 0x119   :  { %v1795_v2 = vpack.c.bf16 %v1034_v60, %v1033_v58  ;;  %v613_v4 = vadd.f32 %v2409_v12, %v612_v62  ;;  %v741_v5 = vadd.f32 %v2409_v12, %v740_v63  ;;  %v614_v6 = vpop.f32.mrb[17].mxu0  ;;  %v742_v7 = vpop.f32.mrb[17].mxu1  ;;  %v1740_v58 = vunpack.c.h.bf16 %v1958_v46 }
 0x11a   :  { %v1875_v3 = vpack.c.bf16 %v1066_v61, %v1065_v59  ;;  %v615_v8 = vpop.f32.mrb[18].mxu0  ;;  %v743_v9 = vpop.f32.mrb[18].mxu1 }
 0x11b   :  { %1970 = vst [vmem:[%s2665_s4 + $0x18] sm:$0xff] %v1795_v2   ;;  %v971_v10 = vadd.f32 %v1667_v56, %v613_v4  ;;  %v1003_v11 = vadd.f32 %v1731_v57, %v741_v5  ;;  %v616_v13 = vadd.f32 %v2409_v12, %v615_v8  ;;  %v744_v14 = vadd.f32 %v2409_v12, %v743_v9  ;;  %v617_v15 = vpop.f32.mrb[19].mxu0  ;;  %v745_v16 = vpop.f32.mrb[19].mxu1  ;;  %v1943_v9 = vld [vmem:[%s2663_s3 + $0x38] sm:$0xff]  }
 0x11c   :  { %1986 = vst [vmem:[%s2665_s4 + $0x98] sm:$0xff] %v1875_v3   ;;  %v1676_v57 = vunpack.c.h.bf16 %v1942_v45 }
 0x11d   :  { %v972_v19 = vadd.f32 %v1668_v0, %v616_v13  ;;  %v1004_v20 = vadd.f32 %v1732_v1, %v744_v14  ;;  %v1035_v23 = vmax.f32 %v971_v10, 0.0  ;;  %v1067_v24 = vmax.f32 %v1003_v11, 0.0  ;;  %v1959_v10 = vld [vmem:[%s2663_s3 + $0xb8] sm:$0xff]  }
 0x11e   :  { %v1679_v14 = vunpack.c.l.bf16 %v1943_v9  ;;  %v1743_v15 = vunpack.c.l.bf16 %v1959_v10 }
 0x11f   :  { %v1036_v25 = vmax.f32 %v972_v19, 0.0  ;;  %v1068_v26 = vmax.f32 %v1004_v20, 0.0 }
 0x120   :  { %v620_v27 = vpop.f32.mrb[20].mxu0  ;;  %v748_v28 = vpop.f32.mrb[20].mxu1 }
 0x121   :  { %v1800_v31 = vpack.c.bf16 %v1036_v25, %v1035_v23  ;;  %v1880_v32 = vpack.c.bf16 %v1068_v26, %v1067_v24  ;;  %v621_v33 = vadd.f32 %v2409_v12, %v620_v27  ;;  %v749_v34 = vadd.f32 %v2409_v12, %v748_v28  ;;  %v622_v35 = vpop.f32.mrb[21].mxu0  ;;  %v750_v36 = vpop.f32.mrb[21].mxu1 }
 0x122   :  { %v623_v37 = vpop.f32.mrb[22].mxu0  ;;  %v751_v38 = vpop.f32.mrb[22].mxu1  ;;  %v1744_v23 = vunpack.c.h.bf16 %v1959_v10 }
 0x123   :  { %1971 = vst [vmem:[%s2665_s4 + $0x20] sm:$0xff] %v1800_v31   ;;  %1987 = vst [vmem:[%s2665_s4 + $0xa0] sm:$0xff] %v1880_v32   ;;  %v973_v39 = vadd.f32 %v1671_v21, %v621_v33  ;;  %v1005_v40 = vadd.f32 %v1735_v22, %v749_v34  ;;  %v624_v41 = vadd.f32 %v2409_v12, %v623_v37  ;;  %v625_v43 = vpop.f32.mrb[23].mxu0  ;;  %v753_v44 = vpop.f32.mrb[23].mxu1  ;;  %v1680_v22 = vunpack.c.h.bf16 %v1943_v9 }
 0x124   :  { %v752_v42 = vadd.f32 %v2409_v12, %v751_v38  ;;  %v1944_v38 = vld [vmem:[%s2663_s3 + $0x40] sm:$0xff]  }
 0x125   :  { %v974_v47 = vadd.f32 %v1672_v29, %v624_v41  ;;  %v1037_v51 = vmax.f32 %v973_v39, 0.0  ;;  %v1069_v52 = vmax.f32 %v1005_v40, 0.0  ;;  %v1960_v39 = vld [vmem:[%s2663_s3 + $0xc0] sm:$0xff]  }
 0x126   :  { %v1006_v48 = vadd.f32 %v1736_v30, %v752_v42  ;;  %v1683_v42 = vunpack.c.l.bf16 %v1944_v38  ;;  %v1747_v43 = vunpack.c.l.bf16 %v1960_v39 }
 0x127   :  { %v1038_v53 = vmax.f32 %v974_v47, 0.0 }
 0x128   :  { %v1070_v54 = vmax.f32 %v1006_v48, 0.0  ;;  %v628_v55 = vpop.f32.mrb[24].mxu0  ;;  %v756_v56 = vpop.f32.mrb[24].mxu1 }
 0x129   :  { %v1805_v59 = vpack.c.bf16 %v1038_v53, %v1037_v51  ;;  %v629_v61 = vadd.f32 %v2409_v12, %v628_v55  ;;  %v757_v62 = vadd.f32 %v2409_v12, %v756_v56  ;;  %v630_v63 = vpop.f32.mrb[25].mxu0  ;;  %v758_v0 = vpop.f32.mrb[25].mxu1  ;;  %v1748_v51 = vunpack.c.h.bf16 %v1960_v39 }
 0x12a   :  { %v1885_v60 = vpack.c.bf16 %v1070_v54, %v1069_v52  ;;  %v631_v1 = vpop.f32.mrb[26].mxu0  ;;  %v759_v2 = vpop.f32.mrb[26].mxu1 }
 0x12b   :  { %1972 = vst [vmem:[%s2665_s4 + $0x28] sm:$0xff] %v1805_v59   ;;  %v975_v3 = vadd.f32 %v1675_v49, %v629_v61  ;;  %v1007_v4 = vadd.f32 %v1739_v50, %v757_v62  ;;  %v632_v5 = vadd.f32 %v2409_v12, %v631_v1  ;;  %v760_v6 = vadd.f32 %v2409_v12, %v759_v2  ;;  %v633_v7 = vpop.f32.mrb[27].mxu0  ;;  %v761_v8 = vpop.f32.mrb[27].mxu1  ;;  %v1945_v2 = vld [vmem:[%s2663_s3 + $0x48] sm:$0xff]  }
 0x12c   :  { %1988 = vst [vmem:[%s2665_s4 + $0xa8] sm:$0xff] %v1885_v60   ;;  %v1684_v50 = vunpack.c.h.bf16 %v1944_v38 }
 0x12d   :  { %v976_v11 = vadd.f32 %v1676_v57, %v632_v5  ;;  %v1008_v13 = vadd.f32 %v1740_v58, %v760_v6  ;;  %v1039_v16 = vmax.f32 %v975_v3, 0.0  ;;  %v1071_v17 = vmax.f32 %v1007_v4, 0.0  ;;  %v1961_v3 = vld [vmem:[%s2663_s3 + $0xc8] sm:$0xff]  }
 0x12e   :  { %v1687_v6 = vunpack.c.l.bf16 %v1945_v2  ;;  %v1751_v7 = vunpack.c.l.bf16 %v1961_v3 }
 0x12f   :  { %v1040_v18 = vmax.f32 %v976_v11, 0.0  ;;  %v1072_v19 = vmax.f32 %v1008_v13, 0.0 }
 0x130   :  { %v636_v20 = vpop.f32.mrb[28].mxu0  ;;  %v764_v21 = vpop.f32.mrb[28].mxu1 }
 0x131   :  { %v1810_v24 = vpack.c.bf16 %v1040_v18, %v1039_v16  ;;  %v1890_v25 = vpack.c.bf16 %v1072_v19, %v1071_v17  ;;  %v637_v26 = vadd.f32 %v2409_v12, %v636_v20  ;;  %v765_v27 = vadd.f32 %v2409_v12, %v764_v21  ;;  %v638_v28 = vpop.f32.mrb[29].mxu0  ;;  %v766_v29 = vpop.f32.mrb[29].mxu1 }
 0x132   :  { %v639_v30 = vpop.f32.mrb[30].mxu0  ;;  %v767_v31 = vpop.f32.mrb[30].mxu1  ;;  %v1752_v16 = vunpack.c.h.bf16 %v1961_v3 }
 0x133   :  { %1973 = vst [vmem:[%s2665_s4 + $0x30] sm:$0xff] %v1810_v24   ;;  %1989 = vst [vmem:[%s2665_s4 + $0xb0] sm:$0xff] %v1890_v25   ;;  %v977_v32 = vadd.f32 %v1679_v14, %v637_v26  ;;  %v1009_v33 = vadd.f32 %v1743_v15, %v765_v27  ;;  %v640_v34 = vadd.f32 %v2409_v12, %v639_v30  ;;  %v641_v36 = vpop.f32.mrb[31].mxu0  ;;  %v769_v37 = vpop.f32.mrb[31].mxu1  ;;  %v1688_v15 = vunpack.c.h.bf16 %v1945_v2 }
 0x134   :  { %v768_v35 = vadd.f32 %v2409_v12, %v767_v31  ;;  %v1946_v31 = vld [vmem:[%s2663_s3 + $0x50] sm:$0xff]  }
 0x135   :  { %v978_v40 = vadd.f32 %v1680_v22, %v640_v34  ;;  %v1041_v44 = vmax.f32 %v977_v32, 0.0  ;;  %v1073_v45 = vmax.f32 %v1009_v33, 0.0  ;;  %v1962_v32 = vld [vmem:[%s2663_s3 + $0xd0] sm:$0xff]  }
 0x136   :  { %v1010_v41 = vadd.f32 %v1744_v23, %v768_v35  ;;  %v1691_v35 = vunpack.c.l.bf16 %v1946_v31  ;;  %v1755_v36 = vunpack.c.l.bf16 %v1962_v32 }
 0x137   :  { %v1042_v46 = vmax.f32 %v978_v40, 0.0 }
 0x138   :  { %v1074_v47 = vmax.f32 %v1010_v41, 0.0  ;;  %v644_v48 = vpop.f32.mrb[32].mxu0  ;;  %v772_v49 = vpop.f32.mrb[32].mxu1 }
 0x139   :  { %v1815_v52 = vpack.c.bf16 %v1042_v46, %v1041_v44  ;;  %v645_v54 = vadd.f32 %v2409_v12, %v644_v48  ;;  %v773_v55 = vadd.f32 %v2409_v12, %v772_v49  ;;  %v646_v56 = vpop.f32.mrb[33].mxu0  ;;  %v774_v57 = vpop.f32.mrb[33].mxu1  ;;  %v1756_v44 = vunpack.c.h.bf16 %v1962_v32 }
 0x13a   :  { %v1895_v53 = vpack.c.bf16 %v1074_v47, %v1073_v45  ;;  %v647_v58 = vpop.f32.mrb[34].mxu0  ;;  %v775_v59 = vpop.f32.mrb[34].mxu1 }
 0x13b   :  { %1974 = vst [vmem:[%s2665_s4 + $0x38] sm:$0xff] %v1815_v52   ;;  %v979_v60 = vadd.f32 %v1683_v42, %v645_v54  ;;  %v1011_v61 = vadd.f32 %v1747_v43, %v773_v55  ;;  %v648_v62 = vadd.f32 %v2409_v12, %v647_v58  ;;  %v776_v63 = vadd.f32 %v2409_v12, %v775_v59  ;;  %v649_v0 = vpop.f32.mrb[35].mxu0  ;;  %v777_v1 = vpop.f32.mrb[35].mxu1  ;;  %v1947_v59 = vld [vmem:[%s2663_s3 + $0x58] sm:$0xff]  }
 0x13c   :  { %1990 = vst [vmem:[%s2665_s4 + $0xb8] sm:$0xff] %v1895_v53   ;;  %v1692_v43 = vunpack.c.h.bf16 %v1946_v31 }
 0x13d   :  { %v980_v4 = vadd.f32 %v1684_v50, %v648_v62  ;;  %v1012_v5 = vadd.f32 %v1748_v51, %v776_v63  ;;  %v1043_v8 = vmax.f32 %v979_v60, 0.0  ;;  %v1075_v9 = vmax.f32 %v1011_v61, 0.0  ;;  %v1963_v60 = vld [vmem:[%s2663_s3 + $0xd8] sm:$0xff]  }
 0x13e   :  { %v1695_v63 = vunpack.c.l.bf16 %v1947_v59  ;;  %v1759_v0 = vunpack.c.l.bf16 %v1963_v60 }
 0x13f   :  { %v1044_v10 = vmax.f32 %v980_v4, 0.0  ;;  %v1076_v11 = vmax.f32 %v1012_v5, 0.0 }
 0x140   :  { %v652_v13 = vpop.f32.mrb[36].mxu0  ;;  %v780_v14 = vpop.f32.mrb[36].mxu1 }
 0x141   :  { %v1820_v17 = vpack.c.bf16 %v1044_v10, %v1043_v8  ;;  %v1900_v18 = vpack.c.bf16 %v1076_v11, %v1075_v9  ;;  %v653_v19 = vadd.f32 %v2409_v12, %v652_v13  ;;  %v781_v20 = vadd.f32 %v2409_v12, %v780_v14  ;;  %v654_v21 = vpop.f32.mrb[37].mxu0  ;;  %v782_v22 = vpop.f32.mrb[37].mxu1 }
 0x142   :  { %v655_v23 = vpop.f32.mrb[38].mxu0  ;;  %v783_v24 = vpop.f32.mrb[38].mxu1  ;;  %v1760_v8 = vunpack.c.h.bf16 %v1963_v60 }
 0x143   :  { %1975 = vst [vmem:[%s2665_s4 + $0x40] sm:$0xff] %v1820_v17   ;;  %1991 = vst [vmem:[%s2665_s4 + $0xc0] sm:$0xff] %v1900_v18   ;;  %v981_v25 = vadd.f32 %v1687_v6, %v653_v19  ;;  %v1013_v26 = vadd.f32 %v1751_v7, %v781_v20  ;;  %v656_v27 = vadd.f32 %v2409_v12, %v655_v23  ;;  %v657_v29 = vpop.f32.mrb[39].mxu0  ;;  %v785_v30 = vpop.f32.mrb[39].mxu1  ;;  %v1696_v7 = vunpack.c.h.bf16 %v1947_v59 }
 0x144   :  { %v784_v28 = vadd.f32 %v2409_v12, %v783_v24  ;;  %v1948_v24 = vld [vmem:[%s2663_s3 + $0x60] sm:$0xff]  }
 0x145   :  { %v982_v33 = vadd.f32 %v1688_v15, %v656_v27  ;;  %v1045_v37 = vmax.f32 %v981_v25, 0.0  ;;  %v1077_v38 = vmax.f32 %v1013_v26, 0.0  ;;  %v1964_v25 = vld [vmem:[%s2663_s3 + $0xe0] sm:$0xff]  }
 0x146   :  { %v1014_v34 = vadd.f32 %v1752_v16, %v784_v28  ;;  %v1699_v28 = vunpack.c.l.bf16 %v1948_v24  ;;  %v1763_v29 = vunpack.c.l.bf16 %v1964_v25 }
 0x147   :  { %v1046_v39 = vmax.f32 %v982_v33, 0.0 }
 0x148   :  { %v1078_v40 = vmax.f32 %v1014_v34, 0.0  ;;  %v660_v41 = vpop.f32.mrb[40].mxu0  ;;  %v788_v42 = vpop.f32.mrb[40].mxu1 }
 0x149   :  { %v1825_v45 = vpack.c.bf16 %v1046_v39, %v1045_v37  ;;  %v661_v47 = vadd.f32 %v2409_v12, %v660_v41  ;;  %v789_v48 = vadd.f32 %v2409_v12, %v788_v42  ;;  %v662_v49 = vpop.f32.mrb[41].mxu0  ;;  %v790_v50 = vpop.f32.mrb[41].mxu1  ;;  %v1764_v37 = vunpack.c.h.bf16 %v1964_v25 }
 0x14a   :  { %v1905_v46 = vpack.c.bf16 %v1078_v40, %v1077_v38  ;;  %v663_v51 = vpop.f32.mrb[42].mxu0  ;;  %v791_v52 = vpop.f32.mrb[42].mxu1 }
 0x14b   :  { %1976 = vst [vmem:[%s2665_s4 + $0x48] sm:$0xff] %v1825_v45   ;;  %v983_v53 = vadd.f32 %v1691_v35, %v661_v47  ;;  %v1015_v54 = vadd.f32 %v1755_v36, %v789_v48  ;;  %v664_v55 = vadd.f32 %v2409_v12, %v663_v51  ;;  %v792_v56 = vadd.f32 %v2409_v12, %v791_v52  ;;  %v665_v57 = vpop.f32.mrb[43].mxu0  ;;  %v793_v58 = vpop.f32.mrb[43].mxu1  ;;  %v1949_v52 = vld [vmem:[%s2663_s3 + $0x68] sm:$0xff]  }
 0x14c   :  { %1992 = vst [vmem:[%s2665_s4 + $0xc8] sm:$0xff] %v1905_v46   ;;  %v1700_v36 = vunpack.c.h.bf16 %v1948_v24 }
 0x14d   :  { %v984_v61 = vadd.f32 %v1692_v43, %v664_v55  ;;  %v1016_v62 = vadd.f32 %v1756_v44, %v792_v56  ;;  %v1047_v1 = vmax.f32 %v983_v53, 0.0  ;;  %v1079_v2 = vmax.f32 %v1015_v54, 0.0  ;;  %v1965_v53 = vld [vmem:[%s2663_s3 + $0xe8] sm:$0xff]  }
 0x14e   :  { %v1703_v56 = vunpack.c.l.bf16 %v1949_v52  ;;  %v1767_v57 = vunpack.c.l.bf16 %v1965_v53 }
 0x14f   :  { %v1048_v3 = vmax.f32 %v984_v61, 0.0  ;;  %v1080_v4 = vmax.f32 %v1016_v62, 0.0 }
 0x150   :  { %v668_v5 = vpop.f32.mrb[44].mxu0  ;;  %v796_v6 = vpop.f32.mrb[44].mxu1 }
 0x151   :  { %v1830_v9 = vpack.c.bf16 %v1048_v3, %v1047_v1  ;;  %v1910_v10 = vpack.c.bf16 %v1080_v4, %v1079_v2  ;;  %v669_v11 = vadd.f32 %v2409_v12, %v668_v5  ;;  %v797_v13 = vadd.f32 %v2409_v12, %v796_v6  ;;  %v670_v14 = vpop.f32.mrb[45].mxu0  ;;  %v798_v15 = vpop.f32.mrb[45].mxu1 }
 0x152   :  { %v671_v16 = vpop.f32.mrb[46].mxu0  ;;  %v799_v17 = vpop.f32.mrb[46].mxu1  ;;  %v1768_v1 = vunpack.c.h.bf16 %v1965_v53 }
 0x153   :  { %1977 = vst [vmem:[%s2665_s4 + $0x50] sm:$0xff] %v1830_v9   ;;  %1993 = vst [vmem:[%s2665_s4 + $0xd0] sm:$0xff] %v1910_v10   ;;  %v985_v18 = vadd.f32 %v1695_v63, %v669_v11  ;;  %v1017_v19 = vadd.f32 %v1759_v0, %v797_v13  ;;  %v672_v20 = vadd.f32 %v2409_v12, %v671_v16  ;;  %v673_v22 = vpop.f32.mrb[47].mxu0  ;;  %v801_v23 = vpop.f32.mrb[47].mxu1  ;;  %v1704_v0 = vunpack.c.h.bf16 %v1949_v52 }
 0x154   :  { %v800_v21 = vadd.f32 %v2409_v12, %v799_v17  ;;  %v1950_v17 = vld [vmem:[%s2663_s3 + $0x70] sm:$0xff]  }
 0x155   :  { %v986_v26 = vadd.f32 %v1696_v7, %v672_v20  ;;  %v1049_v30 = vmax.f32 %v985_v18, 0.0  ;;  %v1081_v31 = vmax.f32 %v1017_v19, 0.0  ;;  %v1966_v18 = vld [vmem:[%s2663_s3 + $0xf0] sm:$0xff]  }
 0x156   :  { %v1018_v27 = vadd.f32 %v1760_v8, %v800_v21  ;;  %v1707_v21 = vunpack.c.l.bf16 %v1950_v17  ;;  %v1771_v22 = vunpack.c.l.bf16 %v1966_v18 }
 0x157   :  { %v1050_v32 = vmax.f32 %v986_v26, 0.0 }
 0x158   :  { %v1082_v33 = vmax.f32 %v1018_v27, 0.0  ;;  %v676_v34 = vpop.f32.mrb[48].mxu0  ;;  %v804_v35 = vpop.f32.mrb[48].mxu1 }
 0x159   :  { %v1835_v38 = vpack.c.bf16 %v1050_v32, %v1049_v30  ;;  %v677_v40 = vadd.f32 %v2409_v12, %v676_v34  ;;  %v805_v41 = vadd.f32 %v2409_v12, %v804_v35  ;;  %v678_v42 = vpop.f32.mrb[49].mxu0  ;;  %v806_v43 = vpop.f32.mrb[49].mxu1  ;;  %v1772_v30 = vunpack.c.h.bf16 %v1966_v18 }
 0x15a   :  { %v1915_v39 = vpack.c.bf16 %v1082_v33, %v1081_v31  ;;  %v679_v44 = vpop.f32.mrb[50].mxu0  ;;  %v807_v45 = vpop.f32.mrb[50].mxu1 }
 0x15b   :  { %1978 = vst [vmem:[%s2665_s4 + $0x58] sm:$0xff] %v1835_v38   ;;  %v987_v46 = vadd.f32 %v1699_v28, %v677_v40  ;;  %v1019_v47 = vadd.f32 %v1763_v29, %v805_v41  ;;  %v680_v48 = vadd.f32 %v2409_v12, %v679_v44  ;;  %v808_v49 = vadd.f32 %v2409_v12, %v807_v45  ;;  %v681_v50 = vpop.f32.mrb[51].mxu0  ;;  %v809_v51 = vpop.f32.mrb[51].mxu1  ;;  %v1951_v45 = vld [vmem:[%s2663_s3 + $0x78] sm:$0xff]  }
 0x15c   :  { %1994 = vst [vmem:[%s2665_s4 + $0xd8] sm:$0xff] %v1915_v39   ;;  %v1708_v29 = vunpack.c.h.bf16 %v1950_v17 }
 0x15d   :  { %v988_v54 = vadd.f32 %v1700_v36, %v680_v48  ;;  %v1020_v55 = vadd.f32 %v1764_v37, %v808_v49  ;;  %v1051_v58 = vmax.f32 %v987_v46, 0.0  ;;  %v1083_v59 = vmax.f32 %v1019_v47, 0.0  ;;  %v1967_v46 = vld [vmem:[%s2663_s3 + $0xf8] sm:$0xff]  }
 0x15e   :  { %v1711_v49 = vunpack.c.l.bf16 %v1951_v45  ;;  %v1775_v50 = vunpack.c.l.bf16 %v1967_v46 }
 0x15f   :  { %v1052_v60 = vmax.f32 %v988_v54, 0.0  ;;  %v1084_v61 = vmax.f32 %v1020_v55, 0.0 }
 0x160   :  { %v684_v62 = vpop.f32.mrb[52].mxu0  ;;  %v812_v63 = vpop.f32.mrb[52].mxu1 }
 0x161   :  { %v1840_v2 = vpack.c.bf16 %v1052_v60, %v1051_v58  ;;  %v1920_v3 = vpack.c.bf16 %v1084_v61, %v1083_v59  ;;  %v685_v4 = vadd.f32 %v2409_v12, %v684_v62  ;;  %v813_v5 = vadd.f32 %v2409_v12, %v812_v63  ;;  %v686_v6 = vpop.f32.mrb[53].mxu0  ;;  %v814_v7 = vpop.f32.mrb[53].mxu1 }
 0x162   :  { %v687_v8 = vpop.f32.mrb[54].mxu0  ;;  %v815_v9 = vpop.f32.mrb[54].mxu1  ;;  %v1776_v58 = vunpack.c.h.bf16 %v1967_v46 }
 0x163   :  { %1979 = vst [vmem:[%s2665_s4 + $0x60] sm:$0xff] %v1840_v2   ;;  %1995 = vst [vmem:[%s2665_s4 + $0xe0] sm:$0xff] %v1920_v3   ;;  %v989_v10 = vadd.f32 %v1703_v56, %v685_v4  ;;  %v1021_v11 = vadd.f32 %v1767_v57, %v813_v5  ;;  %v688_v13 = vadd.f32 %v2409_v12, %v687_v8  ;;  %v689_v15 = vpop.f32.mrb[55].mxu0  ;;  %v817_v16 = vpop.f32.mrb[55].mxu1  ;;  %v1712_v57 = vunpack.c.h.bf16 %v1951_v45 }
 0x164   :  { %v816_v14 = vadd.f32 %v2409_v12, %v815_v9 }
 0x165   :  { %v990_v19 = vadd.f32 %v1704_v0, %v688_v13  ;;  %v1053_v23 = vmax.f32 %v989_v10, 0.0  ;;  %v1085_v24 = vmax.f32 %v1021_v11, 0.0 }
 0x166   :  { %v1022_v20 = vadd.f32 %v1768_v1, %v816_v14 }
 0x167   :  { %v1054_v25 = vmax.f32 %v990_v19, 0.0 }
 0x168   :  { %v1086_v26 = vmax.f32 %v1022_v20, 0.0  ;;  %v692_v27 = vpop.f32.mrb[56].mxu0  ;;  %v820_v28 = vpop.f32.mrb[56].mxu1 }
 0x169   :  { %v1845_v31 = vpack.c.bf16 %v1054_v25, %v1053_v23  ;;  %v693_v33 = vadd.f32 %v2409_v12, %v692_v27  ;;  %v821_v34 = vadd.f32 %v2409_v12, %v820_v28  ;;  %v694_v35 = vpop.f32.mrb[57].mxu0  ;;  %v822_v36 = vpop.f32.mrb[57].mxu1 }
 0x16a   :  { %v1925_v32 = vpack.c.bf16 %v1086_v26, %v1085_v24  ;;  %v695_v37 = vpop.f32.mrb[58].mxu0  ;;  %v823_v38 = vpop.f32.mrb[58].mxu1 }
 0x16b   :  { %1980 = vst [vmem:[%s2665_s4 + $0x68] sm:$0xff] %v1845_v31   ;;  %v991_v39 = vadd.f32 %v1707_v21, %v693_v33  ;;  %v1023_v40 = vadd.f32 %v1771_v22, %v821_v34  ;;  %v696_v41 = vadd.f32 %v2409_v12, %v695_v37  ;;  %v824_v42 = vadd.f32 %v2409_v12, %v823_v38  ;;  %v697_v43 = vpop.f32.mrb[59].mxu0  ;;  %v825_v44 = vpop.f32.mrb[59].mxu1 }
 0x16c   :  { %1996 = vst [vmem:[%s2665_s4 + $0xe8] sm:$0xff] %v1925_v32  }
 0x16d   :  { %v992_v47 = vadd.f32 %v1708_v29, %v696_v41  ;;  %v1024_v48 = vadd.f32 %v1772_v30, %v824_v42  ;;  %v1055_v51 = vmax.f32 %v991_v39, 0.0  ;;  %v1087_v52 = vmax.f32 %v1023_v40, 0.0 }
 0x16f   :  { %v1056_v53 = vmax.f32 %v992_v47, 0.0  ;;  %v1088_v54 = vmax.f32 %v1024_v48, 0.0 }
 0x170   :  { %v700_v55 = vpop.f32.mrb[60].mxu0  ;;  %v828_v56 = vpop.f32.mrb[60].mxu1 }
 0x171   :  { %v1850_v59 = vpack.c.bf16 %v1056_v53, %v1055_v51  ;;  %v1930_v60 = vpack.c.bf16 %v1088_v54, %v1087_v52  ;;  %v701_v61 = vadd.f32 %v2409_v12, %v700_v55  ;;  %v829_v62 = vadd.f32 %v2409_v12, %v828_v56  ;;  %v702_v63 = vpop.f32.mrb[61].mxu0  ;;  %v830_v0 = vpop.f32.mrb[61].mxu1 }
 0x172   :  { %v703_v1 = vpop.f32.mrb[62].mxu0  ;;  %v831_v2 = vpop.f32.mrb[62].mxu1 }
 0x173   :  { %1981 = vst [vmem:[%s2665_s4 + $0x70] sm:$0xff] %v1850_v59   ;;  %1997 = vst [vmem:[%s2665_s4 + $0xf0] sm:$0xff] %v1930_v60   ;;  %v993_v3 = vadd.f32 %v1711_v49, %v701_v61  ;;  %v1025_v4 = vadd.f32 %v1775_v50, %v829_v62  ;;  %v704_v5 = vadd.f32 %v2409_v12, %v703_v1  ;;  %v705_v7 = vpop.f32.mrb[63].mxu0  ;;  %v833_v8 = vpop.f32.mrb[63].mxu1 }
 0x174   :  { %v832_v6 = vadd.f32 %v2409_v12, %v831_v2 }
 0x175   :  { %v994_v9 = vadd.f32 %v1712_v57, %v704_v5  ;;  %v1057_v11 = vmax.f32 %v993_v3, 0.0  ;;  %v1089_v13 = vmax.f32 %v1025_v4, 0.0 }
 0x176   :  { %v1026_v10 = vadd.f32 %v1776_v58, %v832_v6 }
 0x177   :  { %v1058_v14 = vmax.f32 %v994_v9, 0.0 }
 0x178   :  { %v1090_v15 = vmax.f32 %v1026_v10, 0.0 }
 0x179   :  { %v1855_v16 = vpack.c.bf16 %v1058_v14, %v1057_v11 }
 0x17a   :  { %v1935_v17 = vpack.c.bf16 %v1090_v15, %v1089_v13 }
 0x17b   :  { %1982 = vst [vmem:[%s2665_s4 + $0x78] sm:$0xff] %v1855_v16  }
 0x17c   :  { %1998 = vst [vmem:[%s2665_s4 + $0xf8] sm:$0xff] %v1935_v17  }

// kernel: resnet_features.31
= control target key start
LH: loop header
LB: loop body
LE: loop exit
PB: predicated region body
PF: predicated region fallthrough
CT: control target
= control target key end

     0   :  { %v1769_v0 = vmov 0   ;;  %vm446_vm0 = vcmask 130048   ;;  %s2206_s1 = inlined_call_operand.vmem [shape: bf16[144,128], index: 1, kind: input, shape index: {}]   ;;  %s2207_s0 = inlined_call_operand.vmem [shape: bf16[512,144], index: 0, kind: input, shape index: {}]   ;;  %s2208_s2 = inlined_call_operand.vmem [shape: f32[1,128], index: 2, kind: input, shape index: {}]   ;;  %s2209_s3 = inlined_call_operand.vmem [shape: bf16[512,128], index: 3, kind: output, shape index: {}]  }
   0x1   :  { %543 = vmatprep.subr.bf16.mxu0 %v1769_v0  ;;  %1645 = vmatprep.subr.bf16.mxu1 %v1769_v0  ;;  %v1664_v1 = vld [vmem:[%s2206_s1] sm:$0xff]   ;;  %v1665_v2 = vld [vmem:[%s2206_s1 + $0x8] sm:$0xff]   ;;  %v1666_v3 = vld [vmem:[%s2206_s1 + $0x10] sm:$0xff]  }
   0x2   :  { %544 = vmatpush1.bf16.msra.mxu0 %v1664_v1  ;;  %1654 = vmatpush1.bf16.msra.mxu1 %v1664_v1  ;;  %v1667_v4 = vld [vmem:[%s2206_s1 + $0x18] sm:$0xff]   ;;  %v1675_v5 = vld [vmem:[%s2207_s0 + $0x4] ss:$8 sps:$4 sm:$0xff]   ;;  %v1670_v9 = vld [vmem:[%s2206_s1 + $0x30] sm:$0xff]  }
   0x3   :  { %545 = vmatprep.subr.bf16.mxu0 %v1769_v0  ;;  %1646 = vmatprep.subr.bf16.mxu1 %v1769_v0  ;;  %v1678_v6 = vld [vmem:[%s2207_s0 + $0x104] ss:$8 sps:$4 sm:$0xff]   ;;  %v1671_v10 = vld [vmem:[%s2206_s1 + $0x38] sm:$0xff]   ;;  %v1673_v12 = vld [vmem:[%s2207_s0] ss:$8 sps:$4 sm:$0xff]  }
   0x4   :  { %1294 = vmatprep.mubr.msk.bf16.mxu0 %vm446_vm0, %v1675_v5  ;;  %1310 = vmatprep.mubr.msk.bf16.mxu1 %vm446_vm0, %v1678_v6  ;;  %v1668_v7 = vld [vmem:[%s2206_s1 + $0x20] sm:$0xff]   ;;  %v1669_v8 = vld [vmem:[%s2206_s1 + $0x28] sm:$0xff]   ;;  %v1679_v14 = vld [vmem:[%s2207_s0 + $0x14] ss:$8 sps:$4 sm:$0xff]  }
   0x5   :  { %v1672_v11 = vld [vmem:[%s2206_s1 + $0x40] sm:$0xff]   ;;  %v1681_v15 = vld [vmem:[%s2207_s0 + $0x114] ss:$8 sps:$4 sm:$0xff]   ;;  %v1683_v16 = vld [vmem:[%s2207_s0 + $0x10] ss:$8 sps:$4 sm:$0xff]  }
   0x6   :  { %546 = vmatpush1.bf16.msra.mxu0 %v1665_v2  ;;  %1655 = vmatpush1.bf16.msra.mxu1 %v1665_v2  ;;  %v1676_v13 = vld [vmem:[%s2207_s0 + $0x100] ss:$8 sps:$4 sm:$0xff]   ;;  %v1684_v17 = vld [vmem:[%s2207_s0 + $0x110] ss:$8 sps:$4 sm:$0xff]   ;;  %v1685_v18 = vld [vmem:[%s2207_s0 + $0x24] ss:$8 sps:$4 sm:$0xff]  }
   0x7   :  { %547 = vmatprep.subr.bf16.mxu0 %v1769_v0  ;;  %1647 = vmatprep.subr.bf16.mxu1 %v1769_v0  ;;  %v1687_v19 = vld [vmem:[%s2207_s0 + $0x124] ss:$8 sps:$4 sm:$0xff]   ;;  %v1689_v20 = vld [vmem:[%s2207_s0 + $0x20] ss:$8 sps:$4 sm:$0xff]   ;;  %v1691_v22 = vld [vmem:[%s2207_s0 + $0x34] ss:$8 sps:$4 sm:$0xff]  }
   0x8   :  { %v1690_v21 = vld [vmem:[%s2207_s0 + $0x120] ss:$8 sps:$4 sm:$0xff]   ;;  %v1693_v23 = vld [vmem:[%s2207_s0 + $0x134] ss:$8 sps:$4 sm:$0xff]   ;;  %v1695_v24 = vld [vmem:[%s2207_s0 + $0x30] ss:$8 sps:$4 sm:$0xff]  }
   0x9   :  { %v1696_v25 = vld [vmem:[%s2207_s0 + $0x130] ss:$8 sps:$4 sm:$0xff]   ;;  %v1697_v26 = vld [vmem:[%s2207_s0 + $0x44] ss:$8 sps:$4 sm:$0xff]   ;;  %v1701_v28 = vld [vmem:[%s2207_s0 + $0x40] ss:$8 sps:$4 sm:$0xff]  }
   0xa   :  { %548 = vmatpush1.bf16.msra.mxu0 %v1666_v3  ;;  %1656 = vmatpush1.bf16.msra.mxu1 %v1666_v3  ;;  %v1699_v27 = vld [vmem:[%s2207_s0 + $0x144] ss:$8 sps:$4 sm:$0xff]   ;;  %v1702_v29 = vld [vmem:[%s2207_s0 + $0x140] ss:$8 sps:$4 sm:$0xff]   ;;  %v1703_v30 = vld [vmem:[%s2207_s0 + $0x54] ss:$8 sps:$4 sm:$0xff]  }
   0xb   :  { %549 = vmatprep.subr.bf16.mxu0 %v1769_v0  ;;  %1648 = vmatprep.subr.bf16.mxu1 %v1769_v0  ;;  %v1705_v31 = vld [vmem:[%s2207_s0 + $0x154] ss:$8 sps:$4 sm:$0xff]   ;;  %v1707_v32 = vld [vmem:[%s2207_s0 + $0x50] ss:$8 sps:$4 sm:$0xff]   ;;  %v1709_v34 = vld [vmem:[%s2207_s0 + $0x64] ss:$8 sps:$4 sm:$0xff]  }
   0xc   :  { %v1708_v33 = vld [vmem:[%s2207_s0 + $0x150] ss:$8 sps:$4 sm:$0xff]   ;;  %v1711_v35 = vld [vmem:[%s2207_s0 + $0x164] ss:$8 sps:$4 sm:$0xff]   ;;  %v1713_v36 = vld [vmem:[%s2207_s0 + $0x60] ss:$8 sps:$4 sm:$0xff]  }
   0xd   :  { %v1714_v37 = vld [vmem:[%s2207_s0 + $0x160] ss:$8 sps:$4 sm:$0xff]   ;;  %v1715_v38 = vld [vmem:[%s2207_s0 + $0x74] ss:$8 sps:$4 sm:$0xff]   ;;  %v1719_v40 = vld [vmem:[%s2207_s0 + $0x70] ss:$8 sps:$4 sm:$0xff]  }
   0xe   :  { %550 = vmatpush1.bf16.msra.mxu0 %v1667_v4  ;;  %1657 = vmatpush1.bf16.msra.mxu1 %v1667_v4  ;;  %v1717_v39 = vld [vmem:[%s2207_s0 + $0x174] ss:$8 sps:$4 sm:$0xff]   ;;  %v1720_v41 = vld [vmem:[%s2207_s0 + $0x170] ss:$8 sps:$4 sm:$0xff]   ;;  %v1721_v42 = vld [vmem:[%s2207_s0 + $0x84] ss:$8 sps:$4 sm:$0xff]  }
   0xf   :  { %551 = vmatprep.subr.bf16.mxu0 %v1769_v0  ;;  %1649 = vmatprep.subr.bf16.mxu1 %v1769_v0  ;;  %v1723_v43 = vld [vmem:[%s2207_s0 + $0x184] ss:$8 sps:$4 sm:$0xff]   ;;  %v1725_v44 = vld [vmem:[%s2207_s0 + $0x80] ss:$8 sps:$4 sm:$0xff]   ;;  %v1727_v46 = vld [vmem:[%s2207_s0 + $0x94] ss:$8 sps:$4 sm:$0xff]  }
  0x10   :  { %v1726_v45 = vld [vmem:[%s2207_s0 + $0x180] ss:$8 sps:$4 sm:$0xff]   ;;  %v1729_v47 = vld [vmem:[%s2207_s0 + $0x194] ss:$8 sps:$4 sm:$0xff]   ;;  %v1731_v48 = vld [vmem:[%s2207_s0 + $0x90] ss:$8 sps:$4 sm:$0xff]  }
  0x11   :  { %v1732_v49 = vld [vmem:[%s2207_s0 + $0x190] ss:$8 sps:$4 sm:$0xff]   ;;  %v1733_v50 = vld [vmem:[%s2207_s0 + $0xa4] ss:$8 sps:$4 sm:$0xff]   ;;  %v1737_v52 = vld [vmem:[%s2207_s0 + $0xa0] ss:$8 sps:$4 sm:$0xff]  }
  0x12   :  { %552 = vmatpush1.bf16.msra.mxu0 %v1668_v7  ;;  %1658 = vmatpush1.bf16.msra.mxu1 %v1668_v7  ;;  %v1735_v51 = vld [vmem:[%s2207_s0 + $0x1a4] ss:$8 sps:$4 sm:$0xff]   ;;  %v1738_v53 = vld [vmem:[%s2207_s0 + $0x1a0] ss:$8 sps:$4 sm:$0xff]   ;;  %v1739_v54 = vld [vmem:[%s2207_s0 + $0xb4] ss:$8 sps:$4 sm:$0xff]  }
  0x13   :  { %553 = vmatprep.subr.bf16.mxu0 %v1769_v0  ;;  %1650 = vmatprep.subr.bf16.mxu1 %v1769_v0  ;;  %v1741_v55 = vld [vmem:[%s2207_s0 + $0x1b4] ss:$8 sps:$4 sm:$0xff]   ;;  %v1743_v56 = vld [vmem:[%s2207_s0 + $0xb0] ss:$8 sps:$4 sm:$0xff]   ;;  %v1745_v58 = vld [vmem:[%s2207_s0 + $0xc4] ss:$8 sps:$4 sm:$0xff]  }
  0x14   :  { %v1744_v57 = vld [vmem:[%s2207_s0 + $0x1b0] ss:$8 sps:$4 sm:$0xff]   ;;  %v1747_v59 = vld [vmem:[%s2207_s0 + $0x1c4] ss:$8 sps:$4 sm:$0xff]   ;;  %v1749_v60 = vld [vmem:[%s2207_s0 + $0xc0] ss:$8 sps:$4 sm:$0xff]  }
  0x15   :  { %v1750_v61 = vld [vmem:[%s2207_s0 + $0x1c0] ss:$8 sps:$4 sm:$0xff]   ;;  %v1751_v62 = vld [vmem:[%s2207_s0 + $0xd4] ss:$8 sps:$4 sm:$0xff]   ;;  %v1756_v1 = vld [vmem:[%s2207_s0 + $0x1d0] ss:$8 sps:$4 sm:$0xff]  }
  0x16   :  { %554 = vmatpush1.bf16.msra.mxu0 %v1669_v8  ;;  %1659 = vmatpush1.bf16.msra.mxu1 %v1669_v8  ;;  %v1753_v63 = vld [vmem:[%s2207_s0 + $0x1d4] ss:$8 sps:$4 sm:$0xff]   ;;  %v1757_v2 = vld [vmem:[%s2207_s0 + $0xe4] ss:$8 sps:$4 sm:$0xff]   ;;  %v1761_v4 = vld [vmem:[%s2207_s0 + $0xe0] ss:$8 sps:$4 sm:$0xff]  }
  0x17   :  { %555 = vmatprep.subr.bf16.mxu0 %v1769_v0  ;;  %1651 = vmatprep.subr.bf16.mxu1 %v1769_v0  ;;  %v1759_v3 = vld [vmem:[%s2207_s0 + $0x1e4] ss:$8 sps:$4 sm:$0xff]   ;;  %v1762_v5 = vld [vmem:[%s2207_s0 + $0x1e0] ss:$8 sps:$4 sm:$0xff]   ;;  %v1763_v6 = vld [vmem:[%s2207_s0 + $0xf4] ss:$8 sps:$4 sm:$0xff]  }
  0x18   :  { %v1765_v7 = vld [vmem:[%s2207_s0 + $0x1f4] ss:$8 sps:$4 sm:$0xff]   ;;  %v1767_v8 = vld [vmem:[%s2207_s0 + $0xf0] ss:$8 sps:$4 sm:$0xff]  }
  0x1a   :  { %556 = vmatpush1.bf16.msra.mxu0 %v1670_v9  ;;  %1660 = vmatpush1.bf16.msra.mxu1 %v1670_v9  ;;  %v1768_v9 = vld [vmem:[%s2207_s0 + $0x1f0] ss:$8 sps:$4 sm:$0xff]  }
  0x1b   :  { %557 = vmatprep.subr.bf16.mxu0 %v1769_v0  ;;  %1652 = vmatprep.subr.bf16.mxu1 %v1769_v0 }
  0x1e   :  { %558 = vmatpush1.bf16.msra.mxu0 %v1671_v10  ;;  %1661 = vmatpush1.bf16.msra.mxu1 %v1671_v10  ;;  %v2044_v10 = vld [vmem:[%s2208_s2] ss:$0 sm:$0xff] }
  0x1f   :  { %559 = vmatprep.subr.bf16.mxu0 %v1769_v0  ;;  %1653 = vmatprep.subr.bf16.mxu1 %v1769_v0  ;;  %v1755_v0 = vld [vmem:[%s2207_s0 + $0xd0] ss:$8 sps:$4 sm:$0xff]  }
  0x22   :  { %560 = vmatpush1.bf16.msra.mxu0 %v1672_v11  ;;  %1662 = vmatpush1.bf16.msra.mxu1 %v1672_v11 }
  0x25   :  { %576 = vmatmul.mubr.bf16.vlgmr.msra.gmra.mrb[0].mxu0 %v1673_v12  ;;  %704 = vmatmul.mubr.bf16.vlgmr.msra.gmra.mrb[0].mxu1 %v1676_v13 }
  0x26   :  { %1295 = vmatprep.mubr.msk.bf16.mxu0 %vm446_vm0, %v1679_v14  ;;  %1311 = vmatprep.mubr.msk.bf16.mxu1 %vm446_vm0, %v1681_v15 }
  0x2d   :  { %584 = vmatmul.mubr.bf16.gmra.mrb[4].mxu0 %v1683_v16  ;;  %712 = vmatmul.mubr.bf16.gmra.mrb[4].mxu1 %v1684_v17 }
  0x2e   :  { %1296 = vmatprep.mubr.msk.bf16.mxu0 %vm446_vm0, %v1685_v18  ;;  %1312 = vmatprep.mubr.msk.bf16.mxu1 %vm446_vm0, %v1687_v19 }
  0x35   :  { %592 = vmatmul.mubr.bf16.gmra.mrb[8].mxu0 %v1689_v20  ;;  %720 = vmatmul.mubr.bf16.gmra.mrb[8].mxu1 %v1690_v21 }
  0x36   :  { %1297 = vmatprep.mubr.msk.bf16.mxu0 %vm446_vm0, %v1691_v22  ;;  %1313 = vmatprep.mubr.msk.bf16.mxu1 %vm446_vm0, %v1693_v23 }
  0x3d   :  { %600 = vmatmul.mubr.bf16.gmra.mrb[12].mxu0 %v1695_v24  ;;  %728 = vmatmul.mubr.bf16.gmra.mrb[12].mxu1 %v1696_v25 }
  0x3e   :  { %1298 = vmatprep.mubr.msk.bf16.mxu0 %vm446_vm0, %v1697_v26  ;;  %1314 = vmatprep.mubr.msk.bf16.mxu1 %vm446_vm0, %v1699_v27 }
  0x45   :  { %608 = vmatmul.mubr.bf16.gmra.mrb[16].mxu0 %v1701_v28  ;;  %736 = vmatmul.mubr.bf16.gmra.mrb[16].mxu1 %v1702_v29 }
  0x46   :  { %1299 = vmatprep.mubr.msk.bf16.mxu0 %vm446_vm0, %v1703_v30  ;;  %1315 = vmatprep.mubr.msk.bf16.mxu1 %vm446_vm0, %v1705_v31 }
  0x4d   :  { %616 = vmatmul.mubr.bf16.gmra.mrb[20].mxu0 %v1707_v32  ;;  %744 = vmatmul.mubr.bf16.gmra.mrb[20].mxu1 %v1708_v33 }
  0x4e   :  { %1300 = vmatprep.mubr.msk.bf16.mxu0 %vm446_vm0, %v1709_v34  ;;  %1316 = vmatprep.mubr.msk.bf16.mxu1 %vm446_vm0, %v1711_v35 }
  0x55   :  { %624 = vmatmul.mubr.bf16.gmra.mrb[24].mxu0 %v1713_v36  ;;  %752 = vmatmul.mubr.bf16.gmra.mrb[24].mxu1 %v1714_v37 }
  0x56   :  { %1301 = vmatprep.mubr.msk.bf16.mxu0 %vm446_vm0, %v1715_v38  ;;  %1317 = vmatprep.mubr.msk.bf16.mxu1 %vm446_vm0, %v1717_v39 }
  0x5d   :  { %632 = vmatmul.mubr.bf16.gmra.mrb[28].mxu0 %v1719_v40  ;;  %760 = vmatmul.mubr.bf16.gmra.mrb[28].mxu1 %v1720_v41 }
  0x5e   :  { %1302 = vmatprep.mubr.msk.bf16.mxu0 %vm446_vm0, %v1721_v42  ;;  %1318 = vmatprep.mubr.msk.bf16.mxu1 %vm446_vm0, %v1723_v43 }
  0x65   :  { %640 = vmatmul.mubr.bf16.gmra.mrb[32].mxu0 %v1725_v44  ;;  %768 = vmatmul.mubr.bf16.gmra.mrb[32].mxu1 %v1726_v45 }
  0x66   :  { %1303 = vmatprep.mubr.msk.bf16.mxu0 %vm446_vm0, %v1727_v46  ;;  %1319 = vmatprep.mubr.msk.bf16.mxu1 %vm446_vm0, %v1729_v47 }
  0x6d   :  { %648 = vmatmul.mubr.bf16.gmra.mrb[36].mxu0 %v1731_v48  ;;  %776 = vmatmul.mubr.bf16.gmra.mrb[36].mxu1 %v1732_v49 }
  0x6e   :  { %1304 = vmatprep.mubr.msk.bf16.mxu0 %vm446_vm0, %v1733_v50  ;;  %1320 = vmatprep.mubr.msk.bf16.mxu1 %vm446_vm0, %v1735_v51 }
  0x75   :  { %656 = vmatmul.mubr.bf16.gmra.mrb[40].mxu0 %v1737_v52  ;;  %784 = vmatmul.mubr.bf16.gmra.mrb[40].mxu1 %v1738_v53 }
  0x76   :  { %1305 = vmatprep.mubr.msk.bf16.mxu0 %vm446_vm0, %v1739_v54  ;;  %1321 = vmatprep.mubr.msk.bf16.mxu1 %vm446_vm0, %v1741_v55 }
  0x7d   :  { %664 = vmatmul.mubr.bf16.gmra.mrb[44].mxu0 %v1743_v56  ;;  %792 = vmatmul.mubr.bf16.gmra.mrb[44].mxu1 %v1744_v57 }
  0x7e   :  { %1306 = vmatprep.mubr.msk.bf16.mxu0 %vm446_vm0, %v1745_v58  ;;  %1322 = vmatprep.mubr.msk.bf16.mxu1 %vm446_vm0, %v1747_v59 }
  0x85   :  { %672 = vmatmul.mubr.bf16.gmra.mrb[48].mxu0 %v1749_v60  ;;  %800 = vmatmul.mubr.bf16.gmra.mrb[48].mxu1 %v1750_v61 }
  0x86   :  { %1307 = vmatprep.mubr.msk.bf16.mxu0 %vm446_vm0, %v1751_v62  ;;  %1323 = vmatprep.mubr.msk.bf16.mxu1 %vm446_vm0, %v1753_v63 }
  0x8d   :  { %680 = vmatmul.mubr.bf16.gmra.mrb[52].mxu0 %v1755_v0  ;;  %808 = vmatmul.mubr.bf16.gmra.mrb[52].mxu1 %v1756_v1 }
  0x8e   :  { %1308 = vmatprep.mubr.msk.bf16.mxu0 %vm446_vm0, %v1757_v2  ;;  %1324 = vmatprep.mubr.msk.bf16.mxu1 %vm446_vm0, %v1759_v3 }
  0x95   :  { %688 = vmatmul.mubr.bf16.gmra.mrb[56].mxu0 %v1761_v4  ;;  %816 = vmatmul.mubr.bf16.gmra.mrb[56].mxu1 %v1762_v5 }
  0x96   :  { %1309 = vmatprep.mubr.msk.bf16.mxu0 %vm446_vm0, %v1763_v6  ;;  %1325 = vmatprep.mubr.msk.bf16.mxu1 %vm446_vm0, %v1765_v7 }
  0x9d   :  { %696 = vmatmul.mubr.bf16.gmra.mrb[60].mxu0 %v1767_v8  ;;  %824 = vmatmul.mubr.bf16.gmra.mrb[60].mxu1 %v1768_v9 }
  0xf8   :  { %v577_v11 = vpop.f32.mrb[0].mxu0  ;;  %v705_v12 = vpop.f32.mrb[0].mxu1 }
  0xf9   :  { %v578_v13 = vadd.f32 %v2044_v10, %v577_v11  ;;  %v706_v14 = vadd.f32 %v2044_v10, %v705_v12  ;;  %v579_v15 = vpop.f32.mrb[1].mxu0  ;;  %v707_v16 = vpop.f32.mrb[1].mxu1 }
  0xfa   :  { %v580_v17 = vpop.f32.mrb[2].mxu0  ;;  %v708_v18 = vpop.f32.mrb[2].mxu1 }
  0xfb   :  { %v581_v19 = vadd.f32 %v2044_v10, %v580_v17  ;;  %v709_v20 = vadd.f32 %v2044_v10, %v708_v18  ;;  %v582_v21 = vpop.f32.mrb[3].mxu0  ;;  %v710_v22 = vpop.f32.mrb[3].mxu1  ;;  %v832_v23 = vmax.f32 %v578_v13, 0.0  ;;  %v864_v24 = vmax.f32 %v706_v14, 0.0 }
  0xfd   :  { %v833_v25 = vmax.f32 %v581_v19, 0.0  ;;  %v865_v26 = vmax.f32 %v709_v20, 0.0 }
  0xff   :  { %v1457_v27 = vpack.c.bf16 %v833_v25, %v832_v23  ;;  %v1537_v28 = vpack.c.bf16 %v865_v26, %v864_v24 }
 0x100   :  { %v585_v29 = vpop.f32.mrb[4].mxu0  ;;  %v713_v30 = vpop.f32.mrb[4].mxu1 }
 0x101   :  { %1458 = vst [vmem:[%s2209_s3] sm:$0xff] %v1457_v27   ;;  %1629 = vst [vmem:[%s2209_s3 + $0x80] sm:$0xff] %v1537_v28   ;;  %v586_v31 = vadd.f32 %v2044_v10, %v585_v29  ;;  %v714_v32 = vadd.f32 %v2044_v10, %v713_v30  ;;  %v587_v33 = vpop.f32.mrb[5].mxu0  ;;  %v715_v34 = vpop.f32.mrb[5].mxu1 }
 0x102   :  { %v588_v35 = vpop.f32.mrb[6].mxu0  ;;  %v716_v36 = vpop.f32.mrb[6].mxu1 }
 0x103   :  { %v589_v37 = vadd.f32 %v2044_v10, %v588_v35  ;;  %v717_v38 = vadd.f32 %v2044_v10, %v716_v36  ;;  %v590_v39 = vpop.f32.mrb[7].mxu0  ;;  %v718_v40 = vpop.f32.mrb[7].mxu1  ;;  %v834_v41 = vmax.f32 %v586_v31, 0.0  ;;  %v866_v42 = vmax.f32 %v714_v32, 0.0 }
 0x105   :  { %v835_v43 = vmax.f32 %v589_v37, 0.0  ;;  %v867_v44 = vmax.f32 %v717_v38, 0.0 }
 0x107   :  { %v1462_v45 = vpack.c.bf16 %v835_v43, %v834_v41  ;;  %v1542_v46 = vpack.c.bf16 %v867_v44, %v866_v42 }
 0x108   :  { %v593_v47 = vpop.f32.mrb[8].mxu0  ;;  %v721_v48 = vpop.f32.mrb[8].mxu1 }
 0x109   :  { %1614 = vst [vmem:[%s2209_s3 + $0x8] sm:$0xff] %v1462_v45   ;;  %1630 = vst [vmem:[%s2209_s3 + $0x88] sm:$0xff] %v1542_v46   ;;  %v594_v49 = vadd.f32 %v2044_v10, %v593_v47  ;;  %v722_v50 = vadd.f32 %v2044_v10, %v721_v48  ;;  %v595_v51 = vpop.f32.mrb[9].mxu0  ;;  %v723_v52 = vpop.f32.mrb[9].mxu1 }
 0x10a   :  { %v596_v53 = vpop.f32.mrb[10].mxu0  ;;  %v724_v54 = vpop.f32.mrb[10].mxu1 }
 0x10b   :  { %v597_v55 = vadd.f32 %v2044_v10, %v596_v53  ;;  %v725_v56 = vadd.f32 %v2044_v10, %v724_v54  ;;  %v598_v57 = vpop.f32.mrb[11].mxu0  ;;  %v726_v58 = vpop.f32.mrb[11].mxu1  ;;  %v836_v59 = vmax.f32 %v594_v49, 0.0  ;;  %v868_v60 = vmax.f32 %v722_v50, 0.0 }
 0x10d   :  { %v837_v61 = vmax.f32 %v597_v55, 0.0  ;;  %v869_v62 = vmax.f32 %v725_v56, 0.0 }
 0x10f   :  { %v1467_v63 = vpack.c.bf16 %v837_v61, %v836_v59  ;;  %v1547_v0 = vpack.c.bf16 %v869_v62, %v868_v60 }
 0x110   :  { %v601_v1 = vpop.f32.mrb[12].mxu0  ;;  %v729_v2 = vpop.f32.mrb[12].mxu1 }
 0x111   :  { %1615 = vst [vmem:[%s2209_s3 + $0x10] sm:$0xff] %v1467_v63   ;;  %1631 = vst [vmem:[%s2209_s3 + $0x90] sm:$0xff] %v1547_v0   ;;  %v602_v3 = vadd.f32 %v2044_v10, %v601_v1  ;;  %v730_v4 = vadd.f32 %v2044_v10, %v729_v2  ;;  %v603_v5 = vpop.f32.mrb[13].mxu0  ;;  %v731_v6 = vpop.f32.mrb[13].mxu1 }
 0x112   :  { %v604_v7 = vpop.f32.mrb[14].mxu0  ;;  %v732_v8 = vpop.f32.mrb[14].mxu1 }
 0x113   :  { %v605_v9 = vadd.f32 %v2044_v10, %v604_v7  ;;  %v733_v11 = vadd.f32 %v2044_v10, %v732_v8  ;;  %v606_v12 = vpop.f32.mrb[15].mxu0  ;;  %v734_v13 = vpop.f32.mrb[15].mxu1  ;;  %v838_v14 = vmax.f32 %v602_v3, 0.0  ;;  %v870_v15 = vmax.f32 %v730_v4, 0.0 }
 0x115   :  { %v839_v16 = vmax.f32 %v605_v9, 0.0  ;;  %v871_v17 = vmax.f32 %v733_v11, 0.0 }
 0x117   :  { %v1472_v18 = vpack.c.bf16 %v839_v16, %v838_v14  ;;  %v1552_v19 = vpack.c.bf16 %v871_v17, %v870_v15 }
 0x118   :  { %v609_v20 = vpop.f32.mrb[16].mxu0  ;;  %v737_v21 = vpop.f32.mrb[16].mxu1 }
 0x119   :  { %1616 = vst [vmem:[%s2209_s3 + $0x18] sm:$0xff] %v1472_v18   ;;  %1632 = vst [vmem:[%s2209_s3 + $0x98] sm:$0xff] %v1552_v19   ;;  %v610_v22 = vadd.f32 %v2044_v10, %v609_v20  ;;  %v738_v23 = vadd.f32 %v2044_v10, %v737_v21  ;;  %v611_v24 = vpop.f32.mrb[17].mxu0  ;;  %v739_v25 = vpop.f32.mrb[17].mxu1 }
 0x11a   :  { %v612_v26 = vpop.f32.mrb[18].mxu0  ;;  %v740_v27 = vpop.f32.mrb[18].mxu1 }
 0x11b   :  { %v613_v28 = vadd.f32 %v2044_v10, %v612_v26  ;;  %v741_v29 = vadd.f32 %v2044_v10, %v740_v27  ;;  %v614_v30 = vpop.f32.mrb[19].mxu0  ;;  %v742_v31 = vpop.f32.mrb[19].mxu1  ;;  %v840_v32 = vmax.f32 %v610_v22, 0.0  ;;  %v872_v33 = vmax.f32 %v738_v23, 0.0 }
 0x11d   :  { %v841_v34 = vmax.f32 %v613_v28, 0.0  ;;  %v873_v35 = vmax.f32 %v741_v29, 0.0 }
 0x11f   :  { %v1477_v36 = vpack.c.bf16 %v841_v34, %v840_v32  ;;  %v1557_v37 = vpack.c.bf16 %v873_v35, %v872_v33 }
 0x120   :  { %v617_v38 = vpop.f32.mrb[20].mxu0  ;;  %v745_v39 = vpop.f32.mrb[20].mxu1 }
 0x121   :  { %1617 = vst [vmem:[%s2209_s3 + $0x20] sm:$0xff] %v1477_v36   ;;  %1633 = vst [vmem:[%s2209_s3 + $0xa0] sm:$0xff] %v1557_v37   ;;  %v618_v40 = vadd.f32 %v2044_v10, %v617_v38  ;;  %v746_v41 = vadd.f32 %v2044_v10, %v745_v39  ;;  %v619_v42 = vpop.f32.mrb[21].mxu0  ;;  %v747_v43 = vpop.f32.mrb[21].mxu1 }
 0x122   :  { %v620_v44 = vpop.f32.mrb[22].mxu0  ;;  %v748_v45 = vpop.f32.mrb[22].mxu1 }
 0x123   :  { %v621_v46 = vadd.f32 %v2044_v10, %v620_v44  ;;  %v749_v47 = vadd.f32 %v2044_v10, %v748_v45  ;;  %v622_v48 = vpop.f32.mrb[23].mxu0  ;;  %v750_v49 = vpop.f32.mrb[23].mxu1  ;;  %v842_v50 = vmax.f32 %v618_v40, 0.0  ;;  %v874_v51 = vmax.f32 %v746_v41, 0.0 }
 0x125   :  { %v843_v52 = vmax.f32 %v621_v46, 0.0  ;;  %v875_v53 = vmax.f32 %v749_v47, 0.0 }
 0x127   :  { %v1482_v54 = vpack.c.bf16 %v843_v52, %v842_v50  ;;  %v1562_v55 = vpack.c.bf16 %v875_v53, %v874_v51 }
 0x128   :  { %v625_v56 = vpop.f32.mrb[24].mxu0  ;;  %v753_v57 = vpop.f32.mrb[24].mxu1 }
 0x129   :  { %1618 = vst [vmem:[%s2209_s3 + $0x28] sm:$0xff] %v1482_v54   ;;  %1634 = vst [vmem:[%s2209_s3 + $0xa8] sm:$0xff] %v1562_v55   ;;  %v626_v58 = vadd.f32 %v2044_v10, %v625_v56  ;;  %v754_v59 = vadd.f32 %v2044_v10, %v753_v57  ;;  %v627_v60 = vpop.f32.mrb[25].mxu0  ;;  %v755_v61 = vpop.f32.mrb[25].mxu1 }
 0x12a   :  { %v628_v62 = vpop.f32.mrb[26].mxu0  ;;  %v756_v63 = vpop.f32.mrb[26].mxu1 }
 0x12b   :  { %v629_v0 = vadd.f32 %v2044_v10, %v628_v62  ;;  %v757_v1 = vadd.f32 %v2044_v10, %v756_v63  ;;  %v630_v2 = vpop.f32.mrb[27].mxu0  ;;  %v758_v3 = vpop.f32.mrb[27].mxu1  ;;  %v844_v4 = vmax.f32 %v626_v58, 0.0  ;;  %v876_v5 = vmax.f32 %v754_v59, 0.0 }
 0x12d   :  { %v845_v6 = vmax.f32 %v629_v0, 0.0  ;;  %v877_v7 = vmax.f32 %v757_v1, 0.0 }
 0x12f   :  { %v1487_v8 = vpack.c.bf16 %v845_v6, %v844_v4  ;;  %v1567_v9 = vpack.c.bf16 %v877_v7, %v876_v5 }
 0x130   :  { %v633_v11 = vpop.f32.mrb[28].mxu0  ;;  %v761_v12 = vpop.f32.mrb[28].mxu1 }
 0x131   :  { %1619 = vst [vmem:[%s2209_s3 + $0x30] sm:$0xff] %v1487_v8   ;;  %1635 = vst [vmem:[%s2209_s3 + $0xb0] sm:$0xff] %v1567_v9   ;;  %v634_v13 = vadd.f32 %v2044_v10, %v633_v11  ;;  %v762_v14 = vadd.f32 %v2044_v10, %v761_v12  ;;  %v635_v15 = vpop.f32.mrb[29].mxu0  ;;  %v763_v16 = vpop.f32.mrb[29].mxu1 }
 0x132   :  { %v636_v17 = vpop.f32.mrb[30].mxu0  ;;  %v764_v18 = vpop.f32.mrb[30].mxu1 }
 0x133   :  { %v637_v19 = vadd.f32 %v2044_v10, %v636_v17  ;;  %v765_v20 = vadd.f32 %v2044_v10, %v764_v18  ;;  %v638_v21 = vpop.f32.mrb[31].mxu0  ;;  %v766_v22 = vpop.f32.mrb[31].mxu1  ;;  %v846_v23 = vmax.f32 %v634_v13, 0.0  ;;  %v878_v24 = vmax.f32 %v762_v14, 0.0 }
 0x135   :  { %v847_v25 = vmax.f32 %v637_v19, 0.0  ;;  %v879_v26 = vmax.f32 %v765_v20, 0.0 }
 0x137   :  { %v1492_v27 = vpack.c.bf16 %v847_v25, %v846_v23  ;;  %v1572_v28 = vpack.c.bf16 %v879_v26, %v878_v24 }
 0x138   :  { %v641_v29 = vpop.f32.mrb[32].mxu0  ;;  %v769_v30 = vpop.f32.mrb[32].mxu1 }
 0x139   :  { %1620 = vst [vmem:[%s2209_s3 + $0x38] sm:$0xff] %v1492_v27   ;;  %1636 = vst [vmem:[%s2209_s3 + $0xb8] sm:$0xff] %v1572_v28   ;;  %v642_v31 = vadd.f32 %v2044_v10, %v641_v29  ;;  %v770_v32 = vadd.f32 %v2044_v10, %v769_v30  ;;  %v643_v33 = vpop.f32.mrb[33].mxu0  ;;  %v771_v34 = vpop.f32.mrb[33].mxu1 }
 0x13a   :  { %v644_v35 = vpop.f32.mrb[34].mxu0  ;;  %v772_v36 = vpop.f32.mrb[34].mxu1 }
 0x13b   :  { %v645_v37 = vadd.f32 %v2044_v10, %v644_v35  ;;  %v773_v38 = vadd.f32 %v2044_v10, %v772_v36  ;;  %v646_v39 = vpop.f32.mrb[35].mxu0  ;;  %v774_v40 = vpop.f32.mrb[35].mxu1  ;;  %v848_v41 = vmax.f32 %v642_v31, 0.0  ;;  %v880_v42 = vmax.f32 %v770_v32, 0.0 }
 0x13d   :  { %v849_v43 = vmax.f32 %v645_v37, 0.0  ;;  %v881_v44 = vmax.f32 %v773_v38, 0.0 }
 0x13f   :  { %v1497_v45 = vpack.c.bf16 %v849_v43, %v848_v41  ;;  %v1577_v46 = vpack.c.bf16 %v881_v44, %v880_v42 }
 0x140   :  { %v649_v47 = vpop.f32.mrb[36].mxu0  ;;  %v777_v48 = vpop.f32.mrb[36].mxu1 }
 0x141   :  { %1621 = vst [vmem:[%s2209_s3 + $0x40] sm:$0xff] %v1497_v45   ;;  %1637 = vst [vmem:[%s2209_s3 + $0xc0] sm:$0xff] %v1577_v46   ;;  %v650_v49 = vadd.f32 %v2044_v10, %v649_v47  ;;  %v778_v50 = vadd.f32 %v2044_v10, %v777_v48  ;;  %v651_v51 = vpop.f32.mrb[37].mxu0  ;;  %v779_v52 = vpop.f32.mrb[37].mxu1 }
 0x142   :  { %v652_v53 = vpop.f32.mrb[38].mxu0  ;;  %v780_v54 = vpop.f32.mrb[38].mxu1 }
 0x143   :  { %v653_v55 = vadd.f32 %v2044_v10, %v652_v53  ;;  %v781_v56 = vadd.f32 %v2044_v10, %v780_v54  ;;  %v654_v57 = vpop.f32.mrb[39].mxu0  ;;  %v782_v58 = vpop.f32.mrb[39].mxu1  ;;  %v850_v59 = vmax.f32 %v650_v49, 0.0  ;;  %v882_v60 = vmax.f32 %v778_v50, 0.0 }
 0x145   :  { %v851_v61 = vmax.f32 %v653_v55, 0.0  ;;  %v883_v62 = vmax.f32 %v781_v56, 0.0 }
 0x147   :  { %v1502_v63 = vpack.c.bf16 %v851_v61, %v850_v59  ;;  %v1582_v0 = vpack.c.bf16 %v883_v62, %v882_v60 }
 0x148   :  { %v657_v1 = vpop.f32.mrb[40].mxu0  ;;  %v785_v2 = vpop.f32.mrb[40].mxu1 }
 0x149   :  { %1622 = vst [vmem:[%s2209_s3 + $0x48] sm:$0xff] %v1502_v63   ;;  %1638 = vst [vmem:[%s2209_s3 + $0xc8] sm:$0xff] %v1582_v0   ;;  %v658_v3 = vadd.f32 %v2044_v10, %v657_v1  ;;  %v786_v4 = vadd.f32 %v2044_v10, %v785_v2  ;;  %v659_v5 = vpop.f32.mrb[41].mxu0  ;;  %v787_v6 = vpop.f32.mrb[41].mxu1 }
 0x14a   :  { %v660_v7 = vpop.f32.mrb[42].mxu0  ;;  %v788_v8 = vpop.f32.mrb[42].mxu1 }
 0x14b   :  { %v661_v9 = vadd.f32 %v2044_v10, %v660_v7  ;;  %v789_v11 = vadd.f32 %v2044_v10, %v788_v8  ;;  %v662_v12 = vpop.f32.mrb[43].mxu0  ;;  %v790_v13 = vpop.f32.mrb[43].mxu1  ;;  %v852_v14 = vmax.f32 %v658_v3, 0.0  ;;  %v884_v15 = vmax.f32 %v786_v4, 0.0 }
 0x14d   :  { %v853_v16 = vmax.f32 %v661_v9, 0.0  ;;  %v885_v17 = vmax.f32 %v789_v11, 0.0 }
 0x14f   :  { %v1507_v18 = vpack.c.bf16 %v853_v16, %v852_v14  ;;  %v1587_v19 = vpack.c.bf16 %v885_v17, %v884_v15 }
 0x150   :  { %v665_v20 = vpop.f32.mrb[44].mxu0  ;;  %v793_v21 = vpop.f32.mrb[44].mxu1 }
 0x151   :  { %1623 = vst [vmem:[%s2209_s3 + $0x50] sm:$0xff] %v1507_v18   ;;  %1639 = vst [vmem:[%s2209_s3 + $0xd0] sm:$0xff] %v1587_v19   ;;  %v666_v22 = vadd.f32 %v2044_v10, %v665_v20  ;;  %v794_v23 = vadd.f32 %v2044_v10, %v793_v21  ;;  %v667_v24 = vpop.f32.mrb[45].mxu0  ;;  %v795_v25 = vpop.f32.mrb[45].mxu1 }
 0x152   :  { %v668_v26 = vpop.f32.mrb[46].mxu0  ;;  %v796_v27 = vpop.f32.mrb[46].mxu1 }
 0x153   :  { %v669_v28 = vadd.f32 %v2044_v10, %v668_v26  ;;  %v797_v29 = vadd.f32 %v2044_v10, %v796_v27  ;;  %v670_v30 = vpop.f32.mrb[47].mxu0  ;;  %v798_v31 = vpop.f32.mrb[47].mxu1  ;;  %v854_v32 = vmax.f32 %v666_v22, 0.0  ;;  %v886_v33 = vmax.f32 %v794_v23, 0.0 }
 0x155   :  { %v855_v34 = vmax.f32 %v669_v28, 0.0  ;;  %v887_v35 = vmax.f32 %v797_v29, 0.0 }
 0x157   :  { %v1512_v36 = vpack.c.bf16 %v855_v34, %v854_v32  ;;  %v1592_v37 = vpack.c.bf16 %v887_v35, %v886_v33 }
 0x158   :  { %v673_v38 = vpop.f32.mrb[48].mxu0  ;;  %v801_v39 = vpop.f32.mrb[48].mxu1 }
 0x159   :  { %1624 = vst [vmem:[%s2209_s3 + $0x58] sm:$0xff] %v1512_v36   ;;  %1640 = vst [vmem:[%s2209_s3 + $0xd8] sm:$0xff] %v1592_v37   ;;  %v674_v40 = vadd.f32 %v2044_v10, %v673_v38  ;;  %v802_v41 = vadd.f32 %v2044_v10, %v801_v39  ;;  %v675_v42 = vpop.f32.mrb[49].mxu0  ;;  %v803_v43 = vpop.f32.mrb[49].mxu1 }
 0x15a   :  { %v676_v44 = vpop.f32.mrb[50].mxu0  ;;  %v804_v45 = vpop.f32.mrb[50].mxu1 }
 0x15b   :  { %v677_v46 = vadd.f32 %v2044_v10, %v676_v44  ;;  %v805_v47 = vadd.f32 %v2044_v10, %v804_v45  ;;  %v678_v48 = vpop.f32.mrb[51].mxu0  ;;  %v806_v49 = vpop.f32.mrb[51].mxu1  ;;  %v856_v50 = vmax.f32 %v674_v40, 0.0  ;;  %v888_v51 = vmax.f32 %v802_v41, 0.0 }
 0x15d   :  { %v857_v52 = vmax.f32 %v677_v46, 0.0  ;;  %v889_v53 = vmax.f32 %v805_v47, 0.0 }
 0x15f   :  { %v1517_v54 = vpack.c.bf16 %v857_v52, %v856_v50  ;;  %v1597_v55 = vpack.c.bf16 %v889_v53, %v888_v51 }
 0x160   :  { %v681_v56 = vpop.f32.mrb[52].mxu0  ;;  %v809_v57 = vpop.f32.mrb[52].mxu1 }
 0x161   :  { %1625 = vst [vmem:[%s2209_s3 + $0x60] sm:$0xff] %v1517_v54   ;;  %1641 = vst [vmem:[%s2209_s3 + $0xe0] sm:$0xff] %v1597_v55   ;;  %v682_v58 = vadd.f32 %v2044_v10, %v681_v56  ;;  %v810_v59 = vadd.f32 %v2044_v10, %v809_v57  ;;  %v683_v60 = vpop.f32.mrb[53].mxu0  ;;  %v811_v61 = vpop.f32.mrb[53].mxu1 }
 0x162   :  { %v684_v62 = vpop.f32.mrb[54].mxu0  ;;  %v812_v63 = vpop.f32.mrb[54].mxu1 }
 0x163   :  { %v685_v0 = vadd.f32 %v2044_v10, %v684_v62  ;;  %v813_v1 = vadd.f32 %v2044_v10, %v812_v63  ;;  %v686_v2 = vpop.f32.mrb[55].mxu0  ;;  %v814_v3 = vpop.f32.mrb[55].mxu1  ;;  %v858_v4 = vmax.f32 %v682_v58, 0.0  ;;  %v890_v5 = vmax.f32 %v810_v59, 0.0 }
 0x165   :  { %v859_v6 = vmax.f32 %v685_v0, 0.0  ;;  %v891_v7 = vmax.f32 %v813_v1, 0.0 }
 0x167   :  { %v1522_v8 = vpack.c.bf16 %v859_v6, %v858_v4  ;;  %v1602_v9 = vpack.c.bf16 %v891_v7, %v890_v5 }
 0x168   :  { %v689_v11 = vpop.f32.mrb[56].mxu0  ;;  %v817_v12 = vpop.f32.mrb[56].mxu1 }
 0x169   :  { %1626 = vst [vmem:[%s2209_s3 + $0x68] sm:$0xff] %v1522_v8   ;;  %1642 = vst [vmem:[%s2209_s3 + $0xe8] sm:$0xff] %v1602_v9   ;;  %v690_v13 = vadd.f32 %v2044_v10, %v689_v11  ;;  %v818_v14 = vadd.f32 %v2044_v10, %v817_v12  ;;  %v691_v15 = vpop.f32.mrb[57].mxu0  ;;  %v819_v16 = vpop.f32.mrb[57].mxu1 }
 0x16a   :  { %v692_v17 = vpop.f32.mrb[58].mxu0  ;;  %v820_v18 = vpop.f32.mrb[58].mxu1 }
 0x16b   :  { %v693_v19 = vadd.f32 %v2044_v10, %v692_v17  ;;  %v821_v20 = vadd.f32 %v2044_v10, %v820_v18  ;;  %v694_v21 = vpop.f32.mrb[59].mxu0  ;;  %v822_v22 = vpop.f32.mrb[59].mxu1  ;;  %v860_v23 = vmax.f32 %v690_v13, 0.0  ;;  %v892_v24 = vmax.f32 %v818_v14, 0.0 }
 0x16d   :  { %v861_v25 = vmax.f32 %v693_v19, 0.0  ;;  %v893_v26 = vmax.f32 %v821_v20, 0.0 }
 0x16f   :  { %v1527_v27 = vpack.c.bf16 %v861_v25, %v860_v23  ;;  %v1607_v28 = vpack.c.bf16 %v893_v26, %v892_v24 }
 0x170   :  { %v697_v29 = vpop.f32.mrb[60].mxu0  ;;  %v825_v30 = vpop.f32.mrb[60].mxu1 }
 0x171   :  { %1627 = vst [vmem:[%s2209_s3 + $0x70] sm:$0xff] %v1527_v27   ;;  %1643 = vst [vmem:[%s2209_s3 + $0xf0] sm:$0xff] %v1607_v28   ;;  %v698_v31 = vadd.f32 %v2044_v10, %v697_v29  ;;  %v826_v32 = vadd.f32 %v2044_v10, %v825_v30  ;;  %v699_v33 = vpop.f32.mrb[61].mxu0  ;;  %v827_v34 = vpop.f32.mrb[61].mxu1 }
 0x172   :  { %v700_v35 = vpop.f32.mrb[62].mxu0  ;;  %v828_v36 = vpop.f32.mrb[62].mxu1 }
 0x173   :  { %v701_v37 = vadd.f32 %v2044_v10, %v700_v35  ;;  %v829_v38 = vadd.f32 %v2044_v10, %v828_v36  ;;  %v702_v39 = vpop.f32.mrb[63].mxu0  ;;  %v830_v40 = vpop.f32.mrb[63].mxu1  ;;  %v862_v41 = vmax.f32 %v698_v31, 0.0  ;;  %v894_v42 = vmax.f32 %v826_v32, 0.0 }
 0x175   :  { %v863_v43 = vmax.f32 %v701_v37, 0.0  ;;  %v895_v44 = vmax.f32 %v829_v38, 0.0 }
 0x177   :  { %v1532_v45 = vpack.c.bf16 %v863_v43, %v862_v41  ;;  %v1612_v46 = vpack.c.bf16 %v895_v44, %v894_v42 }
 0x179   :  { %1628 = vst [vmem:[%s2209_s3 + $0x78] sm:$0xff] %v1532_v45   ;;  %1644 = vst [vmem:[%s2209_s3 + $0xf8] sm:$0xff] %v1612_v46  }

// kernel: resnet_features.34
= control target key start
LH: loop header
LB: loop body
LE: loop exit
PB: predicated region body
PF: predicated region fallthrough
CT: control target
= control target key end

     0   :  { %v569_v0 = vmov 0   ;;  %vm182_vm0 = vcmask 130048   ;;  %s718_s1 = inlined_call_operand.vmem [shape: bf16[144,128], index: 1, kind: input, shape index: {}]   ;;  %s719_s0 = inlined_call_operand.vmem [shape: bf16[128,144], index: 0, kind: input, shape index: {}]   ;;  %s720_s2 = inlined_call_operand.vmem [shape: f32[1,128], index: 2, kind: input, shape index: {}]   ;;  %s721_s3 = inlined_call_operand.vmem [shape: bf16[128,128], index: 3, kind: output, shape index: {}]  }
   0x1   :  { %207 = vmatprep.subr.bf16.mxu0 %v569_v0  ;;  %517 = vmatprep.subr.bf16.mxu1 %v569_v0  ;;  %v536_v1 = vld [vmem:[%s718_s1] sm:$0xff]   ;;  %v537_v2 = vld [vmem:[%s718_s1 + $0x8] sm:$0xff]   ;;  %v538_v3 = vld [vmem:[%s718_s1 + $0x10] sm:$0xff]  }
   0x2   :  { %208 = vmatpush1.bf16.msra.mxu0 %v536_v1  ;;  %526 = vmatpush1.bf16.msra.mxu1 %v536_v1  ;;  %v539_v4 = vld [vmem:[%s718_s1 + $0x18] sm:$0xff]   ;;  %v547_v5 = vld [vmem:[%s719_s0 + $0x4] ss:$8 sps:$4 sm:$0xff]   ;;  %v542_v9 = vld [vmem:[%s718_s1 + $0x30] sm:$0xff]  }
   0x3   :  { %209 = vmatprep.subr.bf16.mxu0 %v569_v0  ;;  %518 = vmatprep.subr.bf16.mxu1 %v569_v0  ;;  %v550_v6 = vld [vmem:[%s719_s0 + $0x44] ss:$8 sps:$4 sm:$0xff]   ;;  %v543_v10 = vld [vmem:[%s718_s1 + $0x38] sm:$0xff]   ;;  %v545_v12 = vld [vmem:[%s719_s0] ss:$8 sps:$4 sm:$0xff]  }
   0x4   :  { %430 = vmatprep.mubr.msk.bf16.mxu0 %vm182_vm0, %v547_v5  ;;  %434 = vmatprep.mubr.msk.bf16.mxu1 %vm182_vm0, %v550_v6  ;;  %v540_v7 = vld [vmem:[%s718_s1 + $0x20] sm:$0xff]   ;;  %v541_v8 = vld [vmem:[%s718_s1 + $0x28] sm:$0xff]   ;;  %v551_v14 = vld [vmem:[%s719_s0 + $0x14] ss:$8 sps:$4 sm:$0xff]  }
   0x5   :  { %v544_v11 = vld [vmem:[%s718_s1 + $0x40] sm:$0xff]   ;;  %v553_v15 = vld [vmem:[%s719_s0 + $0x54] ss:$8 sps:$4 sm:$0xff]   ;;  %v555_v16 = vld [vmem:[%s719_s0 + $0x10] ss:$8 sps:$4 sm:$0xff]  }
   0x6   :  { %210 = vmatpush1.bf16.msra.mxu0 %v537_v2  ;;  %527 = vmatpush1.bf16.msra.mxu1 %v537_v2  ;;  %v548_v13 = vld [vmem:[%s719_s0 + $0x40] ss:$8 sps:$4 sm:$0xff]   ;;  %v556_v17 = vld [vmem:[%s719_s0 + $0x50] ss:$8 sps:$4 sm:$0xff]   ;;  %v557_v18 = vld [vmem:[%s719_s0 + $0x24] ss:$8 sps:$4 sm:$0xff]  }
   0x7   :  { %211 = vmatprep.subr.bf16.mxu0 %v569_v0  ;;  %519 = vmatprep.subr.bf16.mxu1 %v569_v0  ;;  %v559_v19 = vld [vmem:[%s719_s0 + $0x64] ss:$8 sps:$4 sm:$0xff]   ;;  %v561_v20 = vld [vmem:[%s719_s0 + $0x20] ss:$8 sps:$4 sm:$0xff]   ;;  %v563_v22 = vld [vmem:[%s719_s0 + $0x34] ss:$8 sps:$4 sm:$0xff]  }
   0x8   :  { %v562_v21 = vld [vmem:[%s719_s0 + $0x60] ss:$8 sps:$4 sm:$0xff]   ;;  %v565_v23 = vld [vmem:[%s719_s0 + $0x74] ss:$8 sps:$4 sm:$0xff]   ;;  %v567_v24 = vld [vmem:[%s719_s0 + $0x30] ss:$8 sps:$4 sm:$0xff]  }
   0x9   :  { %v568_v25 = vld [vmem:[%s719_s0 + $0x70] ss:$8 sps:$4 sm:$0xff]   ;;  %v676_v26 = vld [vmem:[%s720_s2] ss:$0 sm:$0xff] }
   0xa   :  { %212 = vmatpush1.bf16.msra.mxu0 %v538_v3  ;;  %528 = vmatpush1.bf16.msra.mxu1 %v538_v3 }
   0xb   :  { %213 = vmatprep.subr.bf16.mxu0 %v569_v0  ;;  %520 = vmatprep.subr.bf16.mxu1 %v569_v0 }
   0xe   :  { %214 = vmatpush1.bf16.msra.mxu0 %v539_v4  ;;  %529 = vmatpush1.bf16.msra.mxu1 %v539_v4 }
   0xf   :  { %215 = vmatprep.subr.bf16.mxu0 %v569_v0  ;;  %521 = vmatprep.subr.bf16.mxu1 %v569_v0 }
  0x12   :  { %216 = vmatpush1.bf16.msra.mxu0 %v540_v7  ;;  %530 = vmatpush1.bf16.msra.mxu1 %v540_v7 }
  0x13   :  { %217 = vmatprep.subr.bf16.mxu0 %v569_v0  ;;  %522 = vmatprep.subr.bf16.mxu1 %v569_v0 }
  0x16   :  { %218 = vmatpush1.bf16.msra.mxu0 %v541_v8  ;;  %531 = vmatpush1.bf16.msra.mxu1 %v541_v8 }
  0x17   :  { %219 = vmatprep.subr.bf16.mxu0 %v569_v0  ;;  %523 = vmatprep.subr.bf16.mxu1 %v569_v0 }
  0x1a   :  { %220 = vmatpush1.bf16.msra.mxu0 %v542_v9  ;;  %532 = vmatpush1.bf16.msra.mxu1 %v542_v9 }
  0x1b   :  { %221 = vmatprep.subr.bf16.mxu0 %v569_v0  ;;  %524 = vmatprep.subr.bf16.mxu1 %v569_v0 }
  0x1e   :  { %222 = vmatpush1.bf16.msra.mxu0 %v543_v10  ;;  %533 = vmatpush1.bf16.msra.mxu1 %v543_v10 }
  0x1f   :  { %223 = vmatprep.subr.bf16.mxu0 %v569_v0  ;;  %525 = vmatprep.subr.bf16.mxu1 %v569_v0 }
  0x22   :  { %224 = vmatpush1.bf16.msra.mxu0 %v544_v11  ;;  %534 = vmatpush1.bf16.msra.mxu1 %v544_v11 }
  0x25   :  { %240 = vmatmul.mubr.bf16.vlgmr.msra.gmra.mrb[0].mxu0 %v545_v12  ;;  %272 = vmatmul.mubr.bf16.vlgmr.msra.gmra.mrb[0].mxu1 %v548_v13 }
  0x26   :  { %431 = vmatprep.mubr.msk.bf16.mxu0 %vm182_vm0, %v551_v14  ;;  %435 = vmatprep.mubr.msk.bf16.mxu1 %vm182_vm0, %v553_v15 }
  0x2d   :  { %248 = vmatmul.mubr.bf16.gmra.mrb[4].mxu0 %v555_v16  ;;  %280 = vmatmul.mubr.bf16.gmra.mrb[4].mxu1 %v556_v17 }
  0x2e   :  { %432 = vmatprep.mubr.msk.bf16.mxu0 %vm182_vm0, %v557_v18  ;;  %436 = vmatprep.mubr.msk.bf16.mxu1 %vm182_vm0, %v559_v19 }
  0x35   :  { %256 = vmatmul.mubr.bf16.gmra.mrb[8].mxu0 %v561_v20  ;;  %288 = vmatmul.mubr.bf16.gmra.mrb[8].mxu1 %v562_v21 }
  0x36   :  { %433 = vmatprep.mubr.msk.bf16.mxu0 %vm182_vm0, %v563_v22  ;;  %437 = vmatprep.mubr.msk.bf16.mxu1 %vm182_vm0, %v565_v23 }
  0x3d   :  { %264 = vmatmul.mubr.bf16.gmra.mrb[12].mxu0 %v567_v24  ;;  %296 = vmatmul.mubr.bf16.gmra.mrb[12].mxu1 %v568_v25 }
  0xf8   :  { %v241_v27 = vpop.f32.mrb[0].mxu0  ;;  %v273_v28 = vpop.f32.mrb[0].mxu1 }
  0xf9   :  { %v242_v29 = vadd.f32 %v676_v26, %v241_v27  ;;  %v274_v30 = vadd.f32 %v676_v26, %v273_v28  ;;  %v243_v31 = vpop.f32.mrb[1].mxu0  ;;  %v275_v32 = vpop.f32.mrb[1].mxu1 }
  0xfa   :  { %v244_v33 = vpop.f32.mrb[2].mxu0  ;;  %v276_v34 = vpop.f32.mrb[2].mxu1 }
  0xfb   :  { %v245_v35 = vadd.f32 %v676_v26, %v244_v33  ;;  %v277_v36 = vadd.f32 %v676_v26, %v276_v34  ;;  %v246_v37 = vpop.f32.mrb[3].mxu0  ;;  %v278_v38 = vpop.f32.mrb[3].mxu1  ;;  %v304_v39 = vmax.f32 %v242_v29, 0.0  ;;  %v312_v40 = vmax.f32 %v274_v30, 0.0 }
  0xfd   :  { %v305_v41 = vmax.f32 %v245_v35, 0.0  ;;  %v313_v42 = vmax.f32 %v277_v36, 0.0 }
  0xff   :  { %v473_v43 = vpack.c.bf16 %v305_v41, %v304_v39  ;;  %v493_v44 = vpack.c.bf16 %v313_v42, %v312_v40 }
 0x100   :  { %v249_v45 = vpop.f32.mrb[4].mxu0  ;;  %v281_v46 = vpop.f32.mrb[4].mxu1 }
 0x101   :  { %474 = vst [vmem:[%s721_s3] sm:$0xff] %v473_v43   ;;  %513 = vst [vmem:[%s721_s3 + $0x20] sm:$0xff] %v493_v44   ;;  %v250_v47 = vadd.f32 %v676_v26, %v249_v45  ;;  %v282_v48 = vadd.f32 %v676_v26, %v281_v46  ;;  %v251_v49 = vpop.f32.mrb[5].mxu0  ;;  %v283_v50 = vpop.f32.mrb[5].mxu1 }
 0x102   :  { %v252_v51 = vpop.f32.mrb[6].mxu0  ;;  %v284_v52 = vpop.f32.mrb[6].mxu1 }
 0x103   :  { %v253_v53 = vadd.f32 %v676_v26, %v252_v51  ;;  %v285_v54 = vadd.f32 %v676_v26, %v284_v52  ;;  %v254_v55 = vpop.f32.mrb[7].mxu0  ;;  %v286_v56 = vpop.f32.mrb[7].mxu1  ;;  %v306_v57 = vmax.f32 %v250_v47, 0.0  ;;  %v314_v58 = vmax.f32 %v282_v48, 0.0 }
 0x105   :  { %v307_v59 = vmax.f32 %v253_v53, 0.0  ;;  %v315_v60 = vmax.f32 %v285_v54, 0.0 }
 0x107   :  { %v478_v61 = vpack.c.bf16 %v307_v59, %v306_v57  ;;  %v498_v62 = vpack.c.bf16 %v315_v60, %v314_v58 }
 0x108   :  { %v257_v63 = vpop.f32.mrb[8].mxu0  ;;  %v289_v0 = vpop.f32.mrb[8].mxu1 }
 0x109   :  { %510 = vst [vmem:[%s721_s3 + $0x8] sm:$0xff] %v478_v61   ;;  %514 = vst [vmem:[%s721_s3 + $0x28] sm:$0xff] %v498_v62   ;;  %v258_v1 = vadd.f32 %v676_v26, %v257_v63  ;;  %v290_v2 = vadd.f32 %v676_v26, %v289_v0  ;;  %v259_v3 = vpop.f32.mrb[9].mxu0  ;;  %v291_v4 = vpop.f32.mrb[9].mxu1 }
 0x10a   :  { %v260_v5 = vpop.f32.mrb[10].mxu0  ;;  %v292_v6 = vpop.f32.mrb[10].mxu1 }
 0x10b   :  { %v261_v7 = vadd.f32 %v676_v26, %v260_v5  ;;  %v293_v8 = vadd.f32 %v676_v26, %v292_v6  ;;  %v262_v9 = vpop.f32.mrb[11].mxu0  ;;  %v294_v10 = vpop.f32.mrb[11].mxu1  ;;  %v308_v11 = vmax.f32 %v258_v1, 0.0  ;;  %v316_v12 = vmax.f32 %v290_v2, 0.0 }
 0x10d   :  { %v309_v13 = vmax.f32 %v261_v7, 0.0  ;;  %v317_v14 = vmax.f32 %v293_v8, 0.0 }
 0x10f   :  { %v483_v15 = vpack.c.bf16 %v309_v13, %v308_v11  ;;  %v503_v16 = vpack.c.bf16 %v317_v14, %v316_v12 }
 0x110   :  { %v265_v17 = vpop.f32.mrb[12].mxu0  ;;  %v297_v18 = vpop.f32.mrb[12].mxu1 }
 0x111   :  { %511 = vst [vmem:[%s721_s3 + $0x10] sm:$0xff] %v483_v15   ;;  %515 = vst [vmem:[%s721_s3 + $0x30] sm:$0xff] %v503_v16   ;;  %v266_v19 = vadd.f32 %v676_v26, %v265_v17  ;;  %v298_v20 = vadd.f32 %v676_v26, %v297_v18  ;;  %v267_v21 = vpop.f32.mrb[13].mxu0  ;;  %v299_v22 = vpop.f32.mrb[13].mxu1 }
 0x112   :  { %v268_v23 = vpop.f32.mrb[14].mxu0  ;;  %v300_v24 = vpop.f32.mrb[14].mxu1 }
 0x113   :  { %v269_v25 = vadd.f32 %v676_v26, %v268_v23  ;;  %v301_v27 = vadd.f32 %v676_v26, %v300_v24  ;;  %v270_v28 = vpop.f32.mrb[15].mxu0  ;;  %v302_v29 = vpop.f32.mrb[15].mxu1  ;;  %v310_v30 = vmax.f32 %v266_v19, 0.0  ;;  %v318_v31 = vmax.f32 %v298_v20, 0.0 }
 0x115   :  { %v311_v32 = vmax.f32 %v269_v25, 0.0  ;;  %v319_v33 = vmax.f32 %v301_v27, 0.0 }
 0x117   :  { %v488_v34 = vpack.c.bf16 %v311_v32, %v310_v30  ;;  %v508_v35 = vpack.c.bf16 %v319_v33, %v318_v31 }
 0x119   :  { %512 = vst [vmem:[%s721_s3 + $0x18] sm:$0xff] %v488_v34   ;;  %516 = vst [vmem:[%s721_s3 + $0x38] sm:$0xff] %v508_v35  }

// kernel: resnet_features.33
= control target key start
LH: loop header
LB: loop body
LE: loop exit
PB: predicated region body
PF: predicated region fallthrough
CT: control target
= control target key end

     0   :  { %vm86_vm0 = vcmask 130048   ;;  %s509_s1 = inlined_call_operand.vmem [shape: bf16[16,128], index: 1, kind: input, shape index: {}]   ;;  %s510_s0 = inlined_call_operand.vmem [shape: bf16[128,16], index: 0, kind: input, shape index: {}]   ;;  %s511_s2 = inlined_call_operand.vmem [shape: f32[1,128], index: 2, kind: input, shape index: {}]   ;;  %s512_s3 = inlined_call_operand.vmem [shape: bf16[128,128], index: 3, kind: output, shape index: {}]  }
   0x1   :  { %v418_v0 = vld [vmem:[%s509_s1] sm:$0xff]   ;;  %v421_v3 = vld [vmem:[%s510_s0 + $0x8] sm:$0xff]   ;;  %v423_v5 = vld [vmem:[%s510_s0 + $0x10] sm:$0xff]  }
   0x2   :  { %v419_v1 = vld [vmem:[%s510_s0] sm:$0xff]   ;;  %398 = vmatprep.subr.bf16.mxu0 %v418_v0  ;;  %416 = vmatprep.subr.bf16.mxu1 %v418_v0  ;;  %v422_v4 = vld [vmem:[%s510_s0 + $0x28] sm:$0xff]   ;;  %v424_v6 = vld [vmem:[%s510_s0 + $0x30] sm:$0xff]  }
   0x3   :  { %v420_v2 = vld [vmem:[%s510_s0 + $0x20] sm:$0xff]   ;;  %399 = vmatpush3.bf16.msra.mxu0 %v418_v0  ;;  %417 = vmatpush3.bf16.msra.mxu1 %v418_v0  ;;  %v425_v7 = vld [vmem:[%s510_s0 + $0x18] sm:$0xff]  }
   0x4   :  { %400 = vmatprep.mubr.msk.bf16.mxu0 %vm86_vm0, %v419_v1  ;;  %408 = vmatprep.mubr.msk.bf16.mxu1 %vm86_vm0, %v420_v2  ;;  %v426_v8 = vld [vmem:[%s510_s0 + $0x38] sm:$0xff]   ;;  %v292_v10 = vld [vmem:[%s511_s2] ss:$0 sm:$0xff] }
   0x6   :  { %401 = vmatmul.mubr.msk.bf16.vlgmr.msra.gmra.mrb[0].mxu0 %vm86_vm0, %v421_v3  ;;  %409 = vmatmul.mubr.msk.bf16.vlgmr.msra.gmra.mrb[0].mxu1 %vm86_vm0, %v422_v4 }
   0x7   :  { %404 = vmatprep.mubr.msk.bf16.mxu0 %vm86_vm0, %v423_v5  ;;  %412 = vmatprep.mubr.msk.bf16.mxu1 %vm86_vm0, %v424_v6 }
   0xe   :  { %405 = vmatmul.mubr.msk.bf16.gmra.mrb[4].mxu0 %vm86_vm0, %v425_v7  ;;  %413 = vmatmul.mubr.msk.bf16.gmra.mrb[4].mxu1 %vm86_vm0, %v426_v8 }
  0xd9   :  { %v402_v9 = vpop.f32.mrb[0].mxu0  ;;  %v410_v11 = vpop.f32.mrb[0].mxu1 }
  0xda   :  { %v145_v12 = vpop.f32.mrb[1].mxu0  ;;  %v177_v13 = vpop.f32.mrb[1].mxu1  ;;  %v154_v16 = vadd.f32 %v402_v9, %v292_v10  ;;  %v186_v17 = vadd.f32 %v410_v11, %v292_v10 }
  0xdb   :  { %v403_v14 = vpop.f32.mrb[2].mxu0  ;;  %v411_v15 = vpop.f32.mrb[2].mxu1  ;;  %v146_v22 = vadd.f32 %v292_v10, %v145_v12  ;;  %v178_v23 = vadd.f32 %v292_v10, %v177_v13 }
  0xdc   :  { %v157_v18 = vadd.f32 %v403_v14, %v292_v10  ;;  %v189_v19 = vadd.f32 %v411_v15, %v292_v10  ;;  %v148_v20 = vpop.f32.mrb[3].mxu0  ;;  %v180_v21 = vpop.f32.mrb[3].mxu1 }
  0xdd   :  { %v149_v24 = vadd.f32 %v292_v10, %v148_v20  ;;  %v181_v25 = vadd.f32 %v292_v10, %v180_v21 }
  0xde   :  { %v350_v26 = vpack.c.bf16 %v157_v18, %v154_v16  ;;  %v370_v27 = vpack.c.bf16 %v189_v19, %v186_v17 }
  0xdf   :  { %v345_v28 = vpack.c.bf16 %v149_v24, %v146_v22  ;;  %v365_v29 = vpack.c.bf16 %v181_v25, %v178_v23 }
  0xe0   :  { %382 = vst [vmem:[%s512_s3 + $0x8] sm:$0xff] %v350_v26   ;;  %386 = vst [vmem:[%s512_s3 + $0x28] sm:$0xff] %v370_v27  }
  0xe1   :  { %346 = vst [vmem:[%s512_s3] sm:$0xff] %v345_v28   ;;  %385 = vst [vmem:[%s512_s3 + $0x20] sm:$0xff] %v365_v29   ;;  %v406_v30 = vpop.f32.mrb[4].mxu0  ;;  %v414_v31 = vpop.f32.mrb[4].mxu1 }
  0xe2   :  { %v161_v32 = vpop.f32.mrb[5].mxu0  ;;  %v193_v33 = vpop.f32.mrb[5].mxu1  ;;  %v170_v36 = vadd.f32 %v406_v30, %v292_v10  ;;  %v202_v37 = vadd.f32 %v414_v31, %v292_v10 }
  0xe3   :  { %v407_v34 = vpop.f32.mrb[6].mxu0  ;;  %v415_v35 = vpop.f32.mrb[6].mxu1  ;;  %v162_v42 = vadd.f32 %v292_v10, %v161_v32  ;;  %v194_v43 = vadd.f32 %v292_v10, %v193_v33 }
  0xe4   :  { %v173_v38 = vadd.f32 %v407_v34, %v292_v10  ;;  %v205_v39 = vadd.f32 %v415_v35, %v292_v10  ;;  %v164_v40 = vpop.f32.mrb[7].mxu0  ;;  %v196_v41 = vpop.f32.mrb[7].mxu1 }
  0xe5   :  { %v165_v44 = vadd.f32 %v292_v10, %v164_v40  ;;  %v197_v45 = vadd.f32 %v292_v10, %v196_v41 }
  0xe6   :  { %v360_v46 = vpack.c.bf16 %v173_v38, %v170_v36  ;;  %v380_v47 = vpack.c.bf16 %v205_v39, %v202_v37 }
  0xe7   :  { %v355_v48 = vpack.c.bf16 %v165_v44, %v162_v42  ;;  %v375_v49 = vpack.c.bf16 %v197_v45, %v194_v43 }
  0xe8   :  { %384 = vst [vmem:[%s512_s3 + $0x18] sm:$0xff] %v360_v46   ;;  %388 = vst [vmem:[%s512_s3 + $0x38] sm:$0xff] %v380_v47  }
  0xe9   :  { %383 = vst [vmem:[%s512_s3 + $0x10] sm:$0xff] %v355_v48   ;;  %387 = vst [vmem:[%s512_s3 + $0x30] sm:$0xff] %v375_v49  }

// kernel: resnet_features.35
= control target key start
LH: loop header
LB: loop body
LE: loop exit
PB: predicated region body
PF: predicated region fallthrough
CT: control target
= control target key end

     0   :  { %vm321_vm0 = vcmask 261120   ;;  %s1257_s1 = inlined_call_operand.vmem [shape: bf16[288,128], index: 1, kind: input, shape index: {}]   ;;  %s1258_s0 = inlined_call_operand.vmem [shape: bf16[128,288], index: 0, kind: input, shape index: {}]   ;;  %s1259_s3 = inlined_call_operand.vmem [shape: bf16[128,128], index: 3, kind: input, shape index: {}]   ;;  %s1260_s2 = inlined_call_operand.vmem [shape: f32[1,128], index: 2, kind: input, shape index: {}]   ;;  %s1261_s4 = inlined_call_operand.vmem [shape: bf16[128,128], index: 4, kind: output, shape index: {}]  }
   0x1   :  { %v967_v0 = vld [vmem:[%s1257_s1 + $0x40] sm:$0xff]   ;;  %v969_v2 = vld [vmem:[%s1257_s1 + $0x48] sm:$0xff]   ;;  %v971_v4 = vld [vmem:[%s1257_s1 + $0x50] sm:$0xff]  }
   0x2   :  { %v968_v1 = vld [vmem:[%s1257_s1] sm:$0xff]   ;;  %857 = vmatprep.subr.bf16.mxu0 %v967_v0  ;;  %951 = vmatprep.subr.bf16.mxu1 %v967_v0  ;;  %v970_v3 = vld [vmem:[%s1257_s1 + $0x8] sm:$0xff]   ;;  %v972_v5 = vld [vmem:[%s1257_s1 + $0x10] sm:$0xff]  }
   0x3   :  { %858 = vmatpush3.bf16.msra.mxu0 %v968_v1  ;;  %959 = vmatpush3.bf16.msra.mxu1 %v968_v1  ;;  %v973_v6 = vld [vmem:[%s1257_s1 + $0x58] sm:$0xff]   ;;  %v975_v8 = vld [vmem:[%s1257_s1 + $0x60] sm:$0xff]   ;;  %v977_v10 = vld [vmem:[%s1257_s1 + $0x68] sm:$0xff]  }
   0x4   :  { %859 = vmatprep.subr.bf16.mxu0 %v969_v2  ;;  %952 = vmatprep.subr.bf16.mxu1 %v969_v2  ;;  %v974_v7 = vld [vmem:[%s1257_s1 + $0x18] sm:$0xff]   ;;  %v976_v9 = vld [vmem:[%s1257_s1 + $0x20] sm:$0xff]   ;;  %v978_v13 = vld [vmem:[%s1257_s1 + $0x28] sm:$0xff]  }
   0x5   :  { %v985_v11 = vld [vmem:[%s1258_s0 + $0x4] ss:$12 sps:$4 sm:$0xff]   ;;  %v988_v12 = vld [vmem:[%s1258_s0 + $0x94] ss:$12 sps:$4 sm:$0xff]   ;;  %v981_v16 = vld [vmem:[%s1257_s1 + $0x78] sm:$0xff]  }
   0x6   :  { %v979_v14 = vld [vmem:[%s1257_s1 + $0x70] sm:$0xff]   ;;  %378 = vmatprep.mubr.bf16.mxu0 %v985_v11  ;;  %426 = vmatprep.mubr.bf16.mxu1 %v988_v12  ;;  %v982_v17 = vld [vmem:[%s1257_s1 + $0x38] sm:$0xff]   ;;  %v983_v18 = vld [vmem:[%s1258_s0] ss:$12 sps:$4 sm:$0xff]  }
   0x7   :  { %860 = vmatpush3.bf16.msra.mxu0 %v970_v3  ;;  %960 = vmatpush3.bf16.msra.mxu1 %v970_v3  ;;  %v980_v15 = vld [vmem:[%s1257_s1 + $0x30] sm:$0xff]   ;;  %v989_v19 = vld [vmem:[%s1257_s1 + $0x80] sm:$0xff]   ;;  %v990_v21 = vld [vmem:[%s1258_s0 + $0x1c] ss:$12 sps:$4 sm:$0xff]  }
   0x8   :  { %861 = vmatprep.subr.bf16.mxu0 %v971_v4  ;;  %953 = vmatprep.subr.bf16.mxu1 %v971_v4  ;;  %v986_v20 = vld [vmem:[%s1258_s0 + $0x90] ss:$12 sps:$4 sm:$0xff]   ;;  %v992_v22 = vld [vmem:[%s1258_s0 + $0xac] ss:$12 sps:$4 sm:$0xff]   ;;  %v995_v25 = vld [vmem:[%s1258_s0 + $0xa8] ss:$12 sps:$4 sm:$0xff]  }
   0x9   :  { %v996_v23 = vld [vmem:[%s1257_s1 + $0x88] sm:$0xff]   ;;  %v994_v24 = vld [vmem:[%s1258_s0 + $0x18] ss:$12 sps:$4 sm:$0xff]   ;;  %v997_v26 = vld [vmem:[%s1258_s0 + $0x34] ss:$12 sps:$4 sm:$0xff]  }
   0xa   :  { %v999_v27 = vld [vmem:[%s1258_s0 + $0x8] ss:$12 sps:$4 sm:$0xff]   ;;  %v1000_v28 = vld [vmem:[%s1258_s0 + $0x30] ss:$12 sps:$4 sm:$0xff]   ;;  %v1001_v29 = vld [vmem:[%s1258_s0 + $0x20] ss:$12 sps:$4 sm:$0xff]  }
   0xb   :  { %862 = vmatpush3.bf16.msra.mxu0 %v972_v5  ;;  %961 = vmatpush3.bf16.msra.mxu1 %v972_v5  ;;  %v1002_v30 = vld [vmem:[%s1258_s0 + $0x4c] ss:$12 sps:$4 sm:$0xff]   ;;  %v1005_v32 = vld [vmem:[%s1258_s0 + $0x48] ss:$12 sps:$4 sm:$0xff]   ;;  %v1006_v33 = vld [vmem:[%s1258_s0 + $0x50] ss:$12 sps:$4 sm:$0xff]  }
   0xc   :  { %863 = vmatprep.subr.bf16.mxu0 %v973_v6  ;;  %954 = vmatprep.subr.bf16.mxu1 %v973_v6  ;;  %v1004_v31 = vld [vmem:[%s1258_s0 + $0x38] ss:$12 sps:$4 sm:$0xff]   ;;  %v1009_v35 = vld [vmem:[%s1258_s0 + $0x68] ss:$12 sps:$4 sm:$0xff]   ;;  %v1010_v36 = vld [vmem:[%s1258_s0 + $0x60] ss:$12 sps:$4 sm:$0xff]  }
   0xd   :  { %v1007_v34 = vld [vmem:[%s1258_s0 + $0x64] ss:$12 sps:$4 sm:$0xff]   ;;  %v1011_v37 = vld [vmem:[%s1258_s0 + $0x80] ss:$12 sps:$4 sm:$0xff]   ;;  %v1012_v38 = vld [vmem:[%s1258_s0 + $0x7c] ss:$12 sps:$4 sm:$0xff]  }
   0xe   :  { %v1014_v39 = vld [vmem:[%s1258_s0 + $0x98] ss:$12 sps:$4 sm:$0xff]   ;;  %v1016_v41 = vld [vmem:[%s1258_s0 + $0xb0] ss:$12 sps:$4 sm:$0xff]   ;;  %v843_v2 = vld [vmem:[%s1259_s3 + $0x8] sm:$0xff]  }
   0xf   :  { %864 = vmatpush3.bf16.msra.mxu0 %v974_v7  ;;  %962 = vmatpush3.bf16.msra.mxu1 %v974_v7  ;;  %v1015_v40 = vld [vmem:[%s1258_s0 + $0x78] ss:$12 sps:$4 sm:$0xff]   ;;  %v1190_v3 = vld [vmem:[%s1260_s2] ss:$0 sm:$0xff]  ;;  %v777_v6 = vunpack.c.l.bf16 %v843_v2 }
  0x10   :  { %865 = vmatprep.subr.bf16.mxu0 %v975_v8  ;;  %955 = vmatprep.subr.bf16.mxu1 %v975_v8  ;;  %v772_v4 = vld [vmem:[%s1259_s3] sm:$0xff]  }
  0x13   :  { %866 = vmatpush3.bf16.msra.mxu0 %v976_v9  ;;  %963 = vmatpush3.bf16.msra.mxu1 %v976_v9 }
  0x14   :  { %867 = vmatprep.subr.bf16.mxu0 %v977_v10  ;;  %956 = vmatprep.subr.bf16.mxu1 %v977_v10  ;;  %v773_v10 = vunpack.c.l.bf16 %v772_v4 }
  0x17   :  { %868 = vmatpush3.bf16.msra.mxu0 %v978_v13  ;;  %964 = vmatpush3.bf16.msra.mxu1 %v978_v13 }
  0x18   :  { %869 = vmatprep.subr.bf16.mxu0 %v979_v14  ;;  %957 = vmatprep.subr.bf16.mxu1 %v979_v14 }
  0x1b   :  { %870 = vmatpush3.bf16.msra.mxu0 %v980_v15  ;;  %965 = vmatpush3.bf16.msra.mxu1 %v980_v15  ;;  %v778_v15 = vunpack.c.h.bf16 %v843_v2 }
  0x1c   :  { %871 = vmatprep.subr.bf16.mxu0 %v981_v16  ;;  %958 = vmatprep.subr.bf16.mxu1 %v981_v16 }
  0x1f   :  { %872 = vmatpush3.bf16.msra.mxu0 %v982_v17  ;;  %966 = vmatpush3.bf16.msra.mxu1 %v982_v17 }
  0x20   :  { %931 = vmatprep.subr.bf16.mxu1 %v989_v19 }
  0x22   :  { %379 = vmatmul.mubr.bf16.vlgmr.msra.gmra.mrb[0].mxu0 %v983_v18  ;;  %427 = vmatmul.mubr.bf16.vlgmr.msra.gmra.mrb[0].mxu1 %v986_v20 }
  0x23   :  { %932 = vmatpush3.bf16.msra.mxu1 %v989_v19  ;;  %386 = vmatprep.mubr.bf16.mxu0 %v990_v21  ;;  %v774_v21 = vunpack.c.h.bf16 %v772_v4 }
  0x24   :  { %434 = vmatprep.mubr.bf16.mxu1 %v992_v22  ;;  %933 = vmatprep.subr.bf16.mxu1 %v996_v23 }
  0x27   :  { %934 = vmatpush3.bf16.msra.mxu1 %v996_v23 }
  0x2a   :  { %387 = vmatmul.mubr.bf16.gmra.mrb[4].mxu0 %v994_v24  ;;  %435 = vmatmul.mubr.bf16.gmra.mrb[4].mxu1 %v995_v25 }
  0x2b   :  { %394 = vmatprep.mubr.bf16.mxu0 %v997_v26  ;;  %935 = vmatprep.mubr.msk.bf16.mxu1 %vm321_vm0, %v999_v27 }
  0x32   :  { %395 = vmatmul.mubr.bf16.gmra.mrb[8].mxu0 %v1000_v28  ;;  %936 = vmatmul.mubr.msk.bf16.vlgmr.msra.gmra.mrb[8].mxu1 %vm321_vm0, %v1001_v29 }
  0x33   :  { %402 = vmatprep.mubr.bf16.mxu0 %v1002_v30  ;;  %939 = vmatprep.mubr.msk.bf16.mxu1 %vm321_vm0, %v1004_v31  ;;  %v844_v30 = vld [vmem:[%s1259_s3 + $0x10] sm:$0xff]  }
  0x3a   :  { %403 = vmatmul.mubr.bf16.gmra.mrb[12].mxu0 %v1005_v32  ;;  %940 = vmatmul.mubr.msk.bf16.gmra.mrb[12].mxu1 %vm321_vm0, %v1006_v33 }
  0x3b   :  { %410 = vmatprep.mubr.bf16.mxu0 %v1007_v34  ;;  %943 = vmatprep.mubr.msk.bf16.mxu1 %vm321_vm0, %v1009_v35 }
  0x42   :  { %411 = vmatmul.mubr.bf16.gmra.mrb[16].mxu0 %v1010_v36  ;;  %944 = vmatmul.mubr.msk.bf16.gmra.mrb[16].mxu1 %vm321_vm0, %v1011_v37 }
  0x43   :  { %418 = vmatprep.mubr.bf16.mxu0 %v1012_v38  ;;  %947 = vmatprep.mubr.msk.bf16.mxu1 %vm321_vm0, %v1014_v39  ;;  %v845_v38 = vld [vmem:[%s1259_s3 + $0x18] sm:$0xff]  }
  0x4a   :  { %419 = vmatmul.mubr.bf16.gmra.mrb[20].mxu0 %v1015_v40  ;;  %948 = vmatmul.mubr.msk.bf16.gmra.mrb[20].mxu1 %vm321_vm0, %v1016_v41  ;;  %v781_v40 = vunpack.c.l.bf16 %v844_v30 }
  0xf5   :  { %v873_v42 = vpop.f32.mrb[0].mxu0  ;;  %v909_v43 = vpop.f32.mrb[0].mxu1 }
  0xf6   :  { %v874_v44 = vpop.f32.mrb[1].mxu0  ;;  %v910_v45 = vpop.f32.mrb[1].mxu1 }
  0xf7   :  { %v875_v46 = vadd.f32 %v874_v44, %v873_v42  ;;  %v876_v47 = vpop.f32.mrb[2].mxu0  ;;  %v1176_v48 = vadd.f32 %v910_v45, %v909_v43  ;;  %v912_v49 = vpop.f32.mrb[2].mxu1  ;;  %v782_v44 = vunpack.c.h.bf16 %v844_v30 }
  0xf8   :  { %v877_v50 = vpop.f32.mrb[3].mxu0  ;;  %v913_v51 = vpop.f32.mrb[3].mxu1 }
  0xf9   :  { %v878_v52 = vadd.f32 %v877_v50, %v876_v47  ;;  %v1178_v53 = vadd.f32 %v913_v51, %v912_v49  ;;  %v381_v9 = vadd.f32 %v875_v46, %v1190_v3 }
  0xfb   :  { %v384_v20 = vadd.f32 %v878_v52, %v1190_v3  ;;  %v785_v52 = vunpack.c.l.bf16 %v845_v38 }
  0xfd   :  { %v879_v54 = vpop.f32.mrb[4].mxu0  ;;  %v915_v55 = vpop.f32.mrb[4].mxu1 }
  0xfe   :  { %v880_v56 = vpop.f32.mrb[5].mxu0  ;;  %v916_v57 = vpop.f32.mrb[5].mxu1 }
  0xff   :  { %v881_v58 = vadd.f32 %v880_v56, %v879_v54  ;;  %v882_v59 = vpop.f32.mrb[6].mxu0  ;;  %v1180_v60 = vadd.f32 %v916_v57, %v915_v55  ;;  %v918_v61 = vpop.f32.mrb[6].mxu1 }
 0x100   :  { %v883_v62 = vpop.f32.mrb[7].mxu0  ;;  %v919_v63 = vpop.f32.mrb[7].mxu1 }
 0x101   :  { %v884_v0 = vadd.f32 %v883_v62, %v882_v59  ;;  %v1182_v1 = vadd.f32 %v919_v63, %v918_v61  ;;  %v389_v5 = vadd.f32 %v881_v58, %v1190_v3  ;;  %v786_v63 = vunpack.c.h.bf16 %v845_v38 }
 0x102   :  { %v437_v30 = vadd.f32 %v1180_v60, %v1190_v3 }
 0x103   :  { %v392_v14 = vadd.f32 %v884_v0, %v1190_v3 }
 0x105   :  { %v885_v7 = vpop.f32.mrb[8].mxu0  ;;  %v937_v8 = vpop.f32.mrb[8].mxu1 }
 0x106   :  { %v486_v11 = vadd.f32 %v937_v8, %v389_v5  ;;  %v886_v12 = vpop.f32.mrb[9].mxu0  ;;  %v477_v13 = vpop.f32.mrb[9].mxu1 }
 0x107   :  { %v887_v16 = vadd.f32 %v886_v12, %v885_v7  ;;  %v478_v17 = vadd.f32 %v477_v13, %v381_v9  ;;  %v888_v18 = vpop.f32.mrb[10].mxu0  ;;  %v938_v19 = vpop.f32.mrb[10].mxu1  ;;  %v846_v9 = vld [vmem:[%s1259_s3 + $0x20] sm:$0xff]  }
 0x108   :  { %v574_v22 = vadd.f32 %v777_v6, %v486_v11  ;;  %v489_v23 = vadd.f32 %v938_v19, %v392_v14  ;;  %v889_v24 = vpop.f32.mrb[11].mxu0  ;;  %v480_v25 = vpop.f32.mrb[11].mxu1 }
 0x109   :  { %v572_v26 = vadd.f32 %v773_v10, %v478_v17  ;;  %v890_v27 = vadd.f32 %v889_v24, %v888_v18  ;;  %v481_v28 = vadd.f32 %v480_v25, %v384_v20  ;;  %v397_v39 = vadd.f32 %v887_v16, %v1190_v3  ;;  %v849_v24 = vld [vmem:[%s1259_s3 + $0x38] sm:$0xff]  }
 0x10a   :  { %v575_v29 = vadd.f32 %v778_v15, %v489_v23  ;;  %v590_v32 = vmax.f32 %v574_v22, 0.0  ;;  %v789_v17 = vunpack.c.l.bf16 %v846_v9 }
 0x10b   :  { %v573_v31 = vadd.f32 %v774_v21, %v481_v28  ;;  %v588_v34 = vmax.f32 %v572_v26, 0.0  ;;  %v400_v51 = vadd.f32 %v890_v27, %v1190_v3  ;;  %v790_v28 = vunpack.c.h.bf16 %v846_v9 }
 0x10c   :  { %v591_v33 = vmax.f32 %v575_v29, 0.0  ;;  %v848_v29 = vld [vmem:[%s1259_s3 + $0x30] sm:$0xff]  }
 0x10d   :  { %v589_v35 = vmax.f32 %v573_v31, 0.0  ;;  %v891_v36 = vpop.f32.mrb[12].mxu0  ;;  %v941_v37 = vpop.f32.mrb[12].mxu1  ;;  %v801_v31 = vunpack.c.l.bf16 %v849_v24  ;;  %v797_v60 = vunpack.c.l.bf16 %v848_v29 }
 0x10e   :  { %v811_v41 = vpack.c.bf16 %v591_v33, %v590_v32  ;;  %v892_v42 = vpop.f32.mrb[13].mxu0  ;;  %v493_v43 = vpop.f32.mrb[13].mxu1 }
 0x10f   :  { %v806_v45 = vpack.c.bf16 %v589_v35, %v588_v34  ;;  %v893_v46 = vadd.f32 %v892_v42, %v891_v36  ;;  %v494_v47 = vadd.f32 %v493_v43, %v397_v39  ;;  %v894_v49 = vpop.f32.mrb[14].mxu0  ;;  %v942_v50 = vpop.f32.mrb[14].mxu1  ;;  %v847_v36 = vld [vmem:[%s1259_s3 + $0x28] sm:$0xff]   ;;  %v802_v42 = vunpack.c.h.bf16 %v849_v24 }
 0x110   :  { %850 = vst [vmem:[%s1261_s4 + $0x8] sm:$0xff] %v811_v41   ;;  %v895_v54 = vpop.f32.mrb[15].mxu0  ;;  %v496_v55 = vpop.f32.mrb[15].mxu1  ;;  %v440_v41 = vadd.f32 %v1182_v1, %v1190_v3 }
 0x111   :  { %807 = vst [vmem:[%s1261_s4] sm:$0xff] %v806_v45   ;;  %v405_v56 = vadd.f32 %v893_v46, %v1190_v3  ;;  %v576_v57 = vadd.f32 %v781_v40, %v494_v47  ;;  %v896_v58 = vadd.f32 %v895_v54, %v894_v49  ;;  %v497_v59 = vadd.f32 %v496_v55, %v400_v51 }
 0x112   :  { %v798_v49 = vunpack.c.h.bf16 %v848_v29  ;;  %v793_v51 = vunpack.c.l.bf16 %v847_v36 }
 0x113   :  { %v502_v61 = vadd.f32 %v941_v37, %v405_v56  ;;  %v408_v62 = vadd.f32 %v896_v58, %v1190_v3  ;;  %v577_v0 = vadd.f32 %v782_v44, %v497_v59  ;;  %v592_v4 = vmax.f32 %v576_v57, 0.0 }
 0x114   :  { %v429_v37 = vadd.f32 %v1176_v48, %v1190_v3  ;;  %v432_v48 = vadd.f32 %v1178_v53, %v1190_v3 }
 0x115   :  { %v578_v2 = vadd.f32 %v785_v52, %v502_v61  ;;  %v505_v5 = vadd.f32 %v942_v50, %v408_v62  ;;  %v593_v6 = vmax.f32 %v577_v0, 0.0  ;;  %v897_v7 = vpop.f32.mrb[16].mxu0  ;;  %v945_v8 = vpop.f32.mrb[16].mxu1 }
 0x116   :  { %v898_v10 = vpop.f32.mrb[17].mxu0  ;;  %v509_v11 = vpop.f32.mrb[17].mxu1 }
 0x117   :  { %v579_v12 = vadd.f32 %v786_v63, %v505_v5  ;;  %v816_v13 = vpack.c.bf16 %v593_v6, %v592_v4  ;;  %v899_v14 = vadd.f32 %v898_v10, %v897_v7  ;;  %v900_v15 = vpop.f32.mrb[18].mxu0  ;;  %v946_v16 = vpop.f32.mrb[18].mxu1  ;;  %v594_v20 = vmax.f32 %v578_v2, 0.0 }
 0x118   :  { %v901_v18 = vpop.f32.mrb[19].mxu0  ;;  %v512_v19 = vpop.f32.mrb[19].mxu1  ;;  %v794_v4 = vunpack.c.h.bf16 %v847_v36 }
 0x119   :  { %v595_v21 = vmax.f32 %v579_v12, 0.0  ;;  %851 = vst [vmem:[%s1261_s4 + $0x10] sm:$0xff] %v816_v13   ;;  %v413_v22 = vadd.f32 %v899_v14, %v1190_v3  ;;  %v902_v23 = vadd.f32 %v901_v18, %v900_v15 }
 0x11b   :  { %v821_v25 = vpack.c.bf16 %v595_v21, %v594_v20  ;;  %v510_v26 = vadd.f32 %v509_v11, %v413_v22  ;;  %v416_v27 = vadd.f32 %v902_v23, %v1190_v3 }
 0x11d   :  { %852 = vst [vmem:[%s1261_s4 + $0x18] sm:$0xff] %v821_v25   ;;  %v580_v32 = vadd.f32 %v789_v17, %v510_v26  ;;  %v513_v33 = vadd.f32 %v512_v19, %v416_v27  ;;  %v903_v34 = vpop.f32.mrb[20].mxu0  ;;  %v949_v35 = vpop.f32.mrb[20].mxu1 }
 0x11e   :  { %v534_v38 = vadd.f32 %v949_v35, %v437_v30  ;;  %v904_v39 = vpop.f32.mrb[21].mxu0  ;;  %v525_v40 = vpop.f32.mrb[21].mxu1 }
 0x11f   :  { %v581_v43 = vadd.f32 %v790_v28, %v513_v33  ;;  %v905_v44 = vadd.f32 %v904_v39, %v903_v34  ;;  %v526_v45 = vadd.f32 %v525_v40, %v429_v37  ;;  %v906_v46 = vpop.f32.mrb[22].mxu0  ;;  %v950_v47 = vpop.f32.mrb[22].mxu1  ;;  %v596_v56 = vmax.f32 %v580_v32, 0.0 }
 0x120   :  { %v586_v50 = vadd.f32 %v801_v31, %v534_v38  ;;  %v537_v52 = vadd.f32 %v950_v47, %v440_v41  ;;  %v907_v54 = vpop.f32.mrb[23].mxu0  ;;  %v528_v55 = vpop.f32.mrb[23].mxu1 }
 0x121   :  { %v597_v57 = vmax.f32 %v581_v43, 0.0  ;;  %v421_v58 = vadd.f32 %v905_v44, %v1190_v3  ;;  %v908_v1 = vadd.f32 %v907_v54, %v906_v46  ;;  %v584_v59 = vadd.f32 %v797_v60, %v526_v45 }
 0x122   :  { %v587_v61 = vadd.f32 %v802_v42, %v537_v52  ;;  %v529_v62 = vadd.f32 %v528_v55, %v432_v48  ;;  %v602_v5 = vmax.f32 %v586_v50, 0.0 }
 0x123   :  { %v826_v63 = vpack.c.bf16 %v597_v57, %v596_v56  ;;  %v518_v0 = vadd.f32 %v945_v8, %v421_v58  ;;  %v424_v2 = vadd.f32 %v908_v1, %v1190_v3  ;;  %v600_v10 = vmax.f32 %v584_v59, 0.0 }
 0x124   :  { %v603_v6 = vmax.f32 %v587_v61, 0.0  ;;  %v585_v7 = vadd.f32 %v798_v49, %v529_v62 }
 0x125   :  { %853 = vst [vmem:[%s1261_s4 + $0x20] sm:$0xff] %v826_v63   ;;  %v582_v53 = vadd.f32 %v793_v51, %v518_v0  ;;  %v521_v9 = vadd.f32 %v946_v16, %v424_v2 }
 0x126   :  { %v841_v11 = vpack.c.bf16 %v603_v6, %v602_v5  ;;  %v601_v12 = vmax.f32 %v585_v7, 0.0 }
 0x127   :  { %v583_v13 = vadd.f32 %v794_v4, %v521_v9  ;;  %v598_v3 = vmax.f32 %v582_v53, 0.0 }
 0x128   :  { %856 = vst [vmem:[%s1261_s4 + $0x38] sm:$0xff] %v841_v11   ;;  %v836_v8 = vpack.c.bf16 %v601_v12, %v600_v10 }
 0x129   :  { %v599_v14 = vmax.f32 %v583_v13, 0.0 }
 0x12a   :  { %855 = vst [vmem:[%s1261_s4 + $0x30] sm:$0xff] %v836_v8  }
 0x12b   :  { %v831_v15 = vpack.c.bf16 %v599_v14, %v598_v3 }
 0x12d   :  { %854 = vst [vmem:[%s1261_s4 + $0x28] sm:$0xff] %v831_v15  }

// kernel: resnet_features.36
= control target key start
LH: loop header
LB: loop body
LE: loop exit
PB: predicated region body
PF: predicated region fallthrough
CT: control target
= control target key end

     0   :  { %vm318_vm0 = vcmask 261120   ;;  %s1138_s1 = inlined_call_operand.vmem [shape: bf16[288,128], index: 1, kind: input, shape index: {}]   ;;  %s1139_s0 = inlined_call_operand.vmem [shape: bf16[128,288], index: 0, kind: input, shape index: {}]   ;;  %s1140_s2 = inlined_call_operand.vmem [shape: f32[1,128], index: 2, kind: input, shape index: {}]   ;;  %s1141_s3 = inlined_call_operand.vmem [shape: bf16[128,128], index: 3, kind: output, shape index: {}]  }
   0x1   :  { %v877_v0 = vld [vmem:[%s1138_s1 + $0x40] sm:$0xff]   ;;  %v879_v2 = vld [vmem:[%s1138_s1 + $0x48] sm:$0xff]   ;;  %v881_v4 = vld [vmem:[%s1138_s1 + $0x50] sm:$0xff]  }
   0x2   :  { %v878_v1 = vld [vmem:[%s1138_s1] sm:$0xff]   ;;  %767 = vmatprep.subr.bf16.mxu0 %v877_v0  ;;  %861 = vmatprep.subr.bf16.mxu1 %v877_v0  ;;  %v880_v3 = vld [vmem:[%s1138_s1 + $0x8] sm:$0xff]   ;;  %v882_v5 = vld [vmem:[%s1138_s1 + $0x10] sm:$0xff]  }
   0x3   :  { %768 = vmatpush3.bf16.msra.mxu0 %v878_v1  ;;  %869 = vmatpush3.bf16.msra.mxu1 %v878_v1  ;;  %v883_v6 = vld [vmem:[%s1138_s1 + $0x58] sm:$0xff]   ;;  %v885_v8 = vld [vmem:[%s1138_s1 + $0x60] sm:$0xff]   ;;  %v887_v10 = vld [vmem:[%s1138_s1 + $0x68] sm:$0xff]  }
   0x4   :  { %769 = vmatprep.subr.bf16.mxu0 %v879_v2  ;;  %862 = vmatprep.subr.bf16.mxu1 %v879_v2  ;;  %v884_v7 = vld [vmem:[%s1138_s1 + $0x18] sm:$0xff]   ;;  %v886_v9 = vld [vmem:[%s1138_s1 + $0x20] sm:$0xff]   ;;  %v888_v13 = vld [vmem:[%s1138_s1 + $0x28] sm:$0xff]  }
   0x5   :  { %v895_v11 = vld [vmem:[%s1139_s0 + $0x4] ss:$12 sps:$4 sm:$0xff]   ;;  %v898_v12 = vld [vmem:[%s1139_s0 + $0x94] ss:$12 sps:$4 sm:$0xff]   ;;  %v891_v16 = vld [vmem:[%s1138_s1 + $0x78] sm:$0xff]  }
   0x6   :  { %v889_v14 = vld [vmem:[%s1138_s1 + $0x70] sm:$0xff]   ;;  %375 = vmatprep.mubr.bf16.mxu0 %v895_v11  ;;  %423 = vmatprep.mubr.bf16.mxu1 %v898_v12  ;;  %v892_v17 = vld [vmem:[%s1138_s1 + $0x38] sm:$0xff]   ;;  %v893_v18 = vld [vmem:[%s1139_s0] ss:$12 sps:$4 sm:$0xff]  }
   0x7   :  { %770 = vmatpush3.bf16.msra.mxu0 %v880_v3  ;;  %870 = vmatpush3.bf16.msra.mxu1 %v880_v3  ;;  %v890_v15 = vld [vmem:[%s1138_s1 + $0x30] sm:$0xff]   ;;  %v899_v19 = vld [vmem:[%s1138_s1 + $0x80] sm:$0xff]   ;;  %v900_v21 = vld [vmem:[%s1139_s0 + $0x1c] ss:$12 sps:$4 sm:$0xff]  }
   0x8   :  { %771 = vmatprep.subr.bf16.mxu0 %v881_v4  ;;  %863 = vmatprep.subr.bf16.mxu1 %v881_v4  ;;  %v896_v20 = vld [vmem:[%s1139_s0 + $0x90] ss:$12 sps:$4 sm:$0xff]   ;;  %v902_v22 = vld [vmem:[%s1139_s0 + $0xac] ss:$12 sps:$4 sm:$0xff]   ;;  %v905_v25 = vld [vmem:[%s1139_s0 + $0xa8] ss:$12 sps:$4 sm:$0xff]  }
   0x9   :  { %v906_v23 = vld [vmem:[%s1138_s1 + $0x88] sm:$0xff]   ;;  %v904_v24 = vld [vmem:[%s1139_s0 + $0x18] ss:$12 sps:$4 sm:$0xff]   ;;  %v907_v26 = vld [vmem:[%s1139_s0 + $0x34] ss:$12 sps:$4 sm:$0xff]  }
   0xa   :  { %v909_v27 = vld [vmem:[%s1139_s0 + $0x8] ss:$12 sps:$4 sm:$0xff]   ;;  %v910_v28 = vld [vmem:[%s1139_s0 + $0x30] ss:$12 sps:$4 sm:$0xff]   ;;  %v911_v29 = vld [vmem:[%s1139_s0 + $0x20] ss:$12 sps:$4 sm:$0xff]  }
   0xb   :  { %772 = vmatpush3.bf16.msra.mxu0 %v882_v5  ;;  %871 = vmatpush3.bf16.msra.mxu1 %v882_v5  ;;  %v912_v30 = vld [vmem:[%s1139_s0 + $0x4c] ss:$12 sps:$4 sm:$0xff]   ;;  %v915_v32 = vld [vmem:[%s1139_s0 + $0x48] ss:$12 sps:$4 sm:$0xff]   ;;  %v916_v33 = vld [vmem:[%s1139_s0 + $0x50] ss:$12 sps:$4 sm:$0xff]  }
   0xc   :  { %773 = vmatprep.subr.bf16.mxu0 %v883_v6  ;;  %864 = vmatprep.subr.bf16.mxu1 %v883_v6  ;;  %v914_v31 = vld [vmem:[%s1139_s0 + $0x38] ss:$12 sps:$4 sm:$0xff]   ;;  %v919_v35 = vld [vmem:[%s1139_s0 + $0x68] ss:$12 sps:$4 sm:$0xff]   ;;  %v920_v36 = vld [vmem:[%s1139_s0 + $0x60] ss:$12 sps:$4 sm:$0xff]  }
   0xd   :  { %v917_v34 = vld [vmem:[%s1139_s0 + $0x64] ss:$12 sps:$4 sm:$0xff]   ;;  %v921_v37 = vld [vmem:[%s1139_s0 + $0x80] ss:$12 sps:$4 sm:$0xff]   ;;  %v922_v38 = vld [vmem:[%s1139_s0 + $0x7c] ss:$12 sps:$4 sm:$0xff]  }
   0xe   :  { %v924_v39 = vld [vmem:[%s1139_s0 + $0x98] ss:$12 sps:$4 sm:$0xff]   ;;  %v926_v41 = vld [vmem:[%s1139_s0 + $0xb0] ss:$12 sps:$4 sm:$0xff]   ;;  %v1092_v2 = vld [vmem:[%s1140_s2] ss:$0 sm:$0xff] }
   0xf   :  { %774 = vmatpush3.bf16.msra.mxu0 %v884_v7  ;;  %872 = vmatpush3.bf16.msra.mxu1 %v884_v7  ;;  %v925_v40 = vld [vmem:[%s1139_s0 + $0x78] ss:$12 sps:$4 sm:$0xff]  }
  0x10   :  { %775 = vmatprep.subr.bf16.mxu0 %v885_v8  ;;  %865 = vmatprep.subr.bf16.mxu1 %v885_v8 }
  0x13   :  { %776 = vmatpush3.bf16.msra.mxu0 %v886_v9  ;;  %873 = vmatpush3.bf16.msra.mxu1 %v886_v9 }
  0x14   :  { %777 = vmatprep.subr.bf16.mxu0 %v887_v10  ;;  %866 = vmatprep.subr.bf16.mxu1 %v887_v10 }
  0x17   :  { %778 = vmatpush3.bf16.msra.mxu0 %v888_v13  ;;  %874 = vmatpush3.bf16.msra.mxu1 %v888_v13 }
  0x18   :  { %779 = vmatprep.subr.bf16.mxu0 %v889_v14  ;;  %867 = vmatprep.subr.bf16.mxu1 %v889_v14 }
  0x1b   :  { %780 = vmatpush3.bf16.msra.mxu0 %v890_v15  ;;  %875 = vmatpush3.bf16.msra.mxu1 %v890_v15 }
  0x1c   :  { %781 = vmatprep.subr.bf16.mxu0 %v891_v16  ;;  %868 = vmatprep.subr.bf16.mxu1 %v891_v16 }
  0x1f   :  { %782 = vmatpush3.bf16.msra.mxu0 %v892_v17  ;;  %876 = vmatpush3.bf16.msra.mxu1 %v892_v17 }
  0x20   :  { %841 = vmatprep.subr.bf16.mxu1 %v899_v19 }
  0x22   :  { %376 = vmatmul.mubr.bf16.vlgmr.msra.gmra.mrb[0].mxu0 %v893_v18  ;;  %424 = vmatmul.mubr.bf16.vlgmr.msra.gmra.mrb[0].mxu1 %v896_v20 }
  0x23   :  { %842 = vmatpush3.bf16.msra.mxu1 %v899_v19  ;;  %383 = vmatprep.mubr.bf16.mxu0 %v900_v21 }
  0x24   :  { %431 = vmatprep.mubr.bf16.mxu1 %v902_v22  ;;  %843 = vmatprep.subr.bf16.mxu1 %v906_v23 }
  0x27   :  { %844 = vmatpush3.bf16.msra.mxu1 %v906_v23 }
  0x2a   :  { %384 = vmatmul.mubr.bf16.gmra.mrb[4].mxu0 %v904_v24  ;;  %432 = vmatmul.mubr.bf16.gmra.mrb[4].mxu1 %v905_v25 }
  0x2b   :  { %391 = vmatprep.mubr.bf16.mxu0 %v907_v26  ;;  %845 = vmatprep.mubr.msk.bf16.mxu1 %vm318_vm0, %v909_v27 }
  0x32   :  { %392 = vmatmul.mubr.bf16.gmra.mrb[8].mxu0 %v910_v28  ;;  %846 = vmatmul.mubr.msk.bf16.vlgmr.msra.gmra.mrb[8].mxu1 %vm318_vm0, %v911_v29 }
  0x33   :  { %399 = vmatprep.mubr.bf16.mxu0 %v912_v30  ;;  %849 = vmatprep.mubr.msk.bf16.mxu1 %vm318_vm0, %v914_v31 }
  0x3a   :  { %400 = vmatmul.mubr.bf16.gmra.mrb[12].mxu0 %v915_v32  ;;  %850 = vmatmul.mubr.msk.bf16.gmra.mrb[12].mxu1 %vm318_vm0, %v916_v33 }
  0x3b   :  { %407 = vmatprep.mubr.bf16.mxu0 %v917_v34  ;;  %853 = vmatprep.mubr.msk.bf16.mxu1 %vm318_vm0, %v919_v35 }
  0x42   :  { %408 = vmatmul.mubr.bf16.gmra.mrb[16].mxu0 %v920_v36  ;;  %854 = vmatmul.mubr.msk.bf16.gmra.mrb[16].mxu1 %vm318_vm0, %v921_v37 }
  0x43   :  { %415 = vmatprep.mubr.bf16.mxu0 %v922_v38  ;;  %857 = vmatprep.mubr.msk.bf16.mxu1 %vm318_vm0, %v924_v39 }
  0x4a   :  { %416 = vmatmul.mubr.bf16.gmra.mrb[20].mxu0 %v925_v40  ;;  %858 = vmatmul.mubr.msk.bf16.gmra.mrb[20].mxu1 %vm318_vm0, %v926_v41 }
  0xf5   :  { %v783_v42 = vpop.f32.mrb[0].mxu0  ;;  %v819_v43 = vpop.f32.mrb[0].mxu1 }
  0xf6   :  { %v784_v44 = vpop.f32.mrb[1].mxu0  ;;  %v820_v45 = vpop.f32.mrb[1].mxu1 }
  0xf7   :  { %v785_v46 = vadd.f32 %v784_v44, %v783_v42  ;;  %v786_v47 = vpop.f32.mrb[2].mxu0  ;;  %v1081_v48 = vadd.f32 %v820_v45, %v819_v43  ;;  %v822_v49 = vpop.f32.mrb[2].mxu1 }
  0xf8   :  { %v787_v50 = vpop.f32.mrb[3].mxu0  ;;  %v823_v51 = vpop.f32.mrb[3].mxu1 }
  0xf9   :  { %v788_v52 = vadd.f32 %v787_v50, %v786_v47  ;;  %v1083_v53 = vadd.f32 %v823_v51, %v822_v49  ;;  %v378_v6 = vadd.f32 %v785_v46, %v1092_v2 }
  0xfb   :  { %v381_v15 = vadd.f32 %v788_v52, %v1092_v2 }
  0xfd   :  { %v789_v54 = vpop.f32.mrb[4].mxu0  ;;  %v825_v55 = vpop.f32.mrb[4].mxu1 }
  0xfe   :  { %v790_v56 = vpop.f32.mrb[5].mxu0  ;;  %v826_v57 = vpop.f32.mrb[5].mxu1 }
  0xff   :  { %v791_v58 = vadd.f32 %v790_v56, %v789_v54  ;;  %v792_v59 = vpop.f32.mrb[6].mxu0  ;;  %v1085_v60 = vadd.f32 %v826_v57, %v825_v55  ;;  %v828_v61 = vpop.f32.mrb[6].mxu1 }
 0x100   :  { %v793_v62 = vpop.f32.mrb[7].mxu0  ;;  %v829_v63 = vpop.f32.mrb[7].mxu1 }
 0x101   :  { %v794_v0 = vadd.f32 %v793_v62, %v792_v59  ;;  %v1087_v1 = vadd.f32 %v829_v63, %v828_v61  ;;  %v386_v3 = vadd.f32 %v791_v58, %v1092_v2 }
 0x103   :  { %v389_v10 = vadd.f32 %v794_v0, %v1092_v2 }
 0x105   :  { %v795_v4 = vpop.f32.mrb[8].mxu0  ;;  %v847_v5 = vpop.f32.mrb[8].mxu1 }
 0x106   :  { %v483_v7 = vadd.f32 %v847_v5, %v386_v3  ;;  %v796_v8 = vpop.f32.mrb[9].mxu0  ;;  %v474_v9 = vpop.f32.mrb[9].mxu1  ;;  %v434_v5 = vadd.f32 %v1085_v60, %v1092_v2 }
 0x107   :  { %v797_v11 = vadd.f32 %v796_v8, %v795_v4  ;;  %v475_v12 = vadd.f32 %v474_v9, %v378_v6  ;;  %v798_v13 = vpop.f32.mrb[10].mxu0  ;;  %v848_v14 = vpop.f32.mrb[10].mxu1  ;;  %v426_v9 = vadd.f32 %v1081_v48, %v1092_v2 }
 0x108   :  { %v486_v16 = vadd.f32 %v848_v14, %v389_v10  ;;  %v799_v17 = vpop.f32.mrb[11].mxu0  ;;  %v477_v18 = vpop.f32.mrb[11].mxu1  ;;  %v539_v21 = vmax.f32 %v483_v7, 0.0 }
 0x109   :  { %v800_v19 = vadd.f32 %v799_v17, %v798_v13  ;;  %v478_v20 = vadd.f32 %v477_v18, %v381_v15  ;;  %v537_v23 = vmax.f32 %v475_v12, 0.0  ;;  %v394_v29 = vadd.f32 %v797_v11, %v1092_v2 }
 0x10a   :  { %v540_v22 = vmax.f32 %v486_v16, 0.0  ;;  %v437_v13 = vadd.f32 %v1087_v1, %v1092_v2 }
 0x10b   :  { %v538_v24 = vmax.f32 %v478_v20, 0.0  ;;  %v397_v36 = vadd.f32 %v800_v19, %v1092_v2 }
 0x10c   :  { %v728_v25 = vpack.c.bf16 %v540_v22, %v539_v21  ;;  %v429_v21 = vadd.f32 %v1083_v53, %v1092_v2 }
 0x10d   :  { %v723_v26 = vpack.c.bf16 %v538_v24, %v537_v23  ;;  %v801_v27 = vpop.f32.mrb[12].mxu0  ;;  %v851_v28 = vpop.f32.mrb[12].mxu1 }
 0x10e   :  { %760 = vst [vmem:[%s1141_s3 + $0x8] sm:$0xff] %v728_v25   ;;  %v802_v30 = vpop.f32.mrb[13].mxu0  ;;  %v490_v31 = vpop.f32.mrb[13].mxu1 }
 0x10f   :  { %724 = vst [vmem:[%s1141_s3] sm:$0xff] %v723_v26   ;;  %v803_v32 = vadd.f32 %v802_v30, %v801_v27  ;;  %v491_v33 = vadd.f32 %v490_v31, %v394_v29  ;;  %v804_v34 = vpop.f32.mrb[14].mxu0  ;;  %v852_v35 = vpop.f32.mrb[14].mxu1 }
 0x110   :  { %v805_v37 = vpop.f32.mrb[15].mxu0  ;;  %v493_v38 = vpop.f32.mrb[15].mxu1 }
 0x111   :  { %v402_v39 = vadd.f32 %v803_v32, %v1092_v2  ;;  %v806_v40 = vadd.f32 %v805_v37, %v804_v34  ;;  %v494_v41 = vadd.f32 %v493_v38, %v397_v36  ;;  %v541_v43 = vmax.f32 %v491_v33, 0.0 }
 0x113   :  { %v499_v42 = vadd.f32 %v851_v28, %v402_v39  ;;  %v405_v44 = vadd.f32 %v806_v40, %v1092_v2  ;;  %v542_v45 = vmax.f32 %v494_v41, 0.0 }
 0x115   :  { %v502_v46 = vadd.f32 %v852_v35, %v405_v44  ;;  %v733_v47 = vpack.c.bf16 %v542_v45, %v541_v43  ;;  %v807_v49 = vpop.f32.mrb[16].mxu0  ;;  %v855_v50 = vpop.f32.mrb[16].mxu1  ;;  %v543_v54 = vmax.f32 %v499_v42, 0.0 }
 0x116   :  { %v808_v51 = vpop.f32.mrb[17].mxu0  ;;  %v506_v52 = vpop.f32.mrb[17].mxu1 }
 0x117   :  { %v544_v55 = vmax.f32 %v502_v46, 0.0  ;;  %761 = vst [vmem:[%s1141_s3 + $0x10] sm:$0xff] %v733_v47   ;;  %v809_v56 = vadd.f32 %v808_v51, %v807_v49  ;;  %v810_v57 = vpop.f32.mrb[18].mxu0  ;;  %v856_v58 = vpop.f32.mrb[18].mxu1 }
 0x118   :  { %v811_v59 = vpop.f32.mrb[19].mxu0  ;;  %v509_v61 = vpop.f32.mrb[19].mxu1 }
 0x119   :  { %v738_v62 = vpack.c.bf16 %v544_v55, %v543_v54  ;;  %v410_v63 = vadd.f32 %v809_v56, %v1092_v2  ;;  %v812_v0 = vadd.f32 %v811_v59, %v810_v57 }
 0x11b   :  { %762 = vst [vmem:[%s1141_s3 + $0x18] sm:$0xff] %v738_v62   ;;  %v507_v3 = vadd.f32 %v506_v52, %v410_v63  ;;  %v413_v4 = vadd.f32 %v812_v0, %v1092_v2 }
 0x11d   :  { %v510_v6 = vadd.f32 %v509_v61, %v413_v4  ;;  %v813_v7 = vpop.f32.mrb[20].mxu0  ;;  %v859_v8 = vpop.f32.mrb[20].mxu1  ;;  %v545_v14 = vmax.f32 %v507_v3, 0.0 }
 0x11e   :  { %v531_v10 = vadd.f32 %v859_v8, %v434_v5  ;;  %v814_v11 = vpop.f32.mrb[21].mxu0  ;;  %v522_v12 = vpop.f32.mrb[21].mxu1 }
 0x11f   :  { %v546_v15 = vmax.f32 %v510_v6, 0.0  ;;  %v815_v16 = vadd.f32 %v814_v11, %v813_v7  ;;  %v523_v17 = vadd.f32 %v522_v12, %v426_v9  ;;  %v816_v18 = vpop.f32.mrb[22].mxu0  ;;  %v860_v19 = vpop.f32.mrb[22].mxu1 }
 0x120   :  { %v534_v20 = vadd.f32 %v860_v19, %v437_v13  ;;  %v817_v60 = vpop.f32.mrb[23].mxu0  ;;  %v525_v22 = vpop.f32.mrb[23].mxu1  ;;  %v551_v25 = vmax.f32 %v531_v10, 0.0 }
 0x121   :  { %v743_v23 = vpack.c.bf16 %v546_v15, %v545_v14  ;;  %v418_v48 = vadd.f32 %v815_v16, %v1092_v2  ;;  %v818_v24 = vadd.f32 %v817_v60, %v816_v18  ;;  %v526_v27 = vadd.f32 %v525_v22, %v429_v21 }
 0x122   :  { %v552_v26 = vmax.f32 %v534_v20, 0.0  ;;  %v549_v29 = vmax.f32 %v523_v17, 0.0 }
 0x123   :  { %763 = vst [vmem:[%s1141_s3 + $0x20] sm:$0xff] %v743_v23   ;;  %v515_v1 = vadd.f32 %v855_v50, %v418_v48  ;;  %v421_v28 = vadd.f32 %v818_v24, %v1092_v2  ;;  %v550_v31 = vmax.f32 %v526_v27, 0.0 }
 0x124   :  { %v758_v30 = vpack.c.bf16 %v552_v26, %v551_v25 }
 0x125   :  { %v518_v32 = vadd.f32 %v856_v58, %v421_v28  ;;  %v753_v53 = vpack.c.bf16 %v550_v31, %v549_v29  ;;  %v547_v33 = vmax.f32 %v515_v1, 0.0 }
 0x126   :  { %766 = vst [vmem:[%s1141_s3 + $0x38] sm:$0xff] %v758_v30  }
 0x127   :  { %v548_v34 = vmax.f32 %v518_v32, 0.0  ;;  %765 = vst [vmem:[%s1141_s3 + $0x30] sm:$0xff] %v753_v53  }
 0x129   :  { %v748_v35 = vpack.c.bf16 %v548_v34, %v547_v33 }
 0x12b   :  { %764 = vst [vmem:[%s1141_s3 + $0x28] sm:$0xff] %v748_v35  }

// kernel: resnet_features.39
= control target key start
LH: loop header
LB: loop body
LE: loop exit
PB: predicated region body
PF: predicated region fallthrough
CT: control target
= control target key end

     0   :  { %vm204_vm0 = vcmask 261120   ;;  %s550_s1 = inlined_call_operand.vmem [shape: bf16[288,128], index: 1, kind: input, shape index: {}]   ;;  %s551_s0 = inlined_call_operand.vmem [shape: bf16[32,288], index: 0, kind: input, shape index: {}]   ;;  %s552_s2 = inlined_call_operand.vmem [shape: f32[1,128], index: 2, kind: input, shape index: {}]   ;;  %s553_s3 = inlined_call_operand.vmem [shape: bf16[32,128], index: 3, kind: output, shape index: {}]  }
   0x1   :  { %v423_v0 = vld [vmem:[%s550_s1 + $0x40] sm:$0xff]   ;;  %v425_v2 = vld [vmem:[%s550_s1 + $0x48] sm:$0xff]   ;;  %v427_v4 = vld [vmem:[%s550_s1 + $0x50] sm:$0xff]  }
   0x2   :  { %v424_v1 = vld [vmem:[%s550_s1] sm:$0xff]   ;;  %383 = vmatprep.subr.bf16.mxu0 %v423_v0  ;;  %v426_v3 = vld [vmem:[%s550_s1 + $0x8] sm:$0xff]   ;;  %v428_v5 = vld [vmem:[%s550_s1 + $0x10] sm:$0xff]  }
   0x3   :  { %384 = vmatpush3.bf16.msra.mxu0 %v424_v1  ;;  %v429_v6 = vld [vmem:[%s550_s1 + $0x58] sm:$0xff]   ;;  %v431_v8 = vld [vmem:[%s550_s1 + $0x60] sm:$0xff]   ;;  %v433_v11 = vld [vmem:[%s550_s1 + $0x68] sm:$0xff]  }
   0x4   :  { %385 = vmatprep.subr.bf16.mxu0 %v425_v2  ;;  %v430_v7 = vld [vmem:[%s550_s1 + $0x18] sm:$0xff]   ;;  %v432_v9 = vld [vmem:[%s550_s1 + $0x20] sm:$0xff]   ;;  %v434_v12 = vld [vmem:[%s550_s1 + $0x28] sm:$0xff]  }
   0x5   :  { %v438_v10 = vld [vmem:[%s550_s1 + $0x80] sm:$0xff]   ;;  %v435_v13 = vld [vmem:[%s550_s1 + $0x70] sm:$0xff]   ;;  %v443_v15 = vld [vmem:[%s550_s1 + $0x88] sm:$0xff]  }
   0x6   :  { %415 = vmatprep.subr.bf16.mxu1 %v438_v10  ;;  %v442_v14 = vld [vmem:[%s551_s0 + $0x4] ss:$12 sps:$4 sm:$0xff]   ;;  %v444_v16 = vld [vmem:[%s551_s0 + $0x8] ss:$12 sps:$4 sm:$0xff]   ;;  %v445_v17 = vld [vmem:[%s551_s0 + $0x20] ss:$12 sps:$4 sm:$0xff]  }
   0x7   :  { %386 = vmatpush3.bf16.msra.mxu0 %v426_v3  ;;  %416 = vmatpush3.bf16.msra.mxu1 %v438_v10  ;;  %v436_v18 = vld [vmem:[%s550_s1 + $0x30] sm:$0xff]   ;;  %v437_v19 = vld [vmem:[%s550_s1 + $0x78] sm:$0xff]   ;;  %v440_v21 = vld [vmem:[%s551_s0] ss:$12 sps:$4 sm:$0xff]  }
   0x8   :  { %387 = vmatprep.subr.bf16.mxu0 %v427_v4  ;;  %243 = vmatprep.mubr.bf16.mxu0 %v442_v14  ;;  %v439_v20 = vld [vmem:[%s550_s1 + $0x38] sm:$0xff]   ;;  %v337_v30 = vld [vmem:[%s552_s2] ss:$0 sm:$0xff] }
   0x9   :  { %417 = vmatprep.subr.bf16.mxu1 %v443_v15  ;;  %419 = vmatprep.mubr.msk.bf16.mxu1 %vm204_vm0, %v444_v16  ;;  %v446_v22 = vld [vmem:[%s551_s0 + $0x1c] ss:$12 sps:$4 sm:$0xff]   ;;  %v448_v23 = vld [vmem:[%s551_s0 + $0x18] ss:$12 sps:$4 sm:$0xff]  }
   0xb   :  { %388 = vmatpush3.bf16.msra.mxu0 %v428_v5  ;;  %418 = vmatpush3.bf16.msra.mxu1 %v443_v15 }
   0xc   :  { %389 = vmatprep.subr.bf16.mxu0 %v429_v6 }
   0xe   :  { %420 = vmatmul.mubr.msk.bf16.vlgmr.msra.gmra.mrb[0].mxu1 %vm204_vm0, %v445_v17 }
   0xf   :  { %390 = vmatpush3.bf16.msra.mxu0 %v430_v7 }
  0x10   :  { %391 = vmatprep.subr.bf16.mxu0 %v431_v8 }
  0x13   :  { %392 = vmatpush3.bf16.msra.mxu0 %v432_v9 }
  0x14   :  { %393 = vmatprep.subr.bf16.mxu0 %v433_v11 }
  0x17   :  { %394 = vmatpush3.bf16.msra.mxu0 %v434_v12 }
  0x18   :  { %395 = vmatprep.subr.bf16.mxu0 %v435_v13 }
  0x1b   :  { %396 = vmatpush3.bf16.msra.mxu0 %v436_v18 }
  0x1c   :  { %397 = vmatprep.subr.bf16.mxu0 %v437_v19 }
  0x1f   :  { %398 = vmatpush3.bf16.msra.mxu0 %v439_v20 }
  0x22   :  { %244 = vmatmul.mubr.bf16.vlgmr.msra.gmra.mrb[0].mxu0 %v440_v21 }
  0x23   :  { %251 = vmatprep.mubr.bf16.mxu0 %v446_v22 }
  0x2a   :  { %252 = vmatmul.mubr.bf16.gmra.mrb[4].mxu0 %v448_v23 }
  0xe1   :  { %v421_v24 = vpop.f32.mrb[0].mxu1 }
  0xe2   :  { %v294_v25 = vpop.f32.mrb[1].mxu1 }
  0xe3   :  { %v422_v26 = vpop.f32.mrb[2].mxu1 }
  0xe4   :  { %v297_v27 = vpop.f32.mrb[3].mxu1 }
  0xf5   :  { %v399_v28 = vpop.f32.mrb[0].mxu0 }
  0xf6   :  { %v400_v29 = vpop.f32.mrb[1].mxu0 }
  0xf7   :  { %v401_v31 = vadd.f32 %v400_v29, %v399_v28  ;;  %v402_v32 = vpop.f32.mrb[2].mxu0 }
  0xf8   :  { %v403_v33 = vpop.f32.mrb[3].mxu0 }
  0xf9   :  { %v404_v34 = vadd.f32 %v403_v33, %v402_v32  ;;  %v246_v35 = vadd.f32 %v401_v31, %v337_v30 }
  0xfb   :  { %v295_v36 = vadd.f32 %v294_v25, %v246_v35  ;;  %v249_v37 = vadd.f32 %v404_v34, %v337_v30 }
  0xfd   :  { %v298_v38 = vadd.f32 %v297_v27, %v249_v37  ;;  %v405_v39 = vpop.f32.mrb[4].mxu0  ;;  %v309_v41 = vmax.f32 %v295_v36, 0.0 }
  0xfe   :  { %v406_v40 = vpop.f32.mrb[5].mxu0 }
  0xff   :  { %v310_v42 = vmax.f32 %v298_v38, 0.0  ;;  %v407_v43 = vadd.f32 %v406_v40, %v405_v39  ;;  %v408_v44 = vpop.f32.mrb[6].mxu0 }
 0x100   :  { %v409_v45 = vpop.f32.mrb[7].mxu0 }
 0x101   :  { %v375_v46 = vpack.c.bf16 %v310_v42, %v309_v41  ;;  %v254_v47 = vadd.f32 %v407_v43, %v337_v30  ;;  %v410_v48 = vadd.f32 %v409_v45, %v408_v44 }
 0x103   :  { %376 = vst [vmem:[%s553_s3] sm:$0xff] %v375_v46   ;;  %v303_v49 = vadd.f32 %v421_v24, %v254_v47  ;;  %v257_v50 = vadd.f32 %v410_v48, %v337_v30 }
 0x105   :  { %v306_v51 = vadd.f32 %v422_v26, %v257_v50  ;;  %v311_v52 = vmax.f32 %v303_v49, 0.0 }
 0x107   :  { %v312_v53 = vmax.f32 %v306_v51, 0.0 }
 0x109   :  { %v380_v54 = vpack.c.bf16 %v312_v53, %v311_v52 }
 0x10b   :  { %382 = vst [vmem:[%s553_s3 + $0x8] sm:$0xff] %v380_v54  }

// kernel: resnet_features.38
= control target key start
LH: loop header
LB: loop body
LE: loop exit
PB: predicated region body
PF: predicated region fallthrough
CT: control target
= control target key end

     0   :  { %vm52_vm0 = vcmask 261120   ;;  %s215_s1 = inlined_call_operand.vmem [shape: bf16[32,128], index: 1, kind: input, shape index: {}]   ;;  %s216_s0 = inlined_call_operand.vmem [shape: bf16[32,32], index: 0, kind: input, shape index: {}]   ;;  %s217_s2 = inlined_call_operand.vmem [shape: f32[1,128], index: 2, kind: input, shape index: {}]   ;;  %s218_s3 = inlined_call_operand.vmem [shape: bf16[32,128], index: 3, kind: output, shape index: {}]  }
   0x1   :  { %v170_v0 = vld [vmem:[%s215_s1] sm:$0xff]   ;;  %v171_v1 = vld [vmem:[%s215_s1 + $0x8] sm:$0xff]  }
   0x2   :  { %162 = vmatprep.subr.bf16.mxu0 %v170_v0  ;;  %v172_v2 = vld [vmem:[%s216_s0] sm:$0xff]   ;;  %v173_v3 = vld [vmem:[%s216_s0 + $0x8] sm:$0xff]  }
   0x3   :  { %163 = vmatpush3.bf16.msra.mxu0 %v170_v0  ;;  %166 = vmatprep.mubr.msk.bf16.mxu0 %vm52_vm0, %v172_v2  ;;  %v132_v5 = vld [vmem:[%s217_s2] ss:$0 sm:$0xff] }
   0x4   :  { %164 = vmatprep.subr.bf16.mxu0 %v171_v1 }
   0x7   :  { %165 = vmatpush3.bf16.msra.mxu0 %v171_v1 }
   0xa   :  { %167 = vmatmul.mubr.msk.bf16.vlgmr.msra.gmra.mrb[0].mxu0 %vm52_vm0, %v173_v3 }
  0xdd   :  { %v168_v4 = vpop.f32.mrb[0].mxu0 }
  0xde   :  { %v93_v6 = vpop.f32.mrb[1].mxu0  ;;  %v102_v8 = vadd.f32 %v168_v4, %v132_v5 }
  0xdf   :  { %v169_v7 = vpop.f32.mrb[2].mxu0  ;;  %v94_v11 = vadd.f32 %v132_v5, %v93_v6 }
  0xe0   :  { %v105_v9 = vadd.f32 %v169_v7, %v132_v5  ;;  %v96_v10 = vpop.f32.mrb[3].mxu0 }
  0xe1   :  { %v97_v12 = vadd.f32 %v132_v5, %v96_v10 }
  0xe2   :  { %v155_v13 = vpack.c.bf16 %v105_v9, %v102_v8 }
  0xe3   :  { %v150_v14 = vpack.c.bf16 %v97_v12, %v94_v11 }
  0xe4   :  { %157 = vst [vmem:[%s218_s3 + $0x8] sm:$0xff] %v155_v13  }
  0xe5   :  { %151 = vst [vmem:[%s218_s3] sm:$0xff] %v150_v14  }

// kernel: resnet_features.40
= control target key start
LH: loop header
LB: loop body
LE: loop exit
PB: predicated region body
PF: predicated region fallthrough
CT: control target
= control target key end

     0   :  { %vm375_vm0 = vcmask 523264   ;;  %s948_s1 = inlined_call_operand.vmem [shape: bf16[576,128], index: 1, kind: input, shape index: {}]   ;;  %s949_s0 = inlined_call_operand.vmem [shape: bf16[32,576], index: 0, kind: input, shape index: {}]   ;;  %s950_s2 = inlined_call_operand.vmem [shape: f32[1,128], index: 2, kind: input, shape index: {}]   ;;  %s951_s3 = inlined_call_operand.vmem [shape: bf16[32,128], index: 3, kind: input, shape index: {}]   ;;  %s952_s4 = inlined_call_operand.vmem [shape: bf16[32,128], index: 4, kind: output, shape index: {}]  }
   0x1   :  { %v720_v0 = vld [vmem:[%s948_s1 + $0x40] sm:$0xff]   ;;  %v724_v4 = vld [vmem:[%s948_s1 + $0x48] sm:$0xff]   ;;  %v728_v8 = vld [vmem:[%s948_s1 + $0x50] sm:$0xff]  }
   0x2   :  { %v721_v1 = vld [vmem:[%s948_s1] sm:$0xff]   ;;  %646 = vmatprep.subr.bf16.mxu0 %v720_v0  ;;  %v725_v5 = vld [vmem:[%s948_s1 + $0x8] sm:$0xff]   ;;  %v729_v9 = vld [vmem:[%s948_s1 + $0x10] sm:$0xff]  }
   0x3   :  { %v722_v2 = vld [vmem:[%s948_s1 + $0xc0] sm:$0xff]   ;;  %647 = vmatpush3.bf16.msra.mxu0 %v721_v1  ;;  %v726_v6 = vld [vmem:[%s948_s1 + $0xc8] sm:$0xff]   ;;  %v730_v10 = vld [vmem:[%s948_s1 + $0xd0] sm:$0xff]  }
   0x4   :  { %v723_v3 = vld [vmem:[%s948_s1 + $0x80] sm:$0xff]   ;;  %674 = vmatprep.subr.bf16.mxu1 %v722_v2  ;;  %648 = vmatprep.subr.bf16.mxu0 %v724_v4  ;;  %v727_v7 = vld [vmem:[%s948_s1 + $0x88] sm:$0xff]   ;;  %v731_v11 = vld [vmem:[%s948_s1 + $0x90] sm:$0xff]  }
   0x5   :  { %675 = vmatpush3.bf16.msra.mxu1 %v723_v3  ;;  %v732_v12 = vld [vmem:[%s948_s1 + $0x58] sm:$0xff]   ;;  %v736_v16 = vld [vmem:[%s948_s1 + $0x60] sm:$0xff]   ;;  %v740_v20 = vld [vmem:[%s948_s1 + $0x68] sm:$0xff]  }
   0x6   :  { %676 = vmatprep.subr.bf16.mxu1 %v726_v6  ;;  %v733_v13 = vld [vmem:[%s948_s1 + $0x18] sm:$0xff]   ;;  %v737_v17 = vld [vmem:[%s948_s1 + $0x20] sm:$0xff]   ;;  %v741_v21 = vld [vmem:[%s948_s1 + $0x28] sm:$0xff]  }
   0x7   :  { %649 = vmatpush3.bf16.msra.mxu0 %v725_v5  ;;  %v734_v14 = vld [vmem:[%s948_s1 + $0xd8] sm:$0xff]   ;;  %v738_v18 = vld [vmem:[%s948_s1 + $0xe0] sm:$0xff]   ;;  %v742_v22 = vld [vmem:[%s948_s1 + $0xe8] sm:$0xff]  }
   0x8   :  { %650 = vmatprep.subr.bf16.mxu0 %v728_v8  ;;  %v735_v15 = vld [vmem:[%s948_s1 + $0x98] sm:$0xff]   ;;  %v739_v19 = vld [vmem:[%s948_s1 + $0xa0] sm:$0xff]   ;;  %v743_v23 = vld [vmem:[%s948_s1 + $0xa8] sm:$0xff]  }
   0x9   :  { %677 = vmatpush3.bf16.msra.mxu1 %v727_v7  ;;  %v744_v24 = vld [vmem:[%s948_s1 + $0x70] sm:$0xff]   ;;  %v748_v28 = vld [vmem:[%s948_s1 + $0x78] sm:$0xff]   ;;  %v755_v34 = vld [vmem:[%s948_s1 + $0x100] sm:$0xff]  }
   0xa   :  { %678 = vmatprep.subr.bf16.mxu1 %v730_v10  ;;  %v745_v25 = vld [vmem:[%s948_s1 + $0x30] sm:$0xff]   ;;  %v749_v29 = vld [vmem:[%s948_s1 + $0x38] sm:$0xff]   ;;  %v758_v36 = vld [vmem:[%s949_s0 + $0xc] ss:$20 sps:$4 sm:$0xff]  }
   0xb   :  { %651 = vmatpush3.bf16.msra.mxu0 %v729_v9  ;;  %v746_v26 = vld [vmem:[%s948_s1 + $0xf0] sm:$0xff]   ;;  %v750_v30 = vld [vmem:[%s948_s1 + $0xf8] sm:$0xff]   ;;  %v759_v37 = vld [vmem:[%s948_s1 + $0x108] sm:$0xff]   ;;  %463 = vmatprep.mubr.bf16.mxu1 %v758_v36 }
   0xc   :  { %652 = vmatprep.subr.bf16.mxu0 %v732_v12  ;;  %v747_v27 = vld [vmem:[%s948_s1 + $0xb0] sm:$0xff]   ;;  %v753_v32 = vld [vmem:[%s949_s0 + $0x4] ss:$20 sps:$4 sm:$0xff]   ;;  %v756_v35 = vld [vmem:[%s949_s0 + $0x8] ss:$20 sps:$4 sm:$0xff]  }
   0xd   :  { %679 = vmatpush3.bf16.msra.mxu1 %v731_v11  ;;  %v751_v31 = vld [vmem:[%s949_s0] ss:$20 sps:$4 sm:$0xff]   ;;  %v754_v33 = vld [vmem:[%s948_s1 + $0xb8] sm:$0xff]   ;;  %414 = vmatprep.mubr.bf16.mxu0 %v753_v32  ;;  %v766_v42 = vld [vmem:[%s949_s0 + $0x30] ss:$20 sps:$4 sm:$0xff]  }
   0xe   :  { %680 = vmatprep.subr.bf16.mxu1 %v734_v14  ;;  %v760_v38 = vld [vmem:[%s949_s0 + $0x2c] ss:$20 sps:$4 sm:$0xff]   ;;  %v762_v39 = vld [vmem:[%s949_s0 + $0x28] ss:$20 sps:$4 sm:$0xff]   ;;  %v763_v40 = vld [vmem:[%s948_s1 + $0x110] sm:$0xff]  }
   0xf   :  { %653 = vmatpush3.bf16.msra.mxu0 %v733_v13  ;;  %v764_v41 = vld [vmem:[%s949_s0 + $0x34] ss:$20 sps:$4 sm:$0xff]   ;;  %v767_v43 = vld [vmem:[%s948_s1 + $0x118] sm:$0xff]   ;;  %v768_v44 = vld [vmem:[%s949_s0 + $0x10] ss:$20 sps:$4 sm:$0xff]  }
  0x10   :  { %654 = vmatprep.subr.bf16.mxu0 %v736_v16  ;;  %v769_v45 = vld [vmem:[%s949_s0 + $0x38] ss:$20 sps:$4 sm:$0xff]   ;;  %v569_v47 = vld [vmem:[%s950_s2] ss:$0 sm:$0xff] }
  0x11   :  { %681 = vmatpush3.bf16.msra.mxu1 %v735_v15  ;;  %v644_v10 = vld [vmem:[%s951_s3 + $0x8] sm:$0xff]   ;;  %v627_v13 = vld [vmem:[%s951_s3] sm:$0xff]  }
  0x12   :  { %682 = vmatprep.subr.bf16.mxu1 %v738_v18  ;;  %v632_v16 = vunpack.c.l.bf16 %v644_v10  ;;  %v628_v18 = vunpack.c.l.bf16 %v627_v13 }
  0x13   :  { %655 = vmatpush3.bf16.msra.mxu0 %v737_v17 }
  0x14   :  { %656 = vmatprep.subr.bf16.mxu0 %v740_v20 }
  0x15   :  { %683 = vmatpush3.bf16.msra.mxu1 %v739_v19 }
  0x16   :  { %684 = vmatprep.subr.bf16.mxu1 %v742_v22  ;;  %v633_v22 = vunpack.c.h.bf16 %v644_v10 }
  0x17   :  { %657 = vmatpush3.bf16.msra.mxu0 %v741_v21 }
  0x18   :  { %658 = vmatprep.subr.bf16.mxu0 %v744_v24 }
  0x19   :  { %685 = vmatpush3.bf16.msra.mxu1 %v743_v23 }
  0x1a   :  { %686 = vmatprep.subr.bf16.mxu1 %v746_v26 }
  0x1b   :  { %659 = vmatpush3.bf16.msra.mxu0 %v745_v25  ;;  %v629_v25 = vunpack.c.h.bf16 %v627_v13 }
  0x1c   :  { %660 = vmatprep.subr.bf16.mxu0 %v748_v28 }
  0x1d   :  { %687 = vmatpush3.bf16.msra.mxu1 %v747_v27 }
  0x1e   :  { %688 = vmatprep.subr.bf16.mxu1 %v750_v30 }
  0x1f   :  { %661 = vmatpush3.bf16.msra.mxu0 %v749_v29 }
  0x20   :  { %708 = vmatprep.subr.bf16.mxu0 %v755_v34 }
  0x21   :  { %689 = vmatpush3.bf16.msra.mxu1 %v754_v33 }
  0x22   :  { %415 = vmatmul.mubr.bf16.vlgmr.msra.gmra.mrb[0].mxu0 %v751_v31 }
  0x23   :  { %709 = vmatpush3.bf16.msra.mxu0 %v755_v34  ;;  %422 = vmatprep.mubr.bf16.mxu0 %v760_v38 }
  0x24   :  { %464 = vmatmul.mubr.bf16.vlgmr.msra.gmra.mrb[0].mxu1 %v756_v35  ;;  %710 = vmatprep.subr.bf16.mxu0 %v759_v37 }
  0x25   :  { %471 = vmatprep.mubr.bf16.mxu1 %v764_v41 }
  0x27   :  { %711 = vmatpush3.bf16.msra.mxu0 %v759_v37 }
  0x28   :  { %712 = vmatprep.subr.bf16.mxu0 %v763_v40 }
  0x2a   :  { %423 = vmatmul.mubr.bf16.gmra.mrb[4].mxu0 %v762_v39 }
  0x2b   :  { %716 = vmatprep.mubr.msk.bf16.mxu0 %vm375_vm0, %v768_v44  ;;  %713 = vmatpush3.bf16.msra.mxu0 %v763_v40 }
  0x2c   :  { %472 = vmatmul.mubr.bf16.gmra.mrb[4].mxu1 %v766_v42  ;;  %714 = vmatprep.subr.bf16.mxu0 %v767_v43 }
  0x2f   :  { %715 = vmatpush3.bf16.msra.mxu0 %v767_v43 }
  0x32   :  { %717 = vmatmul.mubr.msk.bf16.vlgmr.msra.gmra.mrb[8].mxu0 %vm375_vm0, %v769_v45 }
  0xf5   :  { %v662_v46 = vpop.f32.mrb[0].mxu0 }
  0xf6   :  { %v663_v48 = vpop.f32.mrb[1].mxu0 }
  0xf7   :  { %v664_v49 = vadd.f32 %v663_v48, %v662_v46  ;;  %v665_v50 = vpop.f32.mrb[2].mxu0  ;;  %v690_v51 = vpop.f32.mrb[0].mxu1 }
  0xf8   :  { %v666_v52 = vpop.f32.mrb[3].mxu0  ;;  %v691_v55 = vpop.f32.mrb[1].mxu1 }
  0xf9   :  { %v417_v53 = vadd.f32 %v664_v49, %v569_v47  ;;  %v667_v54 = vadd.f32 %v666_v52, %v665_v50  ;;  %v692_v56 = vadd.f32 %v691_v55, %v690_v51  ;;  %v693_v57 = vpop.f32.mrb[2].mxu1 }
  0xfa   :  { %v694_v59 = vpop.f32.mrb[3].mxu1 }
  0xfb   :  { %v420_v58 = vadd.f32 %v667_v54, %v569_v47  ;;  %v695_v60 = vadd.f32 %v694_v59, %v693_v57  ;;  %v466_v61 = vadd.f32 %v692_v56, %v417_v53 }
  0xfd   :  { %v668_v62 = vpop.f32.mrb[4].mxu0  ;;  %v469_v0 = vadd.f32 %v695_v60, %v420_v58 }
  0xfe   :  { %v669_v63 = vpop.f32.mrb[5].mxu0 }
  0xff   :  { %v670_v1 = vadd.f32 %v669_v63, %v668_v62  ;;  %v671_v2 = vpop.f32.mrb[6].mxu0  ;;  %v696_v3 = vpop.f32.mrb[4].mxu1 }
 0x100   :  { %v672_v4 = vpop.f32.mrb[7].mxu0  ;;  %v697_v7 = vpop.f32.mrb[5].mxu1 }
 0x101   :  { %v425_v5 = vadd.f32 %v670_v1, %v569_v47  ;;  %v673_v6 = vadd.f32 %v672_v4, %v671_v2  ;;  %v698_v8 = vadd.f32 %v697_v7, %v696_v3  ;;  %v699_v9 = vpop.f32.mrb[6].mxu1 }
 0x102   :  { %v700_v12 = vpop.f32.mrb[7].mxu1 }
 0x103   :  { %v428_v11 = vadd.f32 %v673_v6, %v569_v47  ;;  %v701_v14 = vadd.f32 %v700_v12, %v699_v9  ;;  %v474_v15 = vadd.f32 %v698_v8, %v425_v5 }
 0x105   :  { %v718_v17 = vpop.f32.mrb[8].mxu0  ;;  %v477_v19 = vadd.f32 %v701_v14, %v428_v11 }
 0x106   :  { %v523_v20 = vadd.f32 %v718_v17, %v474_v15  ;;  %v514_v21 = vpop.f32.mrb[9].mxu0 }
 0x107   :  { %v515_v23 = vadd.f32 %v514_v21, %v466_v61  ;;  %v719_v24 = vpop.f32.mrb[10].mxu0 }
 0x108   :  { %v539_v26 = vadd.f32 %v632_v16, %v523_v20  ;;  %v526_v27 = vadd.f32 %v719_v24, %v477_v19  ;;  %v517_v28 = vpop.f32.mrb[11].mxu0 }
 0x109   :  { %v537_v29 = vadd.f32 %v628_v18, %v515_v23  ;;  %v518_v30 = vadd.f32 %v517_v28, %v469_v0 }
 0x10a   :  { %v540_v31 = vadd.f32 %v633_v22, %v526_v27  ;;  %v543_v33 = vmax.f32 %v539_v26, 0.0 }
 0x10b   :  { %v538_v32 = vadd.f32 %v629_v25, %v518_v30  ;;  %v541_v35 = vmax.f32 %v537_v29, 0.0 }
 0x10c   :  { %v544_v34 = vmax.f32 %v540_v31, 0.0 }
 0x10d   :  { %v542_v36 = vmax.f32 %v538_v32, 0.0 }
 0x10e   :  { %v642_v37 = vpack.c.bf16 %v544_v34, %v543_v33 }
 0x10f   :  { %v637_v38 = vpack.c.bf16 %v542_v36, %v541_v35 }
 0x110   :  { %645 = vst [vmem:[%s952_s4 + $0x8] sm:$0xff] %v642_v37  }
 0x111   :  { %638 = vst [vmem:[%s952_s4] sm:$0xff] %v637_v38  }

// kernel: resnet_features.43
= control target key start
LH: loop header
LB: loop body
LE: loop exit
PB: predicated region body
PF: predicated region fallthrough
CT: control target
= control target key end

     0   :  { %s117_s0 = inlined_call_operand.vmem [shape: bf16[2,16,128], index: 0, kind: input, shape index: {}]   ;;  %s118_s1 = inlined_call_operand.hbm [shape: f32[2,128], index: 1, kind: output, shape index: {}]  }
   0x1   :  { %v55_v0 = vld [vmem:[%s117_s0] sm:$0xff]   ;;  %v62_v1 = vld [vmem:[%s117_s0 + $0x8] sm:$0xff]  }
   0x2   :  { %6 = vsyncpa [#allocation3], 0  ;;  %v56_v2 = vunpack.c.l.bf16 %v55_v0  ;;  %v57_v3 = vunpack.c.h.bf16 %v55_v0  ;;  %v60_v4 = vunpack.c.l.bf16 %v62_v1  ;;  %v61_v5 = vunpack.c.h.bf16 %v62_v1  ;;  %s88_s0 = smov [#allocation2]  }
   0x3   :  { %s46_s10 = sshll.u32 %s88_s0, 4  ;;  %vm36_vm0 = vcmask 1041409   ;;  %s47_s10 = int_to_ptr.vmem [resolvable:$true] %s46_s10 }
   0x4   :  { %v17_v6 = vadd.f32 %v57_v3, %v56_v2  ;;  %v24_v7 = vadd.f32 %v61_v5, %v60_v4  ;;  %s64_s11 = scalar_lea.vmem %s47_s10, 32  ;;  %p69_p1 = scmp.lt.s32.totalorder %s47_s10, %s47_s10 }
   0x5   :  { %p65_p0 = scmp.ne.s32.totalorder %s47_s10, %s64_s11  ;;  %p70_p2 = scmp.lt.s32.totalorder %s64_s11, %s64_s11 }
   0x6   :  { %v18_v8 = vrot.slane %v17_v6, 4  ;;  %v25_v9 = vrot.slane %v24_v7, 4 }
   0x7   :  { %p71_p3 = por %p70_p2, %p69_p1 }
   0x8   :  { %v19_v10 = vadd.f32 %v18_v8, %v17_v6  ;;  %v26_v11 = vadd.f32 %v25_v9, %v24_v7 }
   0x9   :  { %p72_p4 = pnand %p71_p3, %p65_p0 }
   0xa   :  { %v20_v12 = vrot.slane %v19_v10, 2  ;;  %v27_v13 = vrot.slane %v26_v11, 2 }
   0xc   :  { %v21_v14 = vadd.f32 %v20_v12, %v19_v10  ;;  %v28_v15 = vadd.f32 %v27_v13, %v26_v11 }
   0xe   :  { %v22_v16 = vrot.slane %v21_v14, 1  ;;  %v29_v17 = vrot.slane %v28_v15, 1 }
  0x10   :  { %v23_v18 = vadd.f32 %v22_v16, %v21_v14  ;;  %v30_v19 = vadd.f32 %v29_v17, %v28_v15 }
  0x12   :  { %v32_v20 = vmul.f32 0.0625, %v23_v18  ;;  %v33_v21 = vmul.f32 0.0625, %v30_v19 }
  0x14   :  { %v37_v22 = vsel %vm36_vm0, %v33_v21, %v32_v20 }
  0x15   :  { %39 = vst [vmem:[#allocation2] sm:$0x3] %v37_v22 }
  0x16   :  { %75 = shalt.err (!%p72_p4)
}
  0x17   :  { %s76_s14 = scalar_lea.hbm %s118_s1, 32 }
  0x18   :  { %p77_p5 = scmp.ne.s32.totalorder %s118_s1, %s76_s14  ;;  %p80_p6 = scmp.lt.u32.totalorder %s76_s14, %s118_s1 }
  0x1a   :  { %p82_p7 = pnand %p80_p6, %p77_p5 }
  0x1c   :  { %85 = shalt.err (!%p82_p7)
}
  0x1d   :  { %49 = dma.vmem_to_hbm [thread:$0]  %s47_s10, 32, %s118_s1, [#allocation3]  }
  0x1e   :  { %86 = dma.done.wait [#allocation3], 32  }
  0x1f   :  { %87 = vsyncadd [#allocation3], 4294967264 }
  0x20   :  { %53 = vsyncpa [#allocation3], 1 }

// kernel: resnet_features.41
= control target key start
LH: loop header
LB: loop body
LE: loop exit
PB: predicated region body
PF: predicated region fallthrough
CT: control target
= control target key end

     0   :  { %vm372_vm0 = vcmask 523264   ;;  %s913_s1 = inlined_call_operand.vmem [shape: bf16[576,128], index: 1, kind: input, shape index: {}]   ;;  %s914_s0 = inlined_call_operand.vmem [shape: bf16[32,576], index: 0, kind: input, shape index: {}]   ;;  %s915_s2 = inlined_call_operand.vmem [shape: f32[1,128], index: 2, kind: input, shape index: {}]   ;;  %s916_s3 = inlined_call_operand.vmem [shape: bf16[32,128], index: 3, kind: output, shape index: {}]  }
   0x1   :  { %v696_v0 = vld [vmem:[%s913_s1 + $0x40] sm:$0xff]   ;;  %v700_v4 = vld [vmem:[%s913_s1 + $0x48] sm:$0xff]   ;;  %v704_v8 = vld [vmem:[%s913_s1 + $0x50] sm:$0xff]  }
   0x2   :  { %v697_v1 = vld [vmem:[%s913_s1] sm:$0xff]   ;;  %622 = vmatprep.subr.bf16.mxu0 %v696_v0  ;;  %v701_v5 = vld [vmem:[%s913_s1 + $0x8] sm:$0xff]   ;;  %v705_v9 = vld [vmem:[%s913_s1 + $0x10] sm:$0xff]  }
   0x3   :  { %v698_v2 = vld [vmem:[%s913_s1 + $0xc0] sm:$0xff]   ;;  %623 = vmatpush3.bf16.msra.mxu0 %v697_v1  ;;  %v702_v6 = vld [vmem:[%s913_s1 + $0xc8] sm:$0xff]   ;;  %v706_v10 = vld [vmem:[%s913_s1 + $0xd0] sm:$0xff]  }
   0x4   :  { %v699_v3 = vld [vmem:[%s913_s1 + $0x80] sm:$0xff]   ;;  %650 = vmatprep.subr.bf16.mxu1 %v698_v2  ;;  %624 = vmatprep.subr.bf16.mxu0 %v700_v4  ;;  %v703_v7 = vld [vmem:[%s913_s1 + $0x88] sm:$0xff]   ;;  %v707_v11 = vld [vmem:[%s913_s1 + $0x90] sm:$0xff]  }
   0x5   :  { %651 = vmatpush3.bf16.msra.mxu1 %v699_v3  ;;  %v708_v12 = vld [vmem:[%s913_s1 + $0x58] sm:$0xff]   ;;  %v712_v16 = vld [vmem:[%s913_s1 + $0x60] sm:$0xff]   ;;  %v716_v20 = vld [vmem:[%s913_s1 + $0x68] sm:$0xff]  }
   0x6   :  { %652 = vmatprep.subr.bf16.mxu1 %v702_v6  ;;  %v709_v13 = vld [vmem:[%s913_s1 + $0x18] sm:$0xff]   ;;  %v713_v17 = vld [vmem:[%s913_s1 + $0x20] sm:$0xff]   ;;  %v717_v21 = vld [vmem:[%s913_s1 + $0x28] sm:$0xff]  }
   0x7   :  { %625 = vmatpush3.bf16.msra.mxu0 %v701_v5  ;;  %v710_v14 = vld [vmem:[%s913_s1 + $0xd8] sm:$0xff]   ;;  %v714_v18 = vld [vmem:[%s913_s1 + $0xe0] sm:$0xff]   ;;  %v718_v22 = vld [vmem:[%s913_s1 + $0xe8] sm:$0xff]  }
   0x8   :  { %626 = vmatprep.subr.bf16.mxu0 %v704_v8  ;;  %v711_v15 = vld [vmem:[%s913_s1 + $0x98] sm:$0xff]   ;;  %v715_v19 = vld [vmem:[%s913_s1 + $0xa0] sm:$0xff]   ;;  %v719_v23 = vld [vmem:[%s913_s1 + $0xa8] sm:$0xff]  }
   0x9   :  { %653 = vmatpush3.bf16.msra.mxu1 %v703_v7  ;;  %v720_v24 = vld [vmem:[%s913_s1 + $0x70] sm:$0xff]   ;;  %v724_v28 = vld [vmem:[%s913_s1 + $0x78] sm:$0xff]   ;;  %v731_v34 = vld [vmem:[%s913_s1 + $0x100] sm:$0xff]  }
   0xa   :  { %654 = vmatprep.subr.bf16.mxu1 %v706_v10  ;;  %v721_v25 = vld [vmem:[%s913_s1 + $0x30] sm:$0xff]   ;;  %v725_v29 = vld [vmem:[%s913_s1 + $0x38] sm:$0xff]   ;;  %v734_v36 = vld [vmem:[%s914_s0 + $0xc] ss:$20 sps:$4 sm:$0xff]  }
   0xb   :  { %627 = vmatpush3.bf16.msra.mxu0 %v705_v9  ;;  %v722_v26 = vld [vmem:[%s913_s1 + $0xf0] sm:$0xff]   ;;  %v726_v30 = vld [vmem:[%s913_s1 + $0xf8] sm:$0xff]   ;;  %v735_v37 = vld [vmem:[%s913_s1 + $0x108] sm:$0xff]   ;;  %460 = vmatprep.mubr.bf16.mxu1 %v734_v36 }
   0xc   :  { %628 = vmatprep.subr.bf16.mxu0 %v708_v12  ;;  %v723_v27 = vld [vmem:[%s913_s1 + $0xb0] sm:$0xff]   ;;  %v729_v32 = vld [vmem:[%s914_s0 + $0x4] ss:$20 sps:$4 sm:$0xff]   ;;  %v732_v35 = vld [vmem:[%s914_s0 + $0x8] ss:$20 sps:$4 sm:$0xff]  }
   0xd   :  { %655 = vmatpush3.bf16.msra.mxu1 %v707_v11  ;;  %v727_v31 = vld [vmem:[%s914_s0] ss:$20 sps:$4 sm:$0xff]   ;;  %v730_v33 = vld [vmem:[%s913_s1 + $0xb8] sm:$0xff]   ;;  %411 = vmatprep.mubr.bf16.mxu0 %v729_v32  ;;  %v742_v42 = vld [vmem:[%s914_s0 + $0x30] ss:$20 sps:$4 sm:$0xff]  }
   0xe   :  { %656 = vmatprep.subr.bf16.mxu1 %v710_v14  ;;  %v736_v38 = vld [vmem:[%s914_s0 + $0x2c] ss:$20 sps:$4 sm:$0xff]   ;;  %v738_v39 = vld [vmem:[%s914_s0 + $0x28] ss:$20 sps:$4 sm:$0xff]   ;;  %v739_v40 = vld [vmem:[%s913_s1 + $0x110] sm:$0xff]  }
   0xf   :  { %629 = vmatpush3.bf16.msra.mxu0 %v709_v13  ;;  %v740_v41 = vld [vmem:[%s914_s0 + $0x34] ss:$20 sps:$4 sm:$0xff]   ;;  %v743_v43 = vld [vmem:[%s913_s1 + $0x118] sm:$0xff]   ;;  %v744_v44 = vld [vmem:[%s914_s0 + $0x10] ss:$20 sps:$4 sm:$0xff]  }
  0x10   :  { %630 = vmatprep.subr.bf16.mxu0 %v712_v16  ;;  %v745_v45 = vld [vmem:[%s914_s0 + $0x38] ss:$20 sps:$4 sm:$0xff]   ;;  %v554_v47 = vld [vmem:[%s915_s2] ss:$0 sm:$0xff] }
  0x11   :  { %657 = vmatpush3.bf16.msra.mxu1 %v711_v15 }
  0x12   :  { %658 = vmatprep.subr.bf16.mxu1 %v714_v18 }
  0x13   :  { %631 = vmatpush3.bf16.msra.mxu0 %v713_v17 }
  0x14   :  { %632 = vmatprep.subr.bf16.mxu0 %v716_v20 }
  0x15   :  { %659 = vmatpush3.bf16.msra.mxu1 %v715_v19 }
  0x16   :  { %660 = vmatprep.subr.bf16.mxu1 %v718_v22 }
  0x17   :  { %633 = vmatpush3.bf16.msra.mxu0 %v717_v21 }
  0x18   :  { %634 = vmatprep.subr.bf16.mxu0 %v720_v24 }
  0x19   :  { %661 = vmatpush3.bf16.msra.mxu1 %v719_v23 }
  0x1a   :  { %662 = vmatprep.subr.bf16.mxu1 %v722_v26 }
  0x1b   :  { %635 = vmatpush3.bf16.msra.mxu0 %v721_v25 }
  0x1c   :  { %636 = vmatprep.subr.bf16.mxu0 %v724_v28 }
  0x1d   :  { %663 = vmatpush3.bf16.msra.mxu1 %v723_v27 }
  0x1e   :  { %664 = vmatprep.subr.bf16.mxu1 %v726_v30 }
  0x1f   :  { %637 = vmatpush3.bf16.msra.mxu0 %v725_v29 }
  0x20   :  { %684 = vmatprep.subr.bf16.mxu0 %v731_v34 }
  0x21   :  { %665 = vmatpush3.bf16.msra.mxu1 %v730_v33 }
  0x22   :  { %412 = vmatmul.mubr.bf16.vlgmr.msra.gmra.mrb[0].mxu0 %v727_v31 }
  0x23   :  { %685 = vmatpush3.bf16.msra.mxu0 %v731_v34  ;;  %419 = vmatprep.mubr.bf16.mxu0 %v736_v38 }
  0x24   :  { %461 = vmatmul.mubr.bf16.vlgmr.msra.gmra.mrb[0].mxu1 %v732_v35  ;;  %686 = vmatprep.subr.bf16.mxu0 %v735_v37 }
  0x25   :  { %468 = vmatprep.mubr.bf16.mxu1 %v740_v41 }
  0x27   :  { %687 = vmatpush3.bf16.msra.mxu0 %v735_v37 }
  0x28   :  { %688 = vmatprep.subr.bf16.mxu0 %v739_v40 }
  0x2a   :  { %420 = vmatmul.mubr.bf16.gmra.mrb[4].mxu0 %v738_v39 }
  0x2b   :  { %692 = vmatprep.mubr.msk.bf16.mxu0 %vm372_vm0, %v744_v44  ;;  %689 = vmatpush3.bf16.msra.mxu0 %v739_v40 }
  0x2c   :  { %469 = vmatmul.mubr.bf16.gmra.mrb[4].mxu1 %v742_v42  ;;  %690 = vmatprep.subr.bf16.mxu0 %v743_v43 }
  0x2f   :  { %691 = vmatpush3.bf16.msra.mxu0 %v743_v43 }
  0x32   :  { %693 = vmatmul.mubr.msk.bf16.vlgmr.msra.gmra.mrb[8].mxu0 %vm372_vm0, %v745_v45 }
  0xf5   :  { %v638_v46 = vpop.f32.mrb[0].mxu0 }
  0xf6   :  { %v639_v48 = vpop.f32.mrb[1].mxu0 }
  0xf7   :  { %v640_v49 = vadd.f32 %v639_v48, %v638_v46  ;;  %v641_v50 = vpop.f32.mrb[2].mxu0  ;;  %v666_v51 = vpop.f32.mrb[0].mxu1 }
  0xf8   :  { %v642_v52 = vpop.f32.mrb[3].mxu0  ;;  %v667_v55 = vpop.f32.mrb[1].mxu1 }
  0xf9   :  { %v414_v53 = vadd.f32 %v640_v49, %v554_v47  ;;  %v643_v54 = vadd.f32 %v642_v52, %v641_v50  ;;  %v668_v56 = vadd.f32 %v667_v55, %v666_v51  ;;  %v669_v57 = vpop.f32.mrb[2].mxu1 }
  0xfa   :  { %v670_v59 = vpop.f32.mrb[3].mxu1 }
  0xfb   :  { %v417_v58 = vadd.f32 %v643_v54, %v554_v47  ;;  %v671_v60 = vadd.f32 %v670_v59, %v669_v57  ;;  %v463_v61 = vadd.f32 %v668_v56, %v414_v53 }
  0xfd   :  { %v644_v62 = vpop.f32.mrb[4].mxu0  ;;  %v466_v0 = vadd.f32 %v671_v60, %v417_v58 }
  0xfe   :  { %v645_v63 = vpop.f32.mrb[5].mxu0 }
  0xff   :  { %v646_v1 = vadd.f32 %v645_v63, %v644_v62  ;;  %v647_v2 = vpop.f32.mrb[6].mxu0  ;;  %v672_v3 = vpop.f32.mrb[4].mxu1 }
 0x100   :  { %v648_v4 = vpop.f32.mrb[7].mxu0  ;;  %v673_v7 = vpop.f32.mrb[5].mxu1 }
 0x101   :  { %v422_v5 = vadd.f32 %v646_v1, %v554_v47  ;;  %v649_v6 = vadd.f32 %v648_v4, %v647_v2  ;;  %v674_v8 = vadd.f32 %v673_v7, %v672_v3  ;;  %v675_v9 = vpop.f32.mrb[6].mxu1 }
 0x102   :  { %v676_v11 = vpop.f32.mrb[7].mxu1 }
 0x103   :  { %v425_v10 = vadd.f32 %v649_v6, %v554_v47  ;;  %v677_v12 = vadd.f32 %v676_v11, %v675_v9  ;;  %v471_v13 = vadd.f32 %v674_v8, %v422_v5 }
 0x105   :  { %v694_v14 = vpop.f32.mrb[8].mxu0  ;;  %v474_v15 = vadd.f32 %v677_v12, %v425_v10 }
 0x106   :  { %v520_v16 = vadd.f32 %v694_v14, %v471_v13  ;;  %v511_v17 = vpop.f32.mrb[9].mxu0 }
 0x107   :  { %v512_v18 = vadd.f32 %v511_v17, %v463_v61  ;;  %v695_v19 = vpop.f32.mrb[10].mxu0 }
 0x108   :  { %v523_v20 = vadd.f32 %v695_v19, %v474_v15  ;;  %v514_v21 = vpop.f32.mrb[11].mxu0  ;;  %v528_v23 = vmax.f32 %v520_v16, 0.0 }
 0x109   :  { %v515_v22 = vadd.f32 %v514_v21, %v466_v0  ;;  %v526_v25 = vmax.f32 %v512_v18, 0.0 }
 0x10a   :  { %v529_v24 = vmax.f32 %v523_v20, 0.0 }
 0x10b   :  { %v527_v26 = vmax.f32 %v515_v22, 0.0 }
 0x10c   :  { %v619_v27 = vpack.c.bf16 %v529_v24, %v528_v23 }
 0x10d   :  { %v614_v28 = vpack.c.bf16 %v527_v26, %v526_v25 }
 0x10e   :  { %621 = vst [vmem:[%s916_s3 + $0x8] sm:$0xff] %v619_v27  }
 0x10f   :  { %615 = vst [vmem:[%s916_s3] sm:$0xff] %v614_v28  }

</bundles_post_ra>
